<compile_context>
chip_gen: v6e
topology: v6e:2x2x1
jax: 0.10.0
libtpu: 0.0.40
codegen_flags: <defaults>
</compile_context>

<pallas_src>
import numpy as np

import jax
import jax.numpy as jnp
from jax.experimental import pallas as pl
from jax.experimental.pallas import tpu as pltpu


# ----------------------------------------------------------------------------
# In-kernel helpers (traced inside the fused Pallas kernel)
# ----------------------------------------------------------------------------
def _ln(x, g, b, eps=1e-5):
    mu = jnp.mean(x, axis=-1, keepdims=True)
    var = jnp.mean(jnp.square(x - mu), axis=-1, keepdims=True)
    return (x - mu) * jax.lax.rsqrt(var + eps) * g + b


def _encoder_layer(x, pos, mask, num_heads, p):
    """One SpeechFormer encoder layer on a (T, E) VMEM-resident activation."""
    T, E = x.shape
    Dh = E // num_heads
    residual = x
    if pos is not None:
        x = x + pos

    # Fused QKV projection (scale already folded into the Q columns of wqkv).
    qkv = jnp.dot(x, p["wqkv"], preferred_element_type=jnp.float32) + p["bqkv"]
    q, k, v = qkv[:, :E], qkv[:, E:2 * E], qkv[:, 2 * E:]

    attn = jnp.zeros((T, E), jnp.float32)
    for h in range(num_heads):                       # static unroll over heads
        sl = slice(h * Dh, (h + 1) * Dh)
        qh, kh, vh = q[:, sl], k[:, sl], v[:, sl]
        # q @ k^T without materialising a transpose.
        s = jax.lax.dot_general(qh, kh, (((1,), (1,)), ((), ())),
                                preferred_element_type=jnp.float32)
        if mask is not None:
            s = s + mask
        s = s - jnp.max(s, axis=-1, keepdims=True)
        e = jnp.exp(s)
        pr = e * pl.reciprocal(jnp.sum(e, axis=-1, keepdims=True), approx=True)
        ctx = jnp.dot(pr, vh, preferred_element_type=jnp.float32)       # (T, Dh)
        # Fold the output projection into the head loop:
        #   concat(heads) @ Wo == sum_h ctx_h @ Wo[h*Dh:(h+1)*Dh, :]
        attn = attn + jnp.dot(ctx, p["wo"][sl, :], preferred_element_type=jnp.float32)
    attn = attn + p["bo"]

    x = _ln(attn + residual, p["ln1_g"], p["ln1_b"])

    residual = x
    h1 = jnp.maximum(jnp.dot(x, p["w1"], preferred_element_type=jnp.float32) + p["b1"], 0.0)
    h2 = jnp.dot(h1, p["w2"], preferred_element_type=jnp.float32) + p["b2"]
    return _ln(h2 + residual, p["ln2_g"], p["ln2_b"])


def _make_forward_kernel(plan):
    """Build the fused whole-network kernel for a statically known block plan."""

    def kernel(*refs):
        x_ref, o_ref = refs[0], refs[-1]
        it = iter(refs[1:-1])
        nxt = lambda: next(it)[...]

        x = x_ref[0].astype(jnp.float32)                    # (T, C) per batch element
        for step in plan:
            if step["kind"] == "former":
                g, b = nxt(), nxt()
                x = _ln(x, g, b)                            # block-entry input_norm
                pos = nxt().astype(jnp.float32) if step["use_pos"] else None
                mask = nxt().astype(jnp.float32) if step["use_mask"] else None
                for _ in range(step["num_layers"]):
                    lp = dict(wqkv=nxt(), bqkv=nxt(), wo=nxt(), bo=nxt(),
                              ln1_g=nxt(), ln1_b=nxt(),
                              w1=nxt(), b1=nxt(), w2=nxt(), b2=nxt(),
                              ln2_g=nxt(), ln2_b=nxt())
                    x = _encoder_layer(x, pos, mask, step["num_heads"], lp)
            elif step["kind"] == "merge":
                pool, w, b, g, beta = nxt(), nxt(), nxt(), nxt(), nxt()
                y = jnp.dot(pool, x, preferred_element_type=jnp.float32)   # chunk means
                y = jnp.dot(y, w, preferred_element_type=jnp.float32) + b  # merge fc
                x = _ln(y, g, beta)
            else:   # classifier: avg-pool over tokens + 3-layer MLP (dropout = identity)
                w1, b1, w2, b2, w3, b3 = [nxt() for _ in range(6)]
                h = jnp.mean(x, axis=0, keepdims=True)                     # (1, C)
                h = jnp.maximum(jnp.dot(h, w1, preferred_element_type=jnp.float32) + b1, 0.0)
                h = jnp.maximum(jnp.dot(h, w2, preferred_element_type=jnp.float32) + b2, 0.0)
                y = jnp.dot(h, w3, preferred_element_type=jnp.float32) + b3
                o_ref[0] = y.astype(o_ref.dtype)

    return kernel


# ----------------------------------------------------------------------------
# Model configuration / parameters (deterministic synthetic init)
# ----------------------------------------------------------------------------
def statistical_information(hop=0.01):
    # TODO(synk): the original repo derives Locals/Merge from frame-hop speech
    # statistics; here we use a small synthetic hierarchy with the same
    # frame/phoneme/word/utterance structure.
    Locals = [2, 4, 8, -1]
    Merge = [2, 4, 8, -1]
    return Locals, Merge


def create_positional_encoding(input_dim, max_seq_len=256):
    pos = np.arange(max_seq_len)[:, None].astype(np.float64)
    j = np.arange(input_dim)[None, :].astype(np.float64)
    angle = pos / np.power(10000.0, 2.0 * (j // 2) / input_dim)
    pe = np.zeros((max_seq_len, input_dim), dtype=np.float32)
    pe[:, 0::2] = np.sin(angle[:, 0::2])
    pe[:, 1::2] = np.cos(angle[:, 1::2])
    return jnp.asarray(pe)


def xavier_uniform(key, shape):
    fan_in, fan_out = shape
    limit = float(np.sqrt(6.0 / (fan_in + fan_out)))
    return jax.random.uniform(key, shape, jnp.float32, -limit, limit)


def build_speechformer_params(key, cfg):
    input_dim = cfg["input_dim"] // cfg["num_heads"] * cfg["num_heads"]
    Locals, Merge = statistical_information(cfg["hop"])
    expand = list(cfg["expand"])
    while len(expand) < len(Merge):
        expand = expand + [-1]

    keys = iter(jax.random.split(key, 256))
    nk = lambda: next(keys)

    embed_dim = input_dim
    ffn_dim = cfg["ffn_embed_dim"]
    H = cfg["num_heads"]
    use_position = True
    last_merge = 1
    blocks = []

    for l, ms, exp, num in zip(Locals, Merge, expand, cfg["num_layers"]):
        _l = l // last_merge if l != -1 else -1
        _ms = ms // last_merge if ms != -1 else -1
        scale = float(embed_dim // H) ** -0.5

        layers = []
        for _ in range(num):
            wq = xavier_uniform(nk(), (embed_dim, embed_dim))
            wk = xavier_uniform(nk(), (embed_dim, embed_dim))
            wv = xavier_uniform(nk(), (embed_dim, embed_dim))
            layers.append(dict(
                # fused QKV with the 1/sqrt(Dh) softmax scale folded into Q
                wqkv=jnp.concatenate([wq * scale, wk, wv], axis=1),
                bqkv=jnp.zeros((1, 3 * embed_dim), jnp.float32),
                wo=xavier_uniform(nk(), (embed_dim, embed_dim)),
                bo=jnp.zeros((1, embed_dim), jnp.float32),
                ln1_g=jnp.ones((1, embed_dim), jnp.float32),
                ln1_b=jnp.zeros((1, embed_dim), jnp.float32),
                w1=xavier_uniform(nk(), (embed_dim, ffn_dim)),
                b1=jnp.zeros((1, ffn_dim), jnp.float32),
                w2=xavier_uniform(nk(), (ffn_dim, embed_dim)),
                b2=jnp.zeros((1, embed_dim), jnp.float32),
                ln2_g=jnp.ones((1, embed_dim), jnp.float32),
                ln2_b=jnp.zeros((1, embed_dim), jnp.float32),
            ))
        blocks.append(dict(
            kind="former",
            local_size=_l,
            num_heads=H,
            in_g=jnp.ones((1, embed_dim), jnp.float32),
            in_b=jnp.zeros((1, embed_dim), jnp.float32),
            position=create_positional_encoding(embed_dim) if use_position else None,
            layers=layers,
        ))

        if _ms != -1:
            out_channels = embed_dim * exp
            blocks.append(dict(
                kind="merge",
                merge_scale=_ms,
                w=xavier_uniform(nk(), (embed_dim, out_channels)),
                b=jnp.zeros((1, out_channels), jnp.float32),
                g=jnp.ones((1, out_channels), jnp.float32),
                beta=jnp.zeros((1, out_channels), jnp.float32),
            ))
            embed_dim *= exp
            ffn_dim *= exp
        last_merge = ms
        if use_position:
            use_position = False

    classifier_dim = input_dim * int(np.prod(cfg["expand"]))
    clf = dict(
        w1=xavier_uniform(nk(), (classifier_dim, classifier_dim // 2)),
        b1=jnp.zeros((1, classifier_dim // 2), jnp.float32),
        w2=xavier_uniform(nk(), (classifier_dim // 2, classifier_dim // 4)),
        b2=jnp.zeros((1, classifier_dim // 4), jnp.float32),
        w3=xavier_uniform(nk(), (classifier_dim // 4, cfg["num_classes"])),
        b3=jnp.zeros((1, cfg["num_classes"]), jnp.float32),
    )
    return dict(input_dim=input_dim, blocks=blocks, classifier=clf)


# ----------------------------------------------------------------------------
# Forward-pass assembly (one pallas_call)
# ----------------------------------------------------------------------------
def make_local_mask(T, local_size, overlap=True):
    # TODO(synk): Speech_MSA's exact overlapping-window gather is not in the
    # provided source; modeled here as an additive band mask (each token's
    # chunk plus half a chunk on either side when overlap=True).
    if local_size == -1 or local_size >= T:
        return jnp.zeros((T, T), jnp.float32)
    idx = np.arange(T)
    start = (idx // local_size) * local_size
    if overlap:
        half = local_size // 2
        lo = start - half
        hi = start + local_size + (local_size - half)
    else:
        lo = start
        hi = start + local_size
    allowed = (idx[None, :] >= lo[:, None]) & (idx[None, :] < hi[:, None])
    return jnp.asarray(np.where(allowed, 0.0, -1e9).astype(np.float32))


def _prepare_forward(params, T_in):
    """Static walk of the block structure → (plan, operands).

    The fused kernel consumes operands positionally in exactly this order."""
    plan, operands = [], []
    T = T_in
    for blk in params["blocks"]:
        if blk["kind"] == "former":
            use_pos = blk["position"] is not None
            use_mask = blk["local_size"] != -1 and blk["local_size"] < T
            plan.append(dict(kind="former", num_heads=blk["num_heads"],
                             num_layers=len(blk["layers"]),
                             use_pos=use_pos, use_mask=use_mask))
            operands += [blk["in_g"], blk["in_b"]]
            if use_pos:
                operands.append(blk["position"][:T])
            if use_mask:
                operands.append(make_local_mask(T, blk["local_size"], overlap=True))
            for lp in blk["layers"]:
                operands += [lp["wqkv"], lp["bqkv"], lp["wo"], lp["bo"],
                             lp["ln1_g"], lp["ln1_b"], lp["w1"], lp["b1"],
                             lp["w2"], lp["b2"], lp["ln2_g"], lp["ln2_b"]]
        else:
            ms = T if blk["merge_scale"] == -1 else blk["merge_scale"]
            T_out = -(-T // ms)
            # Chunk-mean as a tiny constant pooling matrix: missing (zero-padded)
            # frames contribute 0 while the divisor stays ms, matching
            # AdaptiveAvgPool2d on the zero-padded input.
            pool = np.zeros((T_out, T), np.float32)
            for i in range(T_out):
                pool[i, i * ms:min((i + 1) * ms, T)] = 1.0 / ms
            plan.append(dict(kind="merge"))
            operands += [jnp.asarray(pool), blk["w"], blk["b"], blk["g"], blk["beta"]]
            T = T_out
    plan.append(dict(kind="classifier"))
    clf = params["classifier"]
    operands += [clf["w1"], clf["b1"], clf["w2"], clf["b2"], clf["w3"], clf["b3"]]
    return plan, operands


def _full_spec(arr):
    nd = arr.ndim
    return pl.BlockSpec(arr.shape, lambda b, _nd=nd: (0,) * _nd)


def speechformer_forward(x, params):
    input_dim = params["input_dim"]
    if x.shape[-1] != input_dim:
        x = x[:, :, :input_dim]
    B, T, C = x.shape

    plan, operands = _prepare_forward(params, T)
    num_classes = params["classifier"]["w3"].shape[1]
    kernel = _make_forward_kernel(plan)

    # squeeze(dim=1) is a no-op here (final token count > 1); final avg-pool
    # over tokens + classifier MLP is fused into the same kernel.
    in_specs = [pl.BlockSpec((1, T, C), lambda b: (b, 0, 0))]
    in_specs += [_full_spec(op) for op in operands]

    out = pl.pallas_call(
        kernel,
        out_shape=jax.ShapeDtypeStruct((B, 1, num_classes), x.dtype),
        grid=(B,),
        in_specs=in_specs,
        out_specs=pl.BlockSpec((1, 1, num_classes), lambda b: (b, 0, 0)),
        compiler_params=pltpu.CompilerParams(dimension_semantics=("parallel",)),
    )(x, *operands)
    return out.reshape(B, num_classes)


# ----------------------------------------------------------------------------
if __name__ == "__main__":
    cfg = dict(
        input_dim=32,
        ffn_embed_dim=64,
        num_layers=[1, 1, 1, 1],
        num_heads=4,
        hop=0.01,
        num_classes=4,
        expand=[1, 1, 2],
        dropout=0.0,           # inference: dropout is identity
        attention_dropout=0.0,
    )
    key = jax.random.PRNGKey(0)
    pkey, xkey = jax.random.split(key)
    params = build_speechformer_params(pkey, cfg)

    B, T = 2, 16
    x = jax.random.normal(xkey, (B, T, cfg["input_dim"]), dtype=jnp.float32)

    pred = speechformer_forward(x, params)
    jax.block_until_ready(pred)
    assert pred.shape == (B, cfg["num_classes"])
    assert bool(jnp.all(jnp.isfinite(pred)))
    print("KERNEL_OK")
</pallas_src>

<mosaic_0001>
module attributes {stable_mosaic.version = 11 : i64} {
  func.func @kernel(%arg0: i32, %arg1: memref<1x16x32xf32, #tpu.memory_space<vmem>>, %arg2: memref<1x32xf32, #tpu.memory_space<vmem>>, %arg3: memref<1x32xf32, #tpu.memory_space<vmem>>, %arg4: memref<16x32xf32, #tpu.memory_space<vmem>>, %arg5: memref<16x16xf32, #tpu.memory_space<vmem>>, %arg6: memref<32x96xf32, #tpu.memory_space<vmem>>, %arg7: memref<1x96xf32, #tpu.memory_space<vmem>>, %arg8: memref<32x32xf32, #tpu.memory_space<vmem>>, %arg9: memref<1x32xf32, #tpu.memory_space<vmem>>, %arg10: memref<1x32xf32, #tpu.memory_space<vmem>>, %arg11: memref<1x32xf32, #tpu.memory_space<vmem>>, %arg12: memref<32x64xf32, #tpu.memory_space<vmem>>, %arg13: memref<1x64xf32, #tpu.memory_space<vmem>>, %arg14: memref<64x32xf32, #tpu.memory_space<vmem>>, %arg15: memref<1x32xf32, #tpu.memory_space<vmem>>, %arg16: memref<1x32xf32, #tpu.memory_space<vmem>>, %arg17: memref<1x32xf32, #tpu.memory_space<vmem>>, %arg18: memref<8x16xf32, #tpu.memory_space<vmem>>, %arg19: memref<32x32xf32, #tpu.memory_space<vmem>>, %arg20: memref<1x32xf32, #tpu.memory_space<vmem>>, %arg21: memref<1x32xf32, #tpu.memory_space<vmem>>, %arg22: memref<1x32xf32, #tpu.memory_space<vmem>>, %arg23: memref<1x32xf32, #tpu.memory_space<vmem>>, %arg24: memref<1x32xf32, #tpu.memory_space<vmem>>, %arg25: memref<8x8xf32, #tpu.memory_space<vmem>>, %arg26: memref<32x96xf32, #tpu.memory_space<vmem>>, %arg27: memref<1x96xf32, #tpu.memory_space<vmem>>, %arg28: memref<32x32xf32, #tpu.memory_space<vmem>>, %arg29: memref<1x32xf32, #tpu.memory_space<vmem>>, %arg30: memref<1x32xf32, #tpu.memory_space<vmem>>, %arg31: memref<1x32xf32, #tpu.memory_space<vmem>>, %arg32: memref<32x64xf32, #tpu.memory_space<vmem>>, %arg33: memref<1x64xf32, #tpu.memory_space<vmem>>, %arg34: memref<64x32xf32, #tpu.memory_space<vmem>>, %arg35: memref<1x32xf32, #tpu.memory_space<vmem>>, %arg36: memref<1x32xf32, #tpu.memory_space<vmem>>, %arg37: memref<1x32xf32, #tpu.memory_space<vmem>>, %arg38: memref<4x8xf32, #tpu.memory_space<vmem>>, %arg39: memref<32x32xf32, #tpu.memory_space<vmem>>, %arg40: memref<1x32xf32, #tpu.memory_space<vmem>>, %arg41: memref<1x32xf32, #tpu.memory_space<vmem>>, %arg42: memref<1x32xf32, #tpu.memory_space<vmem>>, %arg43: memref<1x32xf32, #tpu.memory_space<vmem>>, %arg44: memref<1x32xf32, #tpu.memory_space<vmem>>, %arg45: memref<4x4xf32, #tpu.memory_space<vmem>>, %arg46: memref<32x96xf32, #tpu.memory_space<vmem>>, %arg47: memref<1x96xf32, #tpu.memory_space<vmem>>, %arg48: memref<32x32xf32, #tpu.memory_space<vmem>>, %arg49: memref<1x32xf32, #tpu.memory_space<vmem>>, %arg50: memref<1x32xf32, #tpu.memory_space<vmem>>, %arg51: memref<1x32xf32, #tpu.memory_space<vmem>>, %arg52: memref<32x64xf32, #tpu.memory_space<vmem>>, %arg53: memref<1x64xf32, #tpu.memory_space<vmem>>, %arg54: memref<64x32xf32, #tpu.memory_space<vmem>>, %arg55: memref<1x32xf32, #tpu.memory_space<vmem>>, %arg56: memref<1x32xf32, #tpu.memory_space<vmem>>, %arg57: memref<1x32xf32, #tpu.memory_space<vmem>>, %arg58: memref<2x4xf32, #tpu.memory_space<vmem>>, %arg59: memref<32x64xf32, #tpu.memory_space<vmem>>, %arg60: memref<1x64xf32, #tpu.memory_space<vmem>>, %arg61: memref<1x64xf32, #tpu.memory_space<vmem>>, %arg62: memref<1x64xf32, #tpu.memory_space<vmem>>, %arg63: memref<1x64xf32, #tpu.memory_space<vmem>>, %arg64: memref<1x64xf32, #tpu.memory_space<vmem>>, %arg65: memref<64x192xf32, #tpu.memory_space<vmem>>, %arg66: memref<1x192xf32, #tpu.memory_space<vmem>>, %arg67: memref<64x64xf32, #tpu.memory_space<vmem>>, %arg68: memref<1x64xf32, #tpu.memory_space<vmem>>, %arg69: memref<1x64xf32, #tpu.memory_space<vmem>>, %arg70: memref<1x64xf32, #tpu.memory_space<vmem>>, %arg71: memref<64x128xf32, #tpu.memory_space<vmem>>, %arg72: memref<1x128xf32, #tpu.memory_space<vmem>>, %arg73: memref<128x64xf32, #tpu.memory_space<vmem>>, %arg74: memref<1x64xf32, #tpu.memory_space<vmem>>, %arg75: memref<1x64xf32, #tpu.memory_space<vmem>>, %arg76: memref<1x64xf32, #tpu.memory_space<vmem>>, %arg77: memref<64x32xf32, #tpu.memory_space<vmem>>, %arg78: memref<1x32xf32, #tpu.memory_space<vmem>>, %arg79: memref<32x16xf32, #tpu.memory_space<vmem>>, %arg80: memref<1x16xf32, #tpu.memory_space<vmem>>, %arg81: memref<16x4xf32, #tpu.memory_space<vmem>>, %arg82: memref<1x4xf32, #tpu.memory_space<vmem>>, %arg83: memref<1x1x4xf32, #tpu.memory_space<vmem>>) attributes {dimension_semantics = [#tpu.dimension_semantics<parallel>], iteration_bounds = array<i64: 2>, scalar_prefetch = 0 : i64, scratch_operands = 0 : i64, tpu.core_type = #tpu.core_type<tc>, window_params = [{transform_indices = @transform_0, window_bounds = array<i64: 1, 16, 32>}, {pipeline_mode = #tpu.pipeline_mode<synchronous>, transform_indices = @transform_1, window_bounds = array<i64: 1, 32>}, {pipeline_mode = #tpu.pipeline_mode<synchronous>, transform_indices = @transform_2, window_bounds = array<i64: 1, 32>}, {pipeline_mode = #tpu.pipeline_mode<synchronous>, transform_indices = @transform_3, window_bounds = array<i64: 16, 32>}, {pipeline_mode = #tpu.pipeline_mode<synchronous>, transform_indices = @transform_4, window_bounds = array<i64: 16, 16>}, {pipeline_mode = #tpu.pipeline_mode<synchronous>, transform_indices = @transform_5, window_bounds = array<i64: 32, 96>}, {pipeline_mode = #tpu.pipeline_mode<synchronous>, transform_indices = @transform_6, window_bounds = array<i64: 1, 96>}, {pipeline_mode = #tpu.pipeline_mode<synchronous>, transform_indices = @transform_7, window_bounds = array<i64: 32, 32>}, {pipeline_mode = #tpu.pipeline_mode<synchronous>, transform_indices = @transform_8, window_bounds = array<i64: 1, 32>}, {pipeline_mode = #tpu.pipeline_mode<synchronous>, transform_indices = @transform_9, window_bounds = array<i64: 1, 32>}, {pipeline_mode = #tpu.pipeline_mode<synchronous>, transform_indices = @transform_10, window_bounds = array<i64: 1, 32>}, {pipeline_mode = #tpu.pipeline_mode<synchronous>, transform_indices = @transform_11, window_bounds = array<i64: 32, 64>}, {pipeline_mode = #tpu.pipeline_mode<synchronous>, transform_indices = @transform_12, window_bounds = array<i64: 1, 64>}, {pipeline_mode = #tpu.pipeline_mode<synchronous>, transform_indices = @transform_13, window_bounds = array<i64: 64, 32>}, {pipeline_mode = #tpu.pipeline_mode<synchronous>, transform_indices = @transform_14, window_bounds = array<i64: 1, 32>}, {pipeline_mode = #tpu.pipeline_mode<synchronous>, transform_indices = @transform_15, window_bounds = array<i64: 1, 32>}, {pipeline_mode = #tpu.pipeline_mode<synchronous>, transform_indices = @transform_16, window_bounds = array<i64: 1, 32>}, {pipeline_mode = #tpu.pipeline_mode<synchronous>, transform_indices = @transform_17, window_bounds = array<i64: 8, 16>}, {pipeline_mode = #tpu.pipeline_mode<synchronous>, transform_indices = @transform_18, window_bounds = array<i64: 32, 32>}, {pipeline_mode = #tpu.pipeline_mode<synchronous>, transform_indices = @transform_19, window_bounds = array<i64: 1, 32>}, {pipeline_mode = #tpu.pipeline_mode<synchronous>, transform_indices = @transform_20, window_bounds = array<i64: 1, 32>}, {pipeline_mode = #tpu.pipeline_mode<synchronous>, transform_indices = @transform_21, window_bounds = array<i64: 1, 32>}, {pipeline_mode = #tpu.pipeline_mode<synchronous>, transform_indices = @transform_22, window_bounds = array<i64: 1, 32>}, {pipeline_mode = #tpu.pipeline_mode<synchronous>, transform_indices = @transform_23, window_bounds = array<i64: 1, 32>}, {pipeline_mode = #tpu.pipeline_mode<synchronous>, transform_indices = @transform_24, window_bounds = array<i64: 8, 8>}, {pipeline_mode = #tpu.pipeline_mode<synchronous>, transform_indices = @transform_25, window_bounds = array<i64: 32, 96>}, {pipeline_mode = #tpu.pipeline_mode<synchronous>, transform_indices = @transform_26, window_bounds = array<i64: 1, 96>}, {pipeline_mode = #tpu.pipeline_mode<synchronous>, transform_indices = @transform_27, window_bounds = array<i64: 32, 32>}, {pipeline_mode = #tpu.pipeline_mode<synchronous>, transform_indices = @transform_28, window_bounds = array<i64: 1, 32>}, {pipeline_mode = #tpu.pipeline_mode<synchronous>, transform_indices = @transform_29, window_bounds = array<i64: 1, 32>}, {pipeline_mode = #tpu.pipeline_mode<synchronous>, transform_indices = @transform_30, window_bounds = array<i64: 1, 32>}, {pipeline_mode = #tpu.pipeline_mode<synchronous>, transform_indices = @transform_31, window_bounds = array<i64: 32, 64>}, {pipeline_mode = #tpu.pipeline_mode<synchronous>, transform_indices = @transform_32, window_bounds = array<i64: 1, 64>}, {pipeline_mode = #tpu.pipeline_mode<synchronous>, transform_indices = @transform_33, window_bounds = array<i64: 64, 32>}, {pipeline_mode = #tpu.pipeline_mode<synchronous>, transform_indices = @transform_34, window_bounds = array<i64: 1, 32>}, {pipeline_mode = #tpu.pipeline_mode<synchronous>, transform_indices = @transform_35, window_bounds = array<i64: 1, 32>}, {pipeline_mode = #tpu.pipeline_mode<synchronous>, transform_indices = @transform_36, window_bounds = array<i64: 1, 32>}, {pipeline_mode = #tpu.pipeline_mode<synchronous>, transform_indices = @transform_37, window_bounds = array<i64: 4, 8>}, {pipeline_mode = #tpu.pipeline_mode<synchronous>, transform_indices = @transform_38, window_bounds = array<i64: 32, 32>}, {pipeline_mode = #tpu.pipeline_mode<synchronous>, transform_indices = @transform_39, window_bounds = array<i64: 1, 32>}, {pipeline_mode = #tpu.pipeline_mode<synchronous>, transform_indices = @transform_40, window_bounds = array<i64: 1, 32>}, {pipeline_mode = #tpu.pipeline_mode<synchronous>, transform_indices = @transform_41, window_bounds = array<i64: 1, 32>}, {pipeline_mode = #tpu.pipeline_mode<synchronous>, transform_indices = @transform_42, window_bounds = array<i64: 1, 32>}, {pipeline_mode = #tpu.pipeline_mode<synchronous>, transform_indices = @transform_43, window_bounds = array<i64: 1, 32>}, {pipeline_mode = #tpu.pipeline_mode<synchronous>, transform_indices = @transform_44, window_bounds = array<i64: 4, 4>}, {pipeline_mode = #tpu.pipeline_mode<synchronous>, transform_indices = @transform_45, window_bounds = array<i64: 32, 96>}, {pipeline_mode = #tpu.pipeline_mode<synchronous>, transform_indices = @transform_46, window_bounds = array<i64: 1, 96>}, {pipeline_mode = #tpu.pipeline_mode<synchronous>, transform_indices = @transform_47, window_bounds = array<i64: 32, 32>}, {pipeline_mode = #tpu.pipeline_mode<synchronous>, transform_indices = @transform_48, window_bounds = array<i64: 1, 32>}, {pipeline_mode = #tpu.pipeline_mode<synchronous>, transform_indices = @transform_49, window_bounds = array<i64: 1, 32>}, {pipeline_mode = #tpu.pipeline_mode<synchronous>, transform_indices = @transform_50, window_bounds = array<i64: 1, 32>}, {pipeline_mode = #tpu.pipeline_mode<synchronous>, transform_indices = @transform_51, window_bounds = array<i64: 32, 64>}, {pipeline_mode = #tpu.pipeline_mode<synchronous>, transform_indices = @transform_52, window_bounds = array<i64: 1, 64>}, {pipeline_mode = #tpu.pipeline_mode<synchronous>, transform_indices = @transform_53, window_bounds = array<i64: 64, 32>}, {pipeline_mode = #tpu.pipeline_mode<synchronous>, transform_indices = @transform_54, window_bounds = array<i64: 1, 32>}, {pipeline_mode = #tpu.pipeline_mode<synchronous>, transform_indices = @transform_55, window_bounds = array<i64: 1, 32>}, {pipeline_mode = #tpu.pipeline_mode<synchronous>, transform_indices = @transform_56, window_bounds = array<i64: 1, 32>}, {pipeline_mode = #tpu.pipeline_mode<synchronous>, transform_indices = @transform_57, window_bounds = array<i64: 2, 4>}, {pipeline_mode = #tpu.pipeline_mode<synchronous>, transform_indices = @transform_58, window_bounds = array<i64: 32, 64>}, {pipeline_mode = #tpu.pipeline_mode<synchronous>, transform_indices = @transform_59, window_bounds = array<i64: 1, 64>}, {pipeline_mode = #tpu.pipeline_mode<synchronous>, transform_indices = @transform_60, window_bounds = array<i64: 1, 64>}, {pipeline_mode = #tpu.pipeline_mode<synchronous>, transform_indices = @transform_61, window_bounds = array<i64: 1, 64>}, {pipeline_mode = #tpu.pipeline_mode<synchronous>, transform_indices = @transform_62, window_bounds = array<i64: 1, 64>}, {pipeline_mode = #tpu.pipeline_mode<synchronous>, transform_indices = @transform_63, window_bounds = array<i64: 1, 64>}, {pipeline_mode = #tpu.pipeline_mode<synchronous>, transform_indices = @transform_64, window_bounds = array<i64: 64, 192>}, {pipeline_mode = #tpu.pipeline_mode<synchronous>, transform_indices = @transform_65, window_bounds = array<i64: 1, 192>}, {pipeline_mode = #tpu.pipeline_mode<synchronous>, transform_indices = @transform_66, window_bounds = array<i64: 64, 64>}, {pipeline_mode = #tpu.pipeline_mode<synchronous>, transform_indices = @transform_67, window_bounds = array<i64: 1, 64>}, {pipeline_mode = #tpu.pipeline_mode<synchronous>, transform_indices = @transform_68, window_bounds = array<i64: 1, 64>}, {pipeline_mode = #tpu.pipeline_mode<synchronous>, transform_indices = @transform_69, window_bounds = array<i64: 1, 64>}, {pipeline_mode = #tpu.pipeline_mode<synchronous>, transform_indices = @transform_70, window_bounds = array<i64: 64, 128>}, {pipeline_mode = #tpu.pipeline_mode<synchronous>, transform_indices = @transform_71, window_bounds = array<i64: 1, 128>}, {pipeline_mode = #tpu.pipeline_mode<synchronous>, transform_indices = @transform_72, window_bounds = array<i64: 128, 64>}, {pipeline_mode = #tpu.pipeline_mode<synchronous>, transform_indices = @transform_73, window_bounds = array<i64: 1, 64>}, {pipeline_mode = #tpu.pipeline_mode<synchronous>, transform_indices = @transform_74, window_bounds = array<i64: 1, 64>}, {pipeline_mode = #tpu.pipeline_mode<synchronous>, transform_indices = @transform_75, window_bounds = array<i64: 1, 64>}, {pipeline_mode = #tpu.pipeline_mode<synchronous>, transform_indices = @transform_76, window_bounds = array<i64: 64, 32>}, {pipeline_mode = #tpu.pipeline_mode<synchronous>, transform_indices = @transform_77, window_bounds = array<i64: 1, 32>}, {pipeline_mode = #tpu.pipeline_mode<synchronous>, transform_indices = @transform_78, window_bounds = array<i64: 32, 16>}, {pipeline_mode = #tpu.pipeline_mode<synchronous>, transform_indices = @transform_79, window_bounds = array<i64: 1, 16>}, {pipeline_mode = #tpu.pipeline_mode<synchronous>, transform_indices = @transform_80, window_bounds = array<i64: 16, 4>}, {pipeline_mode = #tpu.pipeline_mode<synchronous>, transform_indices = @transform_81, window_bounds = array<i64: 1, 4>}, {transform_indices = @transform_82, window_bounds = array<i64: 1, 1, 4>}]} {
    %c0 = arith.constant 0 : index
    %c0_0 = arith.constant 0 : index
    %c0_1 = arith.constant 0 : index
    %0 = vector.load %arg1[%c0, %c0_0, %c0_1] : memref<1x16x32xf32, #tpu.memory_space<vmem>>, vector<1x16x32xf32>
    %1 = vector.shape_cast %0 : vector<1x16x32xf32> to vector<16x32xf32>
    %c0_2 = arith.constant 0 : index
    %c0_3 = arith.constant 0 : index
    %2 = vector.load %arg2[%c0_2, %c0_3] : memref<1x32xf32, #tpu.memory_space<vmem>>, vector<1x32xf32>
    %c0_4 = arith.constant 0 : index
    %c0_5 = arith.constant 0 : index
    %3 = vector.load %arg3[%c0_4, %c0_5] : memref<1x32xf32, #tpu.memory_space<vmem>>, vector<1x32xf32>
    %cst = arith.constant dense<0.000000e+00> : vector<16xf32>
    %4 = vector.multi_reduction <add>, %1, %cst [1] : vector<16x32xf32> to vector<16xf32>
    %5 = vector.shape_cast %4 : vector<16xf32> to vector<16x1xf32>
    %cst_6 = arith.constant 3.200000e+01 : f32
    %6 = vector.broadcast %cst_6 : f32 to vector<16x1xf32>
    %7 = arith.divf %5, %6 : vector<16x1xf32>
    %8 = vector.broadcast %7 : vector<16x1xf32> to vector<16x32xf32>
    %9 = arith.subf %1, %8 : vector<16x32xf32>
    %10 = arith.mulf %9, %9 : vector<16x32xf32>
    %cst_7 = arith.constant dense<0.000000e+00> : vector<16xf32>
    %11 = vector.multi_reduction <add>, %10, %cst_7 [1] : vector<16x32xf32> to vector<16xf32>
    %12 = vector.shape_cast %11 : vector<16xf32> to vector<16x1xf32>
    %cst_8 = arith.constant 3.200000e+01 : f32
    %13 = vector.broadcast %cst_8 : f32 to vector<16x1xf32>
    %14 = arith.divf %12, %13 : vector<16x1xf32>
    %15 = vector.broadcast %7 : vector<16x1xf32> to vector<16x32xf32>
    %16 = arith.subf %1, %15 : vector<16x32xf32>
    %cst_9 = arith.constant 9.99999974E-6 : f32
    %17 = vector.broadcast %cst_9 : f32 to vector<16x1xf32>
    %18 = arith.addf %14, %17 : vector<16x1xf32>
    %19 = math.rsqrt %18 : vector<16x1xf32>
    %20 = vector.broadcast %19 : vector<16x1xf32> to vector<16x32xf32>
    %21 = arith.mulf %16, %20 : vector<16x32xf32>
    %22 = vector.broadcast %2 : vector<1x32xf32> to vector<16x32xf32>
    %23 = arith.mulf %21, %22 : vector<16x32xf32>
    %24 = vector.broadcast %3 : vector<1x32xf32> to vector<16x32xf32>
    %25 = arith.addf %23, %24 : vector<16x32xf32>
    %c0_10 = arith.constant 0 : index
    %c0_11 = arith.constant 0 : index
    %26 = vector.load %arg4[%c0_10, %c0_11] : memref<16x32xf32, #tpu.memory_space<vmem>>, vector<16x32xf32>
    %c0_12 = arith.constant 0 : index
    %c0_13 = arith.constant 0 : index
    %27 = vector.load %arg5[%c0_12, %c0_13] : memref<16x16xf32, #tpu.memory_space<vmem>>, vector<16x16xf32>
    %c0_14 = arith.constant 0 : index
    %c0_15 = arith.constant 0 : index
    %28 = vector.load %arg6[%c0_14, %c0_15] : memref<32x96xf32, #tpu.memory_space<vmem>>, vector<32x96xf32>
    %c0_16 = arith.constant 0 : index
    %c0_17 = arith.constant 0 : index
    %29 = vector.load %arg7[%c0_16, %c0_17] : memref<1x96xf32, #tpu.memory_space<vmem>>, vector<1x96xf32>
    %c0_18 = arith.constant 0 : index
    %c0_19 = arith.constant 0 : index
    %30 = vector.load %arg8[%c0_18, %c0_19] : memref<32x32xf32, #tpu.memory_space<vmem>>, vector<32x32xf32>
    %c0_20 = arith.constant 0 : index
    %c0_21 = arith.constant 0 : index
    %31 = vector.load %arg9[%c0_20, %c0_21] : memref<1x32xf32, #tpu.memory_space<vmem>>, vector<1x32xf32>
    %c0_22 = arith.constant 0 : index
    %c0_23 = arith.constant 0 : index
    %32 = vector.load %arg10[%c0_22, %c0_23] : memref<1x32xf32, #tpu.memory_space<vmem>>, vector<1x32xf32>
    %c0_24 = arith.constant 0 : index
    %c0_25 = arith.constant 0 : index
    %33 = vector.load %arg11[%c0_24, %c0_25] : memref<1x32xf32, #tpu.memory_space<vmem>>, vector<1x32xf32>
    %c0_26 = arith.constant 0 : index
    %c0_27 = arith.constant 0 : index
    %34 = vector.load %arg12[%c0_26, %c0_27] : memref<32x64xf32, #tpu.memory_space<vmem>>, vector<32x64xf32>
    %c0_28 = arith.constant 0 : index
    %c0_29 = arith.constant 0 : index
    %35 = vector.load %arg13[%c0_28, %c0_29] : memref<1x64xf32, #tpu.memory_space<vmem>>, vector<1x64xf32>
    %c0_30 = arith.constant 0 : index
    %c0_31 = arith.constant 0 : index
    %36 = vector.load %arg14[%c0_30, %c0_31] : memref<64x32xf32, #tpu.memory_space<vmem>>, vector<64x32xf32>
    %c0_32 = arith.constant 0 : index
    %c0_33 = arith.constant 0 : index
    %37 = vector.load %arg15[%c0_32, %c0_33] : memref<1x32xf32, #tpu.memory_space<vmem>>, vector<1x32xf32>
    %c0_34 = arith.constant 0 : index
    %c0_35 = arith.constant 0 : index
    %38 = vector.load %arg16[%c0_34, %c0_35] : memref<1x32xf32, #tpu.memory_space<vmem>>, vector<1x32xf32>
    %c0_36 = arith.constant 0 : index
    %c0_37 = arith.constant 0 : index
    %39 = vector.load %arg17[%c0_36, %c0_37] : memref<1x32xf32, #tpu.memory_space<vmem>>, vector<1x32xf32>
    %40 = arith.addf %25, %26 : vector<16x32xf32>
    %cst_38 = arith.constant dense<0.000000e+00> : vector<16x96xf32>
    %41 = tpu.matmul %40, %28, %cst_38 {dimension_numbers = #tpu.dot_dimension_numbers<[1], [0], [0], [1], [0, 0, 1, 1], [], []>} : vector<16x32xf32>, vector<32x96xf32>, vector<16x96xf32> -> vector<16x96xf32>
    %42 = vector.broadcast %29 : vector<1x96xf32> to vector<16x96xf32>
    %43 = arith.addf %41, %42 : vector<16x96xf32>
    %44 = vector.extract_strided_slice %43 {offsets = [0, 0], sizes = [16, 32], strides = [1, 1]} : vector<16x96xf32> to vector<16x32xf32>
    %45 = vector.extract_strided_slice %43 {offsets = [0, 32], sizes = [16, 32], strides = [1, 1]} : vector<16x96xf32> to vector<16x32xf32>
    %46 = vector.extract_strided_slice %43 {offsets = [0, 64], sizes = [16, 32], strides = [1, 1]} : vector<16x96xf32> to vector<16x32xf32>
    %cst_39 = arith.constant 0.000000e+00 : f32
    %47 = vector.broadcast %cst_39 : f32 to vector<16x32xf32>
    %48 = vector.extract_strided_slice %44 {offsets = [0, 0], sizes = [16, 8], strides = [1, 1]} : vector<16x32xf32> to vector<16x8xf32>
    %49 = vector.extract_strided_slice %45 {offsets = [0, 0], sizes = [16, 8], strides = [1, 1]} : vector<16x32xf32> to vector<16x8xf32>
    %50 = vector.extract_strided_slice %46 {offsets = [0, 0], sizes = [16, 8], strides = [1, 1]} : vector<16x32xf32> to vector<16x8xf32>
    %cst_40 = arith.constant dense<0.000000e+00> : vector<16x16xf32>
    %51 = tpu.matmul %48, %49, %cst_40 {dimension_numbers = #tpu.dot_dimension_numbers<[1], [1], [0], [0], [0, 0, 1, 0], [], []>} : vector<16x8xf32>, vector<16x8xf32>, vector<16x16xf32> -> vector<16x16xf32>
    %52 = arith.addf %51, %27 : vector<16x16xf32>
    %cst_41 = arith.constant dense<0xFF800000> : vector<16xf32>
    %53 = vector.multi_reduction <maximumf>, %52, %cst_41 [1] : vector<16x16xf32> to vector<16xf32>
    %54 = vector.shape_cast %53 : vector<16xf32> to vector<16x1xf32>
    %55 = vector.broadcast %54 : vector<16x1xf32> to vector<16x16xf32>
    %56 = arith.subf %52, %55 : vector<16x16xf32>
    %57 = math.exp %56 : vector<16x16xf32>
    %cst_42 = arith.constant dense<0.000000e+00> : vector<16xf32>
    %58 = vector.multi_reduction <add>, %57, %cst_42 [1] : vector<16x16xf32> to vector<16xf32>
    %59 = vector.shape_cast %58 : vector<16xf32> to vector<16x1xf32>
    %60 = tpu.reciprocal %59 {approx = true} : vector<16x1xf32> -> vector<16x1xf32>
    %61 = vector.broadcast %60 : vector<16x1xf32> to vector<16x16xf32>
    %62 = arith.mulf %57, %61 : vector<16x16xf32>
    %cst_43 = arith.constant dense<0.000000e+00> : vector<16x8xf32>
    %63 = tpu.matmul %62, %50, %cst_43 {dimension_numbers = #tpu.dot_dimension_numbers<[1], [0], [0], [1], [0, 0, 1, 1], [], []>} : vector<16x16xf32>, vector<16x8xf32>, vector<16x8xf32> -> vector<16x8xf32>
    %64 = vector.extract_strided_slice %30 {offsets = [0, 0], sizes = [8, 32], strides = [1, 1]} : vector<32x32xf32> to vector<8x32xf32>
    %cst_44 = arith.constant dense<0.000000e+00> : vector<16x32xf32>
    %65 = tpu.matmul %63, %64, %cst_44 {dimension_numbers = #tpu.dot_dimension_numbers<[1], [0], [0], [1], [0, 0, 1, 1], [], []>} : vector<16x8xf32>, vector<8x32xf32>, vector<16x32xf32> -> vector<16x32xf32>
    %66 = arith.addf %47, %65 : vector<16x32xf32>
    %67 = vector.extract_strided_slice %44 {offsets = [0, 8], sizes = [16, 8], strides = [1, 1]} : vector<16x32xf32> to vector<16x8xf32>
    %68 = vector.extract_strided_slice %45 {offsets = [0, 8], sizes = [16, 8], strides = [1, 1]} : vector<16x32xf32> to vector<16x8xf32>
    %69 = vector.extract_strided_slice %46 {offsets = [0, 8], sizes = [16, 8], strides = [1, 1]} : vector<16x32xf32> to vector<16x8xf32>
    %cst_45 = arith.constant dense<0.000000e+00> : vector<16x16xf32>
    %70 = tpu.matmul %67, %68, %cst_45 {dimension_numbers = #tpu.dot_dimension_numbers<[1], [1], [0], [0], [0, 0, 1, 0], [], []>} : vector<16x8xf32>, vector<16x8xf32>, vector<16x16xf32> -> vector<16x16xf32>
    %71 = arith.addf %70, %27 : vector<16x16xf32>
    %cst_46 = arith.constant dense<0xFF800000> : vector<16xf32>
    %72 = vector.multi_reduction <maximumf>, %71, %cst_46 [1] : vector<16x16xf32> to vector<16xf32>
    %73 = vector.shape_cast %72 : vector<16xf32> to vector<16x1xf32>
    %74 = vector.broadcast %73 : vector<16x1xf32> to vector<16x16xf32>
    %75 = arith.subf %71, %74 : vector<16x16xf32>
    %76 = math.exp %75 : vector<16x16xf32>
    %cst_47 = arith.constant dense<0.000000e+00> : vector<16xf32>
    %77 = vector.multi_reduction <add>, %76, %cst_47 [1] : vector<16x16xf32> to vector<16xf32>
    %78 = vector.shape_cast %77 : vector<16xf32> to vector<16x1xf32>
    %79 = tpu.reciprocal %78 {approx = true} : vector<16x1xf32> -> vector<16x1xf32>
    %80 = vector.broadcast %79 : vector<16x1xf32> to vector<16x16xf32>
    %81 = arith.mulf %76, %80 : vector<16x16xf32>
    %cst_48 = arith.constant dense<0.000000e+00> : vector<16x8xf32>
    %82 = tpu.matmul %81, %69, %cst_48 {dimension_numbers = #tpu.dot_dimension_numbers<[1], [0], [0], [1], [0, 0, 1, 1], [], []>} : vector<16x16xf32>, vector<16x8xf32>, vector<16x8xf32> -> vector<16x8xf32>
    %83 = vector.extract_strided_slice %30 {offsets = [8, 0], sizes = [8, 32], strides = [1, 1]} : vector<32x32xf32> to vector<8x32xf32>
    %cst_49 = arith.constant dense<0.000000e+00> : vector<16x32xf32>
    %84 = tpu.matmul %82, %83, %cst_49 {dimension_numbers = #tpu.dot_dimension_numbers<[1], [0], [0], [1], [0, 0, 1, 1], [], []>} : vector<16x8xf32>, vector<8x32xf32>, vector<16x32xf32> -> vector<16x32xf32>
    %85 = arith.addf %66, %84 : vector<16x32xf32>
    %86 = vector.extract_strided_slice %44 {offsets = [0, 16], sizes = [16, 8], strides = [1, 1]} : vector<16x32xf32> to vector<16x8xf32>
    %87 = vector.extract_strided_slice %45 {offsets = [0, 16], sizes = [16, 8], strides = [1, 1]} : vector<16x32xf32> to vector<16x8xf32>
    %88 = vector.extract_strided_slice %46 {offsets = [0, 16], sizes = [16, 8], strides = [1, 1]} : vector<16x32xf32> to vector<16x8xf32>
    %cst_50 = arith.constant dense<0.000000e+00> : vector<16x16xf32>
    %89 = tpu.matmul %86, %87, %cst_50 {dimension_numbers = #tpu.dot_dimension_numbers<[1], [1], [0], [0], [0, 0, 1, 0], [], []>} : vector<16x8xf32>, vector<16x8xf32>, vector<16x16xf32> -> vector<16x16xf32>
    %90 = arith.addf %89, %27 : vector<16x16xf32>
    %cst_51 = arith.constant dense<0xFF800000> : vector<16xf32>
    %91 = vector.multi_reduction <maximumf>, %90, %cst_51 [1] : vector<16x16xf32> to vector<16xf32>
    %92 = vector.shape_cast %91 : vector<16xf32> to vector<16x1xf32>
    %93 = vector.broadcast %92 : vector<16x1xf32> to vector<16x16xf32>
    %94 = arith.subf %90, %93 : vector<16x16xf32>
    %95 = math.exp %94 : vector<16x16xf32>
    %cst_52 = arith.constant dense<0.000000e+00> : vector<16xf32>
    %96 = vector.multi_reduction <add>, %95, %cst_52 [1] : vector<16x16xf32> to vector<16xf32>
    %97 = vector.shape_cast %96 : vector<16xf32> to vector<16x1xf32>
    %98 = tpu.reciprocal %97 {approx = true} : vector<16x1xf32> -> vector<16x1xf32>
    %99 = vector.broadcast %98 : vector<16x1xf32> to vector<16x16xf32>
    %100 = arith.mulf %95, %99 : vector<16x16xf32>
    %cst_53 = arith.constant dense<0.000000e+00> : vector<16x8xf32>
    %101 = tpu.matmul %100, %88, %cst_53 {dimension_numbers = #tpu.dot_dimension_numbers<[1], [0], [0], [1], [0, 0, 1, 1], [], []>} : vector<16x16xf32>, vector<16x8xf32>, vector<16x8xf32> -> vector<16x8xf32>
    %102 = vector.extract_strided_slice %30 {offsets = [16, 0], sizes = [8, 32], strides = [1, 1]} : vector<32x32xf32> to vector<8x32xf32>
    %cst_54 = arith.constant dense<0.000000e+00> : vector<16x32xf32>
    %103 = tpu.matmul %101, %102, %cst_54 {dimension_numbers = #tpu.dot_dimension_numbers<[1], [0], [0], [1], [0, 0, 1, 1], [], []>} : vector<16x8xf32>, vector<8x32xf32>, vector<16x32xf32> -> vector<16x32xf32>
    %104 = arith.addf %85, %103 : vector<16x32xf32>
    %105 = vector.extract_strided_slice %44 {offsets = [0, 24], sizes = [16, 8], strides = [1, 1]} : vector<16x32xf32> to vector<16x8xf32>
    %106 = vector.extract_strided_slice %45 {offsets = [0, 24], sizes = [16, 8], strides = [1, 1]} : vector<16x32xf32> to vector<16x8xf32>
    %107 = vector.extract_strided_slice %46 {offsets = [0, 24], sizes = [16, 8], strides = [1, 1]} : vector<16x32xf32> to vector<16x8xf32>
    %cst_55 = arith.constant dense<0.000000e+00> : vector<16x16xf32>
    %108 = tpu.matmul %105, %106, %cst_55 {dimension_numbers = #tpu.dot_dimension_numbers<[1], [1], [0], [0], [0, 0, 1, 0], [], []>} : vector<16x8xf32>, vector<16x8xf32>, vector<16x16xf32> -> vector<16x16xf32>
    %109 = arith.addf %108, %27 : vector<16x16xf32>
    %cst_56 = arith.constant dense<0xFF800000> : vector<16xf32>
    %110 = vector.multi_reduction <maximumf>, %109, %cst_56 [1] : vector<16x16xf32> to vector<16xf32>
    %111 = vector.shape_cast %110 : vector<16xf32> to vector<16x1xf32>
    %112 = vector.broadcast %111 : vector<16x1xf32> to vector<16x16xf32>
    %113 = arith.subf %109, %112 : vector<16x16xf32>
    %114 = math.exp %113 : vector<16x16xf32>
    %cst_57 = arith.constant dense<0.000000e+00> : vector<16xf32>
    %115 = vector.multi_reduction <add>, %114, %cst_57 [1] : vector<16x16xf32> to vector<16xf32>
    %116 = vector.shape_cast %115 : vector<16xf32> to vector<16x1xf32>
    %117 = tpu.reciprocal %116 {approx = true} : vector<16x1xf32> -> vector<16x1xf32>
    %118 = vector.broadcast %117 : vector<16x1xf32> to vector<16x16xf32>
    %119 = arith.mulf %114, %118 : vector<16x16xf32>
    %cst_58 = arith.constant dense<0.000000e+00> : vector<16x8xf32>
    %120 = tpu.matmul %119, %107, %cst_58 {dimension_numbers = #tpu.dot_dimension_numbers<[1], [0], [0], [1], [0, 0, 1, 1], [], []>} : vector<16x16xf32>, vector<16x8xf32>, vector<16x8xf32> -> vector<16x8xf32>
    %121 = vector.extract_strided_slice %30 {offsets = [24, 0], sizes = [8, 32], strides = [1, 1]} : vector<32x32xf32> to vector<8x32xf32>
    %cst_59 = arith.constant dense<0.000000e+00> : vector<16x32xf32>
    %122 = tpu.matmul %120, %121, %cst_59 {dimension_numbers = #tpu.dot_dimension_numbers<[1], [0], [0], [1], [0, 0, 1, 1], [], []>} : vector<16x8xf32>, vector<8x32xf32>, vector<16x32xf32> -> vector<16x32xf32>
    %123 = arith.addf %104, %122 : vector<16x32xf32>
    %124 = vector.broadcast %31 : vector<1x32xf32> to vector<16x32xf32>
    %125 = arith.addf %123, %124 : vector<16x32xf32>
    %126 = arith.addf %125, %25 : vector<16x32xf32>
    %cst_60 = arith.constant dense<0.000000e+00> : vector<16xf32>
    %127 = vector.multi_reduction <add>, %126, %cst_60 [1] : vector<16x32xf32> to vector<16xf32>
    %128 = vector.shape_cast %127 : vector<16xf32> to vector<16x1xf32>
    %cst_61 = arith.constant 3.200000e+01 : f32
    %129 = vector.broadcast %cst_61 : f32 to vector<16x1xf32>
    %130 = arith.divf %128, %129 : vector<16x1xf32>
    %131 = vector.broadcast %130 : vector<16x1xf32> to vector<16x32xf32>
    %132 = arith.subf %126, %131 : vector<16x32xf32>
    %133 = arith.mulf %132, %132 : vector<16x32xf32>
    %cst_62 = arith.constant dense<0.000000e+00> : vector<16xf32>
    %134 = vector.multi_reduction <add>, %133, %cst_62 [1] : vector<16x32xf32> to vector<16xf32>
    %135 = vector.shape_cast %134 : vector<16xf32> to vector<16x1xf32>
    %cst_63 = arith.constant 3.200000e+01 : f32
    %136 = vector.broadcast %cst_63 : f32 to vector<16x1xf32>
    %137 = arith.divf %135, %136 : vector<16x1xf32>
    %138 = vector.broadcast %130 : vector<16x1xf32> to vector<16x32xf32>
    %139 = arith.subf %126, %138 : vector<16x32xf32>
    %cst_64 = arith.constant 9.99999974E-6 : f32
    %140 = vector.broadcast %cst_64 : f32 to vector<16x1xf32>
    %141 = arith.addf %137, %140 : vector<16x1xf32>
    %142 = math.rsqrt %141 : vector<16x1xf32>
    %143 = vector.broadcast %142 : vector<16x1xf32> to vector<16x32xf32>
    %144 = arith.mulf %139, %143 : vector<16x32xf32>
    %145 = vector.broadcast %32 : vector<1x32xf32> to vector<16x32xf32>
    %146 = arith.mulf %144, %145 : vector<16x32xf32>
    %147 = vector.broadcast %33 : vector<1x32xf32> to vector<16x32xf32>
    %148 = arith.addf %146, %147 : vector<16x32xf32>
    %cst_65 = arith.constant dense<0.000000e+00> : vector<16x64xf32>
    %149 = tpu.matmul %148, %34, %cst_65 {dimension_numbers = #tpu.dot_dimension_numbers<[1], [0], [0], [1], [0, 0, 1, 1], [], []>} : vector<16x32xf32>, vector<32x64xf32>, vector<16x64xf32> -> vector<16x64xf32>
    %150 = vector.broadcast %35 : vector<1x64xf32> to vector<16x64xf32>
    %151 = arith.addf %149, %150 : vector<16x64xf32>
    %cst_66 = arith.constant 0.000000e+00 : f32
    %152 = vector.broadcast %cst_66 : f32 to vector<16x64xf32>
    %153 = arith.maximumf %151, %152 : vector<16x64xf32>
    %cst_67 = arith.constant dense<0.000000e+00> : vector<16x32xf32>
    %154 = tpu.matmul %153, %36, %cst_67 {dimension_numbers = #tpu.dot_dimension_numbers<[1], [0], [0], [1], [0, 0, 1, 1], [], []>} : vector<16x64xf32>, vector<64x32xf32>, vector<16x32xf32> -> vector<16x32xf32>
    %155 = vector.broadcast %37 : vector<1x32xf32> to vector<16x32xf32>
    %156 = arith.addf %154, %155 : vector<16x32xf32>
    %157 = arith.addf %156, %148 : vector<16x32xf32>
    %cst_68 = arith.constant dense<0.000000e+00> : vector<16xf32>
    %158 = vector.multi_reduction <add>, %157, %cst_68 [1] : vector<16x32xf32> to vector<16xf32>
    %159 = vector.shape_cast %158 : vector<16xf32> to vector<16x1xf32>
    %cst_69 = arith.constant 3.200000e+01 : f32
    %160 = vector.broadcast %cst_69 : f32 to vector<16x1xf32>
    %161 = arith.divf %159, %160 : vector<16x1xf32>
    %162 = vector.broadcast %161 : vector<16x1xf32> to vector<16x32xf32>
    %163 = arith.subf %157, %162 : vector<16x32xf32>
    %164 = arith.mulf %163, %163 : vector<16x32xf32>
    %cst_70 = arith.constant dense<0.000000e+00> : vector<16xf32>
    %165 = vector.multi_reduction <add>, %164, %cst_70 [1] : vector<16x32xf32> to vector<16xf32>
    %166 = vector.shape_cast %165 : vector<16xf32> to vector<16x1xf32>
    %cst_71 = arith.constant 3.200000e+01 : f32
    %167 = vector.broadcast %cst_71 : f32 to vector<16x1xf32>
    %168 = arith.divf %166, %167 : vector<16x1xf32>
    %169 = vector.broadcast %161 : vector<16x1xf32> to vector<16x32xf32>
    %170 = arith.subf %157, %169 : vector<16x32xf32>
    %cst_72 = arith.constant 9.99999974E-6 : f32
    %171 = vector.broadcast %cst_72 : f32 to vector<16x1xf32>
    %172 = arith.addf %168, %171 : vector<16x1xf32>
    %173 = math.rsqrt %172 : vector<16x1xf32>
    %174 = vector.broadcast %173 : vector<16x1xf32> to vector<16x32xf32>
    %175 = arith.mulf %170, %174 : vector<16x32xf32>
    %176 = vector.broadcast %38 : vector<1x32xf32> to vector<16x32xf32>
    %177 = arith.mulf %175, %176 : vector<16x32xf32>
    %178 = vector.broadcast %39 : vector<1x32xf32> to vector<16x32xf32>
    %179 = arith.addf %177, %178 : vector<16x32xf32>
    %c0_73 = arith.constant 0 : index
    %c0_74 = arith.constant 0 : index
    %180 = vector.load %arg18[%c0_73, %c0_74] : memref<8x16xf32, #tpu.memory_space<vmem>>, vector<8x16xf32>
    %c0_75 = arith.constant 0 : index
    %c0_76 = arith.constant 0 : index
    %181 = vector.load %arg19[%c0_75, %c0_76] : memref<32x32xf32, #tpu.memory_space<vmem>>, vector<32x32xf32>
    %c0_77 = arith.constant 0 : index
    %c0_78 = arith.constant 0 : index
    %182 = vector.load %arg20[%c0_77, %c0_78] : memref<1x32xf32, #tpu.memory_space<vmem>>, vector<1x32xf32>
    %c0_79 = arith.constant 0 : index
    %c0_80 = arith.constant 0 : index
    %183 = vector.load %arg21[%c0_79, %c0_80] : memref<1x32xf32, #tpu.memory_space<vmem>>, vector<1x32xf32>
    %c0_81 = arith.constant 0 : index
    %c0_82 = arith.constant 0 : index
    %184 = vector.load %arg22[%c0_81, %c0_82] : memref<1x32xf32, #tpu.memory_space<vmem>>, vector<1x32xf32>
    %cst_83 = arith.constant dense<0.000000e+00> : vector<8x32xf32>
    %185 = tpu.matmul %180, %179, %cst_83 {dimension_numbers = #tpu.dot_dimension_numbers<[1], [0], [0], [1], [0, 0, 1, 1], [], []>} : vector<8x16xf32>, vector<16x32xf32>, vector<8x32xf32> -> vector<8x32xf32>
    %cst_84 = arith.constant dense<0.000000e+00> : vector<8x32xf32>
    %186 = tpu.matmul %185, %181, %cst_84 {dimension_numbers = #tpu.dot_dimension_numbers<[1], [0], [0], [1], [0, 0, 1, 1], [], []>} : vector<8x32xf32>, vector<32x32xf32>, vector<8x32xf32> -> vector<8x32xf32>
    %187 = vector.broadcast %182 : vector<1x32xf32> to vector<8x32xf32>
    %188 = arith.addf %186, %187 : vector<8x32xf32>
    %cst_85 = arith.constant dense<0.000000e+00> : vector<8xf32>
    %189 = vector.multi_reduction <add>, %188, %cst_85 [1] : vector<8x32xf32> to vector<8xf32>
    %190 = vector.shape_cast %189 : vector<8xf32> to vector<8x1xf32>
    %cst_86 = arith.constant 3.200000e+01 : f32
    %191 = vector.broadcast %cst_86 : f32 to vector<8x1xf32>
    %192 = arith.divf %190, %191 : vector<8x1xf32>
    %193 = vector.broadcast %192 : vector<8x1xf32> to vector<8x32xf32>
    %194 = arith.subf %188, %193 : vector<8x32xf32>
    %195 = arith.mulf %194, %194 : vector<8x32xf32>
    %cst_87 = arith.constant dense<0.000000e+00> : vector<8xf32>
    %196 = vector.multi_reduction <add>, %195, %cst_87 [1] : vector<8x32xf32> to vector<8xf32>
    %197 = vector.shape_cast %196 : vector<8xf32> to vector<8x1xf32>
    %cst_88 = arith.constant 3.200000e+01 : f32
    %198 = vector.broadcast %cst_88 : f32 to vector<8x1xf32>
    %199 = arith.divf %197, %198 : vector<8x1xf32>
    %200 = vector.broadcast %192 : vector<8x1xf32> to vector<8x32xf32>
    %201 = arith.subf %188, %200 : vector<8x32xf32>
    %cst_89 = arith.constant 9.99999974E-6 : f32
    %202 = vector.broadcast %cst_89 : f32 to vector<8x1xf32>
    %203 = arith.addf %199, %202 : vector<8x1xf32>
    %204 = math.rsqrt %203 : vector<8x1xf32>
    %205 = vector.broadcast %204 : vector<8x1xf32> to vector<8x32xf32>
    %206 = arith.mulf %201, %205 : vector<8x32xf32>
    %207 = vector.broadcast %183 : vector<1x32xf32> to vector<8x32xf32>
    %208 = arith.mulf %206, %207 : vector<8x32xf32>
    %209 = vector.broadcast %184 : vector<1x32xf32> to vector<8x32xf32>
    %210 = arith.addf %208, %209 : vector<8x32xf32>
    %c0_90 = arith.constant 0 : index
    %c0_91 = arith.constant 0 : index
    %211 = vector.load %arg23[%c0_90, %c0_91] : memref<1x32xf32, #tpu.memory_space<vmem>>, vector<1x32xf32>
    %c0_92 = arith.constant 0 : index
    %c0_93 = arith.constant 0 : index
    %212 = vector.load %arg24[%c0_92, %c0_93] : memref<1x32xf32, #tpu.memory_space<vmem>>, vector<1x32xf32>
    %cst_94 = arith.constant dense<0.000000e+00> : vector<8xf32>
    %213 = vector.multi_reduction <add>, %210, %cst_94 [1] : vector<8x32xf32> to vector<8xf32>
    %214 = vector.shape_cast %213 : vector<8xf32> to vector<8x1xf32>
    %cst_95 = arith.constant 3.200000e+01 : f32
    %215 = vector.broadcast %cst_95 : f32 to vector<8x1xf32>
    %216 = arith.divf %214, %215 : vector<8x1xf32>
    %217 = vector.broadcast %216 : vector<8x1xf32> to vector<8x32xf32>
    %218 = arith.subf %210, %217 : vector<8x32xf32>
    %219 = arith.mulf %218, %218 : vector<8x32xf32>
    %cst_96 = arith.constant dense<0.000000e+00> : vector<8xf32>
    %220 = vector.multi_reduction <add>, %219, %cst_96 [1] : vector<8x32xf32> to vector<8xf32>
    %221 = vector.shape_cast %220 : vector<8xf32> to vector<8x1xf32>
    %cst_97 = arith.constant 3.200000e+01 : f32
    %222 = vector.broadcast %cst_97 : f32 to vector<8x1xf32>
    %223 = arith.divf %221, %222 : vector<8x1xf32>
    %224 = vector.broadcast %216 : vector<8x1xf32> to vector<8x32xf32>
    %225 = arith.subf %210, %224 : vector<8x32xf32>
    %cst_98 = arith.constant 9.99999974E-6 : f32
    %226 = vector.broadcast %cst_98 : f32 to vector<8x1xf32>
    %227 = arith.addf %223, %226 : vector<8x1xf32>
    %228 = math.rsqrt %227 : vector<8x1xf32>
    %229 = vector.broadcast %228 : vector<8x1xf32> to vector<8x32xf32>
    %230 = arith.mulf %225, %229 : vector<8x32xf32>
    %231 = vector.broadcast %211 : vector<1x32xf32> to vector<8x32xf32>
    %232 = arith.mulf %230, %231 : vector<8x32xf32>
    %233 = vector.broadcast %212 : vector<1x32xf32> to vector<8x32xf32>
    %234 = arith.addf %232, %233 : vector<8x32xf32>
    %c0_99 = arith.constant 0 : index
    %c0_100 = arith.constant 0 : index
    %235 = vector.load %arg25[%c0_99, %c0_100] : memref<8x8xf32, #tpu.memory_space<vmem>>, vector<8x8xf32>
    %c0_101 = arith.constant 0 : index
    %c0_102 = arith.constant 0 : index
    %236 = vector.load %arg26[%c0_101, %c0_102] : memref<32x96xf32, #tpu.memory_space<vmem>>, vector<32x96xf32>
    %c0_103 = arith.constant 0 : index
    %c0_104 = arith.constant 0 : index
    %237 = vector.load %arg27[%c0_103, %c0_104] : memref<1x96xf32, #tpu.memory_space<vmem>>, vector<1x96xf32>
    %c0_105 = arith.constant 0 : index
    %c0_106 = arith.constant 0 : index
    %238 = vector.load %arg28[%c0_105, %c0_106] : memref<32x32xf32, #tpu.memory_space<vmem>>, vector<32x32xf32>
    %c0_107 = arith.constant 0 : index
    %c0_108 = arith.constant 0 : index
    %239 = vector.load %arg29[%c0_107, %c0_108] : memref<1x32xf32, #tpu.memory_space<vmem>>, vector<1x32xf32>
    %c0_109 = arith.constant 0 : index
    %c0_110 = arith.constant 0 : index
    %240 = vector.load %arg30[%c0_109, %c0_110] : memref<1x32xf32, #tpu.memory_space<vmem>>, vector<1x32xf32>
    %c0_111 = arith.constant 0 : index
    %c0_112 = arith.constant 0 : index
    %241 = vector.load %arg31[%c0_111, %c0_112] : memref<1x32xf32, #tpu.memory_space<vmem>>, vector<1x32xf32>
    %c0_113 = arith.constant 0 : index
    %c0_114 = arith.constant 0 : index
    %242 = vector.load %arg32[%c0_113, %c0_114] : memref<32x64xf32, #tpu.memory_space<vmem>>, vector<32x64xf32>
    %c0_115 = arith.constant 0 : index
    %c0_116 = arith.constant 0 : index
    %243 = vector.load %arg33[%c0_115, %c0_116] : memref<1x64xf32, #tpu.memory_space<vmem>>, vector<1x64xf32>
    %c0_117 = arith.constant 0 : index
    %c0_118 = arith.constant 0 : index
    %244 = vector.load %arg34[%c0_117, %c0_118] : memref<64x32xf32, #tpu.memory_space<vmem>>, vector<64x32xf32>
    %c0_119 = arith.constant 0 : index
    %c0_120 = arith.constant 0 : index
    %245 = vector.load %arg35[%c0_119, %c0_120] : memref<1x32xf32, #tpu.memory_space<vmem>>, vector<1x32xf32>
    %c0_121 = arith.constant 0 : index
    %c0_122 = arith.constant 0 : index
    %246 = vector.load %arg36[%c0_121, %c0_122] : memref<1x32xf32, #tpu.memory_space<vmem>>, vector<1x32xf32>
    %c0_123 = arith.constant 0 : index
    %c0_124 = arith.constant 0 : index
    %247 = vector.load %arg37[%c0_123, %c0_124] : memref<1x32xf32, #tpu.memory_space<vmem>>, vector<1x32xf32>
    %cst_125 = arith.constant dense<0.000000e+00> : vector<8x96xf32>
    %248 = tpu.matmul %234, %236, %cst_125 {dimension_numbers = #tpu.dot_dimension_numbers<[1], [0], [0], [1], [0, 0, 1, 1], [], []>} : vector<8x32xf32>, vector<32x96xf32>, vector<8x96xf32> -> vector<8x96xf32>
    %249 = vector.broadcast %237 : vector<1x96xf32> to vector<8x96xf32>
    %250 = arith.addf %248, %249 : vector<8x96xf32>
    %251 = vector.extract_strided_slice %250 {offsets = [0, 0], sizes = [8, 32], strides = [1, 1]} : vector<8x96xf32> to vector<8x32xf32>
    %252 = vector.extract_strided_slice %250 {offsets = [0, 32], sizes = [8, 32], strides = [1, 1]} : vector<8x96xf32> to vector<8x32xf32>
    %253 = vector.extract_strided_slice %250 {offsets = [0, 64], sizes = [8, 32], strides = [1, 1]} : vector<8x96xf32> to vector<8x32xf32>
    %cst_126 = arith.constant 0.000000e+00 : f32
    %254 = vector.broadcast %cst_126 : f32 to vector<8x32xf32>
    %255 = vector.extract_strided_slice %251 {offsets = [0, 0], sizes = [8, 8], strides = [1, 1]} : vector<8x32xf32> to vector<8x8xf32>
    %256 = vector.extract_strided_slice %252 {offsets = [0, 0], sizes = [8, 8], strides = [1, 1]} : vector<8x32xf32> to vector<8x8xf32>
    %257 = vector.extract_strided_slice %253 {offsets = [0, 0], sizes = [8, 8], strides = [1, 1]} : vector<8x32xf32> to vector<8x8xf32>
    %cst_127 = arith.constant dense<0.000000e+00> : vector<8x8xf32>
    %258 = tpu.matmul %255, %256, %cst_127 {dimension_numbers = #tpu.dot_dimension_numbers<[1], [1], [0], [0], [0, 0, 1, 0], [], []>} : vector<8x8xf32>, vector<8x8xf32>, vector<8x8xf32> -> vector<8x8xf32>
    %259 = arith.addf %258, %235 : vector<8x8xf32>
    %cst_128 = arith.constant dense<0xFF800000> : vector<8xf32>
    %260 = vector.multi_reduction <maximumf>, %259, %cst_128 [1] : vector<8x8xf32> to vector<8xf32>
    %261 = vector.shape_cast %260 : vector<8xf32> to vector<8x1xf32>
    %262 = vector.broadcast %261 : vector<8x1xf32> to vector<8x8xf32>
    %263 = arith.subf %259, %262 : vector<8x8xf32>
    %264 = math.exp %263 : vector<8x8xf32>
    %cst_129 = arith.constant dense<0.000000e+00> : vector<8xf32>
    %265 = vector.multi_reduction <add>, %264, %cst_129 [1] : vector<8x8xf32> to vector<8xf32>
    %266 = vector.shape_cast %265 : vector<8xf32> to vector<8x1xf32>
    %267 = tpu.reciprocal %266 {approx = true} : vector<8x1xf32> -> vector<8x1xf32>
    %268 = vector.broadcast %267 : vector<8x1xf32> to vector<8x8xf32>
    %269 = arith.mulf %264, %268 : vector<8x8xf32>
    %cst_130 = arith.constant dense<0.000000e+00> : vector<8x8xf32>
    %270 = tpu.matmul %269, %257, %cst_130 {dimension_numbers = #tpu.dot_dimension_numbers<[1], [0], [0], [1], [0, 0, 1, 1], [], []>} : vector<8x8xf32>, vector<8x8xf32>, vector<8x8xf32> -> vector<8x8xf32>
    %271 = vector.extract_strided_slice %238 {offsets = [0, 0], sizes = [8, 32], strides = [1, 1]} : vector<32x32xf32> to vector<8x32xf32>
    %cst_131 = arith.constant dense<0.000000e+00> : vector<8x32xf32>
    %272 = tpu.matmul %270, %271, %cst_131 {dimension_numbers = #tpu.dot_dimension_numbers<[1], [0], [0], [1], [0, 0, 1, 1], [], []>} : vector<8x8xf32>, vector<8x32xf32>, vector<8x32xf32> -> vector<8x32xf32>
    %273 = arith.addf %254, %272 : vector<8x32xf32>
    %274 = vector.extract_strided_slice %251 {offsets = [0, 8], sizes = [8, 8], strides = [1, 1]} : vector<8x32xf32> to vector<8x8xf32>
    %275 = vector.extract_strided_slice %252 {offsets = [0, 8], sizes = [8, 8], strides = [1, 1]} : vector<8x32xf32> to vector<8x8xf32>
    %276 = vector.extract_strided_slice %253 {offsets = [0, 8], sizes = [8, 8], strides = [1, 1]} : vector<8x32xf32> to vector<8x8xf32>
    %cst_132 = arith.constant dense<0.000000e+00> : vector<8x8xf32>
    %277 = tpu.matmul %274, %275, %cst_132 {dimension_numbers = #tpu.dot_dimension_numbers<[1], [1], [0], [0], [0, 0, 1, 0], [], []>} : vector<8x8xf32>, vector<8x8xf32>, vector<8x8xf32> -> vector<8x8xf32>
    %278 = arith.addf %277, %235 : vector<8x8xf32>
    %cst_133 = arith.constant dense<0xFF800000> : vector<8xf32>
    %279 = vector.multi_reduction <maximumf>, %278, %cst_133 [1] : vector<8x8xf32> to vector<8xf32>
    %280 = vector.shape_cast %279 : vector<8xf32> to vector<8x1xf32>
    %281 = vector.broadcast %280 : vector<8x1xf32> to vector<8x8xf32>
    %282 = arith.subf %278, %281 : vector<8x8xf32>
    %283 = math.exp %282 : vector<8x8xf32>
    %cst_134 = arith.constant dense<0.000000e+00> : vector<8xf32>
    %284 = vector.multi_reduction <add>, %283, %cst_134 [1] : vector<8x8xf32> to vector<8xf32>
    %285 = vector.shape_cast %284 : vector<8xf32> to vector<8x1xf32>
    %286 = tpu.reciprocal %285 {approx = true} : vector<8x1xf32> -> vector<8x1xf32>
    %287 = vector.broadcast %286 : vector<8x1xf32> to vector<8x8xf32>
    %288 = arith.mulf %283, %287 : vector<8x8xf32>
    %cst_135 = arith.constant dense<0.000000e+00> : vector<8x8xf32>
    %289 = tpu.matmul %288, %276, %cst_135 {dimension_numbers = #tpu.dot_dimension_numbers<[1], [0], [0], [1], [0, 0, 1, 1], [], []>} : vector<8x8xf32>, vector<8x8xf32>, vector<8x8xf32> -> vector<8x8xf32>
    %290 = vector.extract_strided_slice %238 {offsets = [8, 0], sizes = [8, 32], strides = [1, 1]} : vector<32x32xf32> to vector<8x32xf32>
    %cst_136 = arith.constant dense<0.000000e+00> : vector<8x32xf32>
    %291 = tpu.matmul %289, %290, %cst_136 {dimension_numbers = #tpu.dot_dimension_numbers<[1], [0], [0], [1], [0, 0, 1, 1], [], []>} : vector<8x8xf32>, vector<8x32xf32>, vector<8x32xf32> -> vector<8x32xf32>
    %292 = arith.addf %273, %291 : vector<8x32xf32>
    %293 = vector.extract_strided_slice %251 {offsets = [0, 16], sizes = [8, 8], strides = [1, 1]} : vector<8x32xf32> to vector<8x8xf32>
    %294 = vector.extract_strided_slice %252 {offsets = [0, 16], sizes = [8, 8], strides = [1, 1]} : vector<8x32xf32> to vector<8x8xf32>
    %295 = vector.extract_strided_slice %253 {offsets = [0, 16], sizes = [8, 8], strides = [1, 1]} : vector<8x32xf32> to vector<8x8xf32>
    %cst_137 = arith.constant dense<0.000000e+00> : vector<8x8xf32>
    %296 = tpu.matmul %293, %294, %cst_137 {dimension_numbers = #tpu.dot_dimension_numbers<[1], [1], [0], [0], [0, 0, 1, 0], [], []>} : vector<8x8xf32>, vector<8x8xf32>, vector<8x8xf32> -> vector<8x8xf32>
    %297 = arith.addf %296, %235 : vector<8x8xf32>
    %cst_138 = arith.constant dense<0xFF800000> : vector<8xf32>
    %298 = vector.multi_reduction <maximumf>, %297, %cst_138 [1] : vector<8x8xf32> to vector<8xf32>
    %299 = vector.shape_cast %298 : vector<8xf32> to vector<8x1xf32>
    %300 = vector.broadcast %299 : vector<8x1xf32> to vector<8x8xf32>
    %301 = arith.subf %297, %300 : vector<8x8xf32>
    %302 = math.exp %301 : vector<8x8xf32>
    %cst_139 = arith.constant dense<0.000000e+00> : vector<8xf32>
    %303 = vector.multi_reduction <add>, %302, %cst_139 [1] : vector<8x8xf32> to vector<8xf32>
    %304 = vector.shape_cast %303 : vector<8xf32> to vector<8x1xf32>
    %305 = tpu.reciprocal %304 {approx = true} : vector<8x1xf32> -> vector<8x1xf32>
    %306 = vector.broadcast %305 : vector<8x1xf32> to vector<8x8xf32>
    %307 = arith.mulf %302, %306 : vector<8x8xf32>
    %cst_140 = arith.constant dense<0.000000e+00> : vector<8x8xf32>
    %308 = tpu.matmul %307, %295, %cst_140 {dimension_numbers = #tpu.dot_dimension_numbers<[1], [0], [0], [1], [0, 0, 1, 1], [], []>} : vector<8x8xf32>, vector<8x8xf32>, vector<8x8xf32> -> vector<8x8xf32>
    %309 = vector.extract_strided_slice %238 {offsets = [16, 0], sizes = [8, 32], strides = [1, 1]} : vector<32x32xf32> to vector<8x32xf32>
    %cst_141 = arith.constant dense<0.000000e+00> : vector<8x32xf32>
    %310 = tpu.matmul %308, %309, %cst_141 {dimension_numbers = #tpu.dot_dimension_numbers<[1], [0], [0], [1], [0, 0, 1, 1], [], []>} : vector<8x8xf32>, vector<8x32xf32>, vector<8x32xf32> -> vector<8x32xf32>
    %311 = arith.addf %292, %310 : vector<8x32xf32>
    %312 = vector.extract_strided_slice %251 {offsets = [0, 24], sizes = [8, 8], strides = [1, 1]} : vector<8x32xf32> to vector<8x8xf32>
    %313 = vector.extract_strided_slice %252 {offsets = [0, 24], sizes = [8, 8], strides = [1, 1]} : vector<8x32xf32> to vector<8x8xf32>
    %314 = vector.extract_strided_slice %253 {offsets = [0, 24], sizes = [8, 8], strides = [1, 1]} : vector<8x32xf32> to vector<8x8xf32>
    %cst_142 = arith.constant dense<0.000000e+00> : vector<8x8xf32>
    %315 = tpu.matmul %312, %313, %cst_142 {dimension_numbers = #tpu.dot_dimension_numbers<[1], [1], [0], [0], [0, 0, 1, 0], [], []>} : vector<8x8xf32>, vector<8x8xf32>, vector<8x8xf32> -> vector<8x8xf32>
    %316 = arith.addf %315, %235 : vector<8x8xf32>
    %cst_143 = arith.constant dense<0xFF800000> : vector<8xf32>
    %317 = vector.multi_reduction <maximumf>, %316, %cst_143 [1] : vector<8x8xf32> to vector<8xf32>
    %318 = vector.shape_cast %317 : vector<8xf32> to vector<8x1xf32>
    %319 = vector.broadcast %318 : vector<8x1xf32> to vector<8x8xf32>
    %320 = arith.subf %316, %319 : vector<8x8xf32>
    %321 = math.exp %320 : vector<8x8xf32>
    %cst_144 = arith.constant dense<0.000000e+00> : vector<8xf32>
    %322 = vector.multi_reduction <add>, %321, %cst_144 [1] : vector<8x8xf32> to vector<8xf32>
    %323 = vector.shape_cast %322 : vector<8xf32> to vector<8x1xf32>
    %324 = tpu.reciprocal %323 {approx = true} : vector<8x1xf32> -> vector<8x1xf32>
    %325 = vector.broadcast %324 : vector<8x1xf32> to vector<8x8xf32>
    %326 = arith.mulf %321, %325 : vector<8x8xf32>
    %cst_145 = arith.constant dense<0.000000e+00> : vector<8x8xf32>
    %327 = tpu.matmul %326, %314, %cst_145 {dimension_numbers = #tpu.dot_dimension_numbers<[1], [0], [0], [1], [0, 0, 1, 1], [], []>} : vector<8x8xf32>, vector<8x8xf32>, vector<8x8xf32> -> vector<8x8xf32>
    %328 = vector.extract_strided_slice %238 {offsets = [24, 0], sizes = [8, 32], strides = [1, 1]} : vector<32x32xf32> to vector<8x32xf32>
    %cst_146 = arith.constant dense<0.000000e+00> : vector<8x32xf32>
    %329 = tpu.matmul %327, %328, %cst_146 {dimension_numbers = #tpu.dot_dimension_numbers<[1], [0], [0], [1], [0, 0, 1, 1], [], []>} : vector<8x8xf32>, vector<8x32xf32>, vector<8x32xf32> -> vector<8x32xf32>
    %330 = arith.addf %311, %329 : vector<8x32xf32>
    %331 = vector.broadcast %239 : vector<1x32xf32> to vector<8x32xf32>
    %332 = arith.addf %330, %331 : vector<8x32xf32>
    %333 = arith.addf %332, %234 : vector<8x32xf32>
    %cst_147 = arith.constant dense<0.000000e+00> : vector<8xf32>
    %334 = vector.multi_reduction <add>, %333, %cst_147 [1] : vector<8x32xf32> to vector<8xf32>
    %335 = vector.shape_cast %334 : vector<8xf32> to vector<8x1xf32>
    %cst_148 = arith.constant 3.200000e+01 : f32
    %336 = vector.broadcast %cst_148 : f32 to vector<8x1xf32>
    %337 = arith.divf %335, %336 : vector<8x1xf32>
    %338 = vector.broadcast %337 : vector<8x1xf32> to vector<8x32xf32>
    %339 = arith.subf %333, %338 : vector<8x32xf32>
    %340 = arith.mulf %339, %339 : vector<8x32xf32>
    %cst_149 = arith.constant dense<0.000000e+00> : vector<8xf32>
    %341 = vector.multi_reduction <add>, %340, %cst_149 [1] : vector<8x32xf32> to vector<8xf32>
    %342 = vector.shape_cast %341 : vector<8xf32> to vector<8x1xf32>
    %cst_150 = arith.constant 3.200000e+01 : f32
    %343 = vector.broadcast %cst_150 : f32 to vector<8x1xf32>
    %344 = arith.divf %342, %343 : vector<8x1xf32>
    %345 = vector.broadcast %337 : vector<8x1xf32> to vector<8x32xf32>
    %346 = arith.subf %333, %345 : vector<8x32xf32>
    %cst_151 = arith.constant 9.99999974E-6 : f32
    %347 = vector.broadcast %cst_151 : f32 to vector<8x1xf32>
    %348 = arith.addf %344, %347 : vector<8x1xf32>
    %349 = math.rsqrt %348 : vector<8x1xf32>
    %350 = vector.broadcast %349 : vector<8x1xf32> to vector<8x32xf32>
    %351 = arith.mulf %346, %350 : vector<8x32xf32>
    %352 = vector.broadcast %240 : vector<1x32xf32> to vector<8x32xf32>
    %353 = arith.mulf %351, %352 : vector<8x32xf32>
    %354 = vector.broadcast %241 : vector<1x32xf32> to vector<8x32xf32>
    %355 = arith.addf %353, %354 : vector<8x32xf32>
    %cst_152 = arith.constant dense<0.000000e+00> : vector<8x64xf32>
    %356 = tpu.matmul %355, %242, %cst_152 {dimension_numbers = #tpu.dot_dimension_numbers<[1], [0], [0], [1], [0, 0, 1, 1], [], []>} : vector<8x32xf32>, vector<32x64xf32>, vector<8x64xf32> -> vector<8x64xf32>
    %357 = vector.broadcast %243 : vector<1x64xf32> to vector<8x64xf32>
    %358 = arith.addf %356, %357 : vector<8x64xf32>
    %cst_153 = arith.constant 0.000000e+00 : f32
    %359 = vector.broadcast %cst_153 : f32 to vector<8x64xf32>
    %360 = arith.maximumf %358, %359 : vector<8x64xf32>
    %cst_154 = arith.constant dense<0.000000e+00> : vector<8x32xf32>
    %361 = tpu.matmul %360, %244, %cst_154 {dimension_numbers = #tpu.dot_dimension_numbers<[1], [0], [0], [1], [0, 0, 1, 1], [], []>} : vector<8x64xf32>, vector<64x32xf32>, vector<8x32xf32> -> vector<8x32xf32>
    %362 = vector.broadcast %245 : vector<1x32xf32> to vector<8x32xf32>
    %363 = arith.addf %361, %362 : vector<8x32xf32>
    %364 = arith.addf %363, %355 : vector<8x32xf32>
    %cst_155 = arith.constant dense<0.000000e+00> : vector<8xf32>
    %365 = vector.multi_reduction <add>, %364, %cst_155 [1] : vector<8x32xf32> to vector<8xf32>
    %366 = vector.shape_cast %365 : vector<8xf32> to vector<8x1xf32>
    %cst_156 = arith.constant 3.200000e+01 : f32
    %367 = vector.broadcast %cst_156 : f32 to vector<8x1xf32>
    %368 = arith.divf %366, %367 : vector<8x1xf32>
    %369 = vector.broadcast %368 : vector<8x1xf32> to vector<8x32xf32>
    %370 = arith.subf %364, %369 : vector<8x32xf32>
    %371 = arith.mulf %370, %370 : vector<8x32xf32>
    %cst_157 = arith.constant dense<0.000000e+00> : vector<8xf32>
    %372 = vector.multi_reduction <add>, %371, %cst_157 [1] : vector<8x32xf32> to vector<8xf32>
    %373 = vector.shape_cast %372 : vector<8xf32> to vector<8x1xf32>
    %cst_158 = arith.constant 3.200000e+01 : f32
    %374 = vector.broadcast %cst_158 : f32 to vector<8x1xf32>
    %375 = arith.divf %373, %374 : vector<8x1xf32>
    %376 = vector.broadcast %368 : vector<8x1xf32> to vector<8x32xf32>
    %377 = arith.subf %364, %376 : vector<8x32xf32>
    %cst_159 = arith.constant 9.99999974E-6 : f32
    %378 = vector.broadcast %cst_159 : f32 to vector<8x1xf32>
    %379 = arith.addf %375, %378 : vector<8x1xf32>
    %380 = math.rsqrt %379 : vector<8x1xf32>
    %381 = vector.broadcast %380 : vector<8x1xf32> to vector<8x32xf32>
    %382 = arith.mulf %377, %381 : vector<8x32xf32>
    %383 = vector.broadcast %246 : vector<1x32xf32> to vector<8x32xf32>
    %384 = arith.mulf %382, %383 : vector<8x32xf32>
    %385 = vector.broadcast %247 : vector<1x32xf32> to vector<8x32xf32>
    %386 = arith.addf %384, %385 : vector<8x32xf32>
    %c0_160 = arith.constant 0 : index
    %c0_161 = arith.constant 0 : index
    %387 = vector.load %arg38[%c0_160, %c0_161] : memref<4x8xf32, #tpu.memory_space<vmem>>, vector<4x8xf32>
    %c0_162 = arith.constant 0 : index
    %c0_163 = arith.constant 0 : index
    %388 = vector.load %arg39[%c0_162, %c0_163] : memref<32x32xf32, #tpu.memory_space<vmem>>, vector<32x32xf32>
    %c0_164 = arith.constant 0 : index
    %c0_165 = arith.constant 0 : index
    %389 = vector.load %arg40[%c0_164, %c0_165] : memref<1x32xf32, #tpu.memory_space<vmem>>, vector<1x32xf32>
    %c0_166 = arith.constant 0 : index
    %c0_167 = arith.constant 0 : index
    %390 = vector.load %arg41[%c0_166, %c0_167] : memref<1x32xf32, #tpu.memory_space<vmem>>, vector<1x32xf32>
    %c0_168 = arith.constant 0 : index
    %c0_169 = arith.constant 0 : index
    %391 = vector.load %arg42[%c0_168, %c0_169] : memref<1x32xf32, #tpu.memory_space<vmem>>, vector<1x32xf32>
    %cst_170 = arith.constant dense<0.000000e+00> : vector<4x32xf32>
    %392 = tpu.matmul %387, %386, %cst_170 {dimension_numbers = #tpu.dot_dimension_numbers<[1], [0], [0], [1], [0, 0, 1, 1], [], []>} : vector<4x8xf32>, vector<8x32xf32>, vector<4x32xf32> -> vector<4x32xf32>
    %cst_171 = arith.constant dense<0.000000e+00> : vector<4x32xf32>
    %393 = tpu.matmul %392, %388, %cst_171 {dimension_numbers = #tpu.dot_dimension_numbers<[1], [0], [0], [1], [0, 0, 1, 1], [], []>} : vector<4x32xf32>, vector<32x32xf32>, vector<4x32xf32> -> vector<4x32xf32>
    %394 = vector.broadcast %389 : vector<1x32xf32> to vector<4x32xf32>
    %395 = arith.addf %393, %394 : vector<4x32xf32>
    %cst_172 = arith.constant dense<0.000000e+00> : vector<4xf32>
    %396 = vector.multi_reduction <add>, %395, %cst_172 [1] : vector<4x32xf32> to vector<4xf32>
    %397 = vector.shape_cast %396 : vector<4xf32> to vector<4x1xf32>
    %cst_173 = arith.constant 3.200000e+01 : f32
    %398 = vector.broadcast %cst_173 : f32 to vector<4x1xf32>
    %399 = arith.divf %397, %398 : vector<4x1xf32>
    %400 = vector.broadcast %399 : vector<4x1xf32> to vector<4x32xf32>
    %401 = arith.subf %395, %400 : vector<4x32xf32>
    %402 = arith.mulf %401, %401 : vector<4x32xf32>
    %cst_174 = arith.constant dense<0.000000e+00> : vector<4xf32>
    %403 = vector.multi_reduction <add>, %402, %cst_174 [1] : vector<4x32xf32> to vector<4xf32>
    %404 = vector.shape_cast %403 : vector<4xf32> to vector<4x1xf32>
    %cst_175 = arith.constant 3.200000e+01 : f32
    %405 = vector.broadcast %cst_175 : f32 to vector<4x1xf32>
    %406 = arith.divf %404, %405 : vector<4x1xf32>
    %407 = vector.broadcast %399 : vector<4x1xf32> to vector<4x32xf32>
    %408 = arith.subf %395, %407 : vector<4x32xf32>
    %cst_176 = arith.constant 9.99999974E-6 : f32
    %409 = vector.broadcast %cst_176 : f32 to vector<4x1xf32>
    %410 = arith.addf %406, %409 : vector<4x1xf32>
    %411 = math.rsqrt %410 : vector<4x1xf32>
    %412 = vector.broadcast %411 : vector<4x1xf32> to vector<4x32xf32>
    %413 = arith.mulf %408, %412 : vector<4x32xf32>
    %414 = vector.broadcast %390 : vector<1x32xf32> to vector<4x32xf32>
    %415 = arith.mulf %413, %414 : vector<4x32xf32>
    %416 = vector.broadcast %391 : vector<1x32xf32> to vector<4x32xf32>
    %417 = arith.addf %415, %416 : vector<4x32xf32>
    %c0_177 = arith.constant 0 : index
    %c0_178 = arith.constant 0 : index
    %418 = vector.load %arg43[%c0_177, %c0_178] : memref<1x32xf32, #tpu.memory_space<vmem>>, vector<1x32xf32>
    %c0_179 = arith.constant 0 : index
    %c0_180 = arith.constant 0 : index
    %419 = vector.load %arg44[%c0_179, %c0_180] : memref<1x32xf32, #tpu.memory_space<vmem>>, vector<1x32xf32>
    %cst_181 = arith.constant dense<0.000000e+00> : vector<4xf32>
    %420 = vector.multi_reduction <add>, %417, %cst_181 [1] : vector<4x32xf32> to vector<4xf32>
    %421 = vector.shape_cast %420 : vector<4xf32> to vector<4x1xf32>
    %cst_182 = arith.constant 3.200000e+01 : f32
    %422 = vector.broadcast %cst_182 : f32 to vector<4x1xf32>
    %423 = arith.divf %421, %422 : vector<4x1xf32>
    %424 = vector.broadcast %423 : vector<4x1xf32> to vector<4x32xf32>
    %425 = arith.subf %417, %424 : vector<4x32xf32>
    %426 = arith.mulf %425, %425 : vector<4x32xf32>
    %cst_183 = arith.constant dense<0.000000e+00> : vector<4xf32>
    %427 = vector.multi_reduction <add>, %426, %cst_183 [1] : vector<4x32xf32> to vector<4xf32>
    %428 = vector.shape_cast %427 : vector<4xf32> to vector<4x1xf32>
    %cst_184 = arith.constant 3.200000e+01 : f32
    %429 = vector.broadcast %cst_184 : f32 to vector<4x1xf32>
    %430 = arith.divf %428, %429 : vector<4x1xf32>
    %431 = vector.broadcast %423 : vector<4x1xf32> to vector<4x32xf32>
    %432 = arith.subf %417, %431 : vector<4x32xf32>
    %cst_185 = arith.constant 9.99999974E-6 : f32
    %433 = vector.broadcast %cst_185 : f32 to vector<4x1xf32>
    %434 = arith.addf %430, %433 : vector<4x1xf32>
    %435 = math.rsqrt %434 : vector<4x1xf32>
    %436 = vector.broadcast %435 : vector<4x1xf32> to vector<4x32xf32>
    %437 = arith.mulf %432, %436 : vector<4x32xf32>
    %438 = vector.broadcast %418 : vector<1x32xf32> to vector<4x32xf32>
    %439 = arith.mulf %437, %438 : vector<4x32xf32>
    %440 = vector.broadcast %419 : vector<1x32xf32> to vector<4x32xf32>
    %441 = arith.addf %439, %440 : vector<4x32xf32>
    %c0_186 = arith.constant 0 : index
    %c0_187 = arith.constant 0 : index
    %442 = vector.load %arg45[%c0_186, %c0_187] : memref<4x4xf32, #tpu.memory_space<vmem>>, vector<4x4xf32>
    %c0_188 = arith.constant 0 : index
    %c0_189 = arith.constant 0 : index
    %443 = vector.load %arg46[%c0_188, %c0_189] : memref<32x96xf32, #tpu.memory_space<vmem>>, vector<32x96xf32>
    %c0_190 = arith.constant 0 : index
    %c0_191 = arith.constant 0 : index
    %444 = vector.load %arg47[%c0_190, %c0_191] : memref<1x96xf32, #tpu.memory_space<vmem>>, vector<1x96xf32>
    %c0_192 = arith.constant 0 : index
    %c0_193 = arith.constant 0 : index
    %445 = vector.load %arg48[%c0_192, %c0_193] : memref<32x32xf32, #tpu.memory_space<vmem>>, vector<32x32xf32>
    %c0_194 = arith.constant 0 : index
    %c0_195 = arith.constant 0 : index
    %446 = vector.load %arg49[%c0_194, %c0_195] : memref<1x32xf32, #tpu.memory_space<vmem>>, vector<1x32xf32>
    %c0_196 = arith.constant 0 : index
    %c0_197 = arith.constant 0 : index
    %447 = vector.load %arg50[%c0_196, %c0_197] : memref<1x32xf32, #tpu.memory_space<vmem>>, vector<1x32xf32>
    %c0_198 = arith.constant 0 : index
    %c0_199 = arith.constant 0 : index
    %448 = vector.load %arg51[%c0_198, %c0_199] : memref<1x32xf32, #tpu.memory_space<vmem>>, vector<1x32xf32>
    %c0_200 = arith.constant 0 : index
    %c0_201 = arith.constant 0 : index
    %449 = vector.load %arg52[%c0_200, %c0_201] : memref<32x64xf32, #tpu.memory_space<vmem>>, vector<32x64xf32>
    %c0_202 = arith.constant 0 : index
    %c0_203 = arith.constant 0 : index
    %450 = vector.load %arg53[%c0_202, %c0_203] : memref<1x64xf32, #tpu.memory_space<vmem>>, vector<1x64xf32>
    %c0_204 = arith.constant 0 : index
    %c0_205 = arith.constant 0 : index
    %451 = vector.load %arg54[%c0_204, %c0_205] : memref<64x32xf32, #tpu.memory_space<vmem>>, vector<64x32xf32>
    %c0_206 = arith.constant 0 : index
    %c0_207 = arith.constant 0 : index
    %452 = vector.load %arg55[%c0_206, %c0_207] : memref<1x32xf32, #tpu.memory_space<vmem>>, vector<1x32xf32>
    %c0_208 = arith.constant 0 : index
    %c0_209 = arith.constant 0 : index
    %453 = vector.load %arg56[%c0_208, %c0_209] : memref<1x32xf32, #tpu.memory_space<vmem>>, vector<1x32xf32>
    %c0_210 = arith.constant 0 : index
    %c0_211 = arith.constant 0 : index
    %454 = vector.load %arg57[%c0_210, %c0_211] : memref<1x32xf32, #tpu.memory_space<vmem>>, vector<1x32xf32>
    %cst_212 = arith.constant dense<0.000000e+00> : vector<4x96xf32>
    %455 = tpu.matmul %441, %443, %cst_212 {dimension_numbers = #tpu.dot_dimension_numbers<[1], [0], [0], [1], [0, 0, 1, 1], [], []>} : vector<4x32xf32>, vector<32x96xf32>, vector<4x96xf32> -> vector<4x96xf32>
    %456 = vector.broadcast %444 : vector<1x96xf32> to vector<4x96xf32>
    %457 = arith.addf %455, %456 : vector<4x96xf32>
    %458 = vector.extract_strided_slice %457 {offsets = [0, 0], sizes = [4, 32], strides = [1, 1]} : vector<4x96xf32> to vector<4x32xf32>
    %459 = vector.extract_strided_slice %457 {offsets = [0, 32], sizes = [4, 32], strides = [1, 1]} : vector<4x96xf32> to vector<4x32xf32>
    %460 = vector.extract_strided_slice %457 {offsets = [0, 64], sizes = [4, 32], strides = [1, 1]} : vector<4x96xf32> to vector<4x32xf32>
    %cst_213 = arith.constant 0.000000e+00 : f32
    %461 = vector.broadcast %cst_213 : f32 to vector<4x32xf32>
    %462 = vector.extract_strided_slice %458 {offsets = [0, 0], sizes = [4, 8], strides = [1, 1]} : vector<4x32xf32> to vector<4x8xf32>
    %463 = vector.extract_strided_slice %459 {offsets = [0, 0], sizes = [4, 8], strides = [1, 1]} : vector<4x32xf32> to vector<4x8xf32>
    %464 = vector.extract_strided_slice %460 {offsets = [0, 0], sizes = [4, 8], strides = [1, 1]} : vector<4x32xf32> to vector<4x8xf32>
    %cst_214 = arith.constant dense<0.000000e+00> : vector<4x4xf32>
    %465 = tpu.matmul %462, %463, %cst_214 {dimension_numbers = #tpu.dot_dimension_numbers<[1], [1], [0], [0], [0, 0, 1, 0], [], []>} : vector<4x8xf32>, vector<4x8xf32>, vector<4x4xf32> -> vector<4x4xf32>
    %466 = arith.addf %465, %442 : vector<4x4xf32>
    %cst_215 = arith.constant dense<0xFF800000> : vector<4xf32>
    %467 = vector.multi_reduction <maximumf>, %466, %cst_215 [1] : vector<4x4xf32> to vector<4xf32>
    %468 = vector.shape_cast %467 : vector<4xf32> to vector<4x1xf32>
    %469 = vector.broadcast %468 : vector<4x1xf32> to vector<4x4xf32>
    %470 = arith.subf %466, %469 : vector<4x4xf32>
    %471 = math.exp %470 : vector<4x4xf32>
    %cst_216 = arith.constant dense<0.000000e+00> : vector<4xf32>
    %472 = vector.multi_reduction <add>, %471, %cst_216 [1] : vector<4x4xf32> to vector<4xf32>
    %473 = vector.shape_cast %472 : vector<4xf32> to vector<4x1xf32>
    %474 = tpu.reciprocal %473 {approx = true} : vector<4x1xf32> -> vector<4x1xf32>
    %475 = vector.broadcast %474 : vector<4x1xf32> to vector<4x4xf32>
    %476 = arith.mulf %471, %475 : vector<4x4xf32>
    %cst_217 = arith.constant dense<0.000000e+00> : vector<4x8xf32>
    %477 = tpu.matmul %476, %464, %cst_217 {dimension_numbers = #tpu.dot_dimension_numbers<[1], [0], [0], [1], [0, 0, 1, 1], [], []>} : vector<4x4xf32>, vector<4x8xf32>, vector<4x8xf32> -> vector<4x8xf32>
    %478 = vector.extract_strided_slice %445 {offsets = [0, 0], sizes = [8, 32], strides = [1, 1]} : vector<32x32xf32> to vector<8x32xf32>
    %cst_218 = arith.constant dense<0.000000e+00> : vector<4x32xf32>
    %479 = tpu.matmul %477, %478, %cst_218 {dimension_numbers = #tpu.dot_dimension_numbers<[1], [0], [0], [1], [0, 0, 1, 1], [], []>} : vector<4x8xf32>, vector<8x32xf32>, vector<4x32xf32> -> vector<4x32xf32>
    %480 = arith.addf %461, %479 : vector<4x32xf32>
    %481 = vector.extract_strided_slice %458 {offsets = [0, 8], sizes = [4, 8], strides = [1, 1]} : vector<4x32xf32> to vector<4x8xf32>
    %482 = vector.extract_strided_slice %459 {offsets = [0, 8], sizes = [4, 8], strides = [1, 1]} : vector<4x32xf32> to vector<4x8xf32>
    %483 = vector.extract_strided_slice %460 {offsets = [0, 8], sizes = [4, 8], strides = [1, 1]} : vector<4x32xf32> to vector<4x8xf32>
    %cst_219 = arith.constant dense<0.000000e+00> : vector<4x4xf32>
    %484 = tpu.matmul %481, %482, %cst_219 {dimension_numbers = #tpu.dot_dimension_numbers<[1], [1], [0], [0], [0, 0, 1, 0], [], []>} : vector<4x8xf32>, vector<4x8xf32>, vector<4x4xf32> -> vector<4x4xf32>
    %485 = arith.addf %484, %442 : vector<4x4xf32>
    %cst_220 = arith.constant dense<0xFF800000> : vector<4xf32>
    %486 = vector.multi_reduction <maximumf>, %485, %cst_220 [1] : vector<4x4xf32> to vector<4xf32>
    %487 = vector.shape_cast %486 : vector<4xf32> to vector<4x1xf32>
    %488 = vector.broadcast %487 : vector<4x1xf32> to vector<4x4xf32>
    %489 = arith.subf %485, %488 : vector<4x4xf32>
    %490 = math.exp %489 : vector<4x4xf32>
    %cst_221 = arith.constant dense<0.000000e+00> : vector<4xf32>
    %491 = vector.multi_reduction <add>, %490, %cst_221 [1] : vector<4x4xf32> to vector<4xf32>
    %492 = vector.shape_cast %491 : vector<4xf32> to vector<4x1xf32>
    %493 = tpu.reciprocal %492 {approx = true} : vector<4x1xf32> -> vector<4x1xf32>
    %494 = vector.broadcast %493 : vector<4x1xf32> to vector<4x4xf32>
    %495 = arith.mulf %490, %494 : vector<4x4xf32>
    %cst_222 = arith.constant dense<0.000000e+00> : vector<4x8xf32>
    %496 = tpu.matmul %495, %483, %cst_222 {dimension_numbers = #tpu.dot_dimension_numbers<[1], [0], [0], [1], [0, 0, 1, 1], [], []>} : vector<4x4xf32>, vector<4x8xf32>, vector<4x8xf32> -> vector<4x8xf32>
    %497 = vector.extract_strided_slice %445 {offsets = [8, 0], sizes = [8, 32], strides = [1, 1]} : vector<32x32xf32> to vector<8x32xf32>
    %cst_223 = arith.constant dense<0.000000e+00> : vector<4x32xf32>
    %498 = tpu.matmul %496, %497, %cst_223 {dimension_numbers = #tpu.dot_dimension_numbers<[1], [0], [0], [1], [0, 0, 1, 1], [], []>} : vector<4x8xf32>, vector<8x32xf32>, vector<4x32xf32> -> vector<4x32xf32>
    %499 = arith.addf %480, %498 : vector<4x32xf32>
    %500 = vector.extract_strided_slice %458 {offsets = [0, 16], sizes = [4, 8], strides = [1, 1]} : vector<4x32xf32> to vector<4x8xf32>
    %501 = vector.extract_strided_slice %459 {offsets = [0, 16], sizes = [4, 8], strides = [1, 1]} : vector<4x32xf32> to vector<4x8xf32>
    %502 = vector.extract_strided_slice %460 {offsets = [0, 16], sizes = [4, 8], strides = [1, 1]} : vector<4x32xf32> to vector<4x8xf32>
    %cst_224 = arith.constant dense<0.000000e+00> : vector<4x4xf32>
    %503 = tpu.matmul %500, %501, %cst_224 {dimension_numbers = #tpu.dot_dimension_numbers<[1], [1], [0], [0], [0, 0, 1, 0], [], []>} : vector<4x8xf32>, vector<4x8xf32>, vector<4x4xf32> -> vector<4x4xf32>
    %504 = arith.addf %503, %442 : vector<4x4xf32>
    %cst_225 = arith.constant dense<0xFF800000> : vector<4xf32>
    %505 = vector.multi_reduction <maximumf>, %504, %cst_225 [1] : vector<4x4xf32> to vector<4xf32>
    %506 = vector.shape_cast %505 : vector<4xf32> to vector<4x1xf32>
    %507 = vector.broadcast %506 : vector<4x1xf32> to vector<4x4xf32>
    %508 = arith.subf %504, %507 : vector<4x4xf32>
    %509 = math.exp %508 : vector<4x4xf32>
    %cst_226 = arith.constant dense<0.000000e+00> : vector<4xf32>
    %510 = vector.multi_reduction <add>, %509, %cst_226 [1] : vector<4x4xf32> to vector<4xf32>
    %511 = vector.shape_cast %510 : vector<4xf32> to vector<4x1xf32>
    %512 = tpu.reciprocal %511 {approx = true} : vector<4x1xf32> -> vector<4x1xf32>
    %513 = vector.broadcast %512 : vector<4x1xf32> to vector<4x4xf32>
    %514 = arith.mulf %509, %513 : vector<4x4xf32>
    %cst_227 = arith.constant dense<0.000000e+00> : vector<4x8xf32>
    %515 = tpu.matmul %514, %502, %cst_227 {dimension_numbers = #tpu.dot_dimension_numbers<[1], [0], [0], [1], [0, 0, 1, 1], [], []>} : vector<4x4xf32>, vector<4x8xf32>, vector<4x8xf32> -> vector<4x8xf32>
    %516 = vector.extract_strided_slice %445 {offsets = [16, 0], sizes = [8, 32], strides = [1, 1]} : vector<32x32xf32> to vector<8x32xf32>
    %cst_228 = arith.constant dense<0.000000e+00> : vector<4x32xf32>
    %517 = tpu.matmul %515, %516, %cst_228 {dimension_numbers = #tpu.dot_dimension_numbers<[1], [0], [0], [1], [0, 0, 1, 1], [], []>} : vector<4x8xf32>, vector<8x32xf32>, vector<4x32xf32> -> vector<4x32xf32>
    %518 = arith.addf %499, %517 : vector<4x32xf32>
    %519 = vector.extract_strided_slice %458 {offsets = [0, 24], sizes = [4, 8], strides = [1, 1]} : vector<4x32xf32> to vector<4x8xf32>
    %520 = vector.extract_strided_slice %459 {offsets = [0, 24], sizes = [4, 8], strides = [1, 1]} : vector<4x32xf32> to vector<4x8xf32>
    %521 = vector.extract_strided_slice %460 {offsets = [0, 24], sizes = [4, 8], strides = [1, 1]} : vector<4x32xf32> to vector<4x8xf32>
    %cst_229 = arith.constant dense<0.000000e+00> : vector<4x4xf32>
    %522 = tpu.matmul %519, %520, %cst_229 {dimension_numbers = #tpu.dot_dimension_numbers<[1], [1], [0], [0], [0, 0, 1, 0], [], []>} : vector<4x8xf32>, vector<4x8xf32>, vector<4x4xf32> -> vector<4x4xf32>
    %523 = arith.addf %522, %442 : vector<4x4xf32>
    %cst_230 = arith.constant dense<0xFF800000> : vector<4xf32>
    %524 = vector.multi_reduction <maximumf>, %523, %cst_230 [1] : vector<4x4xf32> to vector<4xf32>
    %525 = vector.shape_cast %524 : vector<4xf32> to vector<4x1xf32>
    %526 = vector.broadcast %525 : vector<4x1xf32> to vector<4x4xf32>
    %527 = arith.subf %523, %526 : vector<4x4xf32>
    %528 = math.exp %527 : vector<4x4xf32>
    %cst_231 = arith.constant dense<0.000000e+00> : vector<4xf32>
    %529 = vector.multi_reduction <add>, %528, %cst_231 [1] : vector<4x4xf32> to vector<4xf32>
    %530 = vector.shape_cast %529 : vector<4xf32> to vector<4x1xf32>
    %531 = tpu.reciprocal %530 {approx = true} : vector<4x1xf32> -> vector<4x1xf32>
    %532 = vector.broadcast %531 : vector<4x1xf32> to vector<4x4xf32>
    %533 = arith.mulf %528, %532 : vector<4x4xf32>
    %cst_232 = arith.constant dense<0.000000e+00> : vector<4x8xf32>
    %534 = tpu.matmul %533, %521, %cst_232 {dimension_numbers = #tpu.dot_dimension_numbers<[1], [0], [0], [1], [0, 0, 1, 1], [], []>} : vector<4x4xf32>, vector<4x8xf32>, vector<4x8xf32> -> vector<4x8xf32>
    %535 = vector.extract_strided_slice %445 {offsets = [24, 0], sizes = [8, 32], strides = [1, 1]} : vector<32x32xf32> to vector<8x32xf32>
    %cst_233 = arith.constant dense<0.000000e+00> : vector<4x32xf32>
    %536 = tpu.matmul %534, %535, %cst_233 {dimension_numbers = #tpu.dot_dimension_numbers<[1], [0], [0], [1], [0, 0, 1, 1], [], []>} : vector<4x8xf32>, vector<8x32xf32>, vector<4x32xf32> -> vector<4x32xf32>
    %537 = arith.addf %518, %536 : vector<4x32xf32>
    %538 = vector.broadcast %446 : vector<1x32xf32> to vector<4x32xf32>
    %539 = arith.addf %537, %538 : vector<4x32xf32>
    %540 = arith.addf %539, %441 : vector<4x32xf32>
    %cst_234 = arith.constant dense<0.000000e+00> : vector<4xf32>
    %541 = vector.multi_reduction <add>, %540, %cst_234 [1] : vector<4x32xf32> to vector<4xf32>
    %542 = vector.shape_cast %541 : vector<4xf32> to vector<4x1xf32>
    %cst_235 = arith.constant 3.200000e+01 : f32
    %543 = vector.broadcast %cst_235 : f32 to vector<4x1xf32>
    %544 = arith.divf %542, %543 : vector<4x1xf32>
    %545 = vector.broadcast %544 : vector<4x1xf32> to vector<4x32xf32>
    %546 = arith.subf %540, %545 : vector<4x32xf32>
    %547 = arith.mulf %546, %546 : vector<4x32xf32>
    %cst_236 = arith.constant dense<0.000000e+00> : vector<4xf32>
    %548 = vector.multi_reduction <add>, %547, %cst_236 [1] : vector<4x32xf32> to vector<4xf32>
    %549 = vector.shape_cast %548 : vector<4xf32> to vector<4x1xf32>
    %cst_237 = arith.constant 3.200000e+01 : f32
    %550 = vector.broadcast %cst_237 : f32 to vector<4x1xf32>
    %551 = arith.divf %549, %550 : vector<4x1xf32>
    %552 = vector.broadcast %544 : vector<4x1xf32> to vector<4x32xf32>
    %553 = arith.subf %540, %552 : vector<4x32xf32>
    %cst_238 = arith.constant 9.99999974E-6 : f32
    %554 = vector.broadcast %cst_238 : f32 to vector<4x1xf32>
    %555 = arith.addf %551, %554 : vector<4x1xf32>
    %556 = math.rsqrt %555 : vector<4x1xf32>
    %557 = vector.broadcast %556 : vector<4x1xf32> to vector<4x32xf32>
    %558 = arith.mulf %553, %557 : vector<4x32xf32>
    %559 = vector.broadcast %447 : vector<1x32xf32> to vector<4x32xf32>
    %560 = arith.mulf %558, %559 : vector<4x32xf32>
    %561 = vector.broadcast %448 : vector<1x32xf32> to vector<4x32xf32>
    %562 = arith.addf %560, %561 : vector<4x32xf32>
    %cst_239 = arith.constant dense<0.000000e+00> : vector<4x64xf32>
    %563 = tpu.matmul %562, %449, %cst_239 {dimension_numbers = #tpu.dot_dimension_numbers<[1], [0], [0], [1], [0, 0, 1, 1], [], []>} : vector<4x32xf32>, vector<32x64xf32>, vector<4x64xf32> -> vector<4x64xf32>
    %564 = vector.broadcast %450 : vector<1x64xf32> to vector<4x64xf32>
    %565 = arith.addf %563, %564 : vector<4x64xf32>
    %cst_240 = arith.constant 0.000000e+00 : f32
    %566 = vector.broadcast %cst_240 : f32 to vector<4x64xf32>
    %567 = arith.maximumf %565, %566 : vector<4x64xf32>
    %cst_241 = arith.constant dense<0.000000e+00> : vector<4x32xf32>
    %568 = tpu.matmul %567, %451, %cst_241 {dimension_numbers = #tpu.dot_dimension_numbers<[1], [0], [0], [1], [0, 0, 1, 1], [], []>} : vector<4x64xf32>, vector<64x32xf32>, vector<4x32xf32> -> vector<4x32xf32>
    %569 = vector.broadcast %452 : vector<1x32xf32> to vector<4x32xf32>
    %570 = arith.addf %568, %569 : vector<4x32xf32>
    %571 = arith.addf %570, %562 : vector<4x32xf32>
    %cst_242 = arith.constant dense<0.000000e+00> : vector<4xf32>
    %572 = vector.multi_reduction <add>, %571, %cst_242 [1] : vector<4x32xf32> to vector<4xf32>
    %573 = vector.shape_cast %572 : vector<4xf32> to vector<4x1xf32>
    %cst_243 = arith.constant 3.200000e+01 : f32
    %574 = vector.broadcast %cst_243 : f32 to vector<4x1xf32>
    %575 = arith.divf %573, %574 : vector<4x1xf32>
    %576 = vector.broadcast %575 : vector<4x1xf32> to vector<4x32xf32>
    %577 = arith.subf %571, %576 : vector<4x32xf32>
    %578 = arith.mulf %577, %577 : vector<4x32xf32>
    %cst_244 = arith.constant dense<0.000000e+00> : vector<4xf32>
    %579 = vector.multi_reduction <add>, %578, %cst_244 [1] : vector<4x32xf32> to vector<4xf32>
    %580 = vector.shape_cast %579 : vector<4xf32> to vector<4x1xf32>
    %cst_245 = arith.constant 3.200000e+01 : f32
    %581 = vector.broadcast %cst_245 : f32 to vector<4x1xf32>
    %582 = arith.divf %580, %581 : vector<4x1xf32>
    %583 = vector.broadcast %575 : vector<4x1xf32> to vector<4x32xf32>
    %584 = arith.subf %571, %583 : vector<4x32xf32>
    %cst_246 = arith.constant 9.99999974E-6 : f32
    %585 = vector.broadcast %cst_246 : f32 to vector<4x1xf32>
    %586 = arith.addf %582, %585 : vector<4x1xf32>
    %587 = math.rsqrt %586 : vector<4x1xf32>
    %588 = vector.broadcast %587 : vector<4x1xf32> to vector<4x32xf32>
    %589 = arith.mulf %584, %588 : vector<4x32xf32>
    %590 = vector.broadcast %453 : vector<1x32xf32> to vector<4x32xf32>
    %591 = arith.mulf %589, %590 : vector<4x32xf32>
    %592 = vector.broadcast %454 : vector<1x32xf32> to vector<4x32xf32>
    %593 = arith.addf %591, %592 : vector<4x32xf32>
    %c0_247 = arith.constant 0 : index
    %c0_248 = arith.constant 0 : index
    %594 = vector.load %arg58[%c0_247, %c0_248] : memref<2x4xf32, #tpu.memory_space<vmem>>, vector<2x4xf32>
    %c0_249 = arith.constant 0 : index
    %c0_250 = arith.constant 0 : index
    %595 = vector.load %arg59[%c0_249, %c0_250] : memref<32x64xf32, #tpu.memory_space<vmem>>, vector<32x64xf32>
    %c0_251 = arith.constant 0 : index
    %c0_252 = arith.constant 0 : index
    %596 = vector.load %arg60[%c0_251, %c0_252] : memref<1x64xf32, #tpu.memory_space<vmem>>, vector<1x64xf32>
    %c0_253 = arith.constant 0 : index
    %c0_254 = arith.constant 0 : index
    %597 = vector.load %arg61[%c0_253, %c0_254] : memref<1x64xf32, #tpu.memory_space<vmem>>, vector<1x64xf32>
    %c0_255 = arith.constant 0 : index
    %c0_256 = arith.constant 0 : index
    %598 = vector.load %arg62[%c0_255, %c0_256] : memref<1x64xf32, #tpu.memory_space<vmem>>, vector<1x64xf32>
    %cst_257 = arith.constant dense<0.000000e+00> : vector<2x32xf32>
    %599 = tpu.matmul %594, %593, %cst_257 {dimension_numbers = #tpu.dot_dimension_numbers<[1], [0], [0], [1], [0, 0, 1, 1], [], []>} : vector<2x4xf32>, vector<4x32xf32>, vector<2x32xf32> -> vector<2x32xf32>
    %cst_258 = arith.constant dense<0.000000e+00> : vector<2x64xf32>
    %600 = tpu.matmul %599, %595, %cst_258 {dimension_numbers = #tpu.dot_dimension_numbers<[1], [0], [0], [1], [0, 0, 1, 1], [], []>} : vector<2x32xf32>, vector<32x64xf32>, vector<2x64xf32> -> vector<2x64xf32>
    %601 = vector.broadcast %596 : vector<1x64xf32> to vector<2x64xf32>
    %602 = arith.addf %600, %601 : vector<2x64xf32>
    %cst_259 = arith.constant dense<0.000000e+00> : vector<2xf32>
    %603 = vector.multi_reduction <add>, %602, %cst_259 [1] : vector<2x64xf32> to vector<2xf32>
    %604 = vector.shape_cast %603 : vector<2xf32> to vector<2x1xf32>
    %cst_260 = arith.constant 6.400000e+01 : f32
    %605 = vector.broadcast %cst_260 : f32 to vector<2x1xf32>
    %606 = arith.divf %604, %605 : vector<2x1xf32>
    %607 = vector.broadcast %606 : vector<2x1xf32> to vector<2x64xf32>
    %608 = arith.subf %602, %607 : vector<2x64xf32>
    %609 = arith.mulf %608, %608 : vector<2x64xf32>
    %cst_261 = arith.constant dense<0.000000e+00> : vector<2xf32>
    %610 = vector.multi_reduction <add>, %609, %cst_261 [1] : vector<2x64xf32> to vector<2xf32>
    %611 = vector.shape_cast %610 : vector<2xf32> to vector<2x1xf32>
    %cst_262 = arith.constant 6.400000e+01 : f32
    %612 = vector.broadcast %cst_262 : f32 to vector<2x1xf32>
    %613 = arith.divf %611, %612 : vector<2x1xf32>
    %614 = vector.broadcast %606 : vector<2x1xf32> to vector<2x64xf32>
    %615 = arith.subf %602, %614 : vector<2x64xf32>
    %cst_263 = arith.constant 9.99999974E-6 : f32
    %616 = vector.broadcast %cst_263 : f32 to vector<2x1xf32>
    %617 = arith.addf %613, %616 : vector<2x1xf32>
    %618 = math.rsqrt %617 : vector<2x1xf32>
    %619 = vector.broadcast %618 : vector<2x1xf32> to vector<2x64xf32>
    %620 = arith.mulf %615, %619 : vector<2x64xf32>
    %621 = vector.broadcast %597 : vector<1x64xf32> to vector<2x64xf32>
    %622 = arith.mulf %620, %621 : vector<2x64xf32>
    %623 = vector.broadcast %598 : vector<1x64xf32> to vector<2x64xf32>
    %624 = arith.addf %622, %623 : vector<2x64xf32>
    %c0_264 = arith.constant 0 : index
    %c0_265 = arith.constant 0 : index
    %625 = vector.load %arg63[%c0_264, %c0_265] : memref<1x64xf32, #tpu.memory_space<vmem>>, vector<1x64xf32>
    %c0_266 = arith.constant 0 : index
    %c0_267 = arith.constant 0 : index
    %626 = vector.load %arg64[%c0_266, %c0_267] : memref<1x64xf32, #tpu.memory_space<vmem>>, vector<1x64xf32>
    %cst_268 = arith.constant dense<0.000000e+00> : vector<2xf32>
    %627 = vector.multi_reduction <add>, %624, %cst_268 [1] : vector<2x64xf32> to vector<2xf32>
    %628 = vector.shape_cast %627 : vector<2xf32> to vector<2x1xf32>
    %cst_269 = arith.constant 6.400000e+01 : f32
    %629 = vector.broadcast %cst_269 : f32 to vector<2x1xf32>
    %630 = arith.divf %628, %629 : vector<2x1xf32>
    %631 = vector.broadcast %630 : vector<2x1xf32> to vector<2x64xf32>
    %632 = arith.subf %624, %631 : vector<2x64xf32>
    %633 = arith.mulf %632, %632 : vector<2x64xf32>
    %cst_270 = arith.constant dense<0.000000e+00> : vector<2xf32>
    %634 = vector.multi_reduction <add>, %633, %cst_270 [1] : vector<2x64xf32> to vector<2xf32>
    %635 = vector.shape_cast %634 : vector<2xf32> to vector<2x1xf32>
    %cst_271 = arith.constant 6.400000e+01 : f32
    %636 = vector.broadcast %cst_271 : f32 to vector<2x1xf32>
    %637 = arith.divf %635, %636 : vector<2x1xf32>
    %638 = vector.broadcast %630 : vector<2x1xf32> to vector<2x64xf32>
    %639 = arith.subf %624, %638 : vector<2x64xf32>
    %cst_272 = arith.constant 9.99999974E-6 : f32
    %640 = vector.broadcast %cst_272 : f32 to vector<2x1xf32>
    %641 = arith.addf %637, %640 : vector<2x1xf32>
    %642 = math.rsqrt %641 : vector<2x1xf32>
    %643 = vector.broadcast %642 : vector<2x1xf32> to vector<2x64xf32>
    %644 = arith.mulf %639, %643 : vector<2x64xf32>
    %645 = vector.broadcast %625 : vector<1x64xf32> to vector<2x64xf32>
    %646 = arith.mulf %644, %645 : vector<2x64xf32>
    %647 = vector.broadcast %626 : vector<1x64xf32> to vector<2x64xf32>
    %648 = arith.addf %646, %647 : vector<2x64xf32>
    %c0_273 = arith.constant 0 : index
    %c0_274 = arith.constant 0 : index
    %649 = vector.load %arg65[%c0_273, %c0_274] : memref<64x192xf32, #tpu.memory_space<vmem>>, vector<64x192xf32>
    %c0_275 = arith.constant 0 : index
    %c0_276 = arith.constant 0 : index
    %650 = vector.load %arg66[%c0_275, %c0_276] : memref<1x192xf32, #tpu.memory_space<vmem>>, vector<1x192xf32>
    %c0_277 = arith.constant 0 : index
    %c0_278 = arith.constant 0 : index
    %651 = vector.load %arg67[%c0_277, %c0_278] : memref<64x64xf32, #tpu.memory_space<vmem>>, vector<64x64xf32>
    %c0_279 = arith.constant 0 : index
    %c0_280 = arith.constant 0 : index
    %652 = vector.load %arg68[%c0_279, %c0_280] : memref<1x64xf32, #tpu.memory_space<vmem>>, vector<1x64xf32>
    %c0_281 = arith.constant 0 : index
    %c0_282 = arith.constant 0 : index
    %653 = vector.load %arg69[%c0_281, %c0_282] : memref<1x64xf32, #tpu.memory_space<vmem>>, vector<1x64xf32>
    %c0_283 = arith.constant 0 : index
    %c0_284 = arith.constant 0 : index
    %654 = vector.load %arg70[%c0_283, %c0_284] : memref<1x64xf32, #tpu.memory_space<vmem>>, vector<1x64xf32>
    %c0_285 = arith.constant 0 : index
    %c0_286 = arith.constant 0 : index
    %655 = vector.load %arg71[%c0_285, %c0_286] : memref<64x128xf32, #tpu.memory_space<vmem>>, vector<64x128xf32>
    %c0_287 = arith.constant 0 : index
    %c0_288 = arith.constant 0 : index
    %656 = vector.load %arg72[%c0_287, %c0_288] : memref<1x128xf32, #tpu.memory_space<vmem>>, vector<1x128xf32>
    %c0_289 = arith.constant 0 : index
    %c0_290 = arith.constant 0 : index
    %657 = vector.load %arg73[%c0_289, %c0_290] : memref<128x64xf32, #tpu.memory_space<vmem>>, vector<128x64xf32>
    %c0_291 = arith.constant 0 : index
    %c0_292 = arith.constant 0 : index
    %658 = vector.load %arg74[%c0_291, %c0_292] : memref<1x64xf32, #tpu.memory_space<vmem>>, vector<1x64xf32>
    %c0_293 = arith.constant 0 : index
    %c0_294 = arith.constant 0 : index
    %659 = vector.load %arg75[%c0_293, %c0_294] : memref<1x64xf32, #tpu.memory_space<vmem>>, vector<1x64xf32>
    %c0_295 = arith.constant 0 : index
    %c0_296 = arith.constant 0 : index
    %660 = vector.load %arg76[%c0_295, %c0_296] : memref<1x64xf32, #tpu.memory_space<vmem>>, vector<1x64xf32>
    %cst_297 = arith.constant dense<0.000000e+00> : vector<2x192xf32>
    %661 = tpu.matmul %648, %649, %cst_297 {dimension_numbers = #tpu.dot_dimension_numbers<[1], [0], [0], [1], [0, 0, 1, 1], [], []>} : vector<2x64xf32>, vector<64x192xf32>, vector<2x192xf32> -> vector<2x192xf32>
    %662 = vector.broadcast %650 : vector<1x192xf32> to vector<2x192xf32>
    %663 = arith.addf %661, %662 : vector<2x192xf32>
    %664 = vector.extract_strided_slice %663 {offsets = [0, 0], sizes = [2, 64], strides = [1, 1]} : vector<2x192xf32> to vector<2x64xf32>
    %665 = vector.extract_strided_slice %663 {offsets = [0, 64], sizes = [2, 64], strides = [1, 1]} : vector<2x192xf32> to vector<2x64xf32>
    %666 = vector.extract_strided_slice %663 {offsets = [0, 128], sizes = [2, 64], strides = [1, 1]} : vector<2x192xf32> to vector<2x64xf32>
    %cst_298 = arith.constant 0.000000e+00 : f32
    %667 = vector.broadcast %cst_298 : f32 to vector<2x64xf32>
    %668 = vector.extract_strided_slice %664 {offsets = [0, 0], sizes = [2, 16], strides = [1, 1]} : vector<2x64xf32> to vector<2x16xf32>
    %669 = vector.extract_strided_slice %665 {offsets = [0, 0], sizes = [2, 16], strides = [1, 1]} : vector<2x64xf32> to vector<2x16xf32>
    %670 = vector.extract_strided_slice %666 {offsets = [0, 0], sizes = [2, 16], strides = [1, 1]} : vector<2x64xf32> to vector<2x16xf32>
    %cst_299 = arith.constant dense<0.000000e+00> : vector<2x2xf32>
    %671 = tpu.matmul %668, %669, %cst_299 {dimension_numbers = #tpu.dot_dimension_numbers<[1], [1], [0], [0], [0, 0, 1, 0], [], []>} : vector<2x16xf32>, vector<2x16xf32>, vector<2x2xf32> -> vector<2x2xf32>
    %cst_300 = arith.constant dense<0xFF800000> : vector<2xf32>
    %672 = vector.multi_reduction <maximumf>, %671, %cst_300 [1] : vector<2x2xf32> to vector<2xf32>
    %673 = vector.shape_cast %672 : vector<2xf32> to vector<2x1xf32>
    %674 = vector.broadcast %673 : vector<2x1xf32> to vector<2x2xf32>
    %675 = arith.subf %671, %674 : vector<2x2xf32>
    %676 = math.exp %675 : vector<2x2xf32>
    %cst_301 = arith.constant dense<0.000000e+00> : vector<2xf32>
    %677 = vector.multi_reduction <add>, %676, %cst_301 [1] : vector<2x2xf32> to vector<2xf32>
    %678 = vector.shape_cast %677 : vector<2xf32> to vector<2x1xf32>
    %679 = tpu.reciprocal %678 {approx = true} : vector<2x1xf32> -> vector<2x1xf32>
    %680 = vector.broadcast %679 : vector<2x1xf32> to vector<2x2xf32>
    %681 = arith.mulf %676, %680 : vector<2x2xf32>
    %cst_302 = arith.constant dense<0.000000e+00> : vector<2x16xf32>
    %682 = tpu.matmul %681, %670, %cst_302 {dimension_numbers = #tpu.dot_dimension_numbers<[1], [0], [0], [1], [0, 0, 1, 1], [], []>} : vector<2x2xf32>, vector<2x16xf32>, vector<2x16xf32> -> vector<2x16xf32>
    %683 = vector.extract_strided_slice %651 {offsets = [0, 0], sizes = [16, 64], strides = [1, 1]} : vector<64x64xf32> to vector<16x64xf32>
    %cst_303 = arith.constant dense<0.000000e+00> : vector<2x64xf32>
    %684 = tpu.matmul %682, %683, %cst_303 {dimension_numbers = #tpu.dot_dimension_numbers<[1], [0], [0], [1], [0, 0, 1, 1], [], []>} : vector<2x16xf32>, vector<16x64xf32>, vector<2x64xf32> -> vector<2x64xf32>
    %685 = arith.addf %667, %684 : vector<2x64xf32>
    %686 = vector.extract_strided_slice %664 {offsets = [0, 16], sizes = [2, 16], strides = [1, 1]} : vector<2x64xf32> to vector<2x16xf32>
    %687 = vector.extract_strided_slice %665 {offsets = [0, 16], sizes = [2, 16], strides = [1, 1]} : vector<2x64xf32> to vector<2x16xf32>
    %688 = vector.extract_strided_slice %666 {offsets = [0, 16], sizes = [2, 16], strides = [1, 1]} : vector<2x64xf32> to vector<2x16xf32>
    %cst_304 = arith.constant dense<0.000000e+00> : vector<2x2xf32>
    %689 = tpu.matmul %686, %687, %cst_304 {dimension_numbers = #tpu.dot_dimension_numbers<[1], [1], [0], [0], [0, 0, 1, 0], [], []>} : vector<2x16xf32>, vector<2x16xf32>, vector<2x2xf32> -> vector<2x2xf32>
    %cst_305 = arith.constant dense<0xFF800000> : vector<2xf32>
    %690 = vector.multi_reduction <maximumf>, %689, %cst_305 [1] : vector<2x2xf32> to vector<2xf32>
    %691 = vector.shape_cast %690 : vector<2xf32> to vector<2x1xf32>
    %692 = vector.broadcast %691 : vector<2x1xf32> to vector<2x2xf32>
    %693 = arith.subf %689, %692 : vector<2x2xf32>
    %694 = math.exp %693 : vector<2x2xf32>
    %cst_306 = arith.constant dense<0.000000e+00> : vector<2xf32>
    %695 = vector.multi_reduction <add>, %694, %cst_306 [1] : vector<2x2xf32> to vector<2xf32>
    %696 = vector.shape_cast %695 : vector<2xf32> to vector<2x1xf32>
    %697 = tpu.reciprocal %696 {approx = true} : vector<2x1xf32> -> vector<2x1xf32>
    %698 = vector.broadcast %697 : vector<2x1xf32> to vector<2x2xf32>
    %699 = arith.mulf %694, %698 : vector<2x2xf32>
    %cst_307 = arith.constant dense<0.000000e+00> : vector<2x16xf32>
    %700 = tpu.matmul %699, %688, %cst_307 {dimension_numbers = #tpu.dot_dimension_numbers<[1], [0], [0], [1], [0, 0, 1, 1], [], []>} : vector<2x2xf32>, vector<2x16xf32>, vector<2x16xf32> -> vector<2x16xf32>
    %701 = vector.extract_strided_slice %651 {offsets = [16, 0], sizes = [16, 64], strides = [1, 1]} : vector<64x64xf32> to vector<16x64xf32>
    %cst_308 = arith.constant dense<0.000000e+00> : vector<2x64xf32>
    %702 = tpu.matmul %700, %701, %cst_308 {dimension_numbers = #tpu.dot_dimension_numbers<[1], [0], [0], [1], [0, 0, 1, 1], [], []>} : vector<2x16xf32>, vector<16x64xf32>, vector<2x64xf32> -> vector<2x64xf32>
    %703 = arith.addf %685, %702 : vector<2x64xf32>
    %704 = vector.extract_strided_slice %664 {offsets = [0, 32], sizes = [2, 16], strides = [1, 1]} : vector<2x64xf32> to vector<2x16xf32>
    %705 = vector.extract_strided_slice %665 {offsets = [0, 32], sizes = [2, 16], strides = [1, 1]} : vector<2x64xf32> to vector<2x16xf32>
    %706 = vector.extract_strided_slice %666 {offsets = [0, 32], sizes = [2, 16], strides = [1, 1]} : vector<2x64xf32> to vector<2x16xf32>
    %cst_309 = arith.constant dense<0.000000e+00> : vector<2x2xf32>
    %707 = tpu.matmul %704, %705, %cst_309 {dimension_numbers = #tpu.dot_dimension_numbers<[1], [1], [0], [0], [0, 0, 1, 0], [], []>} : vector<2x16xf32>, vector<2x16xf32>, vector<2x2xf32> -> vector<2x2xf32>
    %cst_310 = arith.constant dense<0xFF800000> : vector<2xf32>
    %708 = vector.multi_reduction <maximumf>, %707, %cst_310 [1] : vector<2x2xf32> to vector<2xf32>
    %709 = vector.shape_cast %708 : vector<2xf32> to vector<2x1xf32>
    %710 = vector.broadcast %709 : vector<2x1xf32> to vector<2x2xf32>
    %711 = arith.subf %707, %710 : vector<2x2xf32>
    %712 = math.exp %711 : vector<2x2xf32>
    %cst_311 = arith.constant dense<0.000000e+00> : vector<2xf32>
    %713 = vector.multi_reduction <add>, %712, %cst_311 [1] : vector<2x2xf32> to vector<2xf32>
    %714 = vector.shape_cast %713 : vector<2xf32> to vector<2x1xf32>
    %715 = tpu.reciprocal %714 {approx = true} : vector<2x1xf32> -> vector<2x1xf32>
    %716 = vector.broadcast %715 : vector<2x1xf32> to vector<2x2xf32>
    %717 = arith.mulf %712, %716 : vector<2x2xf32>
    %cst_312 = arith.constant dense<0.000000e+00> : vector<2x16xf32>
    %718 = tpu.matmul %717, %706, %cst_312 {dimension_numbers = #tpu.dot_dimension_numbers<[1], [0], [0], [1], [0, 0, 1, 1], [], []>} : vector<2x2xf32>, vector<2x16xf32>, vector<2x16xf32> -> vector<2x16xf32>
    %719 = vector.extract_strided_slice %651 {offsets = [32, 0], sizes = [16, 64], strides = [1, 1]} : vector<64x64xf32> to vector<16x64xf32>
    %cst_313 = arith.constant dense<0.000000e+00> : vector<2x64xf32>
    %720 = tpu.matmul %718, %719, %cst_313 {dimension_numbers = #tpu.dot_dimension_numbers<[1], [0], [0], [1], [0, 0, 1, 1], [], []>} : vector<2x16xf32>, vector<16x64xf32>, vector<2x64xf32> -> vector<2x64xf32>
    %721 = arith.addf %703, %720 : vector<2x64xf32>
    %722 = vector.extract_strided_slice %664 {offsets = [0, 48], sizes = [2, 16], strides = [1, 1]} : vector<2x64xf32> to vector<2x16xf32>
    %723 = vector.extract_strided_slice %665 {offsets = [0, 48], sizes = [2, 16], strides = [1, 1]} : vector<2x64xf32> to vector<2x16xf32>
    %724 = vector.extract_strided_slice %666 {offsets = [0, 48], sizes = [2, 16], strides = [1, 1]} : vector<2x64xf32> to vector<2x16xf32>
    %cst_314 = arith.constant dense<0.000000e+00> : vector<2x2xf32>
    %725 = tpu.matmul %722, %723, %cst_314 {dimension_numbers = #tpu.dot_dimension_numbers<[1], [1], [0], [0], [0, 0, 1, 0], [], []>} : vector<2x16xf32>, vector<2x16xf32>, vector<2x2xf32> -> vector<2x2xf32>
    %cst_315 = arith.constant dense<0xFF800000> : vector<2xf32>
    %726 = vector.multi_reduction <maximumf>, %725, %cst_315 [1] : vector<2x2xf32> to vector<2xf32>
    %727 = vector.shape_cast %726 : vector<2xf32> to vector<2x1xf32>
    %728 = vector.broadcast %727 : vector<2x1xf32> to vector<2x2xf32>
    %729 = arith.subf %725, %728 : vector<2x2xf32>
    %730 = math.exp %729 : vector<2x2xf32>
    %cst_316 = arith.constant dense<0.000000e+00> : vector<2xf32>
    %731 = vector.multi_reduction <add>, %730, %cst_316 [1] : vector<2x2xf32> to vector<2xf32>
    %732 = vector.shape_cast %731 : vector<2xf32> to vector<2x1xf32>
    %733 = tpu.reciprocal %732 {approx = true} : vector<2x1xf32> -> vector<2x1xf32>
    %734 = vector.broadcast %733 : vector<2x1xf32> to vector<2x2xf32>
    %735 = arith.mulf %730, %734 : vector<2x2xf32>
    %cst_317 = arith.constant dense<0.000000e+00> : vector<2x16xf32>
    %736 = tpu.matmul %735, %724, %cst_317 {dimension_numbers = #tpu.dot_dimension_numbers<[1], [0], [0], [1], [0, 0, 1, 1], [], []>} : vector<2x2xf32>, vector<2x16xf32>, vector<2x16xf32> -> vector<2x16xf32>
    %737 = vector.extract_strided_slice %651 {offsets = [48, 0], sizes = [16, 64], strides = [1, 1]} : vector<64x64xf32> to vector<16x64xf32>
    %cst_318 = arith.constant dense<0.000000e+00> : vector<2x64xf32>
    %738 = tpu.matmul %736, %737, %cst_318 {dimension_numbers = #tpu.dot_dimension_numbers<[1], [0], [0], [1], [0, 0, 1, 1], [], []>} : vector<2x16xf32>, vector<16x64xf32>, vector<2x64xf32> -> vector<2x64xf32>
    %739 = arith.addf %721, %738 : vector<2x64xf32>
    %740 = vector.broadcast %652 : vector<1x64xf32> to vector<2x64xf32>
    %741 = arith.addf %739, %740 : vector<2x64xf32>
    %742 = arith.addf %741, %648 : vector<2x64xf32>
    %cst_319 = arith.constant dense<0.000000e+00> : vector<2xf32>
    %743 = vector.multi_reduction <add>, %742, %cst_319 [1] : vector<2x64xf32> to vector<2xf32>
    %744 = vector.shape_cast %743 : vector<2xf32> to vector<2x1xf32>
    %cst_320 = arith.constant 6.400000e+01 : f32
    %745 = vector.broadcast %cst_320 : f32 to vector<2x1xf32>
    %746 = arith.divf %744, %745 : vector<2x1xf32>
    %747 = vector.broadcast %746 : vector<2x1xf32> to vector<2x64xf32>
    %748 = arith.subf %742, %747 : vector<2x64xf32>
    %749 = arith.mulf %748, %748 : vector<2x64xf32>
    %cst_321 = arith.constant dense<0.000000e+00> : vector<2xf32>
    %750 = vector.multi_reduction <add>, %749, %cst_321 [1] : vector<2x64xf32> to vector<2xf32>
    %751 = vector.shape_cast %750 : vector<2xf32> to vector<2x1xf32>
    %cst_322 = arith.constant 6.400000e+01 : f32
    %752 = vector.broadcast %cst_322 : f32 to vector<2x1xf32>
    %753 = arith.divf %751, %752 : vector<2x1xf32>
    %754 = vector.broadcast %746 : vector<2x1xf32> to vector<2x64xf32>
    %755 = arith.subf %742, %754 : vector<2x64xf32>
    %cst_323 = arith.constant 9.99999974E-6 : f32
    %756 = vector.broadcast %cst_323 : f32 to vector<2x1xf32>
    %757 = arith.addf %753, %756 : vector<2x1xf32>
    %758 = math.rsqrt %757 : vector<2x1xf32>
    %759 = vector.broadcast %758 : vector<2x1xf32> to vector<2x64xf32>
    %760 = arith.mulf %755, %759 : vector<2x64xf32>
    %761 = vector.broadcast %653 : vector<1x64xf32> to vector<2x64xf32>
    %762 = arith.mulf %760, %761 : vector<2x64xf32>
    %763 = vector.broadcast %654 : vector<1x64xf32> to vector<2x64xf32>
    %764 = arith.addf %762, %763 : vector<2x64xf32>
    %cst_324 = arith.constant dense<0.000000e+00> : vector<2x128xf32>
    %765 = tpu.matmul %764, %655, %cst_324 {dimension_numbers = #tpu.dot_dimension_numbers<[1], [0], [0], [1], [0, 0, 1, 1], [], []>} : vector<2x64xf32>, vector<64x128xf32>, vector<2x128xf32> -> vector<2x128xf32>
    %766 = vector.broadcast %656 : vector<1x128xf32> to vector<2x128xf32>
    %767 = arith.addf %765, %766 : vector<2x128xf32>
    %cst_325 = arith.constant 0.000000e+00 : f32
    %768 = vector.broadcast %cst_325 : f32 to vector<2x128xf32>
    %769 = arith.maximumf %767, %768 : vector<2x128xf32>
    %cst_326 = arith.constant dense<0.000000e+00> : vector<2x64xf32>
    %770 = tpu.matmul %769, %657, %cst_326 {dimension_numbers = #tpu.dot_dimension_numbers<[1], [0], [0], [1], [0, 0, 1, 1], [], []>} : vector<2x128xf32>, vector<128x64xf32>, vector<2x64xf32> -> vector<2x64xf32>
    %771 = vector.broadcast %658 : vector<1x64xf32> to vector<2x64xf32>
    %772 = arith.addf %770, %771 : vector<2x64xf32>
    %773 = arith.addf %772, %764 : vector<2x64xf32>
    %cst_327 = arith.constant dense<0.000000e+00> : vector<2xf32>
    %774 = vector.multi_reduction <add>, %773, %cst_327 [1] : vector<2x64xf32> to vector<2xf32>
    %775 = vector.shape_cast %774 : vector<2xf32> to vector<2x1xf32>
    %cst_328 = arith.constant 6.400000e+01 : f32
    %776 = vector.broadcast %cst_328 : f32 to vector<2x1xf32>
    %777 = arith.divf %775, %776 : vector<2x1xf32>
    %778 = vector.broadcast %777 : vector<2x1xf32> to vector<2x64xf32>
    %779 = arith.subf %773, %778 : vector<2x64xf32>
    %780 = arith.mulf %779, %779 : vector<2x64xf32>
    %cst_329 = arith.constant dense<0.000000e+00> : vector<2xf32>
    %781 = vector.multi_reduction <add>, %780, %cst_329 [1] : vector<2x64xf32> to vector<2xf32>
    %782 = vector.shape_cast %781 : vector<2xf32> to vector<2x1xf32>
    %cst_330 = arith.constant 6.400000e+01 : f32
    %783 = vector.broadcast %cst_330 : f32 to vector<2x1xf32>
    %784 = arith.divf %782, %783 : vector<2x1xf32>
    %785 = vector.broadcast %777 : vector<2x1xf32> to vector<2x64xf32>
    %786 = arith.subf %773, %785 : vector<2x64xf32>
    %cst_331 = arith.constant 9.99999974E-6 : f32
    %787 = vector.broadcast %cst_331 : f32 to vector<2x1xf32>
    %788 = arith.addf %784, %787 : vector<2x1xf32>
    %789 = math.rsqrt %788 : vector<2x1xf32>
    %790 = vector.broadcast %789 : vector<2x1xf32> to vector<2x64xf32>
    %791 = arith.mulf %786, %790 : vector<2x64xf32>
    %792 = vector.broadcast %659 : vector<1x64xf32> to vector<2x64xf32>
    %793 = arith.mulf %791, %792 : vector<2x64xf32>
    %794 = vector.broadcast %660 : vector<1x64xf32> to vector<2x64xf32>
    %795 = arith.addf %793, %794 : vector<2x64xf32>
    %c0_332 = arith.constant 0 : index
    %c0_333 = arith.constant 0 : index
    %796 = vector.load %arg77[%c0_332, %c0_333] : memref<64x32xf32, #tpu.memory_space<vmem>>, vector<64x32xf32>
    %c0_334 = arith.constant 0 : index
    %c0_335 = arith.constant 0 : index
    %797 = vector.load %arg78[%c0_334, %c0_335] : memref<1x32xf32, #tpu.memory_space<vmem>>, vector<1x32xf32>
    %c0_336 = arith.constant 0 : index
    %c0_337 = arith.constant 0 : index
    %798 = vector.load %arg79[%c0_336, %c0_337] : memref<32x16xf32, #tpu.memory_space<vmem>>, vector<32x16xf32>
    %c0_338 = arith.constant 0 : index
    %c0_339 = arith.constant 0 : index
    %799 = vector.load %arg80[%c0_338, %c0_339] : memref<1x16xf32, #tpu.memory_space<vmem>>, vector<1x16xf32>
    %c0_340 = arith.constant 0 : index
    %c0_341 = arith.constant 0 : index
    %800 = vector.load %arg81[%c0_340, %c0_341] : memref<16x4xf32, #tpu.memory_space<vmem>>, vector<16x4xf32>
    %c0_342 = arith.constant 0 : index
    %c0_343 = arith.constant 0 : index
    %801 = vector.load %arg82[%c0_342, %c0_343] : memref<1x4xf32, #tpu.memory_space<vmem>>, vector<1x4xf32>
    %cst_344 = arith.constant dense<0.000000e+00> : vector<64xf32>
    %802 = vector.multi_reduction <add>, %795, %cst_344 [0] : vector<2x64xf32> to vector<64xf32>
    %803 = vector.shape_cast %802 : vector<64xf32> to vector<1x64xf32>
    %cst_345 = arith.constant 2.000000e+00 : f32
    %804 = vector.broadcast %cst_345 : f32 to vector<1x64xf32>
    %805 = arith.divf %803, %804 : vector<1x64xf32>
    %cst_346 = arith.constant dense<0.000000e+00> : vector<1x32xf32>
    %806 = tpu.matmul %805, %796, %cst_346 {dimension_numbers = #tpu.dot_dimension_numbers<[1], [0], [0], [1], [0, 0, 1, 1], [], []>} : vector<1x64xf32>, vector<64x32xf32>, vector<1x32xf32> -> vector<1x32xf32>
    %807 = arith.addf %806, %797 : vector<1x32xf32>
    %cst_347 = arith.constant 0.000000e+00 : f32
    %808 = vector.broadcast %cst_347 : f32 to vector<1x32xf32>
    %809 = arith.maximumf %807, %808 : vector<1x32xf32>
    %cst_348 = arith.constant dense<0.000000e+00> : vector<1x16xf32>
    %810 = tpu.matmul %809, %798, %cst_348 {dimension_numbers = #tpu.dot_dimension_numbers<[1], [0], [0], [1], [0, 0, 1, 1], [], []>} : vector<1x32xf32>, vector<32x16xf32>, vector<1x16xf32> -> vector<1x16xf32>
    %811 = arith.addf %810, %799 : vector<1x16xf32>
    %cst_349 = arith.constant 0.000000e+00 : f32
    %812 = vector.broadcast %cst_349 : f32 to vector<1x16xf32>
    %813 = arith.maximumf %811, %812 : vector<1x16xf32>
    %cst_350 = arith.constant dense<0.000000e+00> : vector<1x4xf32>
    %814 = tpu.matmul %813, %800, %cst_350 {dimension_numbers = #tpu.dot_dimension_numbers<[1], [0], [0], [1], [0, 0, 1, 1], [], []>} : vector<1x16xf32>, vector<16x4xf32>, vector<1x4xf32> -> vector<1x4xf32>
    %815 = arith.addf %814, %801 : vector<1x4xf32>
    %c0_351 = arith.constant 0 : index
    %c0_352 = arith.constant 0 : index
    %c0_353 = arith.constant 0 : index
    %816 = vector.load %arg83[%c0_351, %c0_352, %c0_353] : memref<1x1x4xf32, #tpu.memory_space<vmem>>, vector<1x1x4xf32>
    %817 = vector.shape_cast %816 : vector<1x1x4xf32> to vector<1x4xf32>
    %818 = vector.shape_cast %815 : vector<1x4xf32> to vector<1x1x4xf32>
    tpu.vector_store %arg83[%c0_351, %c0_352, %c0_353], %818 {strides = array<i32>} : memref<1x1x4xf32, #tpu.memory_space<vmem>>, vector<1x1x4xf32>,
    return
  }
  func.func @transform_0(%arg0: i32) -> (i32, i32, i32) {
    %c0_i32 = arith.constant 0 : i32
    %c0_i32_0 = arith.constant 0 : i32
    %c0_i32_1 = arith.constant 0 : i32
    return %arg0, %c0_i32, %c0_i32_0 : i32, i32, i32
  }
  func.func @transform_1(%arg0: i32) -> (i32, i32) {
    %c0_i32 = arith.constant 0 : i32
    %c0_i32_0 = arith.constant 0 : i32
    %c0_i32_1 = arith.constant 0 : i32
    return %c0_i32, %c0_i32_0 : i32, i32
  }
  func.func @transform_2(%arg0: i32) -> (i32, i32) {
    %c0_i32 = arith.constant 0 : i32
    %c0_i32_0 = arith.constant 0 : i32
    %c0_i32_1 = arith.constant 0 : i32
    return %c0_i32, %c0_i32_0 : i32, i32
  }
  func.func @transform_3(%arg0: i32) -> (i32, i32) {
    %c0_i32 = arith.constant 0 : i32
    %c0_i32_0 = arith.constant 0 : i32
    %c0_i32_1 = arith.constant 0 : i32
    return %c0_i32, %c0_i32_0 : i32, i32
  }
  func.func @transform_4(%arg0: i32) -> (i32, i32) {
    %c0_i32 = arith.constant 0 : i32
    %c0_i32_0 = arith.constant 0 : i32
    %c0_i32_1 = arith.constant 0 : i32
    return %c0_i32, %c0_i32_0 : i32, i32
  }
  func.func @transform_5(%arg0: i32) -> (i32, i32) {
    %c0_i32 = arith.constant 0 : i32
    %c0_i32_0 = arith.constant 0 : i32
    %c0_i32_1 = arith.constant 0 : i32
    return %c0_i32, %c0_i32_0 : i32, i32
  }
  func.func @transform_6(%arg0: i32) -> (i32, i32) {
    %c0_i32 = arith.constant 0 : i32
    %c0_i32_0 = arith.constant 0 : i32
    %c0_i32_1 = arith.constant 0 : i32
    return %c0_i32, %c0_i32_0 : i32, i32
  }
  func.func @transform_7(%arg0: i32) -> (i32, i32) {
    %c0_i32 = arith.constant 0 : i32
    %c0_i32_0 = arith.constant 0 : i32
    %c0_i32_1 = arith.constant 0 : i32
    return %c0_i32, %c0_i32_0 : i32, i32
  }
  func.func @transform_8(%arg0: i32) -> (i32, i32) {
    %c0_i32 = arith.constant 0 : i32
    %c0_i32_0 = arith.constant 0 : i32
    %c0_i32_1 = arith.constant 0 : i32
    return %c0_i32, %c0_i32_0 : i32, i32
  }
  func.func @transform_9(%arg0: i32) -> (i32, i32) {
    %c0_i32 = arith.constant 0 : i32
    %c0_i32_0 = arith.constant 0 : i32
    %c0_i32_1 = arith.constant 0 : i32
    return %c0_i32, %c0_i32_0 : i32, i32
  }
  func.func @transform_10(%arg0: i32) -> (i32, i32) {
    %c0_i32 = arith.constant 0 : i32
    %c0_i32_0 = arith.constant 0 : i32
    %c0_i32_1 = arith.constant 0 : i32
    return %c0_i32, %c0_i32_0 : i32, i32
  }
  func.func @transform_11(%arg0: i32) -> (i32, i32) {
    %c0_i32 = arith.constant 0 : i32
    %c0_i32_0 = arith.constant 0 : i32
    %c0_i32_1 = arith.constant 0 : i32
    return %c0_i32, %c0_i32_0 : i32, i32
  }
  func.func @transform_12(%arg0: i32) -> (i32, i32) {
    %c0_i32 = arith.constant 0 : i32
    %c0_i32_0 = arith.constant 0 : i32
    %c0_i32_1 = arith.constant 0 : i32
    return %c0_i32, %c0_i32_0 : i32, i32
  }
  func.func @transform_13(%arg0: i32) -> (i32, i32) {
    %c0_i32 = arith.constant 0 : i32
    %c0_i32_0 = arith.constant 0 : i32
    %c0_i32_1 = arith.constant 0 : i32
    return %c0_i32, %c0_i32_0 : i32, i32
  }
  func.func @transform_14(%arg0: i32) -> (i32, i32) {
    %c0_i32 = arith.constant 0 : i32
    %c0_i32_0 = arith.constant 0 : i32
    %c0_i32_1 = arith.constant 0 : i32
    return %c0_i32, %c0_i32_0 : i32, i32
  }
  func.func @transform_15(%arg0: i32) -> (i32, i32) {
    %c0_i32 = arith.constant 0 : i32
    %c0_i32_0 = arith.constant 0 : i32
    %c0_i32_1 = arith.constant 0 : i32
    return %c0_i32, %c0_i32_0 : i32, i32
  }
  func.func @transform_16(%arg0: i32) -> (i32, i32) {
    %c0_i32 = arith.constant 0 : i32
    %c0_i32_0 = arith.constant 0 : i32
    %c0_i32_1 = arith.constant 0 : i32
    return %c0_i32, %c0_i32_0 : i32, i32
  }
  func.func @transform_17(%arg0: i32) -> (i32, i32) {
    %c0_i32 = arith.constant 0 : i32
    %c0_i32_0 = arith.constant 0 : i32
    %c0_i32_1 = arith.constant 0 : i32
    return %c0_i32, %c0_i32_0 : i32, i32
  }
  func.func @transform_18(%arg0: i32) -> (i32, i32) {
    %c0_i32 = arith.constant 0 : i32
    %c0_i32_0 = arith.constant 0 : i32
    %c0_i32_1 = arith.constant 0 : i32
    return %c0_i32, %c0_i32_0 : i32, i32
  }
  func.func @transform_19(%arg0: i32) -> (i32, i32) {
    %c0_i32 = arith.constant 0 : i32
    %c0_i32_0 = arith.constant 0 : i32
    %c0_i32_1 = arith.constant 0 : i32
    return %c0_i32, %c0_i32_0 : i32, i32
  }
  func.func @transform_20(%arg0: i32) -> (i32, i32) {
    %c0_i32 = arith.constant 0 : i32
    %c0_i32_0 = arith.constant 0 : i32
    %c0_i32_1 = arith.constant 0 : i32
    return %c0_i32, %c0_i32_0 : i32, i32
  }
  func.func @transform_21(%arg0: i32) -> (i32, i32) {
    %c0_i32 = arith.constant 0 : i32
    %c0_i32_0 = arith.constant 0 : i32
    %c0_i32_1 = arith.constant 0 : i32
    return %c0_i32, %c0_i32_0 : i32, i32
  }
  func.func @transform_22(%arg0: i32) -> (i32, i32) {
    %c0_i32 = arith.constant 0 : i32
    %c0_i32_0 = arith.constant 0 : i32
    %c0_i32_1 = arith.constant 0 : i32
    return %c0_i32, %c0_i32_0 : i32, i32
  }
  func.func @transform_23(%arg0: i32) -> (i32, i32) {
    %c0_i32 = arith.constant 0 : i32
    %c0_i32_0 = arith.constant 0 : i32
    %c0_i32_1 = arith.constant 0 : i32
    return %c0_i32, %c0_i32_0 : i32, i32
  }
  func.func @transform_24(%arg0: i32) -> (i32, i32) {
    %c0_i32 = arith.constant 0 : i32
    %c0_i32_0 = arith.constant 0 : i32
    %c0_i32_1 = arith.constant 0 : i32
    return %c0_i32, %c0_i32_0 : i32, i32
  }
  func.func @transform_25(%arg0: i32) -> (i32, i32) {
    %c0_i32 = arith.constant 0 : i32
    %c0_i32_0 = arith.constant 0 : i32
    %c0_i32_1 = arith.constant 0 : i32
    return %c0_i32, %c0_i32_0 : i32, i32
  }
  func.func @transform_26(%arg0: i32) -> (i32, i32) {
    %c0_i32 = arith.constant 0 : i32
    %c0_i32_0 = arith.constant 0 : i32
    %c0_i32_1 = arith.constant 0 : i32
    return %c0_i32, %c0_i32_0 : i32, i32
  }
  func.func @transform_27(%arg0: i32) -> (i32, i32) {
    %c0_i32 = arith.constant 0 : i32
    %c0_i32_0 = arith.constant 0 : i32
    %c0_i32_1 = arith.constant 0 : i32
    return %c0_i32, %c0_i32_0 : i32, i32
  }
  func.func @transform_28(%arg0: i32) -> (i32, i32) {
    %c0_i32 = arith.constant 0 : i32
    %c0_i32_0 = arith.constant 0 : i32
    %c0_i32_1 = arith.constant 0 : i32
    return %c0_i32, %c0_i32_0 : i32, i32
  }
  func.func @transform_29(%arg0: i32) -> (i32, i32) {
    %c0_i32 = arith.constant 0 : i32
    %c0_i32_0 = arith.constant 0 : i32
    %c0_i32_1 = arith.constant 0 : i32
    return %c0_i32, %c0_i32_0 : i32, i32
  }
  func.func @transform_30(%arg0: i32) -> (i32, i32) {
    %c0_i32 = arith.constant 0 : i32
    %c0_i32_0 = arith.constant 0 : i32
    %c0_i32_1 = arith.constant 0 : i32
    return %c0_i32, %c0_i32_0 : i32, i32
  }
  func.func @transform_31(%arg0: i32) -> (i32, i32) {
    %c0_i32 = arith.constant 0 : i32
    %c0_i32_0 = arith.constant 0 : i32
    %c0_i32_1 = arith.constant 0 : i32
    return %c0_i32, %c0_i32_0 : i32, i32
  }
  func.func @transform_32(%arg0: i32) -> (i32, i32) {
    %c0_i32 = arith.constant 0 : i32
    %c0_i32_0 = arith.constant 0 : i32
    %c0_i32_1 = arith.constant 0 : i32
    return %c0_i32, %c0_i32_0 : i32, i32
  }
  func.func @transform_33(%arg0: i32) -> (i32, i32) {
    %c0_i32 = arith.constant 0 : i32
    %c0_i32_0 = arith.constant 0 : i32
    %c0_i32_1 = arith.constant 0 : i32
    return %c0_i32, %c0_i32_0 : i32, i32
  }
  func.func @transform_34(%arg0: i32) -> (i32, i32) {
    %c0_i32 = arith.constant 0 : i32
    %c0_i32_0 = arith.constant 0 : i32
    %c0_i32_1 = arith.constant 0 : i32
    return %c0_i32, %c0_i32_0 : i32, i32
  }
  func.func @transform_35(%arg0: i32) -> (i32, i32) {
    %c0_i32 = arith.constant 0 : i32
    %c0_i32_0 = arith.constant 0 : i32
    %c0_i32_1 = arith.constant 0 : i32
    return %c0_i32, %c0_i32_0 : i32, i32
  }
  func.func @transform_36(%arg0: i32) -> (i32, i32) {
    %c0_i32 = arith.constant 0 : i32
    %c0_i32_0 = arith.constant 0 : i32
    %c0_i32_1 = arith.constant 0 : i32
    return %c0_i32, %c0_i32_0 : i32, i32
  }
  func.func @transform_37(%arg0: i32) -> (i32, i32) {
    %c0_i32 = arith.constant 0 : i32
    %c0_i32_0 = arith.constant 0 : i32
    %c0_i32_1 = arith.constant 0 : i32
    return %c0_i32, %c0_i32_0 : i32, i32
  }
  func.func @transform_38(%arg0: i32) -> (i32, i32) {
    %c0_i32 = arith.constant 0 : i32
    %c0_i32_0 = arith.constant 0 : i32
    %c0_i32_1 = arith.constant 0 : i32
    return %c0_i32, %c0_i32_0 : i32, i32
  }
  func.func @transform_39(%arg0: i32) -> (i32, i32) {
    %c0_i32 = arith.constant 0 : i32
    %c0_i32_0 = arith.constant 0 : i32
    %c0_i32_1 = arith.constant 0 : i32
    return %c0_i32, %c0_i32_0 : i32, i32
  }
  func.func @transform_40(%arg0: i32) -> (i32, i32) {
    %c0_i32 = arith.constant 0 : i32
    %c0_i32_0 = arith.constant 0 : i32
    %c0_i32_1 = arith.constant 0 : i32
    return %c0_i32, %c0_i32_0 : i32, i32
  }
  func.func @transform_41(%arg0: i32) -> (i32, i32) {
    %c0_i32 = arith.constant 0 : i32
    %c0_i32_0 = arith.constant 0 : i32
    %c0_i32_1 = arith.constant 0 : i32
    return %c0_i32, %c0_i32_0 : i32, i32
  }
  func.func @transform_42(%arg0: i32) -> (i32, i32) {
    %c0_i32 = arith.constant 0 : i32
    %c0_i32_0 = arith.constant 0 : i32
    %c0_i32_1 = arith.constant 0 : i32
    return %c0_i32, %c0_i32_0 : i32, i32
  }
  func.func @transform_43(%arg0: i32) -> (i32, i32) {
    %c0_i32 = arith.constant 0 : i32
    %c0_i32_0 = arith.constant 0 : i32
    %c0_i32_1 = arith.constant 0 : i32
    return %c0_i32, %c0_i32_0 : i32, i32
  }
  func.func @transform_44(%arg0: i32) -> (i32, i32) {
    %c0_i32 = arith.constant 0 : i32
    %c0_i32_0 = arith.constant 0 : i32
    %c0_i32_1 = arith.constant 0 : i32
    return %c0_i32, %c0_i32_0 : i32, i32
  }
  func.func @transform_45(%arg0: i32) -> (i32, i32) {
    %c0_i32 = arith.constant 0 : i32
    %c0_i32_0 = arith.constant 0 : i32
    %c0_i32_1 = arith.constant 0 : i32
    return %c0_i32, %c0_i32_0 : i32, i32
  }
  func.func @transform_46(%arg0: i32) -> (i32, i32) {
    %c0_i32 = arith.constant 0 : i32
    %c0_i32_0 = arith.constant 0 : i32
    %c0_i32_1 = arith.constant 0 : i32
    return %c0_i32, %c0_i32_0 : i32, i32
  }
  func.func @transform_47(%arg0: i32) -> (i32, i32) {
    %c0_i32 = arith.constant 0 : i32
    %c0_i32_0 = arith.constant 0 : i32
    %c0_i32_1 = arith.constant 0 : i32
    return %c0_i32, %c0_i32_0 : i32, i32
  }
  func.func @transform_48(%arg0: i32) -> (i32, i32) {
    %c0_i32 = arith.constant 0 : i32
    %c0_i32_0 = arith.constant 0 : i32
    %c0_i32_1 = arith.constant 0 : i32
    return %c0_i32, %c0_i32_0 : i32, i32
  }
  func.func @transform_49(%arg0: i32) -> (i32, i32) {
    %c0_i32 = arith.constant 0 : i32
    %c0_i32_0 = arith.constant 0 : i32
    %c0_i32_1 = arith.constant 0 : i32
    return %c0_i32, %c0_i32_0 : i32, i32
  }
  func.func @transform_50(%arg0: i32) -> (i32, i32) {
    %c0_i32 = arith.constant 0 : i32
    %c0_i32_0 = arith.constant 0 : i32
    %c0_i32_1 = arith.constant 0 : i32
    return %c0_i32, %c0_i32_0 : i32, i32
  }
  func.func @transform_51(%arg0: i32) -> (i32, i32) {
    %c0_i32 = arith.constant 0 : i32
    %c0_i32_0 = arith.constant 0 : i32
    %c0_i32_1 = arith.constant 0 : i32
    return %c0_i32, %c0_i32_0 : i32, i32
  }
  func.func @transform_52(%arg0: i32) -> (i32, i32) {
    %c0_i32 = arith.constant 0 : i32
    %c0_i32_0 = arith.constant 0 : i32
    %c0_i32_1 = arith.constant 0 : i32
    return %c0_i32, %c0_i32_0 : i32, i32
  }
  func.func @transform_53(%arg0: i32) -> (i32, i32) {
    %c0_i32 = arith.constant 0 : i32
    %c0_i32_0 = arith.constant 0 : i32
    %c0_i32_1 = arith.constant 0 : i32
    return %c0_i32, %c0_i32_0 : i32, i32
  }
  func.func @transform_54(%arg0: i32) -> (i32, i32) {
    %c0_i32 = arith.constant 0 : i32
    %c0_i32_0 = arith.constant 0 : i32
    %c0_i32_1 = arith.constant 0 : i32
    return %c0_i32, %c0_i32_0 : i32, i32
  }
  func.func @transform_55(%arg0: i32) -> (i32, i32) {
    %c0_i32 = arith.constant 0 : i32
    %c0_i32_0 = arith.constant 0 : i32
    %c0_i32_1 = arith.constant 0 : i32
    return %c0_i32, %c0_i32_0 : i32, i32
  }
  func.func @transform_56(%arg0: i32) -> (i32, i32) {
    %c0_i32 = arith.constant 0 : i32
    %c0_i32_0 = arith.constant 0 : i32
    %c0_i32_1 = arith.constant 0 : i32
    return %c0_i32, %c0_i32_0 : i32, i32
  }
  func.func @transform_57(%arg0: i32) -> (i32, i32) {
    %c0_i32 = arith.constant 0 : i32
    %c0_i32_0 = arith.constant 0 : i32
    %c0_i32_1 = arith.constant 0 : i32
    return %c0_i32, %c0_i32_0 : i32, i32
  }
  func.func @transform_58(%arg0: i32) -> (i32, i32) {
    %c0_i32 = arith.constant 0 : i32
    %c0_i32_0 = arith.constant 0 : i32
    %c0_i32_1 = arith.constant 0 : i32
    return %c0_i32, %c0_i32_0 : i32, i32
  }
  func.func @transform_59(%arg0: i32) -> (i32, i32) {
    %c0_i32 = arith.constant 0 : i32
    %c0_i32_0 = arith.constant 0 : i32
    %c0_i32_1 = arith.constant 0 : i32
    return %c0_i32, %c0_i32_0 : i32, i32
  }
  func.func @transform_60(%arg0: i32) -> (i32, i32) {
    %c0_i32 = arith.constant 0 : i32
    %c0_i32_0 = arith.constant 0 : i32
    %c0_i32_1 = arith.constant 0 : i32
    return %c0_i32, %c0_i32_0 : i32, i32
  }
  func.func @transform_61(%arg0: i32) -> (i32, i32) {
    %c0_i32 = arith.constant 0 : i32
    %c0_i32_0 = arith.constant 0 : i32
    %c0_i32_1 = arith.constant 0 : i32
    return %c0_i32, %c0_i32_0 : i32, i32
  }
  func.func @transform_62(%arg0: i32) -> (i32, i32) {
    %c0_i32 = arith.constant 0 : i32
    %c0_i32_0 = arith.constant 0 : i32
    %c0_i32_1 = arith.constant 0 : i32
    return %c0_i32, %c0_i32_0 : i32, i32
  }
  func.func @transform_63(%arg0: i32) -> (i32, i32) {
    %c0_i32 = arith.constant 0 : i32
    %c0_i32_0 = arith.constant 0 : i32
    %c0_i32_1 = arith.constant 0 : i32
    return %c0_i32, %c0_i32_0 : i32, i32
  }
  func.func @transform_64(%arg0: i32) -> (i32, i32) {
    %c0_i32 = arith.constant 0 : i32
    %c0_i32_0 = arith.constant 0 : i32
    %c0_i32_1 = arith.constant 0 : i32
    return %c0_i32, %c0_i32_0 : i32, i32
  }
  func.func @transform_65(%arg0: i32) -> (i32, i32) {
    %c0_i32 = arith.constant 0 : i32
    %c0_i32_0 = arith.constant 0 : i32
    %c0_i32_1 = arith.constant 0 : i32
    return %c0_i32, %c0_i32_0 : i32, i32
  }
  func.func @transform_66(%arg0: i32) -> (i32, i32) {
    %c0_i32 = arith.constant 0 : i32
    %c0_i32_0 = arith.constant 0 : i32
    %c0_i32_1 = arith.constant 0 : i32
    return %c0_i32, %c0_i32_0 : i32, i32
  }
  func.func @transform_67(%arg0: i32) -> (i32, i32) {
    %c0_i32 = arith.constant 0 : i32
    %c0_i32_0 = arith.constant 0 : i32
    %c0_i32_1 = arith.constant 0 : i32
    return %c0_i32, %c0_i32_0 : i32, i32
  }
  func.func @transform_68(%arg0: i32) -> (i32, i32) {
    %c0_i32 = arith.constant 0 : i32
    %c0_i32_0 = arith.constant 0 : i32
    %c0_i32_1 = arith.constant 0 : i32
    return %c0_i32, %c0_i32_0 : i32, i32
  }
  func.func @transform_69(%arg0: i32) -> (i32, i32) {
    %c0_i32 = arith.constant 0 : i32
    %c0_i32_0 = arith.constant 0 : i32
    %c0_i32_1 = arith.constant 0 : i32
    return %c0_i32, %c0_i32_0 : i32, i32
  }
  func.func @transform_70(%arg0: i32) -> (i32, i32) {
    %c0_i32 = arith.constant 0 : i32
    %c0_i32_0 = arith.constant 0 : i32
    %c0_i32_1 = arith.constant 0 : i32
    return %c0_i32, %c0_i32_0 : i32, i32
  }
  func.func @transform_71(%arg0: i32) -> (i32, i32) {
    %c0_i32 = arith.constant 0 : i32
    %c0_i32_0 = arith.constant 0 : i32
    %c0_i32_1 = arith.constant 0 : i32
    return %c0_i32, %c0_i32_0 : i32, i32
  }
  func.func @transform_72(%arg0: i32) -> (i32, i32) {
    %c0_i32 = arith.constant 0 : i32
    %c0_i32_0 = arith.constant 0 : i32
    %c0_i32_1 = arith.constant 0 : i32
    return %c0_i32, %c0_i32_0 : i32, i32
  }
  func.func @transform_73(%arg0: i32) -> (i32, i32) {
    %c0_i32 = arith.constant 0 : i32
    %c0_i32_0 = arith.constant 0 : i32
    %c0_i32_1 = arith.constant 0 : i32
    return %c0_i32, %c0_i32_0 : i32, i32
  }
  func.func @transform_74(%arg0: i32) -> (i32, i32) {
    %c0_i32 = arith.constant 0 : i32
    %c0_i32_0 = arith.constant 0 : i32
    %c0_i32_1 = arith.constant 0 : i32
    return %c0_i32, %c0_i32_0 : i32, i32
  }
  func.func @transform_75(%arg0: i32) -> (i32, i32) {
    %c0_i32 = arith.constant 0 : i32
    %c0_i32_0 = arith.constant 0 : i32
    %c0_i32_1 = arith.constant 0 : i32
    return %c0_i32, %c0_i32_0 : i32, i32
  }
  func.func @transform_76(%arg0: i32) -> (i32, i32) {
    %c0_i32 = arith.constant 0 : i32
    %c0_i32_0 = arith.constant 0 : i32
    %c0_i32_1 = arith.constant 0 : i32
    return %c0_i32, %c0_i32_0 : i32, i32
  }
  func.func @transform_77(%arg0: i32) -> (i32, i32) {
    %c0_i32 = arith.constant 0 : i32
    %c0_i32_0 = arith.constant 0 : i32
    %c0_i32_1 = arith.constant 0 : i32
    return %c0_i32, %c0_i32_0 : i32, i32
  }
  func.func @transform_78(%arg0: i32) -> (i32, i32) {
    %c0_i32 = arith.constant 0 : i32
    %c0_i32_0 = arith.constant 0 : i32
    %c0_i32_1 = arith.constant 0 : i32
    return %c0_i32, %c0_i32_0 : i32, i32
  }
  func.func @transform_79(%arg0: i32) -> (i32, i32) {
    %c0_i32 = arith.constant 0 : i32
    %c0_i32_0 = arith.constant 0 : i32
    %c0_i32_1 = arith.constant 0 : i32
    return %c0_i32, %c0_i32_0 : i32, i32
  }
  func.func @transform_80(%arg0: i32) -> (i32, i32) {
    %c0_i32 = arith.constant 0 : i32
    %c0_i32_0 = arith.constant 0 : i32
    %c0_i32_1 = arith.constant 0 : i32
    return %c0_i32, %c0_i32_0 : i32, i32
  }
  func.func @transform_81(%arg0: i32) -> (i32, i32) {
    %c0_i32 = arith.constant 0 : i32
    %c0_i32_0 = arith.constant 0 : i32
    %c0_i32_1 = arith.constant 0 : i32
    return %c0_i32, %c0_i32_0 : i32, i32
  }
  func.func @transform_82(%arg0: i32) -> (i32, i32, i32) {
    %c0_i32 = arith.constant 0 : i32
    %c0_i32_0 = arith.constant 0 : i32
    %c0_i32_1 = arith.constant 0 : i32
    return %arg0, %c0_i32, %c0_i32_0 : i32, i32, i32
  }
}

</mosaic_0001>

<bundles_post_ra>
// kernel: tpu_custom_call.1
= control target key start
LH: loop header
LB: loop body
LE: loop exit
PB: predicated region body
PF: predicated region fallthrough
CT: control target
= control target key end

     0   :  { %s13082_s6 = smov 1   ;;  %s13083_s10 = smov 2   ;;  %s14864_s0 = inlined_call_operand.smem [shape: u32[83], index: -1, kind: input, shape index: {}] }
   0x1   :  { %s13241_s5 = sld [smem:[%s14864_s0]]   ;;  %s13084_s14 = smov 3  }
   0x2   :  { %s13246_s9 = sld [smem:[%s14864_s0 + %s13082_s6]]   ;;  %s13085_s18 = smov 4  }
   0x3   :  { %s13251_s13 = sld [smem:[%s14864_s0 + %s13083_s10]]   ;;  %s13086_s22 = smov 5  }
   0x4   :  { %s13256_s17 = sld [smem:[%s14864_s0 + %s13084_s14]]   ;;  %s13087_s26 = smov 6  }
   0x5   :  { %s13261_s21 = sld [smem:[%s14864_s0 + %s13085_s18]]   ;;  %s13088_s30 = smov 7  }
   0x6   :  { %s13266_s25 = sld [smem:[%s14864_s0 + %s13086_s22]]   ;;  %s13089_s4 = smov 8  }
   0x7   :  { %14924 = sst [smem:[#allocation108_spill]] %s13241_s5  ;;  %s13090_s10 = smov 9  }
   0x8   :  { %14925 = sst [smem:[#allocation109_spill]] %s13246_s9  ;;  %s13091_s15 = smov 10  }
   0x9   :  { %14926 = sst [smem:[#allocation110_spill]] %s13251_s13  ;;  %s13092_s20 = smov 11  }
   0xa   :  { %s13271_s29 = sld [smem:[%s14864_s0 + %s13087_s26]]   ;;  %s13093_s26 = smov 12  }
   0xb   :  { %14927 = sst [smem:[#allocation111_spill]] %s13261_s21  ;;  %s13094_s1 = smov 13  }
   0xc   :  { %14928 = sst [smem:[#allocation112_spill]] %s13266_s25  ;;  %s13095_s7 = smov 14  }
   0xd   :  { %s13276_s3 = sld [smem:[%s14864_s0 + %s13088_s30]]   ;;  %s13097_s22 = smov 16  }
   0xe   :  { %s13281_s8 = sld [smem:[%s14864_s0 + %s13089_s4]]   ;;  %s13098_s28 = smov 17  }
   0xf   :  { %s13286_s14 = sld [smem:[%s14864_s0 + %s13090_s10]]  }
  0x10   :  { %s13291_s19 = sld [smem:[%s14864_s0 + %s13091_s15]]   ;;  %s13096_s15 = smov 15  }
  0x11   :  { %s13296_s24 = sld [smem:[%s14864_s0 + %s13092_s20]]  }
  0x12   :  { %s13301_s30 = sld [smem:[%s14864_s0 + %s13093_s26]]  }
  0x13   :  { %14929 = sst [smem:[#allocation113_spill]] %s13276_s3 }
  0x14   :  { %14930 = sst [smem:[#allocation114_spill]] %s13281_s8 }
  0x15   :  { %s13306_s6 = sld [smem:[%s14864_s0 + %s13094_s1]]  }
  0x16   :  { %14931 = sst [smem:[#allocation115_spill]] %s13291_s19 }
  0x17   :  { %14932 = sst [smem:[#allocation116_spill]] %s13296_s24 }
  0x18   :  { %s13311_s12 = sld [smem:[%s14864_s0 + %s13095_s7]]   ;;  %s13099_s7 = smov 18  }
  0x19   :  { %s13316_s20 = sld [smem:[%s14864_s0 + %s13096_s15]]   ;;  %s13100_s15 = smov 19  }
  0x1a   :  { %s13321_s27 = sld [smem:[%s14864_s0 + %s13097_s22]]   ;;  %s13101_s22 = smov 20  }
  0x1b   :  { %14933 = sst [smem:[#allocation117_spill]] %s13306_s6 }
  0x1c   :  { %s13326_s4 = sld [smem:[%s14864_s0 + %s13098_s28]]   ;;  %s13102_s28 = smov 21  }
  0x1d   :  { %s13331_s6 = sld [smem:[%s14864_s0 + %s13099_s7]]   ;;  %s13103_s7 = smov 22  }
  0x1e   :  { %14934 = sst [smem:[#allocation118_spill]] %s13311_s12 }
  0x1f   :  { %s13336_s24 = sld [smem:[%s14864_s0 + %s13100_s15]]   ;;  %s13104_s15 = smov 23  }
  0x20   :  { %14935 = sst [smem:[#allocation119_spill]] %s13321_s27 }
  0x21   :  { %s13341_s3 = sld [smem:[%s14864_s0 + %s13101_s22]]   ;;  %s13105_s22 = smov 24  }
  0x22   :  { %14936 = sst [smem:[#allocation120_spill]] %s13326_s4 }
  0x23   :  { %14937 = sst [smem:[#allocation121_spill]] %s13331_s6 }
  0x24   :  { %s13346_s9 = sld [smem:[%s14864_s0 + %s13102_s28]]   ;;  %s13106_s28 = smov 25  }
  0x25   :  { %14938 = sst [smem:[#allocation122_spill]] %s13336_s24 }
  0x26   :  { %s13351_s6 = sld [smem:[%s14864_s0 + %s13103_s7]]   ;;  %s13107_s7 = smov 26  }
  0x27   :  { %14939 = sst [smem:[#allocation123_spill]] %s13341_s3 }
  0x28   :  { %s13356_s25 = sld [smem:[%s14864_s0 + %s13104_s15]]   ;;  %s13108_s15 = smov 27  }
  0x29   :  { %s13361_s5 = sld [smem:[%s14864_s0 + %s13105_s22]]   ;;  %s13109_s22 = smov 28  }
  0x2a   :  { %14940 = sst [smem:[#allocation124_spill]] %s13346_s9 }
  0x2b   :  { %s13366_s9 = sld [smem:[%s14864_s0 + %s13106_s28]]   ;;  %s13110_s28 = smov 29  }
  0x2c   :  { %14941 = sst [smem:[#allocation125_spill]] %s13351_s6 }
  0x2d   :  { %s13371_s24 = sld [smem:[%s14864_s0 + %s13107_s7]]   ;;  %s13111_s7 = smov 30  }
  0x2e   :  { %14942 = sst [smem:[#allocation126_spill]] %s13356_s25 }
  0x2f   :  { %14943 = sst [smem:[#allocation127_spill]] %s13361_s5 }
  0x30   :  { %s13376_s25 = sld [smem:[%s14864_s0 + %s13108_s15]]   ;;  %s13112_s15 = smov 31  }
  0x31   :  { %14944 = sst [smem:[#allocation128_spill]] %s13366_s9 }
  0x32   :  { %s13381_s27 = sld [smem:[%s14864_s0 + %s13109_s22]]   ;;  %s13113_s22 = smov 32  }
  0x33   :  { %14945 = sst [smem:[#allocation129_spill]] %s13371_s24 }
  0x34   :  { %s13386_s9 = sld [smem:[%s14864_s0 + %s13110_s28]]   ;;  %s13114_s28 = smov 33  }
  0x35   :  { %s13391_s24 = sld [smem:[%s14864_s0 + %s13111_s7]]   ;;  %s13115_s7 = smov 34  }
  0x36   :  { %14946 = sst [smem:[#allocation130_spill]] %s13376_s25 }
  0x37   :  { %s13396_s25 = sld [smem:[%s14864_s0 + %s13112_s15]]   ;;  %s13116_s15 = smov 35  }
  0x38   :  { %s13401_s12 = sld [smem:[%s14864_s0 + %s13113_s22]]   ;;  %s13117_s22 = smov 36  }
  0x39   :  { %s13411_s19 = sld [smem:[%s14864_s0 + %s13115_s7]]   ;;  %s13119_s7 = smov 38  }
  0x3a   :  { %14947 = sst [smem:[#allocation131_spill]] %s13386_s9 }
  0x3b   :  { %s13406_s9 = sld [smem:[%s14864_s0 + %s13114_s28]]   ;;  %s13118_s28 = smov 37  }
  0x3c   :  { %s13421_s8 = sld [smem:[%s14864_s0 + %s13117_s22]]   ;;  %s13121_s22 = smov 40  }
  0x3d   :  { %14948 = sst [smem:[#allocation132_spill]] %s13396_s25 }
  0x3e   :  { %s13416_s25 = sld [smem:[%s14864_s0 + %s13116_s15]]   ;;  %s13120_s15 = smov 39  }
  0x3f   :  { %14950 = sst [smem:[#allocation134_spill]] %s13411_s19 }
  0x40   :  { %s13431_s19 = sld [smem:[%s14864_s0 + %s13119_s7]]   ;;  %s13123_s7 = smov 42  }
  0x41   :  { %14949 = sst [smem:[#allocation133_spill]] %s13406_s9 }
  0x42   :  { %14951 = sst [smem:[#allocation135_spill]] %s13421_s8 }
  0x43   :  { %s13426_s9 = sld [smem:[%s14864_s0 + %s13118_s28]]   ;;  %s13122_s28 = smov 41  }
  0x44   :  { %s13436_s21 = sld [smem:[%s14864_s0 + %s13120_s15]]   ;;  %s13124_s15 = smov 43  }
  0x45   :  { %s13441_s8 = sld [smem:[%s14864_s0 + %s13121_s22]]   ;;  %s13125_s22 = smov 44  }
  0x46   :  { %14952 = sst [smem:[#allocation136_spill]] %s13431_s19 }
  0x47   :  { %s13446_s13 = sld [smem:[%s14864_s0 + %s13122_s28]]   ;;  %s13126_s28 = smov 45  }
  0x48   :  { %s13451_s19 = sld [smem:[%s14864_s0 + %s13123_s7]]   ;;  %s13127_s7 = smov 46  }
  0x4a   :  { %14953 = sst [smem:[#allocation137_spill]] %s13436_s21 }
  0x4b   :  { %14954 = sst [smem:[#allocation138_spill]] %s13441_s8 }
  0x4c   :  { %s13456_s21 = sld [smem:[%s14864_s0 + %s13124_s15]]   ;;  %s13128_s15 = smov 47  }
  0x4d   :  { %14955 = sst [smem:[#allocation139_spill]] %s13446_s13 }
  0x4e   :  { %14956 = sst [smem:[#allocation140_spill]] %s13451_s19 }
  0x4f   :  { %s13461_s8 = sld [smem:[%s14864_s0 + %s13125_s22]]   ;;  %s13129_s22 = smov 48  }
  0x50   :  { %s13466_s13 = sld [smem:[%s14864_s0 + %s13126_s28]]   ;;  %s13130_s28 = smov 49  }
  0x51   :  { %s13471_s19 = sld [smem:[%s14864_s0 + %s13127_s7]]   ;;  %s13131_s7 = smov 50  }
  0x52   :  { %14957 = sst [smem:[#allocation141_spill]] %s13456_s21 }
  0x53   :  { %s13476_s21 = sld [smem:[%s14864_s0 + %s13128_s15]]   ;;  %s13132_s15 = smov 51  }
  0x55   :  { %14958 = sst [smem:[#allocation142_spill]] %s13461_s8 }
  0x56   :  { %14959 = sst [smem:[#allocation143_spill]] %s13466_s13 }
  0x57   :  { %14960 = sst [smem:[#allocation144_spill]] %s13471_s19 }
  0x58   :  { %s13481_s8 = sld [smem:[%s14864_s0 + %s13129_s22]]   ;;  %s13133_s22 = smov 52  }
  0x59   :  { %14961 = sst [smem:[#allocation145_spill]] %s13476_s21 }
  0x5a   :  { %s13486_s13 = sld [smem:[%s14864_s0 + %s13130_s28]]   ;;  %s13134_s28 = smov 53  }
  0x5b   :  { %s13491_s19 = sld [smem:[%s14864_s0 + %s13131_s7]]   ;;  %s13135_s7 = smov 54  }
  0x5c   :  { %s13496_s21 = sld [smem:[%s14864_s0 + %s13132_s15]]   ;;  %s13136_s15 = smov 55  }
  0x5e   :  { %14962 = sst [smem:[#allocation146_spill]] %s13481_s8 }
  0x5f   :  { %s13501_s8 = sld [smem:[%s14864_s0 + %s13133_s22]]   ;;  %s13137_s22 = smov 56  }
  0x60   :  { %14963 = sst [smem:[#allocation147_spill]] %s13486_s13 }
  0x61   :  { %14964 = sst [smem:[#allocation148_spill]] %s13491_s19 }
  0x62   :  { %14965 = sst [smem:[#allocation149_spill]] %s13496_s21 }
  0x63   :  { %s13506_s13 = sld [smem:[%s14864_s0 + %s13134_s28]]   ;;  %s13138_s28 = smov 57  }
  0x64   :  { %s13511_s19 = sld [smem:[%s14864_s0 + %s13135_s7]]   ;;  %s13139_s7 = smov 58  }
  0x65   :  { %14966 = sst [smem:[#allocation150_spill]] %s13501_s8 }
  0x66   :  { %s13516_s21 = sld [smem:[%s14864_s0 + %s13136_s15]]   ;;  %s13140_s15 = smov 59  }
  0x67   :  { %s13521_s8 = sld [smem:[%s14864_s0 + %s13137_s22]]   ;;  %s13141_s22 = smov 60  }
  0x69   :  { %14967 = sst [smem:[#allocation151_spill]] %s13506_s13 }
  0x6a   :  { %14968 = sst [smem:[#allocation152_spill]] %s13511_s19 }
  0x6b   :  { %s13526_s13 = sld [smem:[%s14864_s0 + %s13138_s28]]   ;;  %s13142_s28 = smov 61  }
  0x6c   :  { %14969 = sst [smem:[#allocation153_spill]] %s13516_s21 }
  0x6d   :  { %14970 = sst [smem:[#allocation154_spill]] %s13521_s8 }
  0x6e   :  { %s13531_s19 = sld [smem:[%s14864_s0 + %s13139_s7]]   ;;  %s13143_s7 = smov 62  }
  0x6f   :  { %s13536_s21 = sld [smem:[%s14864_s0 + %s13140_s15]]   ;;  %s13144_s15 = smov 63  }
  0x70   :  { %s13541_s8 = sld [smem:[%s14864_s0 + %s13141_s22]]   ;;  %s13145_s22 = smov 64  }
  0x71   :  { %14971 = sst [smem:[#allocation155_spill]] %s13526_s13 }
  0x72   :  { %s13546_s13 = sld [smem:[%s14864_s0 + %s13142_s28]]   ;;  %s13146_s28 = smov 65  }
  0x74   :  { %14972 = sst [smem:[#allocation156_spill]] %s13531_s19 }
  0x75   :  { %14973 = sst [smem:[#allocation157_spill]] %s13536_s21 }
  0x76   :  { %14974 = sst [smem:[#allocation158_spill]] %s13541_s8 }
  0x77   :  { %s13551_s19 = sld [smem:[%s14864_s0 + %s13143_s7]]   ;;  %s13147_s7 = smov 66  }
  0x78   :  { %14975 = sst [smem:[#allocation159_spill]] %s13546_s13 }
  0x79   :  { %s13556_s21 = sld [smem:[%s14864_s0 + %s13144_s15]]   ;;  %s13148_s15 = smov 67  }
  0x7a   :  { %s13561_s8 = sld [smem:[%s14864_s0 + %s13145_s22]]   ;;  %s13149_s22 = smov 68  }
  0x7b   :  { %s13566_s13 = sld [smem:[%s14864_s0 + %s13146_s28]]   ;;  %s13150_s28 = smov 69  }
  0x7d   :  { %14976 = sst [smem:[#allocation160_spill]] %s13551_s19 }
  0x7e   :  { %s13571_s19 = sld [smem:[%s14864_s0 + %s13147_s7]]   ;;  %s13151_s7 = smov 70  }
  0x7f   :  { %14977 = sst [smem:[#allocation161_spill]] %s13556_s21 }
  0x80   :  { %14978 = sst [smem:[#allocation162_spill]] %s13561_s8 }
  0x81   :  { %14979 = sst [smem:[#allocation163_spill]] %s13566_s13 }
  0x82   :  { %s13576_s21 = sld [smem:[%s14864_s0 + %s13148_s15]]   ;;  %s13152_s15 = smov 71  }
  0x83   :  { %s13581_s8 = sld [smem:[%s14864_s0 + %s13149_s22]]   ;;  %s13153_s22 = smov 72  }
  0x84   :  { %14980 = sst [smem:[#allocation164_spill]] %s13571_s19 }
  0x85   :  { %s13586_s13 = sld [smem:[%s14864_s0 + %s13150_s28]]   ;;  %s13154_s28 = smov 73  }
  0x86   :  { %s13591_s19 = sld [smem:[%s14864_s0 + %s13151_s7]]   ;;  %s13155_s7 = smov 74  }
  0x88   :  { %14981 = sst [smem:[#allocation165_spill]] %s13576_s21 }
  0x89   :  { %14982 = sst [smem:[#allocation166_spill]] %s13581_s8 }
  0x8a   :  { %s13596_s21 = sld [smem:[%s14864_s0 + %s13152_s15]]   ;;  %s13156_s15 = smov 75  }
  0x8b   :  { %14983 = sst [smem:[#allocation167_spill]] %s13586_s13 }
  0x8c   :  { %14984 = sst [smem:[#allocation168_spill]] %s13591_s19 }
  0x8d   :  { %s13601_s8 = sld [smem:[%s14864_s0 + %s13153_s22]]   ;;  %s13157_s22 = smov 76  }
  0x8e   :  { %s13606_s13 = sld [smem:[%s14864_s0 + %s13154_s28]]   ;;  %s13158_s28 = smov 77  }
  0x8f   :  { %s13611_s19 = sld [smem:[%s14864_s0 + %s13155_s7]]   ;;  %s13159_s7 = smov 78  }
  0x90   :  { %14985 = sst [smem:[#allocation169_spill]] %s13596_s21 }
  0x91   :  { %s13616_s21 = sld [smem:[%s14864_s0 + %s13156_s15]]   ;;  %s13160_s15 = smov 79  }
  0x93   :  { %14986 = sst [smem:[#allocation170_spill]] %s13601_s8 }
  0x94   :  { %14987 = sst [smem:[#allocation171_spill]] %s13606_s13 }
  0x95   :  { %14988 = sst [smem:[#allocation172_spill]] %s13611_s19 }
  0x96   :  { %s13621_s8 = sld [smem:[%s14864_s0 + %s13157_s22]]   ;;  %s13161_s22 = smov 80  }
  0x97   :  { %14989 = sst [smem:[#allocation173_spill]] %s13616_s21 }
  0x98   :  { %s13626_s13 = sld [smem:[%s14864_s0 + %s13158_s28]]   ;;  %s13162_s28 = smov 81  }
  0x99   :  { %s13631_s19 = sld [smem:[%s14864_s0 + %s13159_s7]]   ;;  %s13163_s7 = smov 82  }
  0x9a   :  { %s13636_s21 = sld [smem:[%s14864_s0 + %s13160_s15]]  }
  0x9c   :  { %14990 = sst [smem:[#allocation174_spill]] %s13621_s8 }
  0x9d   :  { %s13641_s8 = sld [smem:[%s14864_s0 + %s13161_s22]]  }
  0x9e   :  { %14991 = sst [smem:[#allocation175_spill]] %s13626_s13 }
  0x9f   :  { %14992 = sst [smem:[#allocation176_spill]] %s13631_s19 }
  0xa0   :  { %s13646_s13 = sld [smem:[%s14864_s0 + %s13162_s28]]  }
  0xa1   :  { %s13651_s19 = sld [smem:[%s14864_s0 + %s13163_s7]]  }
  0xa2   :  { %170 = vsyncpa [#allocation3], 0 }
  0xa3   :  { %171 = vsyncpa [#allocation6], 0 }
  0xa4   :  { %172 = vsyncpa [#allocation9], 0 }
  0xa5   :  { %173 = vsyncpa [#allocation12], 0 }
  0xa6   :  { %174 = vsyncpa [#allocation15], 0 }
  0xa7   :  { %175 = vsyncpa [#allocation18], 0 }
  0xa8   :  { %176 = vsyncpa [#allocation21], 0 }
  0xa9   :  { %177 = vsyncpa [#allocation24], 0 }
  0xaa   :  { %178 = vsyncpa [#allocation27], 0 }
  0xab   :  { %179 = vsyncpa [#allocation30], 0 }
  0xac   :  { %180 = vsyncpa [#allocation33], 0 }
  0xad   :  { %181 = vsyncpa [#allocation36], 0 }
  0xae   :  { %182 = vsyncpa [#allocation39], 0 }
  0xaf   :  { %183 = vsyncpa [#allocation42], 0 }
  0xb0   :  { %184 = vsyncpa [#allocation45], 0 }
  0xb1   :  { %185 = vsyncpa [#allocation48], 0 }
  0xb2   :  { %186 = vsyncpa [#allocation51], 0 }
  0xb3   :  { %187 = vsyncpa [#allocation54], 0 }
  0xb4   :  { %188 = vsyncpa [#allocation57], 0 }
  0xb5   :  { %189 = vsyncpa [#allocation60], 0 }
  0xb6   :  { %190 = vsyncpa [#allocation63], 0 }
  0xb7   :  { %191 = vsyncpa [#allocation66], 0 }
  0xb8   :  { %192 = vsyncpa [#allocation69], 0 }
  0xb9   :  { %193 = vsyncpa [#allocation72], 0 }
  0xba   :  { %194 = vsyncpa [#allocation75], 0 }
  0xbb   :  { %195 = vsyncpa [#allocation78], 0 }
  0xbc   :  { %196 = vsyncpa [#allocation4], 0 }
  0xbd   :  { %198 = vsyncpa [#allocation4 + $0x1], 0  ;;  %s13653_s0 = smov 0   ;;  %s13655_s15 = smov 0  }
  0xbe   :  { %s13657_s16 = smov 0   ;;  %s13659_s18 = smov 0  }
  0xbf LB: > { %14993 = sst [smem:[#allocation177_spill]] %s13068_s0  ;;  %s13674_s22 = sadd.s32 4294967295, %s13080_s18   ;;  %s13080_s18 = sphi %s13659_s18, %s15098_s18   ;;  %s13076_s16 = sphi %s13657_s16, %s15100_s16   ;;  %s13072_s15 = sphi %s13655_s15, %s15102_s15   ;;  %s13068_s0 = sphi %s13653_s0, %s15101_s0  }
  0xc0   : > { %14994 = sst [smem:[#allocation178_spill]] %s13076_s16  ;;  %s10036_s23 = sadd.s32 4294967294, %s13080_s18  }
  0xc1   : > { %14995 = sst [smem:[#allocation179_spill]] %s13080_s18  ;;  %s13678_s26 = sadd.s32 1, %s13080_s18  }
  0xc2   : > { %14996 = sst [smem:[#allocation180_spill]] %s13678_s26  ;;  %s1938_s28 = sadd.s32 1, %s13076_s16 }
  0xc3   : > { %s1935_s1 = ssub.s32 %s13080_s18, %s13678_s26  ;;  %p1948_p0 = scmp.ne.s32.totalorder %s13076_s16, %s13072_s15 }
  0xc4   : > { %p1936_p1 = scmp.eq.s32.totalorder %s1935_s1, 0  ;;  %p1949_p2 = scmp.eq.s32.totalorder %s13674_s22, 1 }
  0xc5   : > { %p1954_p3 = scmp.ne.s32.totalorder %s13072_s15, %s13068_s0  ;;  %p1955_p4 = scmp.eq.s32.totalorder %s10036_s23, 1 }
  0xc6   : > { %s13689_s2 = scalar_select %p1936_p1, %s13076_s16, %s1938_s28  }
  0xc7   : > { %p13691_p5 = por %p1949_p2, %p1948_p0  ;;  %p13695_p6 = por %p1955_p4, %p1954_p3 }
  0xc8   : > { %14997 = sst [smem:[#allocation181_spill]] %s13689_s2  ;;  %p10037_p7 = scmp.ge.s32.totalorder %s13080_s18, 1 }
  0xc9   : > { %s14998_s7 = scalar_select %p13691_p5, 1, 0 }
  0xca   : > { %s14999_s10 = scalar_select %p13695_p6, 1, 0 }
  0xcb   : > { %p1962_p8 = scmp.lt.s32.totalorder %s13080_s18, 3 }
  0xcc   : > { %15000 = sst [smem:[#allocation182_spill]] %s14999_s10 }
  0xcd   : > { %p13701_p9 = pnand %p10037_p7, %p1962_p8 }
  0xce   : > { %p11291_p10 = scmp.eq.s32.totalorder (!%p13701_p9), %s13674_s22, 0  ;;  %s13164_s23 = smov (!%p13701_p9), [#allocation5]  }
  0xcf   : > { %1966 = sbr.rel (%p13701_p9) target bundleno = 787 (0x313), region = 12  ;;  %s1988_s28 = sshll.u32 (!%p13701_p9), %s13164_s23, 4  ;;  %s1989_s28 = int_to_ptr.vmem [resolvable:$true] %s1988_s28 }
  0xd0   : > { %s11702_s1 = scalar_lea.vmem (!%p13701_p9), %s1989_s28, 256  ;;  %p11709_p0 = scmp.lt.s32.totalorder (!%p13701_p9), %s1989_s28, %s1989_s28 }
  0xd1   : > { %p11703_p11 = scmp.ne.s32.totalorder (!%p13701_p9), %s1989_s28, %s11702_s1  ;;  %p11710_p1 = scmp.lt.s32.totalorder (!%p13701_p9), %s11702_s1, %s11702_s1 }
  0xd3   : > { %p11704_p12 = pnand (!%p13701_p9), %p11703_p11, %p11291_p10  ;;  %p11711_p2 = por (!%p13701_p9), %p11710_p1, %p11709_p0 }
  0xd5   : > { %p11705_p13 = pneg %p11704_p12 }
  0xd7   : > { %p11712_p3 = pnand %p11711_p2, %p11705_p13 }
  0xd9   : > { %11715 = shalt.err (!%p11712_p3)
}
  0xda   : > { %s14889_s2 = smov 128   ;;  %s14891_s16 = smov 8  }
  0xdb   : > { %11084 = dma.hbm_to_vmem [thread:$0]  (%p11291_p10), %s13256_s17, 256, %s1989_s28, [#allocation6], %s14889_s2, %s14889_s2, %s14891_s16  }
  0xdc   : > { %s13167_s23 = smov [#allocation8]   ;;  %s13168_s10 = smov [#allocation11]  }
  0xdd   : > { %s2018_s26 = sshll.u32 %s13167_s23, 4  ;;  %s2043_s0 = sshll.u32 %s13168_s10, 4  ;;  %s2019_s26 = int_to_ptr.vmem [resolvable:$true] %s2018_s26  ;;  %s2044_s0 = int_to_ptr.vmem [resolvable:$true] %s2043_s0 }
  0xde   : > { %s11726_s1 = scalar_lea.vmem %s2019_s26, 16  ;;  %s11732_s18 = scalar_lea.vmem %s2019_s26, 32 }
  0xdf   : > { %p11727_p4 = scmp.ne.s32.totalorder %s2019_s26, %s11726_s1  ;;  %p11733_p11 = scmp.lt.s32.totalorder %s2019_s26, %s2019_s26 }
  0xe0   : > { %p11734_p12 = scmp.lt.s32.totalorder %s11732_s18, %s11726_s1 }
  0xe1   : > { %p11728_p7 = pnand %p11727_p4, %p11291_p10 }
  0xe2   : > { %p11735_p13 = por %p11734_p12, %p11733_p11 }
  0xe3   : > { %p11729_p8 = pneg %p11728_p7 }
  0xe5   : > { %p11736_p0 = pnand %p11735_p13, %p11729_p8 }
  0xe7   : > { %11739 = shalt.err (!%p11736_p0)
}
  0xe8   : > { %11088 = dma.hbm_to_vmem [thread:$0]  (%p11291_p10), %s13271_s29, 16, %s2019_s26, [#allocation9]  }
  0xe9   : > { %s11750_s28 = scalar_lea.vmem %s2044_s0, 16  ;;  %s11756_s10 = scalar_lea.vmem %s2044_s0, 32 }
  0xea   : > { %p11751_p1 = scmp.ne.s32.totalorder %s2044_s0, %s11750_s28  ;;  %p11757_p6 = scmp.lt.s32.totalorder %s2044_s0, %s2044_s0 }
  0xeb   : > { %p11758_p4 = scmp.lt.s32.totalorder %s11756_s10, %s11750_s28 }
  0xec   : > { %p11752_p2 = pnand %p11751_p1, %p11291_p10 }
  0xed   : > { %p11759_p7 = por %p11758_p4, %p11757_p6 }
  0xee   : > { %p11753_p3 = pneg %p11752_p2 }
  0xf0   : > { %p11760_p5 = pnand %p11759_p7, %p11753_p3 }
  0xf2   : > { %11763 = shalt.err (!%p11760_p5)
}
  0xf3   : > { %11092 = dma.hbm_to_vmem [thread:$0]  (%p11291_p10), %s13286_s14, 16, %s2044_s0, [#allocation12]  }
  0xf4   : > { %s13169_s18 = smov [#allocation14]   ;;  %s13170_s1 = smov [#allocation17]  }
  0xf5   : > { %s2068_s23 = sshll.u32 %s13169_s18, 4  ;;  %s2093_s26 = sshll.u32 %s13170_s1, 4  ;;  %s2069_s23 = int_to_ptr.vmem [resolvable:$true] %s2068_s23  ;;  %s2094_s26 = int_to_ptr.vmem [resolvable:$true] %s2093_s26 }
  0xf6   : > { %s11774_s2 = scalar_lea.vmem %s2069_s23, 16  ;;  %s11780_s28 = scalar_lea.vmem %s2069_s23, 32 }
  0xf7   : > { %p11775_p8 = scmp.ne.s32.totalorder %s2069_s23, %s11774_s2  ;;  %p11781_p6 = scmp.lt.s32.totalorder %s2069_s23, %s2069_s23 }
  0xf8   : > { %p11782_p13 = scmp.lt.s32.totalorder %s11780_s28, %s11774_s2 }
  0xf9   : > { %p11776_p11 = pnand %p11775_p8, %p11291_p10 }
  0xfa   : > { %p11783_p5 = por %p11782_p13, %p11781_p6 }
  0xfb   : > { %p11777_p12 = pneg %p11776_p11 }
  0xfd   : > { %p11784_p0 = pnand %p11783_p5, %p11777_p12 }
  0xff   : > { %11787 = shalt.err (!%p11784_p0)
}
 0x100   : > { %11096 = dma.hbm_to_vmem [thread:$0]  (%p11291_p10), %s13301_s30, 16, %s2069_s23, [#allocation15]  }
 0x101   : > { %s11798_s0 = scalar_lea.vmem %s2094_s26, 16  ;;  %s11804_s10 = scalar_lea.vmem %s2094_s26, 32 }
 0x102   : > { %p11799_p1 = scmp.ne.s32.totalorder %s2094_s26, %s11798_s0  ;;  %p11805_p4 = scmp.lt.s32.totalorder %s2094_s26, %s2094_s26 }
 0x103   : > { %p11806_p7 = scmp.lt.s32.totalorder %s11804_s10, %s11798_s0 }
 0x104   : > { %p11800_p2 = pnand %p11799_p1, %p11291_p10 }
 0x105   : > { %p11807_p8 = por %p11806_p7, %p11805_p4 }
 0x106   : > { %p11801_p3 = pneg %p11800_p2 }
 0x108   : > { %p11808_p11 = pnand %p11807_p8, %p11801_p3 }
 0x10a   : > { %11811 = shalt.err (!%p11808_p11)
}
 0x10b   : > { %11100 = dma.hbm_to_vmem [thread:$0]  (%p11291_p10), %s13316_s20, 16, %s2094_s26, [#allocation18]  }
 0x10c   : > { %s13171_s2 = smov [#allocation20]   ;;  %s13172_s1 = smov [#allocation23]  }
 0x10d   : > { %s2115_s18 = sshll.u32 %s13171_s2, 4  ;;  %s2140_s23 = sshll.u32 %s13172_s1, 4  ;;  %s2116_s18 = int_to_ptr.vmem [resolvable:$true] %s2115_s18  ;;  %s2141_s23 = int_to_ptr.vmem [resolvable:$true] %s2140_s23 }
 0x10e   : > { %s11822_s28 = scalar_lea.vmem %s2116_s18, 128  ;;  %p11829_p5 = scmp.lt.s32.totalorder %s2116_s18, %s2116_s18 }
 0x10f   : > { %p11823_p12 = scmp.ne.s32.totalorder %s2116_s18, %s11822_s28  ;;  %p11830_p0 = scmp.lt.s32.totalorder %s11822_s28, %s11822_s28 }
 0x111   : > { %p11824_p6 = pnand %p11823_p12, %p11291_p10  ;;  %p11831_p1 = por %p11830_p0, %p11829_p5 }
 0x113   : > { %p11825_p13 = pneg %p11824_p6 }
 0x115   : > { %p11832_p2 = pnand %p11831_p1, %p11825_p13 }
 0x117   : > { %11835 = shalt.err (!%p11832_p2)
}
 0x118   : > { %s15002_s4 = sld [smem:[#allocation120_spill]]  ;;  %s11846_s26 = scalar_lea.vmem %s2141_s23, 16 }
 0x119   : > { %p11847_p3 = scmp.ne.s32.totalorder %s2141_s23, %s11846_s26  ;;  %s11852_s0 = scalar_lea.vmem %s2141_s23, 32 }
 0x11a   : > { %p11853_p8 = scmp.lt.s32.totalorder %s2141_s23, %s2141_s23  ;;  %p11854_p11 = scmp.lt.s32.totalorder %s11852_s0, %s11846_s26 }
 0x11b   : > { %p11848_p4 = pnand %p11847_p3, %p11291_p10 }
 0x11c   : > { %p11855_p12 = por %p11854_p11, %p11853_p8 }
 0x11d   : > { %p11849_p7 = pneg %p11848_p4 }
 0x11e   : > { %11104 = dma.hbm_to_vmem [thread:$0]  (%p11291_p10), %s15002_s4, 128, %s2116_s18, [#allocation21]  }
 0x11f   : > { %p11856_p6 = pnand %p11855_p12, %p11849_p7 }
 0x121   : > { %11859 = shalt.err (!%p11856_p6)
}
 0x122   : > { %s15003_s3 = sld [smem:[#allocation123_spill]]  ;;  %s13173_s10 = smov [#allocation26]  }
 0x123   : > { %s2162_s2 = sshll.u32 %s13173_s10, 4  ;;  %s13174_s1 = smov [#allocation29]   ;;  %s2163_s2 = int_to_ptr.vmem [resolvable:$true] %s2162_s2 }
 0x124   : > { %s2184_s18 = sshll.u32 %s13174_s1, 4  ;;  %s11870_s28 = scalar_lea.vmem %s2163_s2, 16  ;;  %s2185_s18 = int_to_ptr.vmem [resolvable:$true] %s2184_s18 }
 0x125   : > { %p11871_p13 = scmp.ne.s32.totalorder %s2163_s2, %s11870_s28  ;;  %s11876_s26 = scalar_lea.vmem %s2163_s2, 32 }
 0x126   : > { %p11877_p1 = scmp.lt.s32.totalorder %s2163_s2, %s2163_s2  ;;  %p11878_p2 = scmp.lt.s32.totalorder %s11876_s26, %s11870_s28 }
 0x127   : > { %p11872_p5 = pnand %p11871_p13, %p11291_p10 }
 0x128   : > { %11108 = dma.hbm_to_vmem [thread:$0]  (%p11291_p10), %s15003_s3, 16, %s2141_s23, [#allocation24]  }
 0x129   : > { %p11873_p0 = pneg %p11872_p5  ;;  %p11879_p3 = por %p11878_p2, %p11877_p1 }
 0x12b   : > { %p11880_p4 = pnand %p11879_p3, %p11873_p0 }
 0x12d   : > { %11883 = shalt.err (!%p11880_p4)
}
 0x12e   : > { %s15004_s6 = sld [smem:[#allocation125_spill]]  ;;  %s11894_s23 = scalar_lea.vmem %s2185_s18, 128 }
 0x12f   : > { %p11895_p7 = scmp.ne.s32.totalorder %s2185_s18, %s11894_s23  ;;  %p11901_p12 = scmp.lt.s32.totalorder %s2185_s18, %s2185_s18 }
 0x130   : > { %p11902_p6 = scmp.lt.s32.totalorder %s11894_s23, %s11894_s23 }
 0x131   : > { %p11896_p8 = pnand %p11895_p7, %p11291_p10 }
 0x132   : > { %p11903_p13 = por %p11902_p6, %p11901_p12 }
 0x133   : > { %p11897_p11 = pneg %p11896_p8 }
 0x134   : > { %11112 = dma.hbm_to_vmem [thread:$0]  (%p11291_p10), %s15004_s6, 16, %s2163_s2, [#allocation27]  }
 0x135   : > { %p11904_p5 = pnand %p11903_p13, %p11897_p11 }
 0x137   : > { %11907 = shalt.err (!%p11904_p5)
}
 0x138   : > { %s15005_s5 = sld [smem:[#allocation127_spill]]  ;;  %s13175_s0 = smov [#allocation32]  }
 0x139   : > { %s2212_s10 = sshll.u32 %s13175_s0, 4  ;;  %s13176_s1 = smov [#allocation35]   ;;  %s2213_s10 = int_to_ptr.vmem [resolvable:$true] %s2212_s10 }
 0x13a   : > { %s2234_s28 = sshll.u32 %s13176_s1, 4  ;;  %s11918_s2 = scalar_lea.vmem %s2213_s10, 16  ;;  %s2235_s28 = int_to_ptr.vmem [resolvable:$true] %s2234_s28 }
 0x13b   : > { %p11919_p0 = scmp.ne.s32.totalorder %s2213_s10, %s11918_s2  ;;  %s11924_s26 = scalar_lea.vmem %s2213_s10, 32 }
 0x13c   : > { %p11925_p3 = scmp.lt.s32.totalorder %s2213_s10, %s2213_s10  ;;  %p11926_p4 = scmp.lt.s32.totalorder %s11924_s26, %s11918_s2 }
 0x13d   : > { %p11920_p1 = pnand %p11919_p0, %p11291_p10 }
 0x13e   : > { %11116 = dma.hbm_to_vmem [thread:$0]  (%p11291_p10), %s15005_s5, 128, %s2185_s18, [#allocation30]  }
 0x13f   : > { %p11921_p2 = pneg %p11920_p1  ;;  %p11927_p7 = por %p11926_p4, %p11925_p3 }
 0x141   : > { %p11928_p8 = pnand %p11927_p7, %p11921_p2 }
 0x143   : > { %11931 = shalt.err (!%p11928_p8)
}
 0x144   : > { %11120 = dma.hbm_to_vmem [thread:$0]  (%p11291_p10), %s13381_s27, 16, %s2213_s10, [#allocation33]  }
 0x145   : > { %s11942_s18 = scalar_lea.vmem %s2235_s28, 16  ;;  %s11948_s23 = scalar_lea.vmem %s2235_s28, 32 }
 0x146   : > { %p11943_p11 = scmp.ne.s32.totalorder %s2235_s28, %s11942_s18  ;;  %p11949_p13 = scmp.lt.s32.totalorder %s2235_s28, %s2235_s28 }
 0x147   : > { %p11950_p5 = scmp.lt.s32.totalorder %s11948_s23, %s11942_s18 }
 0x148   : > { %p11944_p12 = pnand %p11943_p11, %p11291_p10 }
 0x149   : > { %p11951_p0 = por %p11950_p5, %p11949_p13 }
 0x14a   : > { %p11945_p6 = pneg %p11944_p12 }
 0x14c   : > { %p11952_p1 = pnand %p11951_p0, %p11945_p6 }
 0x14e   : > { %11955 = shalt.err (!%p11952_p1)
}
 0x14f   : > { %11124 = dma.hbm_to_vmem [thread:$0]  (%p11291_p10), %s13391_s24, 16, %s2235_s28, [#allocation36]  }
 0x150   : > { %s13177_s0 = smov [#allocation38]   ;;  %s13178_s2 = smov [#allocation41]  }
 0x151   : > { %s2258_s1 = sshll.u32 %s13177_s0, 4  ;;  %s2283_s10 = sshll.u32 %s13178_s2, 4  ;;  %s2259_s1 = int_to_ptr.vmem [resolvable:$true] %s2258_s1  ;;  %s2284_s10 = int_to_ptr.vmem [resolvable:$true] %s2283_s10 }
 0x152   : > { %s11966_s26 = scalar_lea.vmem %s2259_s1, 16  ;;  %s11972_s18 = scalar_lea.vmem %s2259_s1, 32 }
 0x153   : > { %p11967_p2 = scmp.ne.s32.totalorder %s2259_s1, %s11966_s26  ;;  %p11973_p7 = scmp.lt.s32.totalorder %s2259_s1, %s2259_s1 }
 0x154   : > { %p11974_p8 = scmp.lt.s32.totalorder %s11972_s18, %s11966_s26 }
 0x155   : > { %p11968_p3 = pnand %p11967_p2, %p11291_p10 }
 0x156   : > { %p11975_p11 = por %p11974_p8, %p11973_p7 }
 0x157   : > { %p11969_p4 = pneg %p11968_p3 }
 0x159   : > { %p11976_p12 = pnand %p11975_p11, %p11969_p4 }
 0x15b   : > { %11979 = shalt.err (!%p11976_p12)
}
 0x15c   : > { %11128 = dma.hbm_to_vmem [thread:$0]  (%p11291_p10), %s13401_s12, 16, %s2259_s1, [#allocation39]  }
 0x15d   : > { %s11990_s28 = scalar_lea.vmem %s2284_s10, 16  ;;  %s11996_s23 = scalar_lea.vmem %s2284_s10, 32 }
 0x15e   : > { %p11991_p6 = scmp.ne.s32.totalorder %s2284_s10, %s11990_s28  ;;  %p11997_p0 = scmp.lt.s32.totalorder %s2284_s10, %s2284_s10 }
 0x15f   : > { %p11998_p1 = scmp.lt.s32.totalorder %s11996_s23, %s11990_s28 }
 0x160   : > { %p11992_p13 = pnand %p11991_p6, %p11291_p10 }
 0x161   : > { %p11999_p2 = por %p11998_p1, %p11997_p0 }
 0x162   : > { %p11993_p5 = pneg %p11992_p13 }
 0x164   : > { %p12000_p3 = pnand %p11999_p2, %p11993_p5 }
 0x166   : > { %12003 = shalt.err (!%p12000_p3)
}
 0x167   : > { %11132 = dma.hbm_to_vmem [thread:$0]  (%p11291_p10), %s13416_s25, 16, %s2284_s10, [#allocation42]  }
 0x168   : > { %s13179_s0 = smov [#allocation44]   ;;  %s13180_s26 = smov [#allocation47]  }
 0x169   : > { %s2305_s2 = sshll.u32 %s13179_s0, 4  ;;  %s2330_s1 = sshll.u32 %s13180_s26, 4  ;;  %s2306_s2 = int_to_ptr.vmem [resolvable:$true] %s2305_s2  ;;  %s2331_s1 = int_to_ptr.vmem [resolvable:$true] %s2330_s1 }
 0x16a   : > { %s12014_s18 = scalar_lea.vmem %s2306_s2, 64  ;;  %p12021_p11 = scmp.lt.s32.totalorder %s2306_s2, %s2306_s2 }
 0x16b   : > { %p12015_p4 = scmp.ne.s32.totalorder %s2306_s2, %s12014_s18  ;;  %p12022_p12 = scmp.lt.s32.totalorder %s12014_s18, %s12014_s18 }
 0x16d   : > { %p12016_p7 = pnand %p12015_p4, %p11291_p10  ;;  %p12023_p6 = por %p12022_p12, %p12021_p11 }
 0x16f   : > { %p12017_p8 = pneg %p12016_p7 }
 0x171   : > { %p12024_p13 = pnand %p12023_p6, %p12017_p8 }
 0x173   : > { %12027 = shalt.err (!%p12024_p13)
}
 0x174   : > { %11136 = dma.hbm_to_vmem [thread:$0]  (%p11291_p10), %s13426_s9, 64, %s2306_s2, [#allocation45]  }
 0x175   : > { %s12038_s10 = scalar_lea.vmem %s2331_s1, 16  ;;  %s12044_s28 = scalar_lea.vmem %s2331_s1, 32 }
 0x176   : > { %p12039_p5 = scmp.ne.s32.totalorder %s2331_s1, %s12038_s10  ;;  %p12045_p2 = scmp.lt.s32.totalorder %s2331_s1, %s2331_s1 }
 0x177   : > { %p12046_p3 = scmp.lt.s32.totalorder %s12044_s28, %s12038_s10 }
 0x178   : > { %p12040_p0 = pnand %p12039_p5, %p11291_p10 }
 0x179   : > { %p12047_p4 = por %p12046_p3, %p12045_p2 }
 0x17a   : > { %p12041_p1 = pneg %p12040_p0 }
 0x17c   : > { %p12048_p7 = pnand %p12047_p4, %p12041_p1 }
 0x17e   : > { %12051 = shalt.err (!%p12048_p7)
}
 0x17f   : > { %s15006_s23 = sld [smem:[#allocation138_spill]]  ;;  %s13181_s0 = smov [#allocation50]  }
 0x180   : > { %s2352_s26 = sshll.u32 %s13181_s0, 4  ;;  %s13182_s18 = smov [#allocation53]   ;;  %s2353_s26 = int_to_ptr.vmem [resolvable:$true] %s2352_s26 }
 0x181   : > { %s2374_s2 = sshll.u32 %s13182_s18, 4  ;;  %s12062_s16 = scalar_lea.vmem %s2353_s26, 16  ;;  %s2375_s2 = int_to_ptr.vmem [resolvable:$true] %s2374_s2 }
 0x182   : > { %p12063_p8 = scmp.ne.s32.totalorder %s2353_s26, %s12062_s16  ;;  %s12068_s10 = scalar_lea.vmem %s2353_s26, 32 }
 0x183   : > { %p12069_p6 = scmp.lt.s32.totalorder %s2353_s26, %s2353_s26  ;;  %p12070_p13 = scmp.lt.s32.totalorder %s12068_s10, %s12062_s16 }
 0x184   : > { %p12064_p11 = pnand %p12063_p8, %p11291_p10 }
 0x185   : > { %11140 = dma.hbm_to_vmem [thread:$0]  (%p11291_p10), %s15006_s23, 16, %s2331_s1, [#allocation48]  }
 0x186   : > { %p12065_p12 = pneg %p12064_p11  ;;  %p12071_p5 = por %p12070_p13, %p12069_p6 }
 0x188   : > { %p12072_p0 = pnand %p12071_p5, %p12065_p12 }
 0x18a   : > { %12075 = shalt.err (!%p12072_p0)
}
 0x18b   : > { %s15007_s1 = sld [smem:[#allocation140_spill]]  ;;  %s12086_s28 = scalar_lea.vmem %s2375_s2, 64 }
 0x18c   : > { %p12087_p1 = scmp.ne.s32.totalorder %s2375_s2, %s12086_s28  ;;  %p12093_p4 = scmp.lt.s32.totalorder %s2375_s2, %s2375_s2 }
 0x18d   : > { %p12094_p7 = scmp.lt.s32.totalorder %s12086_s28, %s12086_s28 }
 0x18e   : > { %p12088_p2 = pnand %p12087_p1, %p11291_p10 }
 0x18f   : > { %p12095_p8 = por %p12094_p7, %p12093_p4 }
 0x190   : > { %p12089_p3 = pneg %p12088_p2 }
 0x191   : > { %11144 = dma.hbm_to_vmem [thread:$0]  (%p11291_p10), %s15007_s1, 16, %s2353_s26, [#allocation51]  }
 0x192   : > { %p12096_p11 = pnand %p12095_p8, %p12089_p3 }
 0x194   : > { %12099 = shalt.err (!%p12096_p11)
}
 0x195   : > { %s15008_s16 = sld [smem:[#allocation142_spill]]  ;;  %s13183_s23 = smov [#allocation56]  }
 0x196   : > { %s2398_s0 = sshll.u32 %s13183_s23, 4  ;;  %s13184_s18 = smov [#allocation59]   ;;  %s2399_s0 = int_to_ptr.vmem [resolvable:$true] %s2398_s0 }
 0x197   : > { %s2422_s10 = sshll.u32 %s13184_s18, 4  ;;  %s12110_s26 = scalar_lea.vmem %s2399_s0, 16  ;;  %s2423_s10 = int_to_ptr.vmem [resolvable:$true] %s2422_s10 }
 0x198   : > { %p12111_p12 = scmp.ne.s32.totalorder %s2399_s0, %s12110_s26  ;;  %s12116_s1 = scalar_lea.vmem %s2399_s0, 32 }
 0x199   : > { %p12117_p5 = scmp.lt.s32.totalorder %s2399_s0, %s2399_s0  ;;  %p12118_p0 = scmp.lt.s32.totalorder %s12116_s1, %s12110_s26 }
 0x19a   : > { %p12112_p6 = pnand %p12111_p12, %p11291_p10 }
 0x19b   : > { %11148 = dma.hbm_to_vmem [thread:$0]  (%p11291_p10), %s15008_s16, 64, %s2375_s2, [#allocation54]  }
 0x19c   : > { %p12113_p13 = pneg %p12112_p6  ;;  %p12119_p1 = por %p12118_p0, %p12117_p5 }
 0x19e   : > { %p12120_p2 = pnand %p12119_p1, %p12113_p13 }
 0x1a0   : > { %12123 = shalt.err (!%p12120_p2)
}
 0x1a1   : > { %s15009_s2 = sld [smem:[#allocation144_spill]]  ;;  %s12134_s28 = scalar_lea.vmem %s2423_s10, 16 }
 0x1a2   : > { %p12135_p3 = scmp.ne.s32.totalorder %s2423_s10, %s12134_s28  ;;  %s12140_s16 = scalar_lea.vmem %s2423_s10, 32 }
 0x1a3   : > { %p12141_p8 = scmp.lt.s32.totalorder %s2423_s10, %s2423_s10  ;;  %p12142_p11 = scmp.lt.s32.totalorder %s12140_s16, %s12134_s28 }
 0x1a4   : > { %p12136_p4 = pnand %p12135_p3, %p11291_p10 }
 0x1a5   : > { %p12143_p12 = por %p12142_p11, %p12141_p8 }
 0x1a6   : > { %p12137_p7 = pneg %p12136_p4 }
 0x1a7   : > { %11152 = dma.hbm_to_vmem [thread:$0]  (%p11291_p10), %s15009_s2, 16, %s2399_s0, [#allocation57]  }
 0x1a8   : > { %p12144_p6 = pnand %p12143_p12, %p12137_p7 }
 0x1aa   : > { %12147 = shalt.err (!%p12144_p6)
}
 0x1ab   : > { %s15010_s23 = sld [smem:[#allocation146_spill]]  ;;  %s13185_s18 = smov [#allocation62]  }
 0x1ac   : > { %s2444_s26 = sshll.u32 %s13185_s18, 4  ;;  %s13186_s1 = smov [#allocation65]   ;;  %s2445_s26 = int_to_ptr.vmem [resolvable:$true] %s2444_s26 }
 0x1ad   : > { %s2468_s0 = sshll.u32 %s13186_s1, 4  ;;  %s12158_s2 = scalar_lea.vmem %s2445_s26, 16  ;;  %s2469_s0 = int_to_ptr.vmem [resolvable:$true] %s2468_s0 }
 0x1ae   : > { %p12159_p13 = scmp.ne.s32.totalorder %s2445_s26, %s12158_s2  ;;  %s12164_s28 = scalar_lea.vmem %s2445_s26, 32 }
 0x1af   : > { %p12165_p1 = scmp.lt.s32.totalorder %s2445_s26, %s2445_s26  ;;  %p12166_p2 = scmp.lt.s32.totalorder %s12164_s28, %s12158_s2 }
 0x1b0   : > { %p12160_p5 = pnand %p12159_p13, %p11291_p10 }
 0x1b1   : > { %11156 = dma.hbm_to_vmem [thread:$0]  (%p11291_p10), %s15010_s23, 16, %s2423_s10, [#allocation60]  }
 0x1b2   : > { %p12161_p0 = pneg %p12160_p5  ;;  %p12167_p3 = por %p12166_p2, %p12165_p1 }
 0x1b4   : > { %p12168_p4 = pnand %p12167_p3, %p12161_p0 }
 0x1b6   : > { %12171 = shalt.err (!%p12168_p4)
}
 0x1b7   : > { %s15011_s10 = sld [smem:[#allocation148_spill]]  ;;  %s12182_s16 = scalar_lea.vmem %s2469_s0, 16 }
 0x1b8   : > { %p12183_p7 = scmp.ne.s32.totalorder %s2469_s0, %s12182_s16  ;;  %s12188_s23 = scalar_lea.vmem %s2469_s0, 32 }
 0x1b9   : > { %p12189_p12 = scmp.lt.s32.totalorder %s2469_s0, %s2469_s0  ;;  %p12190_p6 = scmp.lt.s32.totalorder %s12188_s23, %s12182_s16 }
 0x1ba   : > { %p12184_p8 = pnand %p12183_p7, %p11291_p10 }
 0x1bb   : > { %p12191_p13 = por %p12190_p6, %p12189_p12 }
 0x1bc   : > { %p12185_p11 = pneg %p12184_p8 }
 0x1bd   : > { %11160 = dma.hbm_to_vmem [thread:$0]  (%p11291_p10), %s15011_s10, 16, %s2445_s26, [#allocation63]  }
 0x1be   : > { %p12192_p5 = pnand %p12191_p13, %p12185_p11 }
 0x1c0   : > { %12195 = shalt.err (!%p12192_p5)
}
 0x1c1   : > { %s15012_s18 = sld [smem:[#allocation150_spill]]  ;;  %s13187_s1 = smov [#allocation68]  }
 0x1c2   : > { %s2493_s2 = sshll.u32 %s13187_s1, 4  ;;  %s13188_s28 = smov [#allocation71]   ;;  %s2494_s2 = int_to_ptr.vmem [resolvable:$true] %s2493_s2 }
 0x1c3   : > { %s2515_s26 = sshll.u32 %s13188_s28, 4  ;;  %s12206_s10 = scalar_lea.vmem %s2494_s2, 16  ;;  %s2516_s26 = int_to_ptr.vmem [resolvable:$true] %s2515_s26 }
 0x1c4   : > { %p12207_p0 = scmp.ne.s32.totalorder %s2494_s2, %s12206_s10  ;;  %s12212_s16 = scalar_lea.vmem %s2494_s2, 32 }
 0x1c5   : > { %p12213_p3 = scmp.lt.s32.totalorder %s2494_s2, %s2494_s2  ;;  %p12214_p4 = scmp.lt.s32.totalorder %s12212_s16, %s12206_s10 }
 0x1c6   : > { %p12208_p1 = pnand %p12207_p0, %p11291_p10 }
 0x1c7   : > { %11164 = dma.hbm_to_vmem [thread:$0]  (%p11291_p10), %s15012_s18, 16, %s2469_s0, [#allocation66]  }
 0x1c8   : > { %p12209_p2 = pneg %p12208_p1  ;;  %p12215_p7 = por %p12214_p4, %p12213_p3 }
 0x1ca   : > { %p12216_p8 = pnand %p12215_p7, %p12209_p2 }
 0x1cc   : > { %12219 = shalt.err (!%p12216_p8)
}
 0x1cd   : > { %s15013_s0 = sld [smem:[#allocation153_spill]]  ;;  %s12230_s23 = scalar_lea.vmem %s2516_s26, 32 }
 0x1ce   : > { %p12231_p11 = scmp.ne.s32.totalorder %s2516_s26, %s12230_s23  ;;  %p12237_p13 = scmp.lt.s32.totalorder %s2516_s26, %s2516_s26 }
 0x1cf   : > { %p12238_p5 = scmp.lt.s32.totalorder %s12230_s23, %s12230_s23 }
 0x1d0   : > { %p12232_p12 = pnand %p12231_p11, %p11291_p10 }
 0x1d1   : > { %p12239_p0 = por %p12238_p5, %p12237_p13 }
 0x1d2   : > { %p12233_p6 = pneg %p12232_p12 }
 0x1d3   : > { %11168 = dma.hbm_to_vmem [thread:$0]  (%p11291_p10), %s15013_s0, 16, %s2494_s2, [#allocation69]  }
 0x1d4   : > { %p12240_p1 = pnand %p12239_p0, %p12233_p6 }
 0x1d6   : > { %12243 = shalt.err (!%p12240_p1)
}
 0x1d7   : > { %s15014_s18 = sld [smem:[#allocation155_spill]]  ;;  %s13189_s1 = smov [#allocation74]  }
 0x1d8   : > { %s2540_s28 = sshll.u32 %s13189_s1, 4  ;;  %s13190_s10 = smov [#allocation77]   ;;  %s2541_s28 = int_to_ptr.vmem [resolvable:$true] %s2540_s28 }
 0x1d9   : > { %s2562_s16 = sshll.u32 %s13190_s10, 4  ;;  %s12254_s2 = scalar_lea.vmem %s2541_s28, 16  ;;  %s2563_s16 = int_to_ptr.vmem [resolvable:$true] %s2562_s16 }
 0x1da   : > { %p12255_p2 = scmp.ne.s32.totalorder %s2541_s28, %s12254_s2  ;;  %s12260_s0 = scalar_lea.vmem %s2541_s28, 32 }
 0x1db   : > { %p12261_p7 = scmp.lt.s32.totalorder %s2541_s28, %s2541_s28  ;;  %p12262_p8 = scmp.lt.s32.totalorder %s12260_s0, %s12254_s2 }
 0x1dc   : > { %p12256_p3 = pnand %p12255_p2, %p11291_p10 }
 0x1dd   : > { %11172 = dma.hbm_to_vmem [thread:$0]  (%p11291_p10), %s15014_s18, 32, %s2516_s26, [#allocation72]  }
 0x1de   : > { %p12257_p4 = pneg %p12256_p3  ;;  %p12263_p11 = por %p12262_p8, %p12261_p7 }
 0x1e0   : > { %p12264_p12 = pnand %p12263_p11, %p12257_p4 }
 0x1e2   : > { %12267 = shalt.err (!%p12264_p12)
}
 0x1e3   : > { %s15015_s26 = sld [smem:[#allocation158_spill]]  ;;  %s12278_s23 = scalar_lea.vmem %s2563_s16, 16 }
 0x1e4   : > { %p12279_p6 = scmp.ne.s32.totalorder %s2563_s16, %s12278_s23  ;;  %s12284_s18 = scalar_lea.vmem %s2563_s16, 32 }
 0x1e5   : > { %p12285_p0 = scmp.lt.s32.totalorder %s2563_s16, %s2563_s16  ;;  %p12286_p1 = scmp.lt.s32.totalorder %s12284_s18, %s12278_s23 }
 0x1e6   : > { %p12280_p13 = pnand %p12279_p6, %p11291_p10 }
 0x1e7   : > { %p12287_p2 = por %p12286_p1, %p12285_p0 }
 0x1e8   : > { %p12281_p5 = pneg %p12280_p13 }
 0x1e9   : > { %11176 = dma.hbm_to_vmem [thread:$0]  (%p11291_p10), %s15015_s26, 16, %s2541_s28, [#allocation75]  }
 0x1ea   : > { %p12288_p3 = pnand %p12287_p2, %p12281_p5 }
 0x1ec   : > { %12291 = shalt.err (!%p12288_p3)
}
 0x1ed   : > { %s15016_s1 = sld [smem:[#allocation160_spill]]  ;;  %s13191_s10 = smov [#allocation2]  }
 0x1ee   : > { %s1978_s2 = sshll.u32 %s13191_s10, 4  ;;  %s13192_s28 = smov [#allocation7]   ;;  %s1979_s2 = int_to_ptr.vmem [resolvable:$true] %s1978_s2 }
 0x1ef   : > { %s2001_s0 = sshll.u32 %s13192_s28, 4  ;;  %s12302_s26 = scalar_lea.vmem %s1979_s2, 16  ;;  %s2002_s0 = int_to_ptr.vmem [resolvable:$true] %s2001_s0 }
 0x1f0   : > { %p12303_p4 = scmp.ne.s32.totalorder %s1979_s2, %s12302_s26  ;;  %s12308_s3 = scalar_lea.vmem %s1979_s2, 32 }
 0x1f1   : > { %p12309_p11 = scmp.lt.s32.totalorder %s1979_s2, %s1979_s2  ;;  %p12310_p12 = scmp.lt.s32.totalorder %s12308_s3, %s12302_s26 }
 0x1f2   : > { %p12304_p7 = pnand %p12303_p4, %p11291_p10 }
 0x1f3   : > { %11180 = dma.hbm_to_vmem [thread:$0]  (%p11291_p10), %s15016_s1, 16, %s2563_s16, [#allocation78]  }
 0x1f4   : > { %p12305_p8 = pneg %p12304_p7  ;;  %p12311_p6 = por %p12310_p12, %p12309_p11 }
 0x1f6   : > { %p12312_p13 = pnand %p12311_p6, %p12305_p8 }
 0x1f8   : > { %12315 = shalt.err (!%p12312_p13)
}
 0x1f9   : > { %s15017_s23 = sld [smem:[#allocation110_spill]]  ;;  %s12326_s16 = scalar_lea.vmem %s2002_s0, 256 }
 0x1fa   : > { %p12327_p5 = scmp.ne.s32.totalorder %s2002_s0, %s12326_s16  ;;  %p12333_p2 = scmp.lt.s32.totalorder %s2002_s0, %s2002_s0 }
 0x1fb   : > { %p12334_p3 = scmp.lt.s32.totalorder %s12326_s16, %s12326_s16 }
 0x1fc   : > { %p12328_p0 = pnand %p12327_p5, %p11291_p10 }
 0x1fd   : > { %p12335_p4 = por %p12334_p3, %p12333_p2 }
 0x1fe   : > { %p12329_p1 = pneg %p12328_p0 }
 0x1ff   : > { %11082 = dma.hbm_to_vmem [thread:$0]  (%p11291_p10), %s15017_s23, 16, %s1979_s2, [#allocation3]  }
 0x200   : > { %p12336_p7 = pnand %p12335_p4, %p12329_p1 }
 0x202   : > { %12339 = shalt.err (!%p12336_p7)
}
 0x203   : > { %s15018_s3 = smov 8   ;;  %s15019_s18 = smov 128  }
 0x204   : > { %s15020_s1 = sld [smem:[#allocation111_spill]]  ;;  %s13193_s10 = smov [#allocation10]  }
 0x205   : > { %s2032_s2 = sshll.u32 %s13193_s10, 4  ;;  %s13194_s28 = smov [#allocation13]   ;;  %s2033_s2 = int_to_ptr.vmem [resolvable:$true] %s2032_s2 }
 0x206   : > { %s2054_s26 = sshll.u32 %s13194_s28, 4  ;;  %s12350_s23 = scalar_lea.vmem %s2033_s2, 16  ;;  %s2055_s26 = int_to_ptr.vmem [resolvable:$true] %s2054_s26 }
 0x207   : > { %p12351_p8 = scmp.ne.s32.totalorder %s2033_s2, %s12350_s23  ;;  %s12356_s16 = scalar_lea.vmem %s2033_s2, 32 }
 0x208   : > { %p12357_p6 = scmp.lt.s32.totalorder %s2033_s2, %s2033_s2  ;;  %p12358_p13 = scmp.lt.s32.totalorder %s12356_s16, %s12350_s23 }
 0x209   : > { %p12352_p11 = pnand %p12351_p8, %p11291_p10 }
 0x20a   : > { %11086 = dma.hbm_to_vmem [thread:$0]  (%p11291_p10), %s15020_s1, 256, %s2002_s0, [#allocation6], %s15019_s18, %s15019_s18, %s15018_s3  }
 0x20b   : > { %p12353_p12 = pneg %p12352_p11  ;;  %p12359_p5 = por %p12358_p13, %p12357_p6 }
 0x20d   : > { %p12360_p0 = pnand %p12359_p5, %p12353_p12 }
 0x20f   : > { %12363 = shalt.err (!%p12360_p0)
}
 0x210   : > { %s15021_s4 = sld [smem:[#allocation114_spill]]  ;;  %s12374_s0 = scalar_lea.vmem %s2055_s26, 16 }
 0x211   : > { %p12375_p1 = scmp.ne.s32.totalorder %s2055_s26, %s12374_s0  ;;  %s12380_s1 = scalar_lea.vmem %s2055_s26, 32 }
 0x212   : > { %p12381_p4 = scmp.lt.s32.totalorder %s2055_s26, %s2055_s26  ;;  %p12382_p7 = scmp.lt.s32.totalorder %s12380_s1, %s12374_s0 }
 0x213   : > { %p12376_p2 = pnand %p12375_p1, %p11291_p10 }
 0x214   : > { %p12383_p8 = por %p12382_p7, %p12381_p4 }
 0x215   : > { %p12377_p3 = pneg %p12376_p2 }
 0x216   : > { %11090 = dma.hbm_to_vmem [thread:$0]  (%p11291_p10), %s15021_s4, 16, %s2033_s2, [#allocation9]  }
 0x217   : > { %p12384_p11 = pnand %p12383_p8, %p12377_p3 }
 0x219   : > { %12387 = shalt.err (!%p12384_p11)
}
 0x21a   : > { %s15022_s10 = sld [smem:[#allocation115_spill]]  ;;  %s13195_s28 = smov [#allocation16]  }
 0x21b   : > { %s2082_s23 = sshll.u32 %s13195_s28, 4  ;;  %s13196_s4 = smov [#allocation19]   ;;  %s2083_s23 = int_to_ptr.vmem [resolvable:$true] %s2082_s23 }
 0x21c   : > { %s2104_s2 = sshll.u32 %s13196_s4, 4  ;;  %s12398_s16 = scalar_lea.vmem %s2083_s23, 16  ;;  %s2105_s2 = int_to_ptr.vmem [resolvable:$true] %s2104_s2 }
 0x21d   : > { %p12399_p12 = scmp.ne.s32.totalorder %s2083_s23, %s12398_s16  ;;  %s12404_s5 = scalar_lea.vmem %s2083_s23, 32 }
 0x21e   : > { %p12405_p5 = scmp.lt.s32.totalorder %s2083_s23, %s2083_s23  ;;  %p12406_p0 = scmp.lt.s32.totalorder %s12404_s5, %s12398_s16 }
 0x21f   : > { %p12400_p6 = pnand %p12399_p12, %p11291_p10 }
 0x220   : > { %11094 = dma.hbm_to_vmem [thread:$0]  (%p11291_p10), %s15022_s10, 16, %s2055_s26, [#allocation12]  }
 0x221   : > { %p12401_p13 = pneg %p12400_p6  ;;  %p12407_p1 = por %p12406_p0, %p12405_p5 }
 0x223   : > { %p12408_p2 = pnand %p12407_p1, %p12401_p13 }
 0x225   : > { %12411 = shalt.err (!%p12408_p2)
}
 0x226   : > { %s15023_s0 = sld [smem:[#allocation118_spill]]  ;;  %s12422_s26 = scalar_lea.vmem %s2105_s2, 16 }
 0x227   : > { %p12423_p3 = scmp.ne.s32.totalorder %s2105_s2, %s12422_s26  ;;  %s12428_s1 = scalar_lea.vmem %s2105_s2, 32 }
 0x228   : > { %p12429_p8 = scmp.lt.s32.totalorder %s2105_s2, %s2105_s2  ;;  %p12430_p11 = scmp.lt.s32.totalorder %s12428_s1, %s12422_s26 }
 0x229   : > { %p12424_p4 = pnand %p12423_p3, %p11291_p10 }
 0x22a   : > { %p12431_p12 = por %p12430_p11, %p12429_p8 }
 0x22b   : > { %p12425_p7 = pneg %p12424_p4 }
 0x22c   : > { %11098 = dma.hbm_to_vmem [thread:$0]  (%p11291_p10), %s15023_s0, 16, %s2083_s23, [#allocation15]  }
 0x22d   : > { %p12432_p6 = pnand %p12431_p12, %p12425_p7 }
 0x22f   : > { %12435 = shalt.err (!%p12432_p6)
}
 0x230   : > { %s15024_s5 = sld [smem:[#allocation119_spill]]  ;;  %s13197_s10 = smov [#allocation22]  }
 0x231   : > { %s2129_s28 = sshll.u32 %s13197_s10, 4  ;;  %s13198_s23 = smov [#allocation25]   ;;  %s2130_s28 = int_to_ptr.vmem [resolvable:$true] %s2129_s28 }
 0x232   : > { %s2151_s4 = sshll.u32 %s13198_s23, 4  ;;  %s12446_s16 = scalar_lea.vmem %s2130_s28, 16  ;;  %s2152_s4 = int_to_ptr.vmem [resolvable:$true] %s2151_s4 }
 0x233   : > { %p12447_p13 = scmp.ne.s32.totalorder %s2130_s28, %s12446_s16  ;;  %s12452_s0 = scalar_lea.vmem %s2130_s28, 32 }
 0x234   : > { %p12453_p1 = scmp.lt.s32.totalorder %s2130_s28, %s2130_s28  ;;  %p12454_p2 = scmp.lt.s32.totalorder %s12452_s0, %s12446_s16 }
 0x235   : > { %p12448_p5 = pnand %p12447_p13, %p11291_p10 }
 0x236   : > { %11102 = dma.hbm_to_vmem [thread:$0]  (%p11291_p10), %s15024_s5, 16, %s2105_s2, [#allocation18]  }
 0x237   : > { %p12449_p0 = pneg %p12448_p5  ;;  %p12455_p3 = por %p12454_p2, %p12453_p1 }
 0x239   : > { %p12456_p4 = pnand %p12455_p3, %p12449_p0 }
 0x23b   : > { %12459 = shalt.err (!%p12456_p4)
}
 0x23c   : > { %s15025_s26 = sld [smem:[#allocation122_spill]]  ;;  %s12470_s2 = scalar_lea.vmem %s2152_s4, 16 }
 0x23d   : > { %p12471_p7 = scmp.ne.s32.totalorder %s2152_s4, %s12470_s2  ;;  %s12476_s1 = scalar_lea.vmem %s2152_s4, 32 }
 0x23e   : > { %p12477_p12 = scmp.lt.s32.totalorder %s2152_s4, %s2152_s4  ;;  %p12478_p6 = scmp.lt.s32.totalorder %s12476_s1, %s12470_s2 }
 0x23f   : > { %p12472_p8 = pnand %p12471_p7, %p11291_p10 }
 0x240   : > { %p12479_p13 = por %p12478_p6, %p12477_p12 }
 0x241   : > { %p12473_p11 = pneg %p12472_p8 }
 0x242   : > { %11106 = dma.hbm_to_vmem [thread:$0]  (%p11291_p10), %s15025_s26, 16, %s2130_s28, [#allocation21]  }
 0x243   : > { %p12480_p5 = pnand %p12479_p13, %p12473_p11 }
 0x245   : > { %12483 = shalt.err (!%p12480_p5)
}
 0x246   : > { %s15026_s5 = sld [smem:[#allocation124_spill]]  ;;  %s13199_s10 = smov [#allocation28]  }
 0x247   : > { %s2173_s23 = sshll.u32 %s13199_s10, 4  ;;  %s13200_s28 = smov [#allocation31]   ;;  %s2174_s23 = int_to_ptr.vmem [resolvable:$true] %s2173_s23 }
 0x248   : > { %s2198_s16 = sshll.u32 %s13200_s28, 4  ;;  %s12494_s0 = scalar_lea.vmem %s2174_s23, 16  ;;  %s2199_s16 = int_to_ptr.vmem [resolvable:$true] %s2198_s16 }
 0x249   : > { %p12495_p0 = scmp.ne.s32.totalorder %s2174_s23, %s12494_s0  ;;  %s12500_s26 = scalar_lea.vmem %s2174_s23, 32 }
 0x24a   : > { %p12501_p3 = scmp.lt.s32.totalorder %s2174_s23, %s2174_s23  ;;  %p12502_p4 = scmp.lt.s32.totalorder %s12500_s26, %s12494_s0 }
 0x24b   : > { %p12496_p1 = pnand %p12495_p0, %p11291_p10 }
 0x24c   : > { %11110 = dma.hbm_to_vmem [thread:$0]  (%p11291_p10), %s15026_s5, 16, %s2152_s4, [#allocation24]  }
 0x24d   : > { %p12497_p2 = pneg %p12496_p1  ;;  %p12503_p7 = por %p12502_p4, %p12501_p3 }
 0x24f   : > { %p12504_p8 = pnand %p12503_p7, %p12497_p2 }
 0x251   : > { %12507 = shalt.err (!%p12504_p8)
}
 0x252   : > { %s15027_s2 = sld [smem:[#allocation126_spill]]  ;;  %s12518_s4 = scalar_lea.vmem %s2199_s16, 16 }
 0x253   : > { %p12519_p11 = scmp.ne.s32.totalorder %s2199_s16, %s12518_s4  ;;  %s12524_s1 = scalar_lea.vmem %s2199_s16, 32 }
 0x254   : > { %p12525_p13 = scmp.lt.s32.totalorder %s2199_s16, %s2199_s16  ;;  %p12526_p5 = scmp.lt.s32.totalorder %s12524_s1, %s12518_s4 }
 0x255   : > { %p12520_p12 = pnand %p12519_p11, %p11291_p10 }
 0x256   : > { %p12527_p0 = por %p12526_p5, %p12525_p13 }
 0x257   : > { %p12521_p6 = pneg %p12520_p12 }
 0x258   : > { %11114 = dma.hbm_to_vmem [thread:$0]  (%p11291_p10), %s15027_s2, 16, %s2174_s23, [#allocation27]  }
 0x259   : > { %p12528_p1 = pnand %p12527_p0, %p12521_p6 }
 0x25b   : > { %12531 = shalt.err (!%p12528_p1)
}
 0x25c   : > { %s15028_s5 = sld [smem:[#allocation129_spill]]  ;;  %s13201_s10 = smov [#allocation34]  }
 0x25d   : > { %s2223_s28 = sshll.u32 %s13201_s10, 4  ;;  %s13202_s23 = smov [#allocation37]   ;;  %s2224_s28 = int_to_ptr.vmem [resolvable:$true] %s2223_s28 }
 0x25e   : > { %s2244_s0 = sshll.u32 %s13202_s23, 4  ;;  %s12542_s26 = scalar_lea.vmem %s2224_s28, 16  ;;  %s2245_s0 = int_to_ptr.vmem [resolvable:$true] %s2244_s0 }
 0x25f   : > { %p12543_p2 = scmp.ne.s32.totalorder %s2224_s28, %s12542_s26  ;;  %s12548_s2 = scalar_lea.vmem %s2224_s28, 32 }
 0x260   : > { %p12549_p7 = scmp.lt.s32.totalorder %s2224_s28, %s2224_s28  ;;  %p12550_p8 = scmp.lt.s32.totalorder %s12548_s2, %s12542_s26 }
 0x261   : > { %p12544_p3 = pnand %p12543_p2, %p11291_p10 }
 0x262   : > { %11118 = dma.hbm_to_vmem [thread:$0]  (%p11291_p10), %s15028_s5, 16, %s2199_s16, [#allocation30]  }
 0x263   : > { %p12545_p4 = pneg %p12544_p3  ;;  %p12551_p11 = por %p12550_p8, %p12549_p7 }
 0x265   : > { %p12552_p12 = pnand %p12551_p11, %p12545_p4 }
 0x267   : > { %12555 = shalt.err (!%p12552_p12)
}
 0x268   : > { %s15029_s4 = sld [smem:[#allocation131_spill]]  ;;  %s12566_s16 = scalar_lea.vmem %s2245_s0, 512 }
 0x269   : > { %p12567_p6 = scmp.ne.s32.totalorder %s2245_s0, %s12566_s16  ;;  %p12573_p0 = scmp.lt.s32.totalorder %s2245_s0, %s2245_s0 }
 0x26a   : > { %p12574_p1 = scmp.lt.s32.totalorder %s12566_s16, %s12566_s16 }
 0x26b   : > { %p12568_p13 = pnand %p12567_p6, %p11291_p10 }
 0x26c   : > { %p12575_p2 = por %p12574_p1, %p12573_p0 }
 0x26d   : > { %p12569_p5 = pneg %p12568_p13 }
 0x26e   : > { %11122 = dma.hbm_to_vmem [thread:$0]  (%p11291_p10), %s15029_s4, 16, %s2224_s28, [#allocation33]  }
 0x26f   : > { %p12576_p3 = pnand %p12575_p2, %p12569_p5 }
 0x271   : > { %12579 = shalt.err (!%p12576_p3)
}
 0x272   : > { %s15030_s1 = sld [smem:[#allocation132_spill]]  ;;  %s13203_s5 = smov [#allocation40]  }
 0x273   : > { %s2272_s10 = sshll.u32 %s13203_s5, 4  ;;  %s13204_s28 = smov [#allocation43]   ;;  %s2273_s10 = int_to_ptr.vmem [resolvable:$true] %s2272_s10 }
 0x274   : > { %s2294_s23 = sshll.u32 %s13204_s28, 4  ;;  %s12590_s26 = scalar_lea.vmem %s2273_s10, 16  ;;  %s2295_s23 = int_to_ptr.vmem [resolvable:$true] %s2294_s23 }
 0x275   : > { %p12591_p4 = scmp.ne.s32.totalorder %s2273_s10, %s12590_s26  ;;  %s12596_s2 = scalar_lea.vmem %s2273_s10, 32 }
 0x276   : > { %p12597_p11 = scmp.lt.s32.totalorder %s2273_s10, %s2273_s10  ;;  %p12598_p12 = scmp.lt.s32.totalorder %s12596_s2, %s12590_s26 }
 0x277   : > { %p12592_p7 = pnand %p12591_p4, %p11291_p10 }
 0x278   : > { %11126 = dma.hbm_to_vmem [thread:$0]  (%p11291_p10), %s15030_s1, 512, %s2245_s0, [#allocation36], %s15019_s18, %s15019_s18, %s15018_s3  }
 0x279   : > { %p12593_p8 = pneg %p12592_p7  ;;  %p12599_p6 = por %p12598_p12, %p12597_p11 }
 0x27b   : > { %p12600_p13 = pnand %p12599_p6, %p12593_p8 }
 0x27d   : > { %12603 = shalt.err (!%p12600_p13)
}
 0x27e   : > { %s15031_s4 = sld [smem:[#allocation134_spill]]  ;;  %s12614_s0 = scalar_lea.vmem %s2295_s23, 16 }
 0x27f   : > { %p12615_p5 = scmp.ne.s32.totalorder %s2295_s23, %s12614_s0  ;;  %s12620_s16 = scalar_lea.vmem %s2295_s23, 32 }
 0x280   : > { %p12621_p2 = scmp.lt.s32.totalorder %s2295_s23, %s2295_s23  ;;  %p12622_p3 = scmp.lt.s32.totalorder %s12620_s16, %s12614_s0 }
 0x281   : > { %p12616_p0 = pnand %p12615_p5, %p11291_p10 }
 0x282   : > { %p12623_p4 = por %p12622_p3, %p12621_p2 }
 0x283   : > { %p12617_p1 = pneg %p12616_p0 }
 0x284   : > { %11130 = dma.hbm_to_vmem [thread:$0]  (%p11291_p10), %s15031_s4, 16, %s2273_s10, [#allocation39]  }
 0x285   : > { %p12624_p7 = pnand %p12623_p4, %p12617_p1 }
 0x287   : > { %12627 = shalt.err (!%p12624_p7)
}
 0x288   : > { %s15032_s1 = sld [smem:[#allocation135_spill]]  ;;  %s13205_s5 = smov [#allocation46]  }
 0x289   : > { %s2319_s28 = sshll.u32 %s13205_s5, 4  ;;  %s13206_s10 = smov [#allocation49]   ;;  %s2320_s28 = int_to_ptr.vmem [resolvable:$true] %s2319_s28 }
 0x28a   : > { %s2341_s26 = sshll.u32 %s13206_s10, 4  ;;  %s12638_s2 = scalar_lea.vmem %s2320_s28, 16  ;;  %s2342_s26 = int_to_ptr.vmem [resolvable:$true] %s2341_s26 }
 0x28b   : > { %p12639_p8 = scmp.ne.s32.totalorder %s2320_s28, %s12638_s2  ;;  %s12644_s4 = scalar_lea.vmem %s2320_s28, 32 }
 0x28c   : > { %p12645_p6 = scmp.lt.s32.totalorder %s2320_s28, %s2320_s28  ;;  %p12646_p13 = scmp.lt.s32.totalorder %s12644_s4, %s12638_s2 }
 0x28d   : > { %p12640_p11 = pnand %p12639_p8, %p11291_p10 }
 0x28e   : > { %11134 = dma.hbm_to_vmem [thread:$0]  (%p11291_p10), %s15032_s1, 16, %s2295_s23, [#allocation42]  }
 0x28f   : > { %p12641_p12 = pneg %p12640_p11  ;;  %p12647_p5 = por %p12646_p13, %p12645_p6 }
 0x291   : > { %p12648_p0 = pnand %p12647_p5, %p12641_p12 }
 0x293   : > { %12651 = shalt.err (!%p12648_p0)
}
 0x294   : > { %s15033_s0 = sld [smem:[#allocation137_spill]]  ;;  %s12662_s23 = scalar_lea.vmem %s2342_s26, 16 }
 0x295   : > { %p12663_p1 = scmp.ne.s32.totalorder %s2342_s26, %s12662_s23  ;;  %s12668_s16 = scalar_lea.vmem %s2342_s26, 32 }
 0x296   : > { %p12669_p4 = scmp.lt.s32.totalorder %s2342_s26, %s2342_s26  ;;  %p12670_p7 = scmp.lt.s32.totalorder %s12668_s16, %s12662_s23 }
 0x297   : > { %p12664_p2 = pnand %p12663_p1, %p11291_p10 }
 0x298   : > { %p12671_p8 = por %p12670_p7, %p12669_p4 }
 0x299   : > { %p12665_p3 = pneg %p12664_p2 }
 0x29a   : > { %11138 = dma.hbm_to_vmem [thread:$0]  (%p11291_p10), %s15033_s0, 16, %s2320_s28, [#allocation45]  }
 0x29b   : > { %p12672_p11 = pnand %p12671_p8, %p12665_p3 }
 0x29d   : > { %12675 = shalt.err (!%p12672_p11)
}
 0x29e   : > { %s15034_s1 = sld [smem:[#allocation139_spill]]  ;;  %s13207_s5 = smov [#allocation52]  }
 0x29f   : > { %s2363_s10 = sshll.u32 %s13207_s5, 4  ;;  %s13208_s28 = smov [#allocation55]   ;;  %s2364_s10 = int_to_ptr.vmem [resolvable:$true] %s2363_s10 }
 0x2a0   : > { %s2384_s2 = sshll.u32 %s13208_s28, 4  ;;  %s12686_s4 = scalar_lea.vmem %s2364_s10, 16  ;;  %s2385_s2 = int_to_ptr.vmem [resolvable:$true] %s2384_s2 }
 0x2a1   : > { %p12687_p12 = scmp.ne.s32.totalorder %s2364_s10, %s12686_s4  ;;  %s12692_s0 = scalar_lea.vmem %s2364_s10, 32 }
 0x2a2   : > { %p12693_p5 = scmp.lt.s32.totalorder %s2364_s10, %s2364_s10  ;;  %p12694_p0 = scmp.lt.s32.totalorder %s12692_s0, %s12686_s4 }
 0x2a3   : > { %p12688_p6 = pnand %p12687_p12, %p11291_p10 }
 0x2a4   : > { %11142 = dma.hbm_to_vmem [thread:$0]  (%p11291_p10), %s15034_s1, 16, %s2342_s26, [#allocation48]  }
 0x2a5   : > { %p12689_p13 = pneg %p12688_p6  ;;  %p12695_p1 = por %p12694_p0, %p12693_p5 }
 0x2a7   : > { %p12696_p2 = pnand %p12695_p1, %p12689_p13 }
 0x2a9   : > { %12699 = shalt.err (!%p12696_p2)
}
 0x2aa   : > { %s15035_s23 = sld [smem:[#allocation141_spill]]  ;;  %s12710_s26 = scalar_lea.vmem %s2385_s2, 512 }
 0x2ab   : > { %p12711_p3 = scmp.ne.s32.totalorder %s2385_s2, %s12710_s26  ;;  %p12717_p8 = scmp.lt.s32.totalorder %s2385_s2, %s2385_s2 }
 0x2ac   : > { %p12718_p11 = scmp.lt.s32.totalorder %s12710_s26, %s12710_s26 }
 0x2ad   : > { %p12712_p4 = pnand %p12711_p3, %p11291_p10 }
 0x2ae   : > { %p12719_p12 = por %p12718_p11, %p12717_p8 }
 0x2af   : > { %p12713_p7 = pneg %p12712_p4 }
 0x2b0   : > { %11146 = dma.hbm_to_vmem [thread:$0]  (%p11291_p10), %s15035_s23, 16, %s2364_s10, [#allocation51]  }
 0x2b1   : > { %p12720_p6 = pnand %p12719_p12, %p12713_p7 }
 0x2b3   : > { %12723 = shalt.err (!%p12720_p6)
}
 0x2b4   : > { %s15036_s16 = sld [smem:[#allocation143_spill]]  ;;  %s13209_s1 = smov [#allocation58]  }
 0x2b5   : > { %s2408_s5 = sshll.u32 %s13209_s1, 4  ;;  %s13210_s10 = smov [#allocation61]   ;;  %s2409_s5 = int_to_ptr.vmem [resolvable:$true] %s2408_s5 }
 0x2b6   : > { %s2433_s28 = sshll.u32 %s13210_s10, 4  ;;  %s12734_s4 = scalar_lea.vmem %s2409_s5, 512  ;;  %s2434_s28 = int_to_ptr.vmem [resolvable:$true] %s2433_s28 }
 0x2b7   : > { %p12735_p13 = scmp.ne.s32.totalorder %s2409_s5, %s12734_s4  ;;  %p12741_p1 = scmp.lt.s32.totalorder %s2409_s5, %s2409_s5 }
 0x2b8   : > { %p12742_p2 = scmp.lt.s32.totalorder %s12734_s4, %s12734_s4 }
 0x2b9   : > { %p12736_p5 = pnand %p12735_p13, %p11291_p10 }
 0x2ba   : > { %11150 = dma.hbm_to_vmem [thread:$0]  (%p11291_p10), %s15036_s16, 512, %s2385_s2, [#allocation54], %s15019_s18, %s15019_s18, %s15018_s3  }
 0x2bb   : > { %p12737_p0 = pneg %p12736_p5  ;;  %p12743_p3 = por %p12742_p2, %p12741_p1 }
 0x2bd   : > { %p12744_p4 = pnand %p12743_p3, %p12737_p0 }
 0x2bf   : > { %12747 = shalt.err (!%p12744_p4)
}
 0x2c0   : > { %s15037_s2 = sld [smem:[#allocation145_spill]]  ;;  %s12758_s0 = scalar_lea.vmem %s2434_s28, 16 }
 0x2c1   : > { %p12759_p7 = scmp.ne.s32.totalorder %s2434_s28, %s12758_s0  ;;  %s12764_s23 = scalar_lea.vmem %s2434_s28, 32 }
 0x2c2   : > { %p12765_p12 = scmp.lt.s32.totalorder %s2434_s28, %s2434_s28  ;;  %p12766_p6 = scmp.lt.s32.totalorder %s12764_s23, %s12758_s0 }
 0x2c3   : > { %p12760_p8 = pnand %p12759_p7, %p11291_p10 }
 0x2c4   : > { %p12767_p13 = por %p12766_p6, %p12765_p12 }
 0x2c5   : > { %p12761_p11 = pneg %p12760_p8 }
 0x2c6   : > { %11154 = dma.hbm_to_vmem [thread:$0]  (%p11291_p10), %s15037_s2, 512, %s2409_s5, [#allocation57], %s15019_s18, %s15019_s18, %s15018_s3  }
 0x2c7   : > { %p12768_p5 = pnand %p12767_p13, %p12761_p11 }
 0x2c9   : > { %12771 = shalt.err (!%p12768_p5)
}
 0x2ca   : > { %s15038_s26 = sld [smem:[#allocation147_spill]]  ;;  %s13211_s16 = smov [#allocation64]  }
 0x2cb   : > { %s2454_s1 = sshll.u32 %s13211_s16, 4  ;;  %s13212_s5 = smov [#allocation67]   ;;  %s2455_s1 = int_to_ptr.vmem [resolvable:$true] %s2454_s1 }
 0x2cc   : > { %s2482_s10 = sshll.u32 %s13212_s5, 4  ;;  %s12782_s4 = scalar_lea.vmem %s2455_s1, 512  ;;  %s2483_s10 = int_to_ptr.vmem [resolvable:$true] %s2482_s10 }
 0x2cd   : > { %p12783_p0 = scmp.ne.s32.totalorder %s2455_s1, %s12782_s4  ;;  %p12789_p3 = scmp.lt.s32.totalorder %s2455_s1, %s2455_s1 }
 0x2ce   : > { %p12790_p4 = scmp.lt.s32.totalorder %s12782_s4, %s12782_s4 }
 0x2cf   : > { %p12784_p1 = pnand %p12783_p0, %p11291_p10 }
 0x2d0   : > { %11158 = dma.hbm_to_vmem [thread:$0]  (%p11291_p10), %s15038_s26, 16, %s2434_s28, [#allocation60]  }
 0x2d1   : > { %p12785_p2 = pneg %p12784_p1  ;;  %p12791_p7 = por %p12790_p4, %p12789_p3 }
 0x2d3   : > { %p12792_p8 = pnand %p12791_p7, %p12785_p2 }
 0x2d5   : > { %12795 = shalt.err (!%p12792_p8)
}
 0x2d6   : > { %s15039_s28 = sld [smem:[#allocation149_spill]]  ;;  %s12806_s2 = scalar_lea.vmem %s2483_s10, 16 }
 0x2d7   : > { %p12807_p11 = scmp.ne.s32.totalorder %s2483_s10, %s12806_s2  ;;  %s12812_s0 = scalar_lea.vmem %s2483_s10, 32 }
 0x2d8   : > { %p12813_p13 = scmp.lt.s32.totalorder %s2483_s10, %s2483_s10  ;;  %p12814_p5 = scmp.lt.s32.totalorder %s12812_s0, %s12806_s2 }
 0x2d9   : > { %p12808_p12 = pnand %p12807_p11, %p11291_p10 }
 0x2da   : > { %p12815_p0 = por %p12814_p5, %p12813_p13 }
 0x2db   : > { %p12809_p6 = pneg %p12808_p12 }
 0x2dc   : > { %11162 = dma.hbm_to_vmem [thread:$0]  (%p11291_p10), %s15039_s28, 512, %s2455_s1, [#allocation63], %s15019_s18, %s15019_s18, %s15018_s3  }
 0x2dd   : > { %p12816_p1 = pnand %p12815_p0, %p12809_p6 }
 0x2df   : > { %12819 = shalt.err (!%p12816_p1)
}
 0x2e0   : > { %s15040_s23 = sld [smem:[#allocation152_spill]]  ;;  %s13213_s26 = smov [#allocation70]  }
 0x2e1   : > { %s2504_s16 = sshll.u32 %s13213_s26, 4  ;;  %s13214_s3 = smov [#allocation73]   ;;  %s2505_s16 = int_to_ptr.vmem [resolvable:$true] %s2504_s16 }
 0x2e2   : > { %s2529_s18 = sshll.u32 %s13214_s3, 4  ;;  %s12830_s1 = scalar_lea.vmem %s2505_s16, 16  ;;  %s2530_s18 = int_to_ptr.vmem [resolvable:$true] %s2529_s18 }
 0x2e3   : > { %p12831_p2 = scmp.ne.s32.totalorder %s2505_s16, %s12830_s1  ;;  %s12836_s5 = scalar_lea.vmem %s2505_s16, 32 }
 0x2e4   : > { %p12837_p7 = scmp.lt.s32.totalorder %s2505_s16, %s2505_s16  ;;  %p12838_p8 = scmp.lt.s32.totalorder %s12836_s5, %s12830_s1 }
 0x2e5   : > { %p12832_p3 = pnand %p12831_p2, %p11291_p10 }
 0x2e6   : > { %11166 = dma.hbm_to_vmem [thread:$0]  (%p11291_p10), %s15040_s23, 16, %s2483_s10, [#allocation66]  }
 0x2e7   : > { %p12833_p4 = pneg %p12832_p3  ;;  %p12839_p11 = por %p12838_p8, %p12837_p7 }
 0x2e9   : > { %p12840_p12 = pnand %p12839_p11, %p12833_p4 }
 0x2eb   : > { %12843 = shalt.err (!%p12840_p12)
}
 0x2ec   : > { %s15041_s4 = sld [smem:[#allocation154_spill]]  ;;  %s12854_s10 = scalar_lea.vmem %s2530_s18, 16 }
 0x2ed   : > { %p12855_p6 = scmp.ne.s32.totalorder %s2530_s18, %s12854_s10  ;;  %s12860_s28 = scalar_lea.vmem %s2530_s18, 32 }
 0x2ee   : > { %p12861_p0 = scmp.lt.s32.totalorder %s2530_s18, %s2530_s18  ;;  %p12862_p1 = scmp.lt.s32.totalorder %s12860_s28, %s12854_s10 }
 0x2ef   : > { %p12856_p13 = pnand %p12855_p6, %p11291_p10 }
 0x2f0   : > { %p12863_p2 = por %p12862_p1, %p12861_p0 }
 0x2f1   : > { %p12857_p5 = pneg %p12856_p13 }
 0x2f2   : > { %11170 = dma.hbm_to_vmem [thread:$0]  (%p11291_p10), %s15041_s4, 16, %s2505_s16, [#allocation69]  }
 0x2f3   : > { %p12864_p3 = pnand %p12863_p2, %p12857_p5 }
 0x2f5   : > { %12867 = shalt.err (!%p12864_p3)
}
 0x2f6   : > { %s15042_s2 = sld [smem:[#allocation157_spill]]  ;;  %s13215_s0 = smov [#allocation76]  }
 0x2f7   : > { %s2551_s23 = sshll.u32 %s13215_s0, 4  ;;  %s13216_s26 = smov [#allocation79]   ;;  %s2552_s23 = int_to_ptr.vmem [resolvable:$true] %s2551_s23 }
 0x2f8   : > { %s2573_s16 = sshll.u32 %s13216_s26, 4  ;;  %s12878_s3 = scalar_lea.vmem %s2552_s23, 16  ;;  %s2574_s16 = int_to_ptr.vmem [resolvable:$true] %s2573_s16 }
 0x2f9   : > { %p12879_p4 = scmp.ne.s32.totalorder %s2552_s23, %s12878_s3  ;;  %s12884_s1 = scalar_lea.vmem %s2552_s23, 32 }
 0x2fa   : > { %p12885_p11 = scmp.lt.s32.totalorder %s2552_s23, %s2552_s23  ;;  %p12886_p12 = scmp.lt.s32.totalorder %s12884_s1, %s12878_s3 }
 0x2fb   : > { %p12880_p7 = pnand %p12879_p4, %p11291_p10 }
 0x2fc   : > { %11174 = dma.hbm_to_vmem [thread:$0]  (%p11291_p10), %s15042_s2, 16, %s2530_s18, [#allocation72]  }
 0x2fd   : > { %p12881_p8 = pneg %p12880_p7  ;;  %p12887_p6 = por %p12886_p12, %p12885_p11 }
 0x2ff   : > { %p12888_p13 = pnand %p12887_p6, %p12881_p8 }
 0x301   : > { %12891 = shalt.err (!%p12888_p13)
}
 0x302   : > { %s15043_s5 = sld [smem:[#allocation159_spill]]  ;;  %s12902_s18 = scalar_lea.vmem %s2574_s16, 16 }
 0x303   : > { %p12903_p5 = scmp.ne.s32.totalorder %s2574_s16, %s12902_s18  ;;  %s12908_s4 = scalar_lea.vmem %s2574_s16, 32 }
 0x304   : > { %p12909_p2 = scmp.lt.s32.totalorder %s2574_s16, %s2574_s16  ;;  %p12910_p3 = scmp.lt.s32.totalorder %s12908_s4, %s12902_s18 }
 0x305   : > { %p12904_p0 = pnand %p12903_p5, %p11291_p10 }
 0x306   : > { %p12911_p4 = por %p12910_p3, %p12909_p2 }
 0x307   : > { %p12905_p1 = pneg %p12904_p0 }
 0x308   : > { %11178 = dma.hbm_to_vmem [thread:$0]  (%p11291_p10), %s15043_s5, 16, %s2552_s23, [#allocation75]  }
 0x309   : > { %p12912_p7 = pnand %p12911_p4, %p12905_p1 }
 0x30b   : > { %12915 = shalt.err (!%p12912_p7)
}
 0x30c   : > { %s15044_s10 = sld [smem:[#allocation161_spill]] }
 0x312   : > { %11182 = dma.hbm_to_vmem [thread:$0]  (%p11291_p10), %s15044_s10, 16, %s2574_s16, [#allocation78]  }
 0x313 PF: > { %2648 = sbr.rel (%p13701_p9) target bundleno = 18796 (0x496c), region = 348  ;;  %p11342_p8 = scmp.eq.s32.totalorder (!%p13701_p9), %s13674_s22, 0 }
 0x318   : > { %12959 = dma.done.wait (%p11342_p8), [#allocation3], 16  }
 0x319   : > { %12961 = vsyncadd (%p11342_p8), [#allocation3], 4294967280 }
 0x31a   : > { %12963 = dma.done.wait (%p11342_p8), [#allocation6], 512  }
 0x31b   : > { %12965 = vsyncadd (%p11342_p8), [#allocation6], 4294966784 }
 0x31c   : > { %12967 = dma.done.wait (%p11342_p8), [#allocation9], 32  }
 0x31d   : > { %12969 = vsyncadd (%p11342_p8), [#allocation9], 4294967264 }
 0x31e   : > { %12971 = dma.done.wait (%p11342_p8), [#allocation12], 32  }
 0x31f   : > { %12973 = vsyncadd (%p11342_p8), [#allocation12], 4294967264 }
 0x320   : > { %12975 = dma.done.wait (%p11342_p8), [#allocation15], 32  }
 0x321   : > { %12977 = vsyncadd (%p11342_p8), [#allocation15], 4294967264 }
 0x322   : > { %12979 = dma.done.wait (%p11342_p8), [#allocation18], 32  }
 0x323   : > { %12981 = vsyncadd (%p11342_p8), [#allocation18], 4294967264 }
 0x324   : > { %12983 = dma.done.wait (%p11342_p8), [#allocation21], 144  }
 0x325   : > { %12985 = vsyncadd (%p11342_p8), [#allocation21], 4294967152 }
 0x326   : > { %12987 = dma.done.wait (%p11342_p8), [#allocation24], 32  }
 0x327   : > { %12989 = vsyncadd (%p11342_p8), [#allocation24], 4294967264 }
 0x328   : > { %12991 = dma.done.wait (%p11342_p8), [#allocation27], 32  }
 0x329   : > { %12993 = vsyncadd (%p11342_p8), [#allocation27], 4294967264 }
 0x32a   : > { %12995 = dma.done.wait (%p11342_p8), [#allocation30], 144  }
 0x32b   : > { %12997 = vsyncadd (%p11342_p8), [#allocation30], 4294967152 }
 0x32c   : > { %12999 = dma.done.wait (%p11342_p8), [#allocation33], 32  }
 0x32d   : > { %13001 = vsyncadd (%p11342_p8), [#allocation33], 4294967264 }
 0x32e   : > { %13003 = dma.done.wait (%p11342_p8), [#allocation36], 528  }
 0x32f   : > { %13005 = vsyncadd (%p11342_p8), [#allocation36], 4294966768 }
 0x330   : > { %13007 = dma.done.wait (%p11342_p8), [#allocation39], 32  }
 0x331   : > { %13009 = vsyncadd (%p11342_p8), [#allocation39], 4294967264 }
 0x332   : > { %13011 = dma.done.wait (%p11342_p8), [#allocation42], 32  }
 0x333   : > { %13013 = vsyncadd (%p11342_p8), [#allocation42], 4294967264 }
 0x334   : > { %13015 = dma.done.wait (%p11342_p8), [#allocation45], 80  }
 0x335   : > { %13017 = vsyncadd (%p11342_p8), [#allocation45], 4294967216 }
 0x336   : > { %13019 = dma.done.wait (%p11342_p8), [#allocation48], 32  }
 0x337   : > { %13021 = vsyncadd (%p11342_p8), [#allocation48], 4294967264 }
 0x338   : > { %13023 = dma.done.wait (%p11342_p8), [#allocation51], 32  }
 0x339   : > { %13025 = vsyncadd (%p11342_p8), [#allocation51], 4294967264 }
 0x33a   : > { %13027 = dma.done.wait (%p11342_p8), [#allocation54], 576  }
 0x33b   : > { %13029 = vsyncadd (%p11342_p8), [#allocation54], 4294966720 }
 0x33c   : > { %13031 = dma.done.wait (%p11342_p8), [#allocation57], 528  }
 0x33d   : > { %13033 = vsyncadd (%p11342_p8), [#allocation57], 4294966768 }
 0x33e   : > { %13035 = dma.done.wait (%p11342_p8), [#allocation60], 32  }
 0x33f   : > { %13037 = vsyncadd (%p11342_p8), [#allocation60], 4294967264 }
 0x340   : > { %13039 = dma.done.wait (%p11342_p8), [#allocation63], 528  }
 0x341   : > { %13041 = vsyncadd (%p11342_p8), [#allocation63], 4294966768 }
 0x342   : > { %13043 = dma.done.wait (%p11342_p8), [#allocation66], 32  }
 0x343   : > { %13045 = vsyncadd (%p11342_p8), [#allocation66], 4294967264 }
 0x344   : > { %13047 = dma.done.wait (%p11342_p8), [#allocation69], 32  }
 0x345   : > { %13049 = vsyncadd (%p11342_p8), [#allocation69], 4294967264 }
 0x346   : > { %13051 = dma.done.wait (%p11342_p8), [#allocation72], 48  }
 0x347   : > { %13053 = vsyncadd (%p11342_p8), [#allocation72], 4294967248 }
 0x348   : > { %13055 = dma.done.wait (%p11342_p8), [#allocation75], 32  }
 0x349   : > { %13057 = vsyncadd (%p11342_p8), [#allocation75], 4294967264 }
 0x34a   : > { %13059 = dma.done.wait (%p11342_p8), [#allocation78], 32  }
 0x34b   : > { %13061 = vsyncadd (%p11342_p8), [#allocation78], 4294967264  ;;  %s15045_s11 = sld [smem:[#allocation108_spill]]  ;;  %p3029_p9 = scmp.lt.s32.totalorder %s13674_s22, 1  ;;  %vm3038_vm0 = vcmask 261120   ;;  %v3082_v30 = vld [vmem:[#allocation5] sm:$0xff] }
 0x34c   : > { %s15046_s23 = sld [smem:[#allocation112_spill]]  ;;  %v10145_v27 = vld [vmem:[#allocation2] ss:$0 sm:$0xff]  ;;  %v3083_v35 = vld [vmem:[#allocation5 + $0x8] sm:$0xff]  ;;  %v10146_v38 = vld [vmem:[#allocation8] ss:$0 sm:$0xff] }
 0x34d   : > { %s3030_s28 = scalar_select %p3029_p9, %s13674_s22, 1  ;;  %vm3209_vm1 = vcmask 64512   ;;  %v14138_v49 = vld [vmem:[#allocation7 + $0x8] sm:$0xff]  ;;  %v14140_v51 = vld [vmem:[#allocation7] sm:$0xff]  ;;  %vm3293_vm2 = vcmask 130048   ;;  %vm4478_vm3 = vcmask 523264  }
 0x34e   : > { %s15047_s26 = sld [smem:[#allocation109_spill]]  ;;  %s14909_s16 = smov 96   ;;  %vm13229_vm4 = vmmov 0   ;;  %vm6263_vm5 = vcmask 257024   ;;  %vm6505_vm6 = vcmask 27648   ;;  %vm6523_vm7 = vcmask 1043456  }
 0x34f   : > { %s10307_s2 = sshll.u32 %s3030_s28, 4  ;;  %s14908_s3 = smov 120   ;;  %vm6519_vm8 = vcmask 31744   ;;  %vm7773_vm9 = vcmask 517120   ;;  %vm8065_vm10 = vcmask 1041408   ;;  %vm8049_vm11 = vcmask 9216  }
 0x350   : > { %s14911_s1 = smov 88   ;;  %s14905_s5 = smov 64   ;;  %vm8061_vm12 = vcmask 15360   ;;  %vm9397_vm13 = vcmask 24576  }
 0x351   : > { %s3033_s0 = scalar_lea.vmem %s15045_s11, %s10307_s2  ;;  %s14907_s18 = smov 56  }
 0x352   : > { %v3034_v0 = vld [vmem:[%s3033_s0] sm:$0xff]  ;;  %v3035_v1 = vld [vmem:[%s3033_s0 + $0x8] sm:$0xff]  ;;  %v3089_v14 = vld [vmem:[%s15046_s23 + $0x18] sm:$0xff]  ;;  %s14903_s4 = smov 80   ;;  %s14901_s10 = smov 112  }
 0x353   : > { %v3039_v2 = vsel %vm3038_vm0, %v3034_v0, 0.0  ;;  %v3042_v3 = vsel %vm3038_vm0, %v3035_v1, 0.0  ;;  %v3088_v15 = vld [vmem:[%s15046_s23 + $0x10] sm:$0xff]  ;;  %10553 = vmatprep.subr.mxu0 %v3089_v14  ;;  %v3087_v16 = vld [vmem:[%s15046_s23 + $0x8] sm:$0xff]  ;;  %v3086_v17 = vld [vmem:[%s15046_s23] sm:$0xff]  ;;  %s14899_s11 = smov 72  }
 0x354   : > { %3040 = vadd.xlane.f32.xlu0 %v3039_v2  ;;  %10554 = vmatpush3.msra.mxu0 %v3089_v14  ;;  %v10144_v25 = vld [vmem:[%s15047_s26] ss:$0 sm:$0xff]  ;;  %s14897_s28 = smov 104   ;;  %s15048_s2 = sld [smem:[#allocation113_spill]] }
 0x355   : > { %10555 = vmatprep.subr.mxu0 %v3088_v15  ;;  %s14895_s0 = smov 48   ;;  %s14893_s26 = smov 40  }
 0x356   : > { %10556 = vmatpush3.msra.mxu0 %v3088_v15  ;;  %p15093_p11 = scmp.ne.s32.totalorder %s14998_s7, 0 }
 0x357   : > { %10557 = vmatprep.subr.mxu0 %v3087_v16 }
 0x358   : > { %3043 = vadd.xlane.f32.xlu0 %v3042_v3  ;;  %10558 = vmatpush3.msra.mxu0 %v3087_v16 }
 0x359   : > { %10559 = vmatprep.subr.mxu0 %v3086_v17 }
 0x35a   : > { %10560 = vmatpush3.msra.mxu0 %v3086_v17 }
 0x3dd   : > { %v3041_v4 = vpop.xlane.xlu0 %3040 }
 0x3de   : > { %v3046_v5 = vmul.f32 0.03125, %v3041_v4 }
 0x3e0   : > { %v3048_v6 = vsub.f32 %v3034_v0, %v3046_v5 }
 0x3e1   : > { %v3044_v7 = vpop.xlane.xlu0 %3043 }
 0x3e2   : > { %v3047_v8 = vmul.f32 0.03125, %v3044_v7  ;;  %v3050_v9 = vmul.f32 %v3048_v6, %v3048_v6 }
 0x3e4   : > { %v3049_v10 = vsub.f32 %v3035_v1, %v3047_v8  ;;  %v3052_v11 = vsel %vm3038_vm0, %v3050_v9, 0.0 }
 0x3e5   : > { %3053 = vadd.xlane.f32.xlu1 %v3052_v11 }
 0x3e6   : > { %v3051_v12 = vmul.f32 %v3049_v10, %v3049_v10 }
 0x3e8   : > { %v3055_v13 = vsel %vm3038_vm0, %v3051_v12, 0.0 }
 0x3e9   : > { %3056 = vadd.xlane.f32.xlu1 %v3055_v13 }
 0x46e   : > { %v3054_v18 = vpop.xlane.xlu1 %3053 }
 0x46f   : > { %v3058_v19 = vmul.f32 0.03125, %v3054_v18 }
 0x471   : > { %v3060_v20 = vadd.f32 1e-05, %v3058_v19 }
 0x472   : > { %v3057_v21 = vpop.xlane.xlu1 %3056 }
 0x473   : > { %11576 = vrsqrt.f32 %v3060_v20  ;;  %v3059_v22 = vmul.f32 0.03125, %v3057_v21 }
 0x475   : > { %v3061_v23 = vadd.f32 1e-05, %v3059_v22 }
 0x477   : > { %11578 = vrsqrt.f32 %v3061_v23 }
 0x480   : > { %v11577_v24 = vpop.eup %11576 }
 0x481   : > { %v3064_v26 = vmul.f32 %v11577_v24, %v3048_v6 }
 0x483   : > { %v3072_v28 = vmul.f32 %v10144_v25, %v3064_v26 }
 0x484   : > { %v11579_v29 = vpop.eup %11578 }
 0x485   : > { %v3065_v31 = vmul.f32 %v11579_v29, %v3049_v10  ;;  %v14100_v32 = vadd.f32 %v10145_v27, %v3072_v28 }
 0x487   : > { %v3073_v33 = vmul.f32 %v10144_v25, %v3065_v31  ;;  %v3114_v34 = vadd.f32 %v3082_v30, %v14100_v32 }
 0x489   : > { %v14103_v36 = vadd.f32 %v10145_v27, %v3073_v33  ;;  %10561 = vmatprep.mubr.msk.f32.mxu0 %vm3038_vm0, %v3114_v34  ;;  %v3092_v34 = vld [vmem:[%s15048_s2 + $0x8] sm:$0xff] }
 0x48b   : > { %v3115_v37 = vadd.f32 %v3083_v35, %v14103_v36 }
 0x48d   : > { %10562 = vmatmul.mubr.msk.f32.vlgmr.msra.gmra.mxu0 %vm3038_vm0, %v3115_v37 }
 0x54d   : > { %v10563_v39 = vpop.f32.mrf.mxu0 }
 0x54e   : > { %v14108_v40 = vadd.f32 %v10563_v39, %v10146_v38  ;;  %v3091_v39 = vld [vmem:[%s15048_s2] sm:$0xff] }
 0x54f   : > { %v3194_v41 = vpop.f32.mrf.mxu0 }
 0x550   : > { %v14110_v42 = vadd.f32 %v10146_v38, %v3194_v41  ;;  %3207 = vrot.lane.b32.xlu0 %v14108_v40, %s14909_s16 }
 0x552   : > { %3205 = vrot.lane.b32.xlu1 %v14110_v42, %s14909_s16  ;;  %10568 = vmatprep.mubr.msk.f32.mxu1 %vm3209_vm1, %v14110_v42 }
 0x554   : > { %3403 = vrot.lane.b32.xlu0 %v14110_v42, %s14908_s3 }
 0x556   : > { %3409 = vrot.lane.b32.xlu1 %v14108_v40, %s14911_s1 }
 0x55a   : > { %3407 = vrot.lane.b32.xlu1 %v14110_v42, %s14911_s1 }
 0x55e   : > { %3405 = vrot.lane.b32.xlu1 %v14108_v40, %s14908_s3 }
 0x5c2   : > { %v3208_v43 = vpop.permute.xlu0 %3207 }
 0x5c3   : > { %10564 = vmatprep.subr.msk.mxu1 %vm3209_vm1, %v3208_v43 }
 0x5c4   : > { %10565 = vmatpush3.xpose.msk.msra.mxu1 %vm3209_vm1, %v3208_v43  ;;  %v3206_v44 = vpop.permute.xlu1 %3205 }
 0x5c5   : > { %10566 = vmatprep.subr.msk.mxu1 %vm3209_vm1, %v3206_v44 }
 0x5c6   : > { %v3404_v46 = vpop.permute.xlu0 %3403 }
 0x5c8   : > { %10567 = vmatpush3.xpose.msk.msra.mxu1 %vm3209_vm1, %v3206_v44  ;;  %v3410_v45 = vpop.permute.xlu1 %3409 }
 0x5c9   : > { %10578 = vmatprep.subr.msk.mxu1 %vm3209_vm1, %v3410_v45 }
 0x5cb   : > { %10569 = vmatmul.mubr.msk.f32.vlgmr.msra.gmra.mxu1 %vm3209_vm1, %v14108_v40 }
 0x5cc   : > { %v3408_v47 = vpop.permute.xlu1 %3407  ;;  %10579 = vmatpush3.xpose.msk.msra.mxu1 %vm3209_vm1, %v3410_v45  ;;  %10582 = vmatprep.mubr.msk.f32.mxu1 %vm3209_vm1, %v3404_v46 }
 0x5cd   : > { %10580 = vmatprep.subr.msk.mxu1 %vm3209_vm1, %v3408_v47 }
 0x5d0   : > { %10581 = vmatpush3.xpose.msk.msra.mxu1 %vm3209_vm1, %v3408_v47  ;;  %v3406_v48 = vpop.permute.xlu1 %3405 }
 0x5d1   : > { %10597 = vmatprep.subr.mxu1 %v3091_v39 }
 0x5d3   : > { %10583 = vmatmul.mubr.msk.f32.vlgmr.msra.gmra.mxu1 %vm3209_vm1, %v3406_v48 }
 0x5d4   : > { %10598 = vmatpush3.msra.mxu1 %v3091_v39 }
 0x68b   : > { %v10570_v50 = vpop.f32.mrf.mxu1 }
 0x68c   : > { %v3290_v52 = vadd.f32 %v10570_v50, %v14138_v49 }
 0x68d   : > { %v3284_v53 = vpop.f32.mrf.mxu1 }
 0x68e   : > { %v3285_v54 = vadd.f32 %v3284_v53, %v14140_v51  ;;  %v3297_v55 = vsel %vm3293_vm2, %v3290_v52, -inf }
 0x68f   : > { %3298 = vmax.xlane.f32.xlu1 %v3297_v55 }
 0x690   : > { %v3294_v56 = vsel %vm3293_vm2, %v3285_v54, -inf }
 0x691   : > { %3295 = vmax.xlane.f32.xlu0 %v3294_v56 }
 0x693   : > { %v10584_v57 = vpop.f32.mrf.mxu1 }
 0x694   : > { %v3491_v60 = vadd.f32 %v10584_v57, %v14138_v49 }
 0x695   : > { %v3485_v58 = vpop.f32.mrf.mxu1 }
 0x696   : > { %v3486_v59 = vadd.f32 %v3485_v58, %v14140_v51  ;;  %v3497_v62 = vsel %vm3293_vm2, %v3491_v60, -inf }
 0x698   : > { %v3494_v61 = vsel %vm3293_vm2, %v3486_v59, -inf }
 0x699   : > { %3495 = vmax.xlane.f32.xlu0 %v3494_v61 }
 0x69d   : > { %3498 = vmax.xlane.f32.xlu0 %v3497_v62 }
 0x718   : > { %v3299_v63 = vpop.xlane.xlu1 %3298 }
 0x719   : > { %v3301_v0 = vsub.f32 %v3290_v52, %v3299_v63 }
 0x71a   : > { %v3296_v1 = vpop.xlane.xlu0 %3295 }
 0x71b   : > { %v3304_v2 = vmul.f32 1.442695, %v3301_v0  ;;  %v3300_v3 = vsub.f32 %v3285_v54, %v3296_v1 }
 0x71d   : > { %11580 = vpow2.f32 %v3304_v2  ;;  %v3302_v4 = vmul.f32 1.442695, %v3300_v3 }
 0x71f   : > { %11582 = vpow2.f32 %v3302_v4 }
 0x722   : > { %v3496_v5 = vpop.xlane.xlu0 %3495 }
 0x723   : > { %v3500_v6 = vsub.f32 %v3486_v59, %v3496_v5 }
 0x725   : > { %v3502_v7 = vmul.f32 1.442695, %v3500_v6 }
 0x726   : > { %v3499_v8 = vpop.xlane.xlu0 %3498 }
 0x727   : > { %11584 = vpow2.f32 %v3502_v7  ;;  %v3501_v9 = vsub.f32 %v3491_v60, %v3499_v8 }
 0x729   : > { %v3504_v10 = vmul.f32 1.442695, %v3501_v9 }
 0x72a   : > { %v11581_v11 = vpop.eup %11580 }
 0x72b   : > { %11586 = vpow2.f32 %v3504_v10  ;;  %v3309_v12 = vsel %vm3293_vm2, %v11581_v11, 0.0 }
 0x72c   : > { %v11583_v13 = vpop.eup %11582  ;;  %3310 = vadd.xlane.f32.xlu1 %v3309_v12 }
 0x72d   : > { %v3306_v14 = vsel %vm3293_vm2, %v11583_v13, 0.0 }
 0x72e   : > { %3307 = vadd.xlane.f32.xlu0 %v3306_v14 }
 0x734   : > { %v11585_v15 = vpop.eup %11584 }
 0x735   : > { %v3506_v16 = vsel %vm3293_vm2, %v11585_v15, 0.0 }
 0x736   : > { %3507 = vadd.xlane.f32.xlu0 %v3506_v16 }
 0x738   : > { %v11587_v17 = vpop.eup %11586 }
 0x739   : > { %v3509_v18 = vsel %vm3293_vm2, %v11587_v17, 0.0 }
 0x73a   : > { %3510 = vadd.xlane.f32.xlu1 %v3509_v18 }
 0x74b   : > { %3316 = vrot.lane.b32.xlu1 %v14110_v42, %s14905_s5 }
 0x74c   : > { %3318 = vrot.lane.b32.xlu0 %v14108_v40, %s14905_s5 }
 0x74f   : > { %3518 = vrot.lane.b32.xlu1 %v14108_v40, %s14907_s18 }
 0x750   : > { %3771 = vrot.lane.b32.xlu0 %v14108_v40, %s14903_s4 }
 0x753   : > { %3516 = vrot.lane.b32.xlu1 %v14110_v42, %s14907_s18 }
 0x754   : > { %3765 = vrot.lane.b32.xlu0 %v14110_v42, %s14901_s10 }
 0x757   : > { %3769 = vrot.lane.b32.xlu1 %v14110_v42, %s14903_s4 }
 0x758   : > { %4054 = vrot.lane.b32.xlu0 %v14108_v40, %s14899_s11 }
 0x75b   : > { %3767 = vrot.lane.b32.xlu1 %v14108_v40, %s14901_s10 }
 0x75c   : > { %4048 = vrot.lane.b32.xlu0 %v14110_v42, %s14897_s28 }
 0x75f   : > { %4052 = vrot.lane.b32.xlu1 %v14110_v42, %s14899_s11 }
 0x763   : > { %4050 = vrot.lane.b32.xlu1 %v14108_v40, %s14897_s28 }
 0x7b5   : > { %v3311_v19 = vpop.xlane.xlu1 %3310 }
 0x7b6   : > { %11588 = vrcp.f32 %v3311_v19 }
 0x7b7   : > { %v3308_v20 = vpop.xlane.xlu0 %3307 }
 0x7b8   : > { %11590 = vrcp.f32 %v3308_v20 }
 0x7bf   : > { %v3508_v21 = vpop.xlane.xlu0 %3507 }
 0x7c0   : > { %11592 = vrcp.f32 %v3508_v21 }
 0x7c3   : > { %v3511_v22 = vpop.xlane.xlu1 %3510  ;;  %v3319_v23 = vpop.permute.xlu0 %3318 }
 0x7c4   : > { %v11589_v24 = vpop.eup %11588  ;;  %11594 = vrcp.f32 %v3511_v22  ;;  %10571 = vmatprep.subr.mxu0 %v3319_v23 }
 0x7c5   : > { %v11591_v25 = vpop.eup %11590  ;;  %10572 = vmatpush3.msra.mxu0 %v3319_v23  ;;  %v3315_v28 = vmul.f32 %v11589_v24, %v11581_v11 }
 0x7c6   : > { %v3314_v26 = vmul.f32 %v11591_v25, %v11583_v13  ;;  %v3093_v25 = vld [vmem:[%s15048_s2 + $0x10] sm:$0xff] }
 0x7c7   : > { %v3317_v27 = vpop.permute.xlu1 %3316  ;;  %v3772_v38 = vpop.permute.xlu0 %3771 }
 0x7c8   : > { %10573 = vmatprep.subr.mxu0 %v3317_v27  ;;  %10575 = vmatprep.mubr.msk.f32.mxu0 %vm3293_vm2, %v3314_v26 }
 0x7c9   : > { %10574 = vmatpush3.msra.mxu0 %v3317_v27 }
 0x7ca   : > { %10576 = vmatmul.mubr.msk.f32.vlgmr.msra.gmra.mxu0 %vm3293_vm2, %v3315_v28 }
 0x7cb   : > { %v3519_v29 = vpop.permute.xlu1 %3518  ;;  %v3766_v44 = vpop.permute.xlu0 %3765 }
 0x7cc   : > { %10585 = vmatprep.subr.mxu0 %v3519_v29 }
 0x7cd   : > { %v11593_v30 = vpop.eup %11592  ;;  %10586 = vmatpush3.msra.mxu0 %v3519_v29 }
 0x7ce   : > { %v3514_v31 = vmul.f32 %v11593_v30, %v11585_v15 }
 0x7cf   : > { %v3517_v33 = vpop.permute.xlu1 %3516  ;;  %v4055_v48 = vpop.permute.xlu0 %4054 }
 0x7d0   : > { %10587 = vmatprep.subr.mxu0 %v3517_v33  ;;  %10589 = vmatprep.mubr.msk.f32.mxu0 %vm3293_vm2, %v3514_v31 }
 0x7d1   : > { %v11595_v35 = vpop.eup %11594  ;;  %10588 = vmatpush3.msra.mxu0 %v3517_v33 }
 0x7d2   : > { %10592 = vmatprep.subr.mxu0 %v3092_v34  ;;  %v3515_v37 = vmul.f32 %v11595_v35, %v11587_v17 }
 0x7d3   : > { %v3770_v46 = vpop.permute.xlu1 %3769  ;;  %v4049_v52 = vpop.permute.xlu0 %4048 }
 0x7d4   : > { %10590 = vmatmul.mubr.msk.f32.vlgmr.msra.gmra.mxu0 %vm3293_vm2, %v3515_v37 }
 0x7d5   : > { %10593 = vmatpush3.msra.mxu0 %v3092_v34 }
 0x7d6   : > { %10602 = vmatprep.subr.msk.mxu0 %vm3209_vm1, %v3772_v38 }
 0x7d7   : > { %v3768_v50 = vpop.permute.xlu1 %3767 }
 0x7db   : > { %v4053_v53 = vpop.permute.xlu1 %4052 }
 0x7df   : > { %v4051_v54 = vpop.permute.xlu1 %4050 }
 0x88a   : > { %v10577_v41 = vpop.f32.mrf.mxu0 }
 0x88c   : > { %v3394_v43 = vpop.f32.mrf.mxu0 }
 0x88d   : > { %10599 = vmatprep.mubr.msk.f32.mxu1 %vm3209_vm1, %v3394_v43 }
 0x88e   : > { %10600 = vmatmul.mubr.msk.f32.vlgmr.msra.gmra.mxu1 %vm3209_vm1, %v10577_v41 }
 0x894   : > { %v10591_v45 = vpop.f32.mrf.mxu0 }
 0x896   : > { %v3594_v47 = vpop.f32.mrf.mxu0 }
 0x897   : > { %10594 = vmatprep.mubr.msk.f32.mxu0 %vm3209_vm1, %v3594_v47  ;;  %v3094_v47 = vld [vmem:[%s15048_s2 + $0x18] sm:$0xff]  ;;  %s15065_s2 = smov 96  }
 0x898   : > { %10595 = vmatmul.mubr.msk.f32.vlgmr.msra.gmra.mxu0 %vm3209_vm1, %v10591_v45 }
 0x899   : > { %10603 = vmatpush3.xpose.msk.msra.mxu0 %vm3209_vm1, %v3772_v38  ;;  %10606 = vmatprep.mubr.msk.f32.mxu0 %vm3209_vm1, %v3766_v44 }
 0x89a   : > { %10604 = vmatprep.subr.msk.mxu0 %vm3209_vm1, %v3770_v46 }
 0x89d   : > { %10605 = vmatpush3.xpose.msk.msra.mxu0 %vm3209_vm1, %v3770_v46 }
 0x89e   : > { %10621 = vmatprep.subr.msk.mxu0 %vm3209_vm1, %v4055_v48 }
 0x8a0   : > { %10607 = vmatmul.mubr.msk.f32.vlgmr.msra.gmra.mxu0 %vm3209_vm1, %v3768_v50 }
 0x8a1   : > { %10622 = vmatpush3.xpose.msk.msra.mxu0 %vm3209_vm1, %v4055_v48  ;;  %10625 = vmatprep.mubr.msk.f32.mxu0 %vm3209_vm1, %v4049_v52 }
 0x8a2   : > { %10623 = vmatprep.subr.msk.mxu0 %vm3209_vm1, %v4053_v53 }
 0x8a5   : > { %10624 = vmatpush3.xpose.msk.msra.mxu0 %vm3209_vm1, %v4053_v53 }
 0x8a8   : > { %10626 = vmatmul.mubr.msk.f32.vlgmr.msra.gmra.mxu0 %vm3209_vm1, %v4051_v54 }
 0x94e   : > { %v10601_v55 = vpop.f32.mrf.mxu1 }
 0x950   : > { %v3756_v37 = vpop.f32.mrf.mxu1 }
 0x958   : > { %v10596_v56 = vpop.f32.mrf.mxu0 }
 0x959   : > { %v14200_v57 = vadd.f32 %v10601_v55, %v10596_v56 }
 0x95a   : > { %v14202_v58 = vpop.f32.mrf.mxu0 }
 0x95b   : > { %v3757_v50 = vadd.f32 %v3756_v37, %v14202_v58 }
 0x960   : > { %v10608_v59 = vpop.f32.mrf.mxu0 }
 0x961   : > { %v3853_v60 = vadd.f32 %v10608_v59, %v14138_v49  ;;  %v10181_v59 = vld [vmem:[#allocation10] ss:$0 sm:$0xff] }
 0x962   : > { %v3847_v61 = vpop.f32.mrf.mxu0 }
 0x963   : > { %v3848_v62 = vadd.f32 %v3847_v61, %v14140_v51  ;;  %v3859_v63 = vsel %vm3293_vm2, %v3853_v60, -inf }
 0x964   : > { %3860 = vmax.xlane.f32.xlu1 %v3859_v63 }
 0x965   : > { %v3856_v0 = vsel %vm3293_vm2, %v3848_v62, -inf }
 0x966   : > { %3857 = vmax.xlane.f32.xlu0 %v3856_v0 }
 0x968   : > { %v10627_v1 = vpop.f32.mrf.mxu0 }
 0x969   : > { %v4136_v18 = vadd.f32 %v10627_v1, %v14138_v49 }
 0x96a   : > { %v4130_v2 = vpop.f32.mrf.mxu0 }
 0x96b   : > { %v4131_v3 = vadd.f32 %v4130_v2, %v14140_v51  ;;  %v4142_v19 = vsel %vm3293_vm2, %v4136_v18, -inf }
 0x96d   : > { %v4139_v4 = vsel %vm3293_vm2, %v4131_v3, -inf }
 0x975   : > { %3878 = vrot.lane.b32.xlu1 %v14110_v42, %s14895_s0 }
 0x999   : > { %4140 = vmax.xlane.f32.xlu1 %v4139_v4 }
 0x9ed   : > { %v3861_v5 = vpop.xlane.xlu1 %3860 }
 0x9ee   : > { %v3863_v6 = vsub.f32 %v3853_v60, %v3861_v5 }
 0x9ef   : > { %v3858_v7 = vpop.xlane.xlu0 %3857 }
 0x9f0   : > { %v3866_v8 = vmul.f32 1.442695, %v3863_v6  ;;  %v3862_v9 = vsub.f32 %v3848_v62, %v3858_v7 }
 0x9f1   : > { %v3879_v51 = vpop.permute.xlu1 %3878 }
 0x9f2   : > { %11596 = vpow2.f32 %v3866_v8  ;;  %v3864_v10 = vmul.f32 1.442695, %v3862_v9 }
 0x9f4   : > { %11598 = vpow2.f32 %v3864_v10 }
 0x9ff   : > { %v11597_v11 = vpop.eup %11596 }
 0xa00   : > { %v3871_v12 = vsel %vm3293_vm2, %v11597_v11, 0.0 }
 0xa01   : > { %v11599_v13 = vpop.eup %11598  ;;  %3872 = vadd.xlane.f32.xlu0 %v3871_v12 }
 0xa02   : > { %v3868_v14 = vsel %vm3293_vm2, %v11599_v13, 0.0 }
 0xa05   : > { %3869 = vadd.xlane.f32.xlu0 %v3868_v14 }
 0xa1b   : > { %3880 = vrot.lane.b32.xlu0 %v14108_v40, %s14895_s0  ;;  %s15050_s0 = sld [smem:[#allocation117_spill]] }
 0xa21   : > { %s15051_s28 = smov %s15050_s0 }
 0xa22   : > { %v4141_v15 = vpop.xlane.xlu1 %4140  ;;  %v3104_v37 = vld [vmem:[%s15051_s28 + $0x8] sm:$0xff] }
 0xa23   : > { %v4145_v16 = vsub.f32 %v4131_v3, %v4141_v15  ;;  %v3110_v15 = vld [vmem:[%s15050_s0 + $0x38] sm:$0xff]  ;;  %s15052_s0 = sld [smem:[#allocation121_spill]] }
 0xa25   : > { %v4147_v17 = vmul.f32 1.442695, %v4145_v16  ;;  %v3109_v16 = vld [vmem:[%s15051_s28 + $0x30] sm:$0xff] }
 0xa27   : > { %11600 = vpow2.f32 %v4147_v17  ;;  %v3108_v17 = vld [vmem:[%s15051_s28 + $0x28] sm:$0xff] }
 0xa29   : > { %s15053_s11 = smov %s15052_s0 }
 0xa34   : > { %v11601_v20 = vpop.eup %11600 }
 0xa35   : > { %v4151_v21 = vsel %vm3293_vm2, %v11601_v20, 0.0 }
 0xa3a   : > { %4143 = vmax.xlane.f32.xlu0 %v4142_v19 }
 0xa3e   : > { %4152 = vadd.xlane.f32.xlu0 %v4151_v21 }
 0xa54   : > { %4163 = vrot.lane.b32.xlu0 %v14108_v40, %s14893_s26 }
 0xa8a   : > { %v3873_v22 = vpop.xlane.xlu0 %3872 }
 0xa8b   : > { %11602 = vrcp.f32 %v3873_v22 }
 0xa8e   : > { %v3870_v23 = vpop.xlane.xlu0 %3869 }
 0xa8f   : > { %11604 = vrcp.f32 %v3870_v23 }
 0xa92   : > { %v3881_v24 = vpop.permute.xlu0 %3880 }
 0xa93   : > { %10609 = vmatprep.subr.mxu1 %v3881_v24 }
 0xa94   : > { %10610 = vmatpush3.msra.mxu1 %v3881_v24 }
 0xa95   : > { %10611 = vmatprep.subr.mxu1 %v3879_v51 }
 0xa96   : > { %10612 = vmatpush3.msra.mxu1 %v3879_v51 }
 0xa97   : > { %10616 = vmatprep.subr.mxu1 %v3093_v25 }
 0xa98   : > { %v11603_v49 = vpop.eup %11602 }
 0xa99   : > { %v3877_v28 = vmul.f32 %v11603_v49, %v11597_v11  ;;  %v10182_v49 = vld [vmem:[#allocation11] ss:$0 sm:$0xff] }
 0xa9c   : > { %v11605_v26 = vpop.eup %11604 }
 0xa9d   : > { %v3876_v27 = vmul.f32 %v11605_v26, %v11599_v13 }
 0xa9f   : > { %10613 = vmatprep.mubr.msk.f32.mxu1 %vm3293_vm2, %v3876_v27 }
 0xaa0   : > { %10614 = vmatmul.mubr.msk.f32.vlgmr.msra.gmra.mxu1 %vm3293_vm2, %v3877_v28 }
 0xaa1   : > { %10617 = vmatpush3.msra.mxu1 %v3093_v25 }
 0xac3   : > { %v4144_v40 = vpop.xlane.xlu0 %4143 }
 0xac4   : > { %v4146_v29 = vsub.f32 %v4136_v18, %v4144_v40  ;;  %v3107_v18 = vld [vmem:[%s15051_s28 + $0x20] sm:$0xff] }
 0xac6   : > { %v4149_v30 = vmul.f32 1.442695, %v4146_v29  ;;  %v10183_v29 = vld [vmem:[#allocation13] ss:$0 sm:$0xff] }
 0xac7   : > { %v4153_v31 = vpop.xlane.xlu0 %4152 }
 0xac8   : > { %11606 = vpow2.f32 %v4149_v30 }
 0xac9   : > { %11608 = vrcp.f32 %v4153_v31 }
 0xacb   : > { %v4164_v33 = vpop.permute.xlu0 %4163 }
 0xacc   : > { %10628 = vmatprep.subr.mxu1 %v4164_v33 }
 0xad5   : > { %v11607_v34 = vpop.eup %11606 }
 0xad6   : > { %v4154_v35 = vsel %vm3293_vm2, %v11607_v34, 0.0  ;;  %v11609_v38 = vpop.eup %11608 }
 0xad7   : > { %4155 = vadd.xlane.f32.xlu1 %v4154_v35  ;;  %v4159_v44 = vmul.f32 %v11609_v38, %v11601_v20  ;;  %v3105_v35 = vld [vmem:[%s15051_s28 + $0x10] sm:$0xff]  ;;  %v3103_v38 = vld [vmem:[%s15051_s28] sm:$0xff] }
 0xae8   : > { %4161 = vrot.lane.b32.xlu1 %v14110_v42, %s14893_s26  ;;  %s15049_s26 = sld [smem:[#allocation116_spill]] }
 0xaee   : > { %v3101_v12 = vld [vmem:[%s15049_s26 + $0x18] sm:$0xff]  ;;  %v3100_v13 = vld [vmem:[%s15049_s26 + $0x10] sm:$0xff]  ;;  %v3099_v14 = vld [vmem:[%s15049_s26 + $0x8] sm:$0xff] }
 0xaef   : > { %10640 = vmatprep.subr.mxu0 %v3101_v12  ;;  %v3098_v51 = vld [vmem:[%s15049_s26] sm:$0xff] }
 0xaf0   : > { %10641 = vmatpush3.msra.mxu0 %v3101_v12 }
 0xaf1   : > { %10642 = vmatprep.subr.mxu0 %v3100_v13 }
 0xaf2   : > { %10643 = vmatpush3.msra.mxu0 %v3100_v13  ;;  %v10191_v13 = vld [vmem:[#allocation19] ss:$0 sm:$0xff] }
 0xaf3   : > { %10644 = vmatprep.subr.mxu0 %v3099_v14 }
 0xaf4   : > { %10645 = vmatpush3.msra.mxu0 %v3099_v14 }
 0xaf5   : > { %10646 = vmatprep.subr.mxu0 %v3098_v51 }
 0xaf6   : > { %10647 = vmatpush3.msra.mxu0 %v3098_v51 }
 0xb60   : > { %v10615_v39 = vpop.f32.mrf.mxu1  ;;  %v4156_v41 = vpop.xlane.xlu1 %4155 }
 0xb61   : > { %11610 = vrcp.f32 %v4156_v41 }
 0xb62   : > { %v3956_v43 = vpop.f32.mrf.mxu1 }
 0xb63   : > { %10618 = vmatprep.mubr.msk.f32.mxu1 %vm3209_vm1, %v3956_v43 }
 0xb64   : > { %10619 = vmatmul.mubr.msk.f32.vlgmr.msra.gmra.mxu1 %vm3209_vm1, %v10615_v39  ;;  %v4162_v45 = vpop.permute.xlu1 %4161  ;;  %v10184_v39 = vld [vmem:[#allocation14] ss:$0 sm:$0xff] }
 0xb65   : > { %10629 = vmatpush3.msra.mxu1 %v4164_v33  ;;  %10632 = vmatprep.mubr.msk.f32.mxu1 %vm3293_vm2, %v4159_v44 }
 0xb66   : > { %10630 = vmatprep.subr.mxu1 %v4162_v45 }
 0xb67   : > { %10631 = vmatpush3.msra.mxu1 %v4162_v45 }
 0xb68   : > { %10635 = vmatprep.subr.mxu1 %v3094_v47 }
 0xb6e   : > { %v11611_v42 = vpop.eup %11610 }
 0xb6f   : > { %v4160_v46 = vmul.f32 %v11611_v42, %v11607_v34  ;;  %v3106_v34 = vld [vmem:[%s15051_s28 + $0x18] sm:$0xff] }
 0xb71   : > { %10633 = vmatmul.mubr.msk.f32.vlgmr.msra.gmra.mxu1 %vm3293_vm2, %v4160_v46 }
 0xb72   : > { %10636 = vmatpush3.msra.mxu1 %v3094_v47  ;;  %v10187_v47 = vld [vmem:[#allocation16] ss:$0 sm:$0xff] }
 0xb73   : > { %10651 = vmatprep.subr.mxu1 %v3110_v15 }
 0xc24   : > { %v10620_v48 = vpop.f32.mrf.mxu1 }
 0xc25   : > { %v4047_v52 = vadd.f32 %v10620_v48, %v14200_v57 }
 0xc26   : > { %v4037_v53 = vpop.f32.mrf.mxu1 }
 0xc27   : > { %v4046_v54 = vadd.f32 %v4037_v53, %v3757_v50 }
 0xc31   : > { %v10634_v55 = vpop.f32.mrf.mxu1 }
 0xc33   : > { %v4239_v56 = vpop.f32.mrf.mxu1 }
 0xc34   : > { %10637 = vmatprep.mubr.msk.f32.mxu1 %vm3209_vm1, %v4239_v56 }
 0xc35   : > { %10638 = vmatmul.mubr.msk.f32.vlgmr.msra.gmra.mxu1 %vm3209_vm1, %v10634_v55 }
 0xc36   : > { %10652 = vmatpush3.msra.mxu1 %v3110_v15 }
 0xc37   : > { %10653 = vmatprep.subr.mxu1 %v3109_v16 }
 0xc38   : > { %10654 = vmatpush3.msra.mxu1 %v3109_v16 }
 0xc39   : > { %10655 = vmatprep.subr.mxu1 %v3108_v17 }
 0xc3a   : > { %10656 = vmatpush3.msra.mxu1 %v3108_v17 }
 0xc3b   : > { %10657 = vmatprep.subr.mxu1 %v3107_v18 }
 0xc3c   : > { %10658 = vmatpush3.msra.mxu1 %v3107_v18  ;;  %v4604_v18 = vld [vmem:[#allocation20] sm:$0xff] }
 0xc3d   : > { %10659 = vmatprep.subr.mxu1 %v3106_v34 }
 0xc3e   : > { %10660 = vmatpush3.msra.mxu1 %v3106_v34 }
 0xc3f   : > { %10661 = vmatprep.subr.mxu1 %v3105_v35 }
 0xc40   : > { %10662 = vmatpush3.msra.mxu1 %v3105_v35 }
 0xc41   : > { %10663 = vmatprep.subr.mxu1 %v3104_v37 }
 0xc42   : > { %10664 = vmatpush3.msra.mxu1 %v3104_v37 }
 0xc43   : > { %10665 = vmatprep.subr.mxu1 %v3103_v38 }
 0xc44   : > { %10666 = vmatpush3.msra.mxu1 %v3103_v38 }
 0xcf5   : > { %v10639_v60 = vpop.f32.mrf.mxu1 }
 0xcf6   : > { %v4330_v61 = vadd.f32 %v10639_v60, %v4047_v52 }
 0xcf7   : > { %v4320_v62 = vpop.f32.mrf.mxu1 }
 0xcf8   : > { %v4338_v63 = vadd.f32 %v10181_v59, %v4330_v61  ;;  %v4329_v0 = vadd.f32 %v4320_v62, %v4046_v54 }
 0xcfa   : > { %v4337_v1 = vadd.f32 %v10181_v59, %v4329_v0  ;;  %v4340_v2 = vadd.f32 %v4338_v63, %v14103_v36 }
 0xcfc   : > { %v4344_v58 = vsel %vm3038_vm0, %v4340_v2, 0.0  ;;  %v4339_v57 = vadd.f32 %v4337_v1, %v14100_v32 }
 0xcfd   : > { %4345 = vadd.xlane.f32.xlu0 %v4344_v58 }
 0xcfe   : > { %v4341_v3 = vsel %vm3038_vm0, %v4339_v57, 0.0 }
 0xcff   : > { %4342 = vadd.xlane.f32.xlu1 %v4341_v3 }
 0xd86   : > { %v4346_v4 = vpop.xlane.xlu0 %4345 }
 0xd87   : > { %v4348_v5 = vmul.f32 0.03125, %v4346_v4  ;;  %v13228_v4 = vmov 0.0  }
 0xd88   : > { %v4343_v6 = vpop.xlane.xlu1 %4342  ;;  %10670 = vmatprep.subr.mxu0 %v13228_v4  ;;  %10688 = vmatprep.subr.mxu1 %v13228_v4 }
 0xd89   : > { %v4350_v7 = vsub.f32 %v4340_v2, %v4348_v5  ;;  %v4347_v8 = vmul.f32 0.03125, %v4343_v6 }
 0xd8b   : > { %v4349_v9 = vsub.f32 %v4339_v57, %v4347_v8  ;;  %v4352_v10 = vmul.f32 %v4350_v7, %v4350_v7 }
 0xd8d   : > { %v4356_v36 = vsel %vm3038_vm0, %v4352_v10, 0.0  ;;  %v4351_v11 = vmul.f32 %v4349_v9, %v4349_v9 }
 0xd8e   : > { %4357 = vadd.xlane.f32.xlu1 %v4356_v36 }
 0xd8f   : > { %v4353_v32 = vsel %vm3038_vm0, %v4351_v11, 0.0  ;;  %v10190_v11 = vld [vmem:[#allocation17] ss:$0 sm:$0xff] }
 0xd90   : > { %4354 = vadd.xlane.f32.xlu0 %v4353_v32 }
 0xe17   : > { %v4358_v19 = vpop.xlane.xlu1 %4357 }
 0xe18   : > { %v4360_v20 = vmul.f32 0.03125, %v4358_v19  ;;  %v4608_v19 = vld [vmem:[%s15052_s0 + $0x18] sm:$0xff]  ;;  %s15054_s0 = sld [smem:[#allocation128_spill]] }
 0xe19   : > { %v4355_v21 = vpop.xlane.xlu0 %4354 }
 0xe1a   : > { %v4362_v22 = vadd.f32 1e-05, %v4360_v20  ;;  %v4359_v23 = vmul.f32 0.03125, %v4355_v21  ;;  %v4607_v20 = vld [vmem:[%s15053_s11 + $0x10] sm:$0xff]  ;;  %v4606_v21 = vld [vmem:[%s15053_s11 + $0x8] sm:$0xff] }
 0xe1c   : > { %11612 = vrsqrt.f32 %v4362_v22  ;;  %v4361_v24 = vadd.f32 1e-05, %v4359_v23  ;;  %v4605_v22 = vld [vmem:[%s15053_s11] sm:$0xff] }
 0xe1e   : > { %11614 = vrsqrt.f32 %v4361_v24  ;;  %s15055_s10 = smov %s15054_s0 }
 0xe29   : > { %v11613_v25 = vpop.eup %11612 }
 0xe2a   : > { %v4366_v26 = vmul.f32 %v11613_v25, %v4350_v7  ;;  %v10193_v25 = vld [vmem:[#allocation22] ss:$0 sm:$0xff] }
 0xe2b   : > { %v11615_v27 = vpop.eup %11614 }
 0xe2c   : > { %v4365_v28 = vmul.f32 %v11615_v27, %v4349_v9  ;;  %v4374_v40 = vmul.f32 %v10182_v49, %v4366_v26 }
 0xe2e   : > { %v4373_v30 = vmul.f32 %v10182_v49, %v4365_v28  ;;  %v4382_v33 = vadd.f32 %v10183_v29, %v4374_v40 }
 0xe30   : > { %v4381_v31 = vadd.f32 %v10183_v29, %v4373_v30 }
 0xe32   : > { %10648 = vmatprep.mubr.msk.f32.mxu0 %vm3038_vm0, %v4381_v31 }
 0xe33   : > { %10649 = vmatmul.mubr.msk.f32.vlgmr.msra.gmra.mxu0 %vm3038_vm0, %v4382_v33 }
 0xe34   : > { %10674 = vmatprep.mubr.msk.f32.mxu0 %vm13229_vm4, %v13228_v4 }
 0xef3   : > { %v10650_v41 = vpop.f32.mrf.mxu0 }
 0xef4   : > { %v4467_v43 = vadd.f32 %v10650_v41, %v10184_v39 }
 0xef5   : > { %v4461_v44 = vpop.f32.mrf.mxu0 }
 0xef6   : > { %v4462_v45 = vadd.f32 %v10184_v39, %v4461_v44  ;;  %v4471_v46 = vmax.f32 %v4467_v43, 0.0  ;;  %v10195_v39 = vld [vmem:[#allocation23] ss:$0 sm:$0xff]  ;;  %v10196_v43 = vld [vmem:[#allocation25] ss:$0 sm:$0xff] }
 0xef8   : > { %v4470_v42 = vmax.f32 %v4462_v45, 0.0 }
 0xefa   : > { %10667 = vmatprep.mubr.msk.f32.mxu1 %vm4478_vm3, %v4470_v42 }
 0xefb   : > { %10668 = vmatmul.mubr.msk.f32.vlgmr.msra.gmra.mxu1 %vm4478_vm3, %v4471_v46 }
 0xefc   : > { %10696 = vmatprep.mubr.msk.f32.mxu1 %vm13229_vm4, %v13228_v4 }
 0xfbb   : > { %v10669_v48 = vpop.f32.mrf.mxu1 }
 0xfbc   : > { %v4557_v50 = vadd.f32 %v10669_v48, %v10187_v47 }
 0xfbd   : > { %v4551_v52 = vpop.f32.mrf.mxu1 }
 0xfbe   : > { %v4552_v53 = vadd.f32 %v10187_v47, %v4551_v52  ;;  %v4561_v54 = vadd.f32 %v4557_v50, %v4382_v33 }
 0xfc0   : > { %v4565_v55 = vsel %vm3038_vm0, %v4561_v54, 0.0  ;;  %v4560_v56 = vadd.f32 %v4552_v53, %v4381_v31  ;;  %v4824_v53 = vld [vmem:[%s15054_s0 + $0x18] sm:$0xff]  ;;  %s15056_s0 = smov 112  }
 0xfc1   : > { %4566 = vadd.xlane.f32.xlu0 %v4565_v55  ;;  %10689 = vmatpush3.msra.mxu1 %v4824_v53  ;;  %v4822_v55 = vld [vmem:[%s15055_s10 + $0x8] sm:$0xff] }
 0xfc2   : > { %v4562_v59 = vsel %vm3038_vm0, %v4560_v56, 0.0  ;;  %10690 = vmatprep.subr.mxu1 %v13228_v4 }
 0xfc3   : > { %4563 = vadd.xlane.f32.xlu1 %v4562_v59 }
0x104a   : > { %v4567_v60 = vpop.xlane.xlu0 %4566 }
0x104b   : > { %v4569_v61 = vmul.f32 0.03125, %v4567_v60 }
0x104c   : > { %v4564_v62 = vpop.xlane.xlu1 %4563 }
0x104d   : > { %v4571_v63 = vsub.f32 %v4561_v54, %v4569_v61  ;;  %v4568_v0 = vmul.f32 0.03125, %v4564_v62  ;;  %v4823_v54 = vld [vmem:[%s15055_s10 + $0x10] sm:$0xff] }
0x104e   : > { %10691 = vmatpush3.msra.mxu1 %v4823_v54 }
0x104f   : > { %v4570_v1 = vsub.f32 %v4560_v56, %v4568_v0  ;;  %v4573_v2 = vmul.f32 %v4571_v63, %v4571_v63  ;;  %10692 = vmatprep.subr.mxu1 %v13228_v4  ;;  %v4821_v56 = vld [vmem:[%s15055_s10] sm:$0xff] }
0x1050   : > { %10693 = vmatpush3.msra.mxu1 %v4822_v55 }
0x1051   : > { %v4577_v58 = vsel %vm3038_vm0, %v4573_v2, 0.0  ;;  %v4572_v57 = vmul.f32 %v4570_v1, %v4570_v1  ;;  %10694 = vmatprep.subr.mxu1 %v13228_v4 }
0x1052   : > { %4578 = vadd.xlane.f32.xlu0 %v4577_v58  ;;  %10695 = vmatpush3.msra.mxu1 %v4821_v56 }
0x1053   : > { %v4574_v3 = vsel %vm3038_vm0, %v4572_v57, 0.0  ;;  %10709 = vmatprep.subr.mxu1 %v13228_v4  ;;  %v10199_v57 = vld [vmem:[#allocation31] ss:$0 sm:$0xff] }
0x1054   : > { %4575 = vadd.xlane.f32.xlu1 %v4574_v3 }
0x10db   : > { %v4579_v5 = vpop.xlane.xlu0 %4578 }
0x10dc   : > { %v4581_v6 = vmul.f32 0.03125, %v4579_v5 }
0x10dd   : > { %v4576_v7 = vpop.xlane.xlu1 %4575 }
0x10de   : > { %v4583_v8 = vadd.f32 1e-05, %v4581_v6  ;;  %v4580_v9 = vmul.f32 0.03125, %v4576_v7 }
0x10e0   : > { %11616 = vrsqrt.f32 %v4583_v8  ;;  %v4582_v10 = vadd.f32 1e-05, %v4580_v9 }
0x10e2   : > { %11618 = vrsqrt.f32 %v4582_v10  ;;  %v14321_v10 = vld [vmem:[#allocation29] sm:$0xff] }
0x10ed   : > { %v11617_v36 = vpop.eup %11616 }
0x10ee   : > { %v4587_v32 = vmul.f32 %v11617_v36, %v4571_v63  ;;  %v10197_v63 = vld [vmem:[#allocation26] ss:$0 sm:$0xff] }
0x10ef   : > { %v11619_v12 = vpop.eup %11618 }
0x10f0   : > { %v4595_v14 = vmul.f32 %v10190_v11, %v4587_v32  ;;  %v4586_v51 = vmul.f32 %v11619_v12, %v4570_v1  ;;  %v10198_v1 = vld [vmem:[#allocation28] ss:$0 sm:$0xff] }
0x10f2   : > { %v4603_v15 = vadd.f32 %v10191_v13, %v4595_v14  ;;  %v4594_v16 = vmul.f32 %v10190_v11, %v4586_v51 }
0x10f4   : > { %10671 = vmatpush3.msra.mxu0 %v4603_v15  ;;  %v4602_v17 = vadd.f32 %v10191_v13, %v4594_v16 }
0x10f5   : > { %10672 = vmatprep.subr.mxu0 %v13228_v4 }
0x10f6   : > { %10673 = vmatpush3.msra.mxu0 %v4602_v17 }
0x10f7   : > { %10675 = vmatmul.mubr.msk.f32.vlgmr.msra.gmra.mxu0 %vm3293_vm2, %v4604_v18  ;;  %10677 = vmatprep.subr.mxu0 %v13228_v4 }
0x10f8   : > { %10678 = vmatpush3.msra.mxu0 %v4608_v19  ;;  %10685 = vmatprep.mubr.msk.f32.mxu0 %vm13229_vm4, %v13228_v4 }
0x10f9   : > { %10679 = vmatprep.subr.mxu0 %v13228_v4 }
0x10fa   : > { %10680 = vmatpush3.msra.mxu0 %v4607_v20 }
0x10fb   : > { %10681 = vmatprep.subr.mxu0 %v13228_v4 }
0x10fc   : > { %10682 = vmatpush3.msra.mxu0 %v4606_v21 }
0x10fd   : > { %10683 = vmatprep.subr.mxu0 %v13228_v4 }
0x10fe   : > { %10684 = vmatpush3.msra.mxu0 %v4605_v22 }
0x10ff   : > { %10699 = vmatprep.subr.mxu0 %v13228_v4 }
0x11b7   : > { %v4681_v23 = vpop.f32.mrf.mxu0 }
0x11b8   : > { %10686 = vmatmul.mubr.msk.f32.vlgmr.msra.gmra.mxu0 %vm3038_vm0, %v4681_v23 }
0x11b9   : > { %v10676_v24 = vpop.f32.mrf.mxu0  ;;  %10701 = vmatprep.mubr.msk.f32.mxu0 %vm13229_vm4, %v13228_v4 }
0x1278   : > { %v4760_v49 = vpop.f32.mrf.mxu0 }
0x1279   : > { %v4761_v26 = vadd.f32 %v10193_v25, %v4760_v49 }
0x127a   : > { %v10687_v27 = vpop.f32.mrf.mxu0 }
0x127b   : > { %v4764_v28 = vsel %vm3038_vm0, %v4761_v26, 0.0 }
0x127c   : > { %4765 = vadd.xlane.f32.xlu0 %v4764_v28 }
0x1305   : > { %v4766_v40 = vpop.xlane.xlu0 %4765 }
0x1306   : > { %v4767_v29 = vmul.f32 0.03125, %v4766_v40 }
0x1308   : > { %v4768_v30 = vsub.f32 %v4761_v26, %v4767_v29 }
0x130a   : > { %v4769_v31 = vmul.f32 %v4768_v30, %v4768_v30 }
0x130c   : > { %v4770_v33 = vsel %vm3038_vm0, %v4769_v31, 0.0 }
0x130d   : > { %4771 = vadd.xlane.f32.xlu1 %v4770_v33 }
0x1396   : > { %v4772_v34 = vpop.xlane.xlu1 %4771 }
0x1397   : > { %v4773_v35 = vmul.f32 0.03125, %v4772_v34 }
0x1399   : > { %v4774_v37 = vadd.f32 1e-05, %v4773_v35 }
0x139b   : > { %11620 = vrsqrt.f32 %v4774_v37 }
0x13a8   : > { %v11621_v38 = vpop.eup %11620 }
0x13a9   : > { %v4776_v41 = vmul.f32 %v11621_v38, %v4768_v30 }
0x13ab   : > { %v4783_v44 = vmul.f32 %v10195_v39, %v4776_v41 }
0x13ad   : > { %v4790_v45 = vadd.f32 %v10196_v43, %v4783_v44 }
0x13af   : > { %v4793_v42 = vsel %vm3038_vm0, %v4790_v45, 0.0 }
0x13b0   : > { %4794 = vadd.xlane.f32.xlu0 %v4793_v42 }
0x1439   : > { %v4795_v46 = vpop.xlane.xlu0 %4794 }
0x143a   : > { %v4796_v47 = vmul.f32 0.03125, %v4795_v46 }
0x143c   : > { %v4797_v48 = vsub.f32 %v4790_v45, %v4796_v47 }
0x143e   : > { %v4798_v50 = vmul.f32 %v4797_v48, %v4797_v48 }
0x1440   : > { %v4799_v52 = vsel %vm3038_vm0, %v4798_v50, 0.0 }
0x1441   : > { %4800 = vadd.xlane.f32.xlu1 %v4799_v52 }
0x14ca   : > { %v4801_v59 = vpop.xlane.xlu1 %4800 }
0x14cb   : > { %v4802_v60 = vmul.f32 0.03125, %v4801_v59 }
0x14cd   : > { %v4803_v61 = vadd.f32 1e-05, %v4802_v60 }
0x14cf   : > { %11622 = vrsqrt.f32 %v4803_v61 }
0x14dc   : > { %v11623_v62 = vpop.eup %11622 }
0x14dd   : > { %v4805_v0 = vmul.f32 %v11623_v62, %v4797_v48 }
0x14df   : > { %v4812_v2 = vmul.f32 %v10197_v63, %v4805_v0 }
0x14e1   : > { %v14296_v58 = vadd.f32 %v10198_v1, %v4812_v2 }
0x14e3   : > { %10697 = vmatmul.mubr.msk.f32.vlgmr.msra.gmra.mxu1 %vm3038_vm0, %v14296_v58 }
0x14e4   : > { %10711 = vmatprep.mubr.msk.f32.mxu1 %vm13229_vm4, %v13228_v4 }
0x15a3   : > { %v4924_v3 = vpop.f32.mrf.mxu1 }
0x15a4   : > { %v14302_v5 = vadd.f32 %v10199_v57, %v4924_v3 }
0x15a5   : > { %v10698_v6 = vpop.f32.mrf.mxu1 }
0x15a6   : > { %5094 = vrot.lane.b32.xlu1 %v14302_v5, %s14911_s1  ;;  %4929 = vrot.lane.b32.xlu0 %v14302_v5, %s14909_s16  ;;  %s15061_s16 = smov 40   ;;  %s15062_s1 = sld [smem:[#allocation133_spill]] }
0x15aa   : > { %5092 = vrot.lane.b32.xlu1 %v14302_v5, %s14908_s3  ;;  %s15060_s3 = smov 48  }
0x1618   : > { %v5095_v7 = vpop.permute.xlu1 %5094  ;;  %v4930_v8 = vpop.permute.xlu0 %4929 }
0x1619   : > { %10700 = vmatpush3.xpose.msk.msra.mxu0 %vm3209_vm1, %v4930_v8  ;;  %10710 = vmatpush3.xpose.msk.msra.mxu1 %vm3209_vm1, %v5095_v7 }
0x161a   : > { %10704 = vmatprep.subr.mxu0 %v13228_v4  ;;  %10719 = vmatprep.subr.mxu1 %v13228_v4 }
0x161c   : > { %v5093_v9 = vpop.permute.xlu1 %5092  ;;  %10702 = vmatmul.mubr.msk.f32.vlgmr.msra.gmra.mxu0 %vm3209_vm1, %v14302_v5 }
0x161d   : > { %10712 = vmatmul.mubr.msk.f32.vlgmr.msra.gmra.mxu1 %vm3209_vm1, %v5093_v9  ;;  %10706 = vmatprep.mubr.msk.f32.mxu0 %vm13229_vm4, %v13228_v4 }
0x161e   : > { %10721 = vmatprep.mubr.msk.f32.mxu1 %vm13229_vm4, %v13228_v4 }
0x16dc   : > { %v5001_v36 = vpop.f32.mrf.mxu0 }
0x16dd   : > { %v5002_v11 = vadd.f32 %v5001_v36, %v14321_v10  ;;  %v5166_v32 = vpop.f32.mrf.mxu1 }
0x16de   : > { %v5167_v12 = vadd.f32 %v5166_v32, %v14321_v10  ;;  %v10703_v13 = vpop.f32.mrf.mxu0 }
0x16df   : > { %v10713_v14 = vpop.f32.mrf.mxu1  ;;  %v5005_v51 = vsel %vm3209_vm1, %v5002_v11, -inf }
0x16e0   : > { %5006 = vmax.xlane.f32.xlu1 %v5005_v51  ;;  %v5170_v15 = vsel %vm3209_vm1, %v5167_v12, -inf }
0x16e1   : > { %5171 = vmax.xlane.f32.xlu0 %v5170_v15 }
0x16f1   : > { %5016 = vrot.lane.b32.xlu1 %v14302_v5, %s14905_s5  ;;  %s15058_s5 = smov 72  }
0x16f5   : > { %5405 = vrot.lane.b32.xlu1 %v14302_v5, %s14903_s4  ;;  %s15057_s4 = sld [smem:[#allocation130_spill]] }
0x16f9   : > { %5403 = vrot.lane.b32.xlu1 %v14302_v5, %s15056_s0 }
0x16fb   : > { %v4826_v33 = vld [vmem:[%s15057_s4] sm:$0xff]  ;;  %v4827_v34 = vld [vmem:[%s15057_s4 + $0x8] sm:$0xff]  ;;  %v4828_v57 = vld [vmem:[%s15057_s4 + $0x10] sm:$0xff] }
0x16fc   : > { %10720 = vmatpush3.msra.mxu1 %v4827_v34  ;;  %v4835_v34 = vld [vmem:[#allocation37 + $0x10] sm:$0xff] }
0x16fd   : > { %10729 = vmatprep.subr.mxu1 %v13228_v4 }
0x1769   : > { %v5007_v16 = vpop.xlane.xlu1 %5006 }
0x176a   : > { %v5008_v17 = vsub.f32 %v5002_v11, %v5007_v16  ;;  %v5172_v18 = vpop.xlane.xlu0 %5171 }
0x176b   : > { %v5173_v19 = vsub.f32 %v5167_v12, %v5172_v18 }
0x176c   : > { %v5009_v20 = vmul.f32 1.442695, %v5008_v17 }
0x176d   : > { %v5174_v21 = vmul.f32 1.442695, %v5173_v19  ;;  %v5017_v22 = vpop.permute.xlu1 %5016  ;;  %v4829_v19 = vld [vmem:[%s15057_s4 + $0x18] sm:$0xff]  ;;  %s15066_s4 = smov 120  }
0x176e   : > { %11624 = vpow2.f32 %v5009_v20  ;;  %10705 = vmatpush3.msra.mxu0 %v5017_v22  ;;  %v10217_v22 = vld [vmem:[#allocation32] ss:$0 sm:$0xff] }
0x176f   : > { %10714 = vmatprep.subr.mxu0 %v13228_v4  ;;  %11626 = vpow2.f32 %v5174_v21 }
0x1771   : > { %v5406_v37 = vpop.permute.xlu1 %5405 }
0x1775   : > { %v5404_v43 = vpop.permute.xlu1 %5403 }
0x177b   : > { %v11625_v23 = vpop.eup %11624 }
0x177c   : > { %v5011_v24 = vsel %vm3209_vm1, %v11625_v23, 0.0  ;;  %v11627_v25 = vpop.eup %11626 }
0x177d   : > { %5012 = vadd.xlane.f32.xlu0 %v5011_v24  ;;  %v5176_v49 = vsel %vm3209_vm1, %v11627_v25, 0.0 }
0x1781   : > { %5177 = vadd.xlane.f32.xlu0 %v5176_v49 }
0x1797   : > { %5181 = vrot.lane.b32.xlu0 %v14302_v5, %s14907_s18  ;;  %s15059_s18 = smov 104  }
0x1806   : > { %v5013_v26 = vpop.xlane.xlu0 %5012 }
0x1807   : > { %11628 = vrcp.f32 %v5013_v26 }
0x180a   : > { %v5178_v27 = vpop.xlane.xlu0 %5177 }
0x180b   : > { %11630 = vrcp.f32 %v5178_v27 }
0x180e   : > { %v5182_v29 = vpop.permute.xlu0 %5181 }
0x1814   : > { %v11629_v28 = vpop.eup %11628 }
0x1815   : > { %v5015_v40 = vmul.f32 %v11629_v28, %v11625_v23 }
0x1817   : > { %10707 = vmatmul.mubr.msk.f32.vlgmr.msra.gmra.mxu0 %vm3209_vm1, %v5015_v40 }
0x1818   : > { %v11631_v30 = vpop.eup %11630  ;;  %10715 = vmatpush3.msra.mxu0 %v5182_v29  ;;  %10716 = vmatprep.mubr.msk.f32.mxu0 %vm13229_vm4, %v13228_v4 }
0x1819   : > { %v5180_v31 = vmul.f32 %v11631_v30, %v11627_v25  ;;  %10724 = vmatprep.subr.mxu0 %v13228_v4 }
0x181b   : > { %10717 = vmatmul.mubr.msk.f32.vlgmr.msra.gmra.mxu0 %vm3209_vm1, %v5180_v31 }
0x181c   : > { %10726 = vmatprep.mubr.msk.f32.mxu0 %vm13229_vm4, %v13228_v4  ;;  %10725 = vmatpush3.msra.mxu0 %v4826_v33  ;;  %v4836_v33 = vld [vmem:[#allocation37 + $0x18] sm:$0xff] }
0x181d   : > { %10734 = vmatprep.subr.mxu0 %v13228_v4 }
0x18d7   : > { %v5088_v35 = vpop.f32.mrf.mxu0 }
0x18d8   : > { %10727 = vmatmul.mubr.msk.f32.vlgmr.msra.gmra.mxu0 %vm3209_vm1, %v5088_v35  ;;  %v4833_v35 = vld [vmem:[#allocation37] sm:$0xff] }
0x18d9   : > { %v10708_v38 = vpop.f32.mrf.mxu0  ;;  %10736 = vmatprep.mubr.msk.f32.mxu0 %vm13229_vm4, %v13228_v4 }
0x18da   : > { %v4844_v38 = vld [vmem:[%s15062_s1 + $0x30] sm:$0xff] }
0x18db   : > { %v5253_v39 = vpop.f32.mrf.mxu0 }
0x18dc   : > { %10722 = vmatmul.mubr.msk.f32.vlgmr.msra.gmra.mxu1 %vm3209_vm1, %v5253_v39  ;;  %v4843_v39 = vld [vmem:[%s15062_s1 + $0x28] sm:$0xff] }
0x18dd   : > { %10730 = vmatpush3.xpose.msk.msra.mxu1 %vm3209_vm1, %v5406_v37  ;;  %v10718_v41 = vpop.f32.mrf.mxu0  ;;  %10731 = vmatprep.mubr.msk.f32.mxu1 %vm13229_vm4, %v13228_v4  ;;  %v4845_v37 = vld [vmem:[%s15062_s1 + $0x38] sm:$0xff] }
0x18de   : > { %10739 = vmatprep.subr.mxu1 %v13228_v4  ;;  %v4842_v41 = vld [vmem:[%s15062_s1 + $0x20] sm:$0xff] }
0x18e0   : > { %10732 = vmatmul.mubr.msk.f32.vlgmr.msra.gmra.mxu1 %vm3209_vm1, %v5404_v43  ;;  %v4841_v43 = vld [vmem:[%s15062_s1 + $0x18] sm:$0xff] }
0x18e1   : > { %10741 = vmatprep.mubr.msk.f32.mxu1 %vm13229_vm4, %v13228_v4  ;;  %10740 = vmatpush3.msra.mxu1 %v4828_v57 }
0x18e2   : > { %10749 = vmatprep.subr.mxu1 %v13228_v4 }
0x1998   : > { %v5399_v44 = vpop.f32.mrf.mxu0 }
0x199a   : > { %v10728_v45 = vpop.f32.mrf.mxu0 }
0x199c   : > { %v5326_v42 = vpop.f32.mrf.mxu1 }
0x199d   : > { %v5400_v46 = vadd.f32 %v5399_v44, %v5326_v42 }
0x199e   : > { %v10723_v47 = vpop.f32.mrf.mxu1 }
0x199f   : > { %v10218_v47 = vld [vmem:[#allocation34] ss:$0 sm:$0xff] }
0x19a0   : > { %v5477_v48 = vpop.f32.mrf.mxu1 }
0x19a1   : > { %v5478_v50 = vadd.f32 %v5477_v48, %v14321_v10 }
0x19a2   : > { %v10733_v52 = vpop.f32.mrf.mxu1 }
0x19a3   : > { %v5481_v53 = vsel %vm3209_vm1, %v5478_v50, -inf }
0x19a4   : > { %5482 = vmax.xlane.f32.xlu1 %v5481_v53 }
0x19b5   : > { %5644 = vrot.lane.b32.xlu1 %v14302_v5, %s15058_s5 }
0x19b9   : > { %5642 = vrot.lane.b32.xlu1 %v14302_v5, %s15059_s18 }
0x1a2d   : > { %v5483_v54 = vpop.xlane.xlu1 %5482 }
0x1a2e   : > { %v5484_v55 = vsub.f32 %v5478_v50, %v5483_v54  ;;  %v10219_v50 = vld [vmem:[#allocation35] ss:$0 sm:$0xff] }
0x1a2f   : > { %v4840_v54 = vld [vmem:[%s15062_s1 + $0x10] sm:$0xff] }
0x1a30   : > { %v5485_v56 = vmul.f32 1.442695, %v5484_v55  ;;  %v4839_v55 = vld [vmem:[%s15062_s1 + $0x8] sm:$0xff] }
0x1a31   : > { %v5645_v0 = vpop.permute.xlu1 %5644 }
0x1a32   : > { %11632 = vpow2.f32 %v5485_v56  ;;  %v4838_v56 = vld [vmem:[%s15062_s1] sm:$0xff]  ;;  %s15063_s1 = sld [smem:[#allocation136_spill]] }
0x1a35   : > { %v5643_v2 = vpop.permute.xlu1 %5642 }
0x1a3f   : > { %v11633_v59 = vpop.eup %11632 }
0x1a40   : > { %v5487_v60 = vsel %vm3209_vm1, %v11633_v59, 0.0 }
0x1a41   : > { %5488 = vadd.xlane.f32.xlu0 %v5487_v60 }
0x1a57   : > { %5492 = vrot.lane.b32.xlu0 %v14302_v5, %s15060_s3 }
0x1aca   : > { %v5489_v61 = vpop.xlane.xlu0 %5488 }
0x1acb   : > { %11634 = vrcp.f32 %v5489_v61 }
0x1ace   : > { %v5493_v62 = vpop.permute.xlu0 %5492 }
0x1acf   : > { %10735 = vmatpush3.msra.mxu0 %v5493_v62 }
0x1ad0   : > { %10744 = vmatprep.subr.mxu0 %v13228_v4 }
0x1ad8   : > { %v11635_v63 = vpop.eup %11634 }
0x1ad9   : > { %v5491_v1 = vmul.f32 %v11635_v63, %v11633_v59  ;;  %v10220_v59 = vld [vmem:[#allocation38] ss:$0 sm:$0xff] }
0x1adb   : > { %10737 = vmatmul.mubr.msk.f32.vlgmr.msra.gmra.mxu0 %vm3209_vm1, %v5491_v1 }
0x1adc   : > { %10745 = vmatpush3.xpose.msk.msra.mxu0 %vm3209_vm1, %v5645_v0  ;;  %10746 = vmatprep.mubr.msk.f32.mxu0 %vm13229_vm4, %v13228_v4  ;;  %v10222_v0 = vld [vmem:[#allocation40] ss:$0 sm:$0xff] }
0x1add   : > { %10754 = vmatprep.subr.mxu0 %v13228_v4 }
0x1adf   : > { %10747 = vmatmul.mubr.msk.f32.vlgmr.msra.gmra.mxu0 %vm3209_vm1, %v5643_v2 }
0x1ae0   : > { %10756 = vmatprep.mubr.msk.f32.mxu0 %vm13229_vm4, %v13228_v4  ;;  %10755 = vmatpush3.msra.mxu0 %v4829_v19  ;;  %v6106_v19 = vld [vmem:[%s15063_s1 + $0x10] sm:$0xff] }
0x1ae1   : > { %10770 = vmatprep.subr.mxu0 %v13228_v4 }
0x1b9b   : > { %v5564_v3 = vpop.f32.mrf.mxu0 }
0x1b9c   : > { %10742 = vmatmul.mubr.msk.f32.vlgmr.msra.gmra.mxu1 %vm3209_vm1, %v5564_v3 }
0x1b9d   : > { %v10738_v6 = vpop.f32.mrf.mxu0  ;;  %10751 = vmatprep.mubr.msk.f32.mxu1 %vm13229_vm4, %v13228_v4 }
0x1b9f   : > { %v5716_v7 = vpop.f32.mrf.mxu0 }
0x1ba0   : > { %v5717_v8 = vadd.f32 %v5716_v7, %v14321_v10 }
0x1ba1   : > { %v10748_v9 = vpop.f32.mrf.mxu0 }
0x1ba2   : > { %v5720_v36 = vsel %vm3209_vm1, %v5717_v8, -inf }
0x1ba3   : > { %5721 = vmax.xlane.f32.xlu0 %v5720_v36 }
0x1bb9   : > { %5731 = vrot.lane.b32.xlu0 %v14302_v5, %s15061_s16 }
0x1c2c   : > { %v5722_v11 = vpop.xlane.xlu0 %5721 }
0x1c2d   : > { %v5723_v32 = vsub.f32 %v5717_v8, %v5722_v11 }
0x1c2f   : > { %v5724_v12 = vmul.f32 1.442695, %v5723_v32 }
0x1c30   : > { %v5732_v13 = vpop.permute.xlu0 %5731 }
0x1c31   : > { %11636 = vpow2.f32 %v5724_v12  ;;  %10750 = vmatpush3.msra.mxu1 %v5732_v13 }
0x1c32   : > { %10759 = vmatprep.subr.mxu1 %v13228_v4 }
0x1c3e   : > { %v11637_v14 = vpop.eup %11636 }
0x1c3f   : > { %v5726_v51 = vsel %vm3209_vm1, %v11637_v14, 0.0 }
0x1c40   : > { %5727 = vadd.xlane.f32.xlu1 %v5726_v51  ;;  %v10224_v51 = vld [vmem:[#allocation41] ss:$0 sm:$0xff] }
0x1c5c   : > { %v5637_v10 = vpop.f32.mrf.mxu1 }
0x1c5d   : > { %v5641_v15 = vadd.f32 %v5637_v10, %v5400_v46 }
0x1c5e   : > { %v10743_v16 = vpop.f32.mrf.mxu1 }
0x1cc9   : > { %v5728_v17 = vpop.xlane.xlu1 %5727 }
0x1cca   : > { %11638 = vrcp.f32 %v5728_v17 }
0x1cd7   : > { %v11639_v18 = vpop.eup %11638 }
0x1cd8   : > { %v5730_v5 = vmul.f32 %v11639_v18, %v11637_v14  ;;  %v6103_v18 = vld [vmem:[#allocation44] sm:$0xf] }
0x1cda   : > { %10752 = vmatmul.mubr.msk.f32.vlgmr.msra.gmra.mxu1 %vm3209_vm1, %v5730_v5  ;;  %v6107_v5 = vld [vmem:[%s15063_s1 + $0x18] sm:$0xff] }
0x1cdb   : > { %10767 = vmatprep.mubr.msk.f32.mxu1 %vm13229_vm4, %v13228_v4  ;;  %10760 = vmatpush3.msra.mxu1 %v4836_v33 }
0x1cdc   : > { %10761 = vmatprep.subr.mxu1 %v13228_v4 }
0x1cdd   : > { %10762 = vmatpush3.msra.mxu1 %v4835_v34 }
0x1cde   : > { %10763 = vmatprep.subr.mxu1 %v13228_v4 }
0x1d9a   : > { %v5803_v20 = vpop.f32.mrf.mxu1 }
0x1d9b   : > { %10757 = vmatmul.mubr.msk.f32.vlgmr.msra.gmra.mxu0 %vm3209_vm1, %v5803_v20  ;;  %v6105_v20 = vld [vmem:[%s15063_s1 + $0x8] sm:$0xff] }
0x1d9c   : > { %v10753_v21 = vpop.f32.mrf.mxu1  ;;  %10786 = vmatprep.mubr.msk.f32.mxu0 %vm13229_vm4, %v13228_v4  ;;  %10771 = vmatpush3.msra.mxu0 %v4845_v37  ;;  %v10229_v37 = vld [vmem:[#allocation47] ss:$0 sm:$0xff] }
0x1d9d   : > { %10772 = vmatprep.subr.mxu0 %v13228_v4  ;;  %v6104_v21 = vld [vmem:[%s15063_s1] sm:$0xff]  ;;  %s15064_s1 = smov 88  }
0x1d9e   : > { %10773 = vmatpush3.msra.mxu0 %v4844_v38 }
0x1d9f   : > { %10774 = vmatprep.subr.mxu0 %v13228_v4 }
0x1da0   : > { %10775 = vmatpush3.msra.mxu0 %v4843_v39  ;;  %v10230_v39 = vld [vmem:[#allocation49] ss:$0 sm:$0xff] }
0x1da1   : > { %10776 = vmatprep.subr.mxu0 %v13228_v4 }
0x1da2   : > { %10777 = vmatpush3.msra.mxu0 %v4842_v41 }
0x1da3   : > { %10778 = vmatprep.subr.mxu0 %v13228_v4 }
0x1da4   : > { %10779 = vmatpush3.msra.mxu0 %v4841_v43 }
0x1da5   : > { %10780 = vmatprep.subr.mxu0 %v13228_v4 }
0x1da6   : > { %10781 = vmatpush3.msra.mxu0 %v4840_v54  ;;  %v6321_v54 = vld [vmem:[#allocation55] sm:$0xff] }
0x1da7   : > { %10782 = vmatprep.subr.mxu0 %v13228_v4 }
0x1da8   : > { %10783 = vmatpush3.msra.mxu0 %v4839_v55 }
0x1da9   : > { %10784 = vmatprep.subr.mxu0 %v13228_v4 }
0x1daa   : > { %10785 = vmatpush3.msra.mxu0 %v4838_v56 }
0x1dab   : > { %10805 = vmatprep.subr.mxu0 %v13228_v4 }
0x1e5b   : > { %v5876_v23 = vpop.f32.mrf.mxu0 }
0x1e5c   : > { %v5880_v24 = vadd.f32 %v5876_v23, %v5641_v15  ;;  %v10225_v15 = vld [vmem:[#allocation43] ss:$0 sm:$0xff] }
0x1e5d   : > { %v10758_v25 = vpop.f32.mrf.mxu0 }
0x1e5e   : > { %v5887_v49 = vadd.f32 %v10217_v22, %v5880_v24  ;;  %v10227_v24 = vld [vmem:[#allocation46] ss:$0 sm:$0xff] }
0x1e60   : > { %v5888_v26 = vadd.f32 %v5887_v49, %v14296_v58  ;;  %v4834_v58 = vld [vmem:[#allocation37 + $0x8] sm:$0xff] }
0x1e61   : > { %10764 = vmatpush3.msra.mxu1 %v4834_v58 }
0x1e62   : > { %v5889_v27 = vsel %vm3038_vm0, %v5888_v26, 0.0  ;;  %10765 = vmatprep.subr.mxu1 %v13228_v4 }
0x1e63   : > { %5890 = vadd.xlane.f32.xlu1 %v5889_v27  ;;  %10766 = vmatpush3.msra.mxu1 %v4833_v35 }
0x1e64   : > { %10789 = vmatprep.subr.mxu1 %v13228_v4 }
0x1eec   : > { %v5891_v28 = vpop.xlane.xlu1 %5890 }
0x1eed   : > { %v5892_v40 = vmul.f32 0.03125, %v5891_v28 }
0x1eef   : > { %v5893_v29 = vsub.f32 %v5888_v26, %v5892_v40 }
0x1ef1   : > { %v5894_v30 = vmul.f32 %v5893_v29, %v5893_v29 }
0x1ef3   : > { %v5895_v31 = vsel %vm3038_vm0, %v5894_v30, 0.0 }
0x1ef4   : > { %5896 = vadd.xlane.f32.xlu1 %v5895_v31 }
0x1f7d   : > { %v5897_v44 = vpop.xlane.xlu1 %5896 }
0x1f7e   : > { %v5898_v45 = vmul.f32 0.03125, %v5897_v44 }
0x1f80   : > { %v5899_v42 = vadd.f32 1e-05, %v5898_v45 }
0x1f82   : > { %11640 = vrsqrt.f32 %v5899_v42 }
0x1f8f   : > { %v11641_v46 = vpop.eup %11640 }
0x1f90   : > { %v5901_v48 = vmul.f32 %v11641_v46, %v5893_v29 }
0x1f92   : > { %v5908_v52 = vmul.f32 %v10218_v47, %v5901_v48 }
0x1f94   : > { %v5915_v53 = vadd.f32 %v10219_v50, %v5908_v52  ;;  %v6324_v50 = vld [vmem:[#allocation55 + $0x18] sm:$0xff]  ;;  %v6323_v52 = vld [vmem:[#allocation55 + $0x10] sm:$0xff] }
0x1f96   : > { %10768 = vmatmul.mubr.msk.f32.vlgmr.msra.gmra.mxu1 %vm3038_vm0, %v5915_v53 }
0x1f97   : > { %10791 = vmatprep.mubr.msk.f32.mxu1 %vm13229_vm4, %v13228_v4 }
0x2056   : > { %v5991_v60 = vpop.f32.mrf.mxu1 }
0x2057   : > { %v5992_v61 = vadd.f32 %v10220_v59, %v5991_v60 }
0x2058   : > { %v10769_v62 = vpop.f32.mrf.mxu1 }
0x2059   : > { %v5995_v63 = vmax.f32 %v5992_v61, 0.0  ;;  %v10231_v61 = vld [vmem:[#allocation50] ss:$0 sm:$0xff] }
0x205b   : > { %10787 = vmatmul.mubr.msk.f32.vlgmr.msra.gmra.mxu0 %vm4478_vm3, %v5995_v63  ;;  %v10232_v63 = vld [vmem:[#allocation52] ss:$0 sm:$0xff] }
0x205c   : > { %10813 = vmatprep.mubr.msk.f32.mxu0 %vm13229_vm4, %v13228_v4  ;;  %10806 = vmatpush3.msra.mxu0 %v6324_v50 }
0x205d   : > { %10807 = vmatprep.subr.mxu0 %v13228_v4 }
0x205e   : > { %10808 = vmatpush3.msra.mxu0 %v6323_v52 }
0x205f   : > { %10809 = vmatprep.subr.mxu0 %v13228_v4 }
0x211b   : > { %v6071_v1 = vpop.f32.mrf.mxu0 }
0x211c   : > { %v6072_v2 = vadd.f32 %v10222_v0, %v6071_v1 }
0x211d   : > { %v10788_v57 = vpop.f32.mrf.mxu0 }
0x211e   : > { %v6075_v3 = vadd.f32 %v6072_v2, %v5915_v53  ;;  %v6322_v53 = vld [vmem:[#allocation55 + $0x8] sm:$0xff]  ;;  %v10233_v2 = vld [vmem:[#allocation56] ss:$0 sm:$0xff] }
0x211f   : > { %10810 = vmatpush3.msra.mxu0 %v6322_v53 }
0x2120   : > { %v6076_v6 = vsel %vm3038_vm0, %v6075_v3, 0.0  ;;  %10811 = vmatprep.subr.mxu0 %v13228_v4 }
0x2121   : > { %6077 = vadd.xlane.f32.xlu1 %v6076_v6  ;;  %10812 = vmatpush3.msra.mxu0 %v6321_v54 }
0x2122   : > { %10826 = vmatprep.subr.mxu0 %v13228_v4 }
0x21aa   : > { %v6078_v7 = vpop.xlane.xlu1 %6077 }
0x21ab   : > { %v6079_v8 = vmul.f32 0.03125, %v6078_v7 }
0x21ad   : > { %v6080_v9 = vsub.f32 %v6075_v3, %v6079_v8 }
0x21af   : > { %v6081_v36 = vmul.f32 %v6080_v9, %v6080_v9 }
0x21b1   : > { %v6082_v11 = vsel %vm3038_vm0, %v6081_v36, 0.0  ;;  %v14476_v36 = vld [vmem:[#allocation53] sm:$0xf] }
0x21b2   : > { %6083 = vadd.xlane.f32.xlu1 %v6082_v11 }
0x223b   : > { %v6084_v32 = vpop.xlane.xlu1 %6083 }
0x223c   : > { %v6085_v12 = vmul.f32 0.03125, %v6084_v32 }
0x223e   : > { %v6086_v13 = vadd.f32 1e-05, %v6085_v12 }
0x2240   : > { %11642 = vrsqrt.f32 %v6086_v13 }
0x224d   : > { %v11643_v14 = vpop.eup %11642 }
0x224e   : > { %v6088_v10 = vmul.f32 %v11643_v14, %v6080_v9 }
0x2250   : > { %v6095_v16 = vmul.f32 %v10224_v51, %v6088_v10 }
0x2252   : > { %v6102_v17 = vadd.f32 %v10225_v15, %v6095_v16 }
0x2254   : > { %10790 = vmatpush3.msra.mxu1 %v6102_v17 }
0x2255   : > { %10792 = vmatmul.mubr.msk.f32.vlgmr.msra.gmra.mxu1 %vm3209_vm1, %v6103_v18  ;;  %10794 = vmatprep.subr.mxu1 %v13228_v4 }
0x2256   : > { %10795 = vmatpush3.msra.mxu1 %v6107_v5  ;;  %10802 = vmatprep.mubr.msk.f32.mxu1 %vm13229_vm4, %v13228_v4 }
0x2257   : > { %10796 = vmatprep.subr.mxu1 %v13228_v4 }
0x2258   : > { %10797 = vmatpush3.msra.mxu1 %v6106_v19 }
0x2259   : > { %10798 = vmatprep.subr.mxu1 %v13228_v4 }
0x225a   : > { %10799 = vmatpush3.msra.mxu1 %v6105_v20 }
0x225b   : > { %10800 = vmatprep.subr.mxu1 %v13228_v4 }
0x225c   : > { %10801 = vmatpush3.msra.mxu1 %v6104_v21 }
0x225d   : > { %10816 = vmatprep.subr.mxu1 %v13228_v4 }
0x2315   : > { %v6180_v22 = vpop.f32.mrf.mxu1 }
0x2316   : > { %10803 = vmatmul.mubr.msk.f32.vlgmr.msra.gmra.mxu1 %vm3038_vm0, %v6180_v22 }
0x2317   : > { %v10793_v23 = vpop.f32.mrf.mxu1  ;;  %10818 = vmatprep.mubr.msk.f32.mxu1 %vm13229_vm4, %v13228_v4 }
0x23d6   : > { %v6259_v25 = vpop.f32.mrf.mxu1 }
0x23d7   : > { %v6260_v49 = vadd.f32 %v10227_v24, %v6259_v25 }
0x23d8   : > { %v10804_v26 = vpop.f32.mrf.mxu1 }
0x23d9   : > { %v6264_v27 = vsel %vm6263_vm5, %v6260_v49, 0.0 }
0x23da   : > { %6265 = vadd.xlane.f32.xlu0 %v6264_v27 }
0x2463   : > { %v6266_v28 = vpop.xlane.xlu0 %6265 }
0x2464   : > { %v6267_v40 = vmul.f32 0.03125, %v6266_v28 }
0x2466   : > { %v6268_v29 = vsub.f32 %v6260_v49, %v6267_v40 }
0x2468   : > { %v6269_v30 = vmul.f32 %v6268_v29, %v6268_v29 }
0x246a   : > { %v6270_v31 = vsel %vm6263_vm5, %v6269_v30, 0.0 }
0x246b   : > { %6271 = vadd.xlane.f32.xlu1 %v6270_v31  ;;  %v6326_v31 = vld [vmem:[#allocation58] sm:$0xff] }
0x24f4   : > { %v6272_v33 = vpop.xlane.xlu1 %6271 }
0x24f5   : > { %v6273_v34 = vmul.f32 0.03125, %v6272_v33  ;;  %v6327_v33 = vld [vmem:[#allocation58 + $0x8] sm:$0xff] }
0x24f7   : > { %v6274_v58 = vadd.f32 1e-05, %v6273_v34 }
0x24f9   : > { %11644 = vrsqrt.f32 %v6274_v58 }
0x2506   : > { %v11645_v35 = vpop.eup %11644 }
0x2507   : > { %v6276_v38 = vmul.f32 %v11645_v35, %v6268_v29 }
0x2509   : > { %v6283_v41 = vmul.f32 %v10229_v37, %v6276_v38 }
0x250b   : > { %v6290_v43 = vadd.f32 %v10230_v39, %v6283_v41 }
0x250d   : > { %v6293_v44 = vsel %vm6263_vm5, %v6290_v43, 0.0 }
0x250e   : > { %6294 = vadd.xlane.f32.xlu1 %v6293_v44 }
0x2597   : > { %v6295_v45 = vpop.xlane.xlu1 %6294 }
0x2598   : > { %v6296_v42 = vmul.f32 0.03125, %v6295_v45 }
0x259a   : > { %v6297_v46 = vsub.f32 %v6290_v43, %v6296_v42 }
0x259c   : > { %v6298_v47 = vmul.f32 %v6297_v46, %v6297_v46 }
0x259e   : > { %v6299_v48 = vsel %vm6263_vm5, %v6298_v47, 0.0 }
0x259f   : > { %6300 = vadd.xlane.f32.xlu1 %v6299_v48 }
0x2628   : > { %v6301_v55 = vpop.xlane.xlu1 %6300 }
0x2629   : > { %v6302_v56 = vmul.f32 0.03125, %v6301_v55 }
0x262b   : > { %v6303_v59 = vadd.f32 1e-05, %v6302_v56 }
0x262d   : > { %11646 = vrsqrt.f32 %v6303_v59 }
0x263a   : > { %v11647_v60 = vpop.eup %11646 }
0x263b   : > { %v6305_v62 = vmul.f32 %v11647_v60, %v6297_v46 }
0x263d   : > { %v6312_v0 = vmul.f32 %v10231_v61, %v6305_v62 }
0x263f   : > { %v14451_v1 = vadd.f32 %v10232_v63, %v6312_v0 }
0x2641   : > { %10814 = vmatmul.mubr.msk.f32.vlgmr.msra.gmra.mxu0 %vm3038_vm0, %v14451_v1 }
0x2642   : > { %10828 = vmatprep.mubr.msk.f32.mxu0 %vm13229_vm4, %v13228_v4 }
0x2701   : > { %v6424_v57 = vpop.f32.mrf.mxu0 }
0x2702   : > { %v14457_v3 = vadd.f32 %v10233_v2, %v6424_v57  ;;  %v6328_v2 = vld [vmem:[#allocation58 + $0x10] sm:$0xff] }
0x2703   : > { %v10815_v6 = vpop.f32.mrf.mxu0 }
0x2704   : > { %6598 = vrot.lane.b32.xlu0 %v14457_v3, %s15064_s1  ;;  %6429 = vrot.lane.b32.xlu1 %v14457_v3, %s15065_s2  ;;  %s15067_s1 = smov 56  }
0x2708   : > { %6596 = vrot.lane.b32.xlu1 %v14457_v3, %s15066_s4  ;;  %s15068_s4 = smov 64  }
0x2776   : > { %v6599_v7 = vpop.permute.xlu0 %6598  ;;  %v6430_v8 = vpop.permute.xlu1 %6429 }
0x2777   : > { %10817 = vmatpush3.xpose.msk.msra.mxu1 %vm3209_vm1, %v6430_v8  ;;  %10827 = vmatpush3.xpose.msk.msra.mxu0 %vm3209_vm1, %v6599_v7 }
0x2778   : > { %10821 = vmatprep.subr.mxu1 %v13228_v4  ;;  %10836 = vmatprep.subr.mxu0 %v13228_v4 }
0x277a   : > { %10819 = vmatmul.mubr.msk.f32.vlgmr.msra.gmra.mxu1 %vm3209_vm1, %v14457_v3  ;;  %v6597_v9 = vpop.permute.xlu1 %6596 }
0x277b   : > { %10829 = vmatmul.mubr.msk.f32.vlgmr.msra.gmra.mxu0 %vm3209_vm1, %v6597_v9  ;;  %10823 = vmatprep.mubr.msk.f32.mxu1 %vm13229_vm4, %v13228_v4 }
0x277c   : > { %10838 = vmatprep.mubr.msk.f32.mxu0 %vm13229_vm4, %v13228_v4  ;;  %10837 = vmatpush3.msra.mxu0 %v6327_v33  ;;  %v6335_v33 = vld [vmem:[#allocation64 + $0x10] sm:$0xff] }
0x277d   : > { %10846 = vmatprep.subr.mxu0 %v13228_v4 }
0x283a   : > { %v6501_v11 = vpop.f32.mrf.mxu1 }
0x283b   : > { %v6502_v32 = vadd.f32 %v6501_v11, %v14476_v36  ;;  %v6670_v12 = vpop.f32.mrf.mxu0 }
0x283c   : > { %v6671_v13 = vadd.f32 %v6670_v12, %v14476_v36  ;;  %v10820_v14 = vpop.f32.mrf.mxu1 }
0x283d   : > { %v10830_v51 = vpop.f32.mrf.mxu0  ;;  %v6506_v10 = vsel %vm6505_vm6, %v6502_v32, -inf }
0x283e   : > { %6507 = vmax.xlane.f32.xlu1 %v6506_v10  ;;  %v6674_v15 = vsel %vm6505_vm6, %v6671_v13, -inf }
0x283f   : > { %6675 = vmax.xlane.f32.xlu0 %v6674_v15 }
0x2855   : > { %6685 = vrot.lane.b32.xlu0 %v14457_v3, %s15067_s1  ;;  %s15069_s1 = smov 80  }
0x28c7   : > { %v6508_v16 = vpop.xlane.xlu1 %6507 }
0x28c8   : > { %v6509_v17 = vsub.f32 %v6502_v32, %v6508_v16  ;;  %v6676_v18 = vpop.xlane.xlu0 %6675 }
0x28c9   : > { %v6677_v5 = vsub.f32 %v6671_v13, %v6676_v18 }
0x28ca   : > { %v6510_v19 = vmul.f32 1.442695, %v6509_v17 }
0x28cb   : > { %v6678_v20 = vmul.f32 1.442695, %v6677_v5  ;;  %v6329_v5 = vld [vmem:[#allocation58 + $0x18] sm:$0xff] }
0x28cc   : > { %11648 = vpow2.f32 %v6510_v19  ;;  %v6686_v40 = vpop.permute.xlu0 %6685 }
0x28cd   : > { %11650 = vpow2.f32 %v6678_v20 }
0x28d9   : > { %v11649_v21 = vpop.eup %11648 }
0x28da   : > { %v6512_v22 = vsel %vm6505_vm6, %v11649_v21, 0.0  ;;  %v11651_v23 = vpop.eup %11650 }
0x28db   : > { %6513 = vadd.xlane.f32.xlu1 %v6512_v22  ;;  %v6680_v24 = vsel %vm6505_vm6, %v11651_v23, 0.0 }
0x28df   : > { %6681 = vadd.xlane.f32.xlu1 %v6680_v24 }
0x28f0   : > { %6517 = vrot.lane.b32.xlu1 %v14457_v3, %s15068_s4 }
0x28f4   : > { %6910 = vrot.lane.b32.xlu1 %v14457_v3, %s15069_s1 }
0x28f8   : > { %6908 = vrot.lane.b32.xlu1 %v14457_v3, %s15056_s0 }
0x2964   : > { %v6514_v25 = vpop.xlane.xlu1 %6513 }
0x2965   : > { %11652 = vrcp.f32 %v6514_v25 }
0x2968   : > { %v6682_v49 = vpop.xlane.xlu1 %6681 }
0x2969   : > { %11654 = vrcp.f32 %v6682_v49 }
0x296c   : > { %v6518_v26 = vpop.permute.xlu1 %6517 }
0x296d   : > { %10822 = vmatpush3.msk.msra.mxu1 %vm6523_vm7, %v6518_v26 }
0x296e   : > { %10831 = vmatprep.subr.mxu1 %v13228_v4 }
0x2970   : > { %v6911_v58 = vpop.permute.xlu1 %6910 }
0x2972   : > { %v11653_v27 = vpop.eup %11652 }
0x2973   : > { %v6516_v28 = vmul.f32 %v11653_v27, %v11649_v21  ;;  %v10255_v21 = vld [vmem:[#allocation59] ss:$0 sm:$0xff] }
0x2974   : > { %v6909_v39 = vpop.permute.xlu1 %6908 }
0x2975   : > { %10824 = vmatmul.mubr.msk.f32.vlgmr.msra.gmra.mxu1 %vm6519_vm8, %v6516_v28 }
0x2976   : > { %v11655_v29 = vpop.eup %11654  ;;  %10832 = vmatpush3.msk.msra.mxu1 %vm6523_vm7, %v6686_v40  ;;  %10833 = vmatprep.mubr.msk.f32.mxu1 %vm13229_vm4, %v13228_v4 }
0x2977   : > { %v6684_v30 = vmul.f32 %v11655_v29, %v11651_v23  ;;  %10841 = vmatprep.subr.mxu1 %v13228_v4 }
0x2979   : > { %10834 = vmatmul.mubr.msk.f32.vlgmr.msra.gmra.mxu1 %vm6519_vm8, %v6684_v30 }
0x297a   : > { %10843 = vmatprep.mubr.msk.f32.mxu1 %vm13229_vm4, %v13228_v4  ;;  %10842 = vmatpush3.msra.mxu1 %v6326_v31  ;;  %v6336_v31 = vld [vmem:[#allocation64 + $0x18] sm:$0xff] }
0x297b   : > { %10851 = vmatprep.subr.mxu1 %v13228_v4 }
0x2a35   : > { %v6592_v34 = vpop.f32.mrf.mxu1 }
0x2a36   : > { %10844 = vmatmul.mubr.msk.f32.vlgmr.msra.gmra.mxu1 %vm3209_vm1, %v6592_v34  ;;  %v6333_v34 = vld [vmem:[#allocation64] sm:$0xff] }
0x2a37   : > { %v10825_v35 = vpop.f32.mrf.mxu1  ;;  %10853 = vmatprep.mubr.msk.f32.mxu1 %vm13229_vm4, %v13228_v4 }
0x2a39   : > { %v6758_v37 = vpop.f32.mrf.mxu1 }
0x2a3a   : > { %10839 = vmatmul.mubr.msk.f32.vlgmr.msra.gmra.mxu0 %vm3209_vm1, %v6758_v37 }
0x2a3b   : > { %10847 = vmatpush3.xpose.msk.msra.mxu0 %vm3209_vm1, %v6911_v58  ;;  %v10835_v38 = vpop.f32.mrf.mxu1  ;;  %10848 = vmatprep.mubr.msk.f32.mxu0 %vm13229_vm4, %v13228_v4 }
0x2a3c   : > { %10856 = vmatprep.subr.mxu0 %v13228_v4 }
0x2a3e   : > { %10849 = vmatmul.mubr.msk.f32.vlgmr.msra.gmra.mxu0 %vm3209_vm1, %v6909_v39 }
0x2a3f   : > { %10858 = vmatprep.mubr.msk.f32.mxu0 %vm13229_vm4, %v13228_v4  ;;  %10857 = vmatpush3.msra.mxu0 %v6328_v2 }
0x2a40   : > { %10866 = vmatprep.subr.mxu0 %v13228_v4 }
0x2af6   : > { %v6904_v41 = vpop.f32.mrf.mxu1 }
0x2af8   : > { %v10845_v43 = vpop.f32.mrf.mxu1 }
0x2afa   : > { %v6831_v44 = vpop.f32.mrf.mxu0 }
0x2afb   : > { %v6905_v45 = vadd.f32 %v6904_v41, %v6831_v44 }
0x2afc   : > { %v10840_v42 = vpop.f32.mrf.mxu0 }
0x2afd   : > { %v10256_v42 = vld [vmem:[#allocation61] ss:$0 sm:$0xff] }
0x2afe   : > { %v6982_v46 = vpop.f32.mrf.mxu0 }
0x2aff   : > { %v6983_v47 = vadd.f32 %v6982_v46, %v14476_v36 }
0x2b00   : > { %v10850_v48 = vpop.f32.mrf.mxu0 }
0x2b01   : > { %v6986_v50 = vsel %vm6505_vm6, %v6983_v47, -inf }
0x2b02   : > { %6987 = vmax.xlane.f32.xlu1 %v6986_v50 }
0x2b13   : > { %7150 = vrot.lane.b32.xlu1 %v14457_v3, %s15058_s5 }
0x2b17   : > { %7148 = vrot.lane.b32.xlu1 %v14457_v3, %s15059_s18  ;;  %s15072_s18 = sld [smem:[#allocation156_spill]] }
0x2b8b   : > { %v6988_v52 = vpop.xlane.xlu1 %6987 }
0x2b8c   : > { %v6989_v53 = vsub.f32 %v6983_v47, %v6988_v52  ;;  %v10257_v47 = vld [vmem:[#allocation62] ss:$0 sm:$0xff] }
0x2b8e   : > { %v6990_v54 = vmul.f32 1.442695, %v6989_v53 }
0x2b8f   : > { %v7151_v62 = vpop.permute.xlu1 %7150 }
0x2b90   : > { %11656 = vpow2.f32 %v6990_v54 }
0x2b93   : > { %v7149_v0 = vpop.permute.xlu1 %7148 }
0x2b9d   : > { %v11657_v55 = vpop.eup %11656 }
0x2b9e   : > { %v6992_v56 = vsel %vm6505_vm6, %v11657_v55, 0.0 }
0x2b9f   : > { %6993 = vadd.xlane.f32.xlu0 %v6992_v56 }
0x2bb5   : > { %6997 = vrot.lane.b32.xlu0 %v14457_v3, %s15060_s3 }
0x2c28   : > { %v6994_v59 = vpop.xlane.xlu0 %6993 }
0x2c29   : > { %11658 = vrcp.f32 %v6994_v59 }
0x2c2c   : > { %v6998_v60 = vpop.permute.xlu0 %6997 }
0x2c2d   : > { %10852 = vmatpush3.msk.msra.mxu1 %vm6523_vm7, %v6998_v60 }
0x2c2e   : > { %10861 = vmatprep.subr.mxu1 %v13228_v4 }
0x2c36   : > { %v11659_v61 = vpop.eup %11658 }
0x2c37   : > { %v6996_v63 = vmul.f32 %v11659_v61, %v11657_v55  ;;  %v10258_v55 = vld [vmem:[#allocation65] ss:$0 sm:$0xff] }
0x2c39   : > { %10854 = vmatmul.mubr.msk.f32.vlgmr.msra.gmra.mxu1 %vm6519_vm8, %v6996_v63 }
0x2c3a   : > { %10862 = vmatpush3.xpose.msk.msra.mxu1 %vm3209_vm1, %v7151_v62  ;;  %10863 = vmatprep.mubr.msk.f32.mxu1 %vm13229_vm4, %v13228_v4  ;;  %v10260_v62 = vld [vmem:[#allocation67] ss:$0 sm:$0xff] }
0x2c3b   : > { %10871 = vmatprep.subr.mxu1 %v13228_v4 }
0x2c3d   : > { %10864 = vmatmul.mubr.msk.f32.vlgmr.msra.gmra.mxu1 %vm3209_vm1, %v7149_v0 }
0x2c3e   : > { %10873 = vmatprep.mubr.msk.f32.mxu1 %vm13229_vm4, %v13228_v4  ;;  %10872 = vmatpush3.msra.mxu1 %v6329_v5 }
0x2c3f   : > { %10887 = vmatprep.subr.mxu1 %v13228_v4 }
0x2cf9   : > { %v7070_v57 = vpop.f32.mrf.mxu1 }
0x2cfa   : > { %10859 = vmatmul.mubr.msk.f32.vlgmr.msra.gmra.mxu0 %vm3209_vm1, %v7070_v57 }
0x2cfb   : > { %v10855_v6 = vpop.f32.mrf.mxu1  ;;  %10868 = vmatprep.mubr.msk.f32.mxu0 %vm13229_vm4, %v13228_v4 }
0x2cfd   : > { %v7222_v7 = vpop.f32.mrf.mxu1 }
0x2cfe   : > { %v7223_v8 = vadd.f32 %v7222_v7, %v14476_v36 }
0x2cff   : > { %v10865_v9 = vpop.f32.mrf.mxu1 }
0x2d00   : > { %v7226_v11 = vsel %vm6505_vm6, %v7223_v8, -inf }
0x2d01   : > { %7227 = vmax.xlane.f32.xlu0 %v7226_v11 }
0x2d17   : > { %7237 = vrot.lane.b32.xlu0 %v14457_v3, %s15061_s16  ;;  %s15070_s16 = sld [smem:[#allocation151_spill]] }
0x2d1d   : > { %s15071_s5 = smov %s15070_s16  ;;  %v6345_v58 = vld [vmem:[%s15070_s16 + $0x38] sm:$0xff]  ;;  %s15074_s16 = sld [smem:[#allocation162_spill]] }
0x2d1e   : > { %v6344_v35 = vld [vmem:[%s15071_s5 + $0x30] sm:$0xff]  ;;  %v6343_v37 = vld [vmem:[%s15071_s5 + $0x28] sm:$0xff]  ;;  %v6342_v38 = vld [vmem:[%s15071_s5 + $0x20] sm:$0xff] }
0x2d1f   : > { %v6341_v39 = vld [vmem:[%s15071_s5 + $0x18] sm:$0xff]  ;;  %v6340_v52 = vld [vmem:[%s15071_s5 + $0x10] sm:$0xff]  ;;  %v6339_v53 = vld [vmem:[%s15071_s5 + $0x8] sm:$0xff] }
0x2d20   : > { %v6338_v54 = vld [vmem:[%s15071_s5] sm:$0xff]  ;;  %s15073_s5 = smov %s15072_s18 }
0x2d21   : > { %v7613_v5 = vld [vmem:[%s15073_s5 + $0x10] sm:$0xff] }
0x2d8a   : > { %v7228_v32 = vpop.xlane.xlu0 %7227 }
0x2d8b   : > { %v7229_v12 = vsub.f32 %v7223_v8, %v7228_v32 }
0x2d8d   : > { %v7230_v13 = vmul.f32 1.442695, %v7229_v12 }
0x2d8e   : > { %v7238_v14 = vpop.permute.xlu0 %7237 }
0x2d8f   : > { %11660 = vpow2.f32 %v7230_v13  ;;  %10867 = vmatpush3.msk.msra.mxu0 %vm6523_vm7, %v7238_v14 }
0x2d90   : > { %10876 = vmatprep.subr.mxu0 %v13228_v4 }
0x2d9c   : > { %v11661_v51 = vpop.eup %11660 }
0x2d9d   : > { %v7232_v10 = vsel %vm6505_vm6, %v11661_v51, 0.0 }
0x2d9e   : > { %7233 = vadd.xlane.f32.xlu1 %v7232_v10  ;;  %v10262_v10 = vld [vmem:[#allocation68] ss:$0 sm:$0xff] }
0x2dba   : > { %v7143_v36 = vpop.f32.mrf.mxu0 }
0x2dbb   : > { %v7147_v15 = vadd.f32 %v7143_v36, %v6905_v45 }
0x2dbc   : > { %v10860_v16 = vpop.f32.mrf.mxu0 }
0x2e27   : > { %v7234_v17 = vpop.xlane.xlu1 %7233 }
0x2e28   : > { %11662 = vrcp.f32 %v7234_v17 }
0x2e35   : > { %v11663_v18 = vpop.eup %11662 }
0x2e36   : > { %v7236_v3 = vmul.f32 %v11663_v18, %v11661_v51  ;;  %v7610_v18 = vld [vmem:[#allocation71] sm:$0x3] }
0x2e38   : > { %10869 = vmatmul.mubr.msk.f32.vlgmr.msra.gmra.mxu0 %vm6519_vm8, %v7236_v3  ;;  %v7614_v3 = vld [vmem:[%s15072_s18 + $0x18] sm:$0xff]  ;;  %s15076_s18 = sld [smem:[#allocation163_spill]] }
0x2e39   : > { %10884 = vmatprep.mubr.msk.f32.mxu0 %vm13229_vm4, %v13228_v4  ;;  %10877 = vmatpush3.msra.mxu0 %v6336_v31 }
0x2e3a   : > { %10878 = vmatprep.subr.mxu0 %v13228_v4 }
0x2e3b   : > { %10879 = vmatpush3.msra.mxu0 %v6335_v33 }
0x2e3c   : > { %10880 = vmatprep.subr.mxu0 %v13228_v4 }
0x2ef8   : > { %v7310_v19 = vpop.f32.mrf.mxu0 }
0x2ef9   : > { %10874 = vmatmul.mubr.msk.f32.vlgmr.msra.gmra.mxu1 %vm3209_vm1, %v7310_v19  ;;  %v7612_v19 = vld [vmem:[%s15073_s5 + $0x8] sm:$0xff] }
0x2efa   : > { %v10870_v20 = vpop.f32.mrf.mxu0  ;;  %10903 = vmatprep.mubr.msk.f32.mxu1 %vm13229_vm4, %v13228_v4  ;;  %10888 = vmatpush3.msra.mxu1 %v6345_v58  ;;  %v10268_v58 = vld [vmem:[#allocation74] ss:$0 sm:$0xff] }
0x2efb   : > { %10889 = vmatprep.subr.mxu1 %v13228_v4  ;;  %v7611_v20 = vld [vmem:[%s15073_s5] sm:$0xff]  ;;  %s15075_s5 = smov %s15074_s16 }
0x2efc   : > { %10890 = vmatpush3.msra.mxu1 %v6344_v35 }
0x2efd   : > { %10891 = vmatprep.subr.mxu1 %v13228_v4 }
0x2efe   : > { %10892 = vmatpush3.msra.mxu1 %v6343_v37  ;;  %v10269_v37 = vld [vmem:[#allocation76] ss:$0 sm:$0xff] }
0x2eff   : > { %10893 = vmatprep.subr.mxu1 %v13228_v4 }
0x2f00   : > { %10894 = vmatpush3.msra.mxu1 %v6342_v38 }
0x2f01   : > { %10895 = vmatprep.subr.mxu1 %v13228_v4 }
0x2f02   : > { %10896 = vmatpush3.msra.mxu1 %v6341_v39 }
0x2f03   : > { %10897 = vmatprep.subr.mxu1 %v13228_v4 }
0x2f04   : > { %10898 = vmatpush3.msra.mxu1 %v6340_v52  ;;  %v7843_v52 = vld [vmem:[%s15075_s5 + $0x60] sm:$0xff] }
0x2f05   : > { %10899 = vmatprep.subr.mxu1 %v13228_v4 }
0x2f06   : > { %10900 = vmatpush3.msra.mxu1 %v6339_v53  ;;  %v7842_v53 = vld [vmem:[%s15075_s5 + $0x58] sm:$0xff] }
0x2f07   : > { %10901 = vmatprep.subr.mxu1 %v13228_v4 }
0x2f08   : > { %10902 = vmatpush3.msra.mxu1 %v6338_v54  ;;  %v7841_v54 = vld [vmem:[%s15075_s5 + $0x50] sm:$0xff] }
0x2fb9   : > { %v7383_v22 = vpop.f32.mrf.mxu1 }
0x2fba   : > { %v7387_v23 = vadd.f32 %v7383_v22, %v7147_v15  ;;  %v10263_v15 = vld [vmem:[#allocation70] ss:$0 sm:$0xff] }
0x2fbb   : > { %v10875_v24 = vpop.f32.mrf.mxu1 }
0x2fbc   : > { %v7394_v25 = vadd.f32 %v10255_v21, %v7387_v23  ;;  %v10266_v23 = vld [vmem:[#allocation73] ss:$0 sm:$0xff] }
0x2fbe   : > { %v7395_v49 = vadd.f32 %v7394_v25, %v14451_v1  ;;  %v6334_v1 = vld [vmem:[#allocation64 + $0x8] sm:$0xff] }
0x2fbf   : > { %10881 = vmatpush3.msra.mxu0 %v6334_v1 }
0x2fc0   : > { %v7396_v26 = vsel %vm6263_vm5, %v7395_v49, 0.0  ;;  %10882 = vmatprep.subr.mxu0 %v13228_v4 }
0x2fc1   : > { %7397 = vadd.xlane.f32.xlu1 %v7396_v26  ;;  %10883 = vmatpush3.msra.mxu0 %v6333_v34 }
0x2fc2   : > { %10906 = vmatprep.subr.mxu0 %v13228_v4 }
0x304a   : > { %v7398_v27 = vpop.xlane.xlu1 %7397 }
0x304b   : > { %v7399_v28 = vmul.f32 0.03125, %v7398_v27 }
0x304d   : > { %v7400_v40 = vsub.f32 %v7395_v49, %v7399_v28 }
0x304f   : > { %v7401_v29 = vmul.f32 %v7400_v40, %v7400_v40 }
0x3051   : > { %v7402_v30 = vsel %vm6263_vm5, %v7401_v29, 0.0 }
0x3052   : > { %7403 = vadd.xlane.f32.xlu1 %v7402_v30 }
0x30db   : > { %v7404_v41 = vpop.xlane.xlu1 %7403 }
0x30dc   : > { %v7405_v43 = vmul.f32 0.03125, %v7404_v41 }
0x30de   : > { %v7406_v44 = vadd.f32 1e-05, %v7405_v43 }
0x30e0   : > { %11664 = vrsqrt.f32 %v7406_v44 }
0x30ed   : > { %v11665_v45 = vpop.eup %11664 }
0x30ee   : > { %v7408_v46 = vmul.f32 %v11665_v45, %v7400_v40 }
0x30f0   : > { %v7415_v48 = vmul.f32 %v10256_v42, %v7408_v46 }
0x30f2   : > { %v7422_v50 = vadd.f32 %v10257_v47, %v7415_v48  ;;  %v7846_v47 = vld [vmem:[%s15074_s16 + $0x78] sm:$0xff]  ;;  %v7845_v48 = vld [vmem:[%s15075_s5 + $0x70] sm:$0xff]  ;;  %s15080_s16 = sld [smem:[#allocation170_spill]] }
0x30f3   : > { %7917 = vmatprep.subr.mxu1 %v7846_v47 }
0x30f4   : > { %10885 = vmatmul.mubr.msk.f32.vlgmr.msra.gmra.mxu0 %vm3038_vm0, %v7422_v50 }
0x30f5   : > { %10908 = vmatprep.mubr.msk.f32.mxu0 %vm13229_vm4, %v13228_v4 }
0x31b4   : > { %v7498_v56 = vpop.f32.mrf.mxu0 }
0x31b5   : > { %v7499_v59 = vadd.f32 %v10258_v55, %v7498_v56  ;;  %v7840_v55 = vld [vmem:[%s15075_s5 + $0x48] sm:$0xff]  ;;  %v7839_v56 = vld [vmem:[%s15075_s5 + $0x40] sm:$0xff] }
0x31b6   : > { %v10886_v60 = vpop.f32.mrf.mxu0 }
0x31b7   : > { %v7502_v61 = vmax.f32 %v7499_v59, 0.0  ;;  %v7838_v59 = vld [vmem:[%s15075_s5 + $0x38] sm:$0xff]  ;;  %v7837_v60 = vld [vmem:[%s15075_s5 + $0x30] sm:$0xff] }
0x31b9   : > { %10904 = vmatmul.mubr.msk.f32.vlgmr.msra.gmra.mxu1 %vm4478_vm3, %v7502_v61  ;;  %v7836_v61 = vld [vmem:[%s15075_s5 + $0x28] sm:$0xff] }
0x31ba   : > { %7965 = vmatprep.mubr.f32.mxu1 %v13228_v4  ;;  %7918 = vmatpush1.msra.mxu1 %v7845_v48 }
0x3279   : > { %v7578_v63 = vpop.f32.mrf.mxu1 }
0x327a   : > { %v7579_v0 = vadd.f32 %v10260_v62, %v7578_v63  ;;  %v7835_v62 = vld [vmem:[%s15075_s5 + $0x20] sm:$0xff]  ;;  %v7834_v63 = vld [vmem:[%s15075_s5 + $0x18] sm:$0xff] }
0x327b   : > { %v10905_v2 = vpop.f32.mrf.mxu1 }
0x327c   : > { %v7582_v57 = vadd.f32 %v7579_v0, %v7422_v50  ;;  %v7844_v50 = vld [vmem:[%s15075_s5 + $0x68] sm:$0xff]  ;;  %v7833_v0 = vld [vmem:[%s15075_s5 + $0x10] sm:$0xff] }
0x327d   : > { %7919 = vmatprep.subr.mxu1 %v7844_v50  ;;  %v7832_v2 = vld [vmem:[%s15075_s5 + $0x8] sm:$0xff] }
0x327e   : > { %v7583_v6 = vsel %vm6263_vm5, %v7582_v57, 0.0  ;;  %7920 = vmatpush1.msra.mxu1 %v7843_v52 }
0x327f   : > { %7584 = vadd.xlane.f32.xlu1 %v7583_v6  ;;  %7921 = vmatprep.subr.mxu1 %v7842_v53 }
0x3280   : > { %7922 = vmatpush1.msra.mxu1 %v7841_v54 }
0x3281   : > { %7923 = vmatprep.subr.mxu1 %v7840_v55 }
0x3282   : > { %7924 = vmatpush1.msra.mxu1 %v7839_v56 }
0x3283   : > { %7925 = vmatprep.subr.mxu1 %v7838_v59 }
0x3284   : > { %7926 = vmatpush1.msra.mxu1 %v7837_v60 }
0x3285   : > { %7927 = vmatprep.subr.mxu1 %v7836_v61 }
0x3286   : > { %7928 = vmatpush1.msra.mxu1 %v7835_v62 }
0x3287   : > { %7929 = vmatprep.subr.mxu1 %v7834_v63 }
0x3288   : > { %7930 = vmatpush1.msra.mxu1 %v7833_v0 }
0x3289   : > { %7931 = vmatprep.subr.mxu1 %v7832_v2 }
0x3308   : > { %v7585_v7 = vpop.xlane.xlu1 %7584 }
0x3309   : > { %v7586_v8 = vmul.f32 0.03125, %v7585_v7 }
0x330b   : > { %v7587_v9 = vsub.f32 %v7582_v57, %v7586_v8  ;;  %v7831_v57 = vld [vmem:[%s15075_s5] sm:$0xff]  ;;  %s13232_s5 = smov [#allocation80]  }
0x330c   : > { %7932 = vmatpush1.msra.mxu1 %v7831_v57  ;;  %s12920_s6 = sshll.u32 %s13232_s5, 4  ;;  %s12921_s6 = int_to_ptr.vmem [resolvable:$false] %s12920_s6 }
0x330d   : > { %v7588_v11 = vmul.f32 %v7587_v9, %v7587_v9  ;;  %10942 = vmatprep.subr.mxu1 %v13228_v4 }
0x330f   : > { %v7589_v32 = vsel %vm6263_vm5, %v7588_v11, 0.0  ;;  %v10270_v11 = vld [vmem:[#allocation77] ss:$0 sm:$0xff] }
0x3310   : > { %7590 = vadd.xlane.f32.xlu1 %v7589_v32 }
0x3399   : > { %v7591_v12 = vpop.xlane.xlu1 %7590 }
0x339a   : > { %v7592_v13 = vmul.f32 0.03125, %v7591_v12  ;;  %v10271_v12 = vld [vmem:[#allocation79] ss:$0 sm:$0xff] }
0x339c   : > { %v7593_v14 = vadd.f32 1e-05, %v7592_v13 }
0x339e   : > { %11666 = vrsqrt.f32 %v7593_v14 }
0x33ab   : > { %v11667_v51 = vpop.eup %11666 }
0x33ac   : > { %v7595_v36 = vmul.f32 %v11667_v51, %v7587_v9  ;;  %v7888_v51 = vlaneseq }
0x33ae   : > { %v7602_v16 = vmul.f32 %v10262_v10, %v7595_v36  ;;  %v7889_v10 = vshrl.u32 %v7888_v51, 7 }
0x33b0   : > { %v7609_v17 = vadd.f32 %v10263_v15, %v7602_v16  ;;  %v7890_v36 = vsub.s32 0, %v7889_v10  ;;  %v7847_v15 = vld [vmem:[%s15076_s18] sm:$0x3]  ;;  %s15082_s18 = sld [smem:[#allocation166_spill]] }
0x33b2   : > { %10907 = vmatpush3.msk.msra.mxu0 %vm6523_vm7, %v7609_v17  ;;  %v7891_v16 = vrot.slane %v7847_v15, %v7890_v36 }
0x33b3   : > { %10909 = vmatmul.mubr.msk.f32.vlgmr.msra.gmra.mxu0 %vm6519_vm8, %v7610_v18  ;;  %10911 = vmatprep.subr.mxu0 %v13228_v4 }
0x33b4   : > { %10912 = vmatpush3.msra.mxu0 %v7614_v3  ;;  %10919 = vmatprep.mubr.msk.f32.mxu0 %vm13229_vm4, %v13228_v4  ;;  %v7894_v3 = vsub.s32 1, %v7889_v10 }
0x33b5   : > { %10913 = vmatprep.subr.mxu0 %v13228_v4 }
0x33b6   : > { %10914 = vmatpush3.msra.mxu0 %v7613_v5  ;;  %v7895_v5 = vrot.slane %v7847_v15, %v7894_v3 }
0x33b7   : > { %10915 = vmatprep.subr.mxu0 %v13228_v4 }
0x33b8   : > { %10916 = vmatpush3.msra.mxu0 %v7612_v19 }
0x33b9   : > { %10917 = vmatprep.subr.mxu0 %v13228_v4 }
0x33ba   : > { %10918 = vmatpush3.msra.mxu0 %v7611_v20 }
0x33bb   : > { %10922 = vmatprep.subr.mxu0 %v13228_v4 }
0x3473   : > { %v7690_v21 = vpop.f32.mrf.mxu0 }
0x3474   : > { %10920 = vmatmul.mubr.msk.f32.vlgmr.msra.gmra.mxu0 %vm3038_vm0, %v7690_v21 }
0x3475   : > { %v10910_v22 = vpop.f32.mrf.mxu0  ;;  %10924 = vmatprep.mubr.msk.f32.mxu0 %vm13229_vm4, %v13228_v4 }
0x3534   : > { %v7769_v24 = vpop.f32.mrf.mxu0 }
0x3535   : > { %v7770_v25 = vadd.f32 %v10266_v23, %v7769_v24 }
0x3536   : > { %v10921_v49 = vpop.f32.mrf.mxu0 }
0x3537   : > { %v7774_v26 = vsel %vm7773_vm9, %v7770_v25, 0.0 }
0x3538   : > { %7775 = vadd.xlane.f32.xlu0 %v7774_v26 }
0x35c1   : > { %v7776_v27 = vpop.xlane.xlu0 %7775 }
0x35c2   : > { %v7778_v28 = vmul.f32 0.015625, %v7776_v27 }
0x35c4   : > { %v7779_v40 = vsub.f32 %v7770_v25, %v7778_v28 }
0x35c6   : > { %v7780_v29 = vmul.f32 %v7779_v40, %v7779_v40 }
0x35c8   : > { %v7781_v30 = vsel %vm7773_vm9, %v7780_v29, 0.0 }
0x35c9   : > { %7782 = vadd.xlane.f32.xlu1 %v7781_v30 }
0x3652   : > { %v7783_v31 = vpop.xlane.xlu1 %7782 }
0x3653   : > { %v7784_v33 = vmul.f32 0.015625, %v7783_v31 }
0x3655   : > { %v7785_v1 = vadd.f32 1e-05, %v7784_v33 }
0x3657   : > { %11668 = vrsqrt.f32 %v7785_v1 }
0x3664   : > { %v11669_v34 = vpop.eup %11668 }
0x3665   : > { %v7787_v35 = vmul.f32 %v11669_v34, %v7779_v40 }
0x3667   : > { %v7794_v38 = vmul.f32 %v10268_v58, %v7787_v35 }
0x3669   : > { %v7801_v39 = vadd.f32 %v10269_v37, %v7794_v38 }
0x366b   : > { %v7804_v41 = vsel %vm7773_vm9, %v7801_v39, 0.0 }
0x366c   : > { %7805 = vadd.xlane.f32.xlu1 %v7804_v41 }
0x36f5   : > { %v7806_v43 = vpop.xlane.xlu1 %7805 }
0x36f6   : > { %v7807_v44 = vmul.f32 0.015625, %v7806_v43 }
0x36f8   : > { %v7808_v45 = vsub.f32 %v7801_v39, %v7807_v44 }
0x36fa   : > { %v7809_v42 = vmul.f32 %v7808_v45, %v7808_v45 }
0x36fc   : > { %v7810_v46 = vsel %vm7773_vm9, %v7809_v42, 0.0 }
0x36fd   : > { %7811 = vadd.xlane.f32.xlu1 %v7810_v46 }
0x3786   : > { %v7812_v6 = vpop.xlane.xlu1 %7811 }
0x3787   : > { %v7813_v7 = vmul.f32 0.015625, %v7812_v6 }
0x3789   : > { %v7814_v8 = vadd.f32 1e-05, %v7813_v7 }
0x378b   : > { %11670 = vrsqrt.f32 %v7814_v8 }
0x3798   : > { %v11671_v9 = vpop.eup %11670 }
0x3799   : > { %v7816_v32 = vmul.f32 %v11671_v9, %v7808_v45 }
0x379b   : > { %v7823_v13 = vmul.f32 %v10270_v11, %v7816_v32 }
0x379d   : > { %v14618_v14 = vadd.f32 %v10271_v12, %v7823_v13 }
0x379f   : > { %10272 = vmatmul.mubr.msk.f32.vlgmr.msra.gmra.mxu1 %vm4478_vm3, %v14618_v14 }
0x37a0   : > { %10946 = vmatprep.mubr.msk.f32.mxu1 %vm13229_vm4, %v13228_v4 }
0x385f   : > { %v7967_v17 = vpop.f32.mrf.mxu1 }
0x3860   : > { %v14625_v18 = vadd.f32 %v7967_v17, %v7891_v16 }
0x3861   : > { %v7969_v19 = vpop.f32.mrf.mxu1 }
0x3862   : > { %7973 = vrot.lane.b32.xlu1 %v14625_v18, %s15068_s4  ;;  %v14631_v21 = vadd.f32 %v7969_v19, %v7895_v5  ;;  %s13230_s4 = smov 32  }
0x38d4   : > { %v7974_v20 = vpop.permute.xlu1 %7973 }
0x38d5   : > { %10923 = vmatpush3.xpose.msk.msra.mxu0 %vm3293_vm2, %v7974_v20 }
0x38d6   : > { %10927 = vmatprep.subr.mxu0 %v13228_v4 }
0x38d8   : > { %10925 = vmatmul.mubr.msk.f32.vlgmr.msra.gmra.mxu0 %vm3293_vm2, %v14625_v18 }
0x38d9   : > { %10928 = vmatpush3.msk.msra.mxu0 %vm8065_vm10, %v14631_v21  ;;  %10929 = vmatprep.mubr.msk.f32.mxu0 %vm13229_vm4, %v13228_v4 }
0x38da   : > { %10932 = vmatprep.subr.mxu0 %v13228_v4 }
0x3998   : > { %v8045_v22 = vpop.f32.mrf.mxu0 }
0x3999   : > { %v8050_v23 = vsel %vm8049_vm11, %v8045_v22, -inf }
0x399a   : > { %8051 = vmax.xlane.f32.xlu1 %v8050_v23  ;;  %v10926_v24 = vpop.f32.mrf.mxu0 }
0x3a23   : > { %v8052_v25 = vpop.xlane.xlu1 %8051 }
0x3a24   : > { %v8053_v49 = vsub.f32 %v8045_v22, %v8052_v25 }
0x3a26   : > { %v8054_v26 = vmul.f32 1.442695, %v8053_v49 }
0x3a28   : > { %11672 = vpow2.f32 %v8054_v26 }
0x3a35   : > { %v11673_v27 = vpop.eup %11672 }
0x3a36   : > { %v8056_v28 = vsel %vm8049_vm11, %v11673_v27, 0.0 }
0x3a37   : > { %8057 = vadd.xlane.f32.xlu0 %v8056_v28 }
0x3a4d   : > { %8141 = vrot.lane.b32.xlu0 %v14625_v18, %s15060_s3  ;;  %s15077_s3 = sld [smem:[#allocation164_spill]] }
0x3a51   : > { %8139 = vrot.lane.b32.xlu0 %v14625_v18, %s15056_s0 }
0x3a53   : > { %v7851_v45 = vld [vmem:[%s15077_s3 + $0x18] sm:$0xff]  ;;  %v7850_v42 = vld [vmem:[%s15077_s3 + $0x10] sm:$0xff]  ;;  %v7849_v52 = vld [vmem:[%s15077_s3 + $0x8] sm:$0xff] }
0x3a54   : > { %10943 = vmatpush3.msra.mxu1 %v7851_v45  ;;  %v7848_v53 = vld [vmem:[%s15077_s3] sm:$0xff]  ;;  %v7853_v12 = vld [vmem:[%s15077_s3 + $0x28] sm:$0xff]  ;;  %v7855_v49 = vld [vmem:[%s15077_s3 + $0x38] sm:$0xff] }
0x3a55   : > { %10944 = vmatprep.subr.mxu1 %v13228_v4  ;;  %v7852_v16 = vld [vmem:[%s15077_s3 + $0x20] sm:$0xff] }
0x3a56   : > { %10945 = vmatpush3.msra.mxu1 %v7850_v42 }
0x3a57   : > { %10956 = vmatprep.subr.mxu1 %v13228_v4 }
0x3ac0   : > { %v8058_v40 = vpop.xlane.xlu0 %8057 }
0x3ac1   : > { %11674 = vrcp.f32 %v8058_v40 }
0x3ac4   : > { %v8142_v30 = vpop.permute.xlu0 %8141 }
0x3ac8   : > { %v8140_v33 = vpop.permute.xlu0 %8139 }
0x3ace   : > { %v11675_v29 = vpop.eup %11674 }
0x3acf   : > { %v8060_v31 = vmul.f32 %v11675_v29, %v11673_v27 }
0x3ad1   : > { %10930 = vmatmul.mubr.msk.f32.vlgmr.msra.gmra.mxu0 %vm8061_vm12, %v8060_v31 }
0x3ad2   : > { %10933 = vmatpush3.xpose.msk.msra.mxu0 %vm3293_vm2, %v8142_v30  ;;  %10934 = vmatprep.mubr.msk.f32.mxu0 %vm13229_vm4, %v13228_v4 }
0x3ad3   : > { %10937 = vmatprep.subr.mxu0 %v13228_v4 }
0x3ad5   : > { %10935 = vmatmul.mubr.msk.f32.vlgmr.msra.gmra.mxu0 %vm3293_vm2, %v8140_v33 }
0x3ad6   : > { %10939 = vmatprep.mubr.msk.f32.mxu0 %vm13229_vm4, %v13228_v4 }
0x3b91   : > { %v8135_v1 = vpop.f32.mrf.mxu0 }
0x3b93   : > { %v10931_v34 = vpop.f32.mrf.mxu0 }
0x3b95   : > { %v8213_v58 = vpop.f32.mrf.mxu0 }
0x3b96   : > { %v8217_v35 = vsel %vm8049_vm11, %v8213_v58, -inf }
0x3b97   : > { %8218 = vmax.xlane.f32.xlu0 %v8217_v35  ;;  %v10936_v37 = vpop.f32.mrf.mxu0 }
0x3c20   : > { %v8219_v38 = vpop.xlane.xlu0 %8218 }
0x3c21   : > { %v8220_v39 = vsub.f32 %v8213_v58, %v8219_v38 }
0x3c23   : > { %v8221_v41 = vmul.f32 1.442695, %v8220_v39 }
0x3c25   : > { %11676 = vpow2.f32 %v8221_v41 }
0x3c32   : > { %v11677_v43 = vpop.eup %11676 }
0x3c33   : > { %v8223_v44 = vsel %vm8049_vm11, %v11677_v43, 0.0 }
0x3c34   : > { %8224 = vadd.xlane.f32.xlu1 %v8223_v44 }
0x3c45   : > { %8228 = vrot.lane.b32.xlu1 %v14631_v21, %s15056_s0  ;;  %s13231_s0 = smov 16  }
0x3c49   : > { %8453 = vrot.lane.b32.xlu1 %v14625_v18, %s13230_s4  ;;  %s15081_s4 = smov %s15080_s16 }
0x3c4d   : > { %8451 = vrot.lane.b32.xlu1 %v14625_v18, %s15065_s2 }
0x3cbd   : > { %v8225_v46 = vpop.xlane.xlu1 %8224 }
0x3cbe   : > { %11678 = vrcp.f32 %v8225_v46 }
0x3cc1   : > { %v8229_v47 = vpop.permute.xlu1 %8228 }
0x3cc2   : > { %10938 = vmatpush3.msk.msra.mxu0 %vm8065_vm10, %v8229_v47 }
0x3cc3   : > { %10949 = vmatprep.subr.mxu0 %v13228_v4 }
0x3cc5   : > { %v8454_v54 = vpop.permute.xlu1 %8453 }
0x3cc9   : > { %v8452_v59 = vpop.permute.xlu1 %8451 }
0x3ccb   : > { %v11679_v48 = vpop.eup %11678 }
0x3ccc   : > { %v8227_v50 = vmul.f32 %v11679_v48, %v11677_v43 }
0x3cce   : > { %10940 = vmatmul.mubr.msk.f32.vlgmr.msra.gmra.mxu0 %vm8061_vm12, %v8227_v50 }
0x3ccf   : > { %10950 = vmatpush3.msra.mxu0 %v7849_v52  ;;  %10953 = vmatprep.mubr.msk.f32.mxu0 %vm13229_vm4, %v13228_v4 }
0x3cd0   : > { %10951 = vmatprep.subr.mxu0 %v13228_v4 }
0x3cd1   : > { %10952 = vmatpush3.msra.mxu0 %v7848_v53 }
0x3cd2   : > { %10954 = vmatmul.mubr.msk.f32.vlgmr.msra.gmra.mxu0 %vm3293_vm2, %v8135_v1  ;;  %10961 = vmatprep.subr.mxu0 %v13228_v4 }
0x3cd3   : > { %10963 = vmatprep.mubr.msk.f32.mxu0 %vm13229_vm4, %v13228_v4 }
0x3d8e   : > { %v8301_v55 = vpop.f32.mrf.mxu0 }
0x3d8f   : > { %10947 = vmatmul.mubr.msk.f32.vlgmr.msra.gmra.mxu1 %vm3293_vm2, %v8301_v55 }
0x3d90   : > { %10957 = vmatpush3.xpose.msk.msra.mxu1 %vm3293_vm2, %v8454_v54  ;;  %v10941_v56 = vpop.f32.mrf.mxu0  ;;  %10958 = vmatprep.mubr.msk.f32.mxu1 %vm13229_vm4, %v13228_v4 }
0x3d91   : > { %10966 = vmatprep.subr.mxu1 %v13228_v4 }
0x3d92   : > { %v8447_v60 = vpop.f32.mrf.mxu0 }
0x3d93   : > { %10959 = vmatmul.mubr.msk.f32.vlgmr.msra.gmra.mxu1 %vm3293_vm2, %v8452_v59  ;;  %v7883_v59 = vld [vmem:[%s15080_s16 + $0x78] sm:$0xff]  ;;  %s15085_s16 = sld [smem:[#allocation171_spill]] }
0x3d94   : > { %v10955_v61 = vpop.f32.mrf.mxu0  ;;  %10970 = vmatprep.mubr.msk.f32.mxu1 %vm13229_vm4, %v13228_v4  ;;  %10967 = vmatpush3.msra.mxu1 %v7853_v12 }
0x3d95   : > { %10968 = vmatprep.subr.mxu1 %v13228_v4  ;;  %v7881_v61 = vld [vmem:[%s15081_s4 + $0x68] sm:$0xff] }
0x3d96   : > { %10969 = vmatpush3.msra.mxu1 %v7852_v16 }
0x3d97   : > { %10978 = vmatprep.subr.mxu1 %v13228_v4 }
0x3e4f   : > { %v8374_v62 = vpop.f32.mrf.mxu1 }
0x3e50   : > { %v8448_v26 = vadd.f32 %v8447_v60, %v8374_v62  ;;  %v7882_v60 = vld [vmem:[%s15081_s4 + $0x70] sm:$0xff]  ;;  %v7880_v62 = vld [vmem:[%s15081_s4 + $0x60] sm:$0xff] }
0x3e51   : > { %v10948_v63 = vpop.f32.mrf.mxu1 }
0x3e52   : > { %v7879_v63 = vld [vmem:[%s15081_s4 + $0x58] sm:$0xff] }
0x3e53   : > { %v8525_v0 = vpop.f32.mrf.mxu1 }
0x3e54   : > { %v8529_v2 = vsel %vm8049_vm11, %v8525_v0, -inf }
0x3e55   : > { %8530 = vmax.xlane.f32.xlu0 %v8529_v2  ;;  %v10960_v57 = vpop.f32.mrf.mxu1  ;;  %v7877_v2 = vld [vmem:[%s15081_s4 + $0x48] sm:$0xff] }
0x3e56   : > { %v7876_v57 = vld [vmem:[%s15081_s4 + $0x40] sm:$0xff] }
0x3e6b   : > { %8540 = vrot.lane.b32.xlu0 %v14631_v21, %s15065_s2  ;;  %s15078_s2 = sld [smem:[#allocation165_spill]] }
0x3e6f   : > { %8693 = vrot.lane.b32.xlu0 %v14625_v18, %s13231_s0  ;;  %s15083_s0 = sld [smem:[#allocation167_spill]] }
0x3e71   : > { %v10293_v58 = vld [vmem:[%s15078_s2] ss:$0 sm:$0xff]  ;;  %s15084_s2 = sld [smem:[#allocation169_spill]] }
0x3e73   : > { %8691 = vrot.lane.b32.xlu0 %v14625_v18, %s15069_s1 }
0x3ede   : > { %v8531_v6 = vpop.xlane.xlu0 %8530 }
0x3edf   : > { %v8532_v7 = vsub.f32 %v8525_v0, %v8531_v6  ;;  %v7878_v0 = vld [vmem:[%s15081_s4 + $0x50] sm:$0xff]  ;;  %v7875_v6 = vld [vmem:[%s15081_s4 + $0x38] sm:$0xff] }
0x3ee1   : > { %v8533_v8 = vmul.f32 1.442695, %v8532_v7  ;;  %v7874_v7 = vld [vmem:[%s15081_s4 + $0x30] sm:$0xff] }
0x3ee2   : > { %v8541_v9 = vpop.permute.xlu0 %8540 }
0x3ee3   : > { %11680 = vpow2.f32 %v8533_v8  ;;  %10962 = vmatpush3.msk.msra.mxu0 %vm8065_vm10, %v8541_v9  ;;  %v7873_v8 = vld [vmem:[%s15081_s4 + $0x28] sm:$0xff]  ;;  %v7872_v9 = vld [vmem:[%s15081_s4 + $0x20] sm:$0xff] }
0x3ee4   : > { %10973 = vmatprep.subr.mxu0 %v13228_v4 }
0x3ee6   : > { %v8694_v10 = vpop.permute.xlu0 %8693 }
0x3eea   : > { %v8692_v15 = vpop.permute.xlu0 %8691 }
0x3ef0   : > { %v11681_v11 = vpop.eup %11680 }
0x3ef1   : > { %v8535_v32 = vsel %vm8049_vm11, %v11681_v11, 0.0 }
0x3ef2   : > { %8536 = vadd.xlane.f32.xlu1 %v8535_v32 }
0x3f7b   : > { %v8537_v13 = vpop.xlane.xlu1 %8536 }
0x3f7c   : > { %11682 = vrcp.f32 %v8537_v13 }
0x3f89   : > { %v11683_v51 = vpop.eup %11682 }
0x3f8a   : > { %v8539_v36 = vmul.f32 %v11683_v51, %v11681_v11  ;;  %v7871_v11 = vld [vmem:[%s15081_s4 + $0x18] sm:$0xff] }
0x3f8c   : > { %10964 = vmatmul.mubr.msk.f32.vlgmr.msra.gmra.mxu0 %vm8061_vm12, %v8539_v36 }
0x3f8d   : > { %10974 = vmatpush3.xpose.msk.msra.mxu0 %vm3293_vm2, %v8694_v10  ;;  %10975 = vmatprep.mubr.msk.f32.mxu0 %vm13229_vm4, %v13228_v4  ;;  %v10294_v10 = vld [vmem:[%s15082_s18] ss:$0 sm:$0xff]  ;;  %s15086_s18 = sld [smem:[#allocation174_spill]] }
0x3f8e   : > { %10983 = vmatprep.subr.mxu0 %v13228_v4 }
0x3f90   : > { %10976 = vmatmul.mubr.msk.f32.vlgmr.msra.gmra.mxu0 %vm3293_vm2, %v8692_v15  ;;  %v10295_v15 = vld [vmem:[%s15083_s0] ss:$0 sm:$0xff]  ;;  %s15088_s0 = sld [smem:[#allocation172_spill]] }
0x3f91   : > { %10987 = vmatprep.mubr.msk.f32.mxu0 %vm13229_vm4, %v13228_v4  ;;  %10984 = vmatpush3.msra.mxu0 %v7855_v49 }
0x3f92   : > { %10985 = vmatprep.subr.mxu0 %v13228_v4 }
0x404c   : > { %v8613_v17 = vpop.f32.mrf.mxu0 }
0x404d   : > { %10971 = vmatmul.mubr.msk.f32.vlgmr.msra.gmra.mxu1 %vm3293_vm2, %v8613_v17 }
0x404e   : > { %v10965_v18 = vpop.f32.mrf.mxu0  ;;  %10980 = vmatprep.mubr.msk.f32.mxu1 %vm13229_vm4, %v13228_v4 }
0x404f   : > { %v7870_v18 = vld [vmem:[%s15081_s4 + $0x10] sm:$0xff] }
0x4050   : > { %v8765_v3 = vpop.f32.mrf.mxu0 }
0x4051   : > { %v8769_v5 = vsel %vm8049_vm11, %v8765_v3, -inf }
0x4052   : > { %8770 = vmax.xlane.f32.xlu0 %v8769_v5  ;;  %v10977_v19 = vpop.f32.mrf.mxu0  ;;  %v7868_v5 = vld [vmem:[%s15081_s4] sm:$0xff] }
0x4053   : > { %v10296_v19 = vld [vmem:[%s15084_s2] ss:$0 sm:$0xff]  ;;  %s15089_s2 = sld [smem:[#allocation173_spill]] }
0x40db   : > { %v8771_v20 = vpop.xlane.xlu0 %8770 }
0x40dc   : > { %v8772_v22 = vsub.f32 %v8765_v3, %v8771_v20  ;;  %v7869_v3 = vld [vmem:[%s15081_s4 + $0x8] sm:$0xff] }
0x40de   : > { %v8773_v23 = vmul.f32 1.442695, %v8772_v22 }
0x40e0   : > { %11684 = vpow2.f32 %v8773_v23 }
0x40ed   : > { %v11685_v24 = vpop.eup %11684 }
0x40ee   : > { %v8775_v25 = vsel %vm8049_vm11, %v11685_v24, 0.0 }
0x40ef   : > { %8776 = vadd.xlane.f32.xlu1 %v8775_v25  ;;  %v10298_v25 = vld [vmem:[%s15085_s16] ss:$0 sm:$0xff]  ;;  %s15090_s16 = sld [smem:[#allocation176_spill]] }
0x4100   : > { %8780 = vrot.lane.b32.xlu1 %v14631_v21, %s15069_s1  ;;  %v7854_v21 = vld [vmem:[%s15077_s3 + $0x30] sm:$0xff]  ;;  %s15079_s1 = sld [smem:[#allocation168_spill]]  ;;  %s15091_s3 = smov %s15090_s16 }
0x4101   : > { %10986 = vmatpush3.msra.mxu0 %v7854_v21 }
0x4102   : > { %11009 = vmatprep.subr.mxu0 %v13228_v4 }
0x4106   : > { %v7866_v48 = vld [vmem:[%s15079_s1 + $0x38] sm:$0xff]  ;;  %v7864_v50 = vld [vmem:[%s15079_s1 + $0x28] sm:$0xff]  ;;  %v7863_v52 = vld [vmem:[%s15079_s1 + $0x20] sm:$0xff] }
0x4107   : > { %v7862_v53 = vld [vmem:[%s15079_s1 + $0x18] sm:$0xff]  ;;  %v7861_v54 = vld [vmem:[%s15079_s1 + $0x10] sm:$0xff]  ;;  %v7860_v55 = vld [vmem:[%s15079_s1 + $0x8] sm:$0xff] }
0x4108   : > { %v7859_v56 = vld [vmem:[%s15079_s1] sm:$0xff] }
0x410d   : > { %v8686_v27 = vpop.f32.mrf.mxu1 }
0x410e   : > { %v8690_v28 = vadd.f32 %v8686_v27, %v8448_v26 }
0x410f   : > { %v10972_v40 = vpop.f32.mrf.mxu1 }
0x4178   : > { %v8777_v29 = vpop.xlane.xlu1 %8776 }
0x4179   : > { %11686 = vrcp.f32 %v8777_v29 }
0x417c   : > { %v8781_v30 = vpop.permute.xlu1 %8780 }
0x417d   : > { %10979 = vmatpush3.msk.msra.mxu1 %vm8065_vm10, %v8781_v30 }
0x417e   : > { %10990 = vmatprep.subr.mxu1 %v13228_v4 }
0x4186   : > { %v11687_v31 = vpop.eup %11686 }
0x4187   : > { %v8779_v33 = vmul.f32 %v11687_v31, %v11685_v24 }
0x4189   : > { %10981 = vmatmul.mubr.msk.f32.vlgmr.msra.gmra.mxu1 %vm8061_vm12, %v8779_v33 }
0x418a   : > { %11006 = vmatprep.mubr.msk.f32.mxu1 %vm13229_vm4, %v13228_v4  ;;  %10991 = vmatpush3.msra.mxu1 %v7866_v48  ;;  %v10300_v48 = vld [vmem:[%s15089_s2] ss:$0 sm:$0xff]  ;;  %s10304_s2 = sshll.u32 %s13674_s22, 4  ;;  %s12922_s22 = scalar_lea.vmem %s12921_s6, 32 }
0x418b   : > { %10992 = vmatprep.subr.mxu1 %v13228_v4 }
0x4249   : > { %v8853_v1 = vpop.f32.mrf.mxu1 }
0x424a   : > { %10988 = vmatmul.mubr.msk.f32.vlgmr.msra.gmra.mxu0 %vm3293_vm2, %v8853_v1  ;;  %v9157_v1 = vld [vmem:[%s15086_s18 + $0x38] sm:$0xff] }
0x424b   : > { %v10982_v34 = vpop.f32.mrf.mxu1  ;;  %11041 = vmatprep.mubr.msk.f32.mxu0 %vm13229_vm4, %v13228_v4  ;;  %11010 = vmatpush3.msra.mxu0 %v7883_v59 }
0x424c   : > { %11011 = vmatprep.subr.mxu0 %v13228_v4 }
0x424d   : > { %11012 = vmatpush3.msra.mxu0 %v7882_v60 }
0x424e   : > { %11013 = vmatprep.subr.mxu0 %v13228_v4 }
0x424f   : > { %11014 = vmatpush3.msra.mxu0 %v7881_v61 }
0x4250   : > { %11015 = vmatprep.subr.mxu0 %v13228_v4 }
0x4251   : > { %11016 = vmatpush3.msra.mxu0 %v7880_v62  ;;  %v9162_v62 = vld [vmem:[%s15090_s16 + $0x18] sm:$0xff] }
0x4252   : > { %11017 = vmatprep.subr.mxu0 %v13228_v4 }
0x4253   : > { %11018 = vmatpush3.msra.mxu0 %v7879_v63  ;;  %v9161_v63 = vld [vmem:[%s15091_s3 + $0x10] sm:$0xff] }
0x4254   : > { %11019 = vmatprep.subr.mxu0 %v13228_v4 }
0x4255   : > { %11020 = vmatpush3.msra.mxu0 %v7878_v0  ;;  %v9160_v0 = vld [vmem:[%s15091_s3 + $0x8] sm:$0xff] }
0x4256   : > { %11021 = vmatprep.subr.mxu0 %v13228_v4 }
0x4257   : > { %11022 = vmatpush3.msra.mxu0 %v7877_v2  ;;  %v9159_v2 = vld [vmem:[%s15091_s3] sm:$0xff] }
0x4258   : > { %11023 = vmatprep.subr.mxu0 %v13228_v4 }
0x4259   : > { %11024 = vmatpush3.msra.mxu0 %v7876_v57 }
0x425a   : > { %11025 = vmatprep.subr.mxu0 %v13228_v4 }
0x425b   : > { %11026 = vmatpush3.msra.mxu0 %v7875_v6 }
0x425c   : > { %11027 = vmatprep.subr.mxu0 %v13228_v4 }
0x425d   : > { %11028 = vmatpush3.msra.mxu0 %v7874_v7 }
0x425e   : > { %11029 = vmatprep.subr.mxu0 %v13228_v4 }
0x425f   : > { %11030 = vmatpush3.msra.mxu0 %v7873_v8 }
0x4260   : > { %11031 = vmatprep.subr.mxu0 %v13228_v4 }
0x4261   : > { %11032 = vmatpush3.msra.mxu0 %v7872_v9 }
0x4262   : > { %11033 = vmatprep.subr.mxu0 %v13228_v4 }
0x4263   : > { %11034 = vmatpush3.msra.mxu0 %v7871_v11  ;;  %v9165_v11 = vld [vmem:[%s13641_s8 + $0x8] sm:$0xff] }
0x4264   : > { %11035 = vmatprep.subr.mxu0 %v13228_v4 }
0x4265   : > { %11036 = vmatpush3.msra.mxu0 %v7870_v18 }
0x4266   : > { %11037 = vmatprep.subr.mxu0 %v13228_v4 }
0x4267   : > { %11038 = vmatpush3.msra.mxu0 %v7869_v3 }
0x4268   : > { %11039 = vmatprep.subr.mxu0 %v13228_v4 }
0x4269   : > { %11040 = vmatpush3.msra.mxu0 %v7868_v5 }
0x426a   : > { %11074 = vmatprep.subr.mxu0 %v13228_v4 }
0x430a   : > { %v8926_v35 = vpop.f32.mrf.mxu0 }
0x430b   : > { %v8930_v37 = vadd.f32 %v8926_v35, %v8690_v28 }
0x430c   : > { %v10989_v38 = vpop.f32.mrf.mxu0 }
0x430d   : > { %v8937_v39 = vadd.f32 %v10293_v58, %v8930_v37 }
0x430f   : > { %v8938_v41 = vadd.f32 %v8937_v39, %v14618_v14  ;;  %v7865_v14 = vld [vmem:[%s15079_s1 + $0x30] sm:$0xff]  ;;  %s15087_s1 = smov %s15086_s18  ;;  %s15092_s18 = sld [smem:[#allocation175_spill]] }
0x4310   : > { %10993 = vmatpush3.msra.mxu1 %v7865_v14  ;;  %v9156_v34 = vld [vmem:[%s15087_s1 + $0x30] sm:$0xff]  ;;  %v9155_v58 = vld [vmem:[%s15087_s1 + $0x28] sm:$0xff]  ;;  %v9154_v35 = vld [vmem:[%s15087_s1 + $0x20] sm:$0xff] }
0x4311   : > { %v8939_v43 = vsel %vm7773_vm9, %v8938_v41, 0.0  ;;  %10994 = vmatprep.subr.mxu1 %v13228_v4  ;;  %v9153_v37 = vld [vmem:[%s15087_s1 + $0x18] sm:$0xff]  ;;  %v9152_v38 = vld [vmem:[%s15087_s1 + $0x10] sm:$0xff]  ;;  %v9151_v39 = vld [vmem:[%s15087_s1 + $0x8] sm:$0xff] }
0x4312   : > { %8940 = vadd.xlane.f32.xlu1 %v8939_v43  ;;  %10995 = vmatpush3.msra.mxu1 %v7864_v50 }
0x4313   : > { %10996 = vmatprep.subr.mxu1 %v13228_v4 }
0x4314   : > { %10997 = vmatpush3.msra.mxu1 %v7863_v52 }
0x4315   : > { %10998 = vmatprep.subr.mxu1 %v13228_v4  ;;  %v9158_v57 = vld [vmem:[%s15092_s18] sm:$0x1] }
0x4316   : > { %10999 = vmatpush3.msra.mxu1 %v7862_v53 }
0x4317   : > { %11000 = vmatprep.subr.mxu1 %v13228_v4 }
0x4318   : > { %11001 = vmatpush3.msra.mxu1 %v7861_v54 }
0x4319   : > { %11002 = vmatprep.subr.mxu1 %v13228_v4 }
0x431a   : > { %11003 = vmatpush3.msra.mxu1 %v7860_v55 }
0x431b   : > { %11004 = vmatprep.subr.mxu1 %v13228_v4 }
0x431c   : > { %11005 = vmatpush3.msra.mxu1 %v7859_v56 }
0x431d   : > { %11044 = vmatprep.subr.mxu1 %v13228_v4 }
0x439b   : > { %v8941_v44 = vpop.xlane.xlu1 %8940 }
0x439c   : > { %v8942_v45 = vmul.f32 0.015625, %v8941_v44 }
0x439e   : > { %v14728_v42 = vsub.f32 %v8938_v41, %v8942_v45  ;;  %v9150_v41 = vld [vmem:[%s15087_s1] sm:$0xff]  ;;  %s14833_s1 = scalar_lea.hbm %s13651_s19, %s10304_s2 }
0x43a0   : > { %v8944_v46 = vmul.f32 %v14728_v42, %v14728_v42 }
0x43a2   : > { %v8945_v47 = vsel %vm7773_vm9, %v8944_v46, 0.0  ;;  %v10299_v46 = vld [vmem:[%s15088_s0] ss:$0 sm:$0xff]  ;;  %s3027_s0 = sand.u32 1, %s13072_s15  }
0x43a3   : > { %8946 = vadd.xlane.f32.xlu0 %v8945_v47  ;;  %s3028_s16 = scalar_lea.vmem [#allocation80], %s3027_s0  ;;  %s9400_s3 = scalar_lea.sflag [#allocation4], %s3027_s0 }
0x43a4   : > { %s9412_s18 = sshll.u32 %s3028_s16, 4  ;;  %s9413_s18 = int_to_ptr.vmem [resolvable:$true] %s9412_s18 }
0x43a5   : > { %s12916_s4 = scalar_lea.vmem %s9413_s18, 16  ;;  %p12923_p13 = scmp.lt.s32.totalorder %s9413_s18, %s12921_s6 }
0x43a6   : > { %p12917_p10 = scmp.ne.s32.totalorder %s9413_s18, %s12916_s4  ;;  %p12924_p5 = scmp.lt.s32.totalorder %s12922_s22, %s12916_s4 }
0x43a8   : > { %p12918_p12 = pnand %p12917_p10, %p15093_p11  ;;  %p12925_p0 = por %p12924_p5, %p12923_p13 }
0x43aa   : > { %p12919_p6 = pneg %p12918_p12 }
0x43ac   : > { %p12926_p1 = pnand %p12925_p0, %p12919_p6 }
0x442c   : > { %v8947_v32 = vpop.xlane.xlu0 %8946 }
0x442d   : > { %v8948_v12 = vmul.f32 0.015625, %v8947_v32  ;;  %v9164_v32 = vld [vmem:[%s13641_s8] sm:$0xff] }
0x442f   : > { %v8949_v13 = vadd.f32 1e-05, %v8948_v12  ;;  %v9163_v12 = vld [vmem:[%s13636_s21] sm:$0x1] }
0x4431   : > { %11688 = vrsqrt.f32 %v8949_v13 }
0x443e   : > { %v11689_v51 = vpop.eup %11688 }
0x443f   : > { %v8951_v36 = vmul.f32 %v11689_v51, %v14728_v42 }
0x4441   : > { %v8958_v16 = vmul.f32 %v10294_v10, %v8951_v36 }
0x4443   : > { %v8965_v17 = vadd.f32 %v10295_v15, %v8958_v16  ;;  %v9166_v15 = vld [vmem:[%s13646_s13] sm:$0x1] }
0x4445   : > { %11007 = vmatmul.mubr.msk.f32.vlgmr.msra.gmra.mxu1 %vm4478_vm3, %v8965_v17 }
0x4446   : > { %11060 = vmatprep.mubr.msk.f32.mxu1 %vm13229_vm4, %v13228_v4  ;;  %11045 = vmatpush3.msra.mxu1 %v9157_v1 }
0x4447   : > { %11046 = vmatprep.subr.mxu1 %v13228_v4 }
0x4448   : > { %11047 = vmatpush3.msra.mxu1 %v9156_v34 }
0x4449   : > { %11048 = vmatprep.subr.mxu1 %v13228_v4 }
0x444a   : > { %11049 = vmatpush3.msra.mxu1 %v9155_v58 }
0x444b   : > { %11050 = vmatprep.subr.mxu1 %v13228_v4 }
0x444c   : > { %11051 = vmatpush3.msra.mxu1 %v9154_v35 }
0x444d   : > { %11052 = vmatprep.subr.mxu1 %v13228_v4 }
0x444e   : > { %11053 = vmatpush3.msra.mxu1 %v9153_v37 }
0x444f   : > { %11054 = vmatprep.subr.mxu1 %v13228_v4 }
0x4450   : > { %11055 = vmatpush3.msra.mxu1 %v9152_v38 }
0x4451   : > { %11056 = vmatprep.subr.mxu1 %v13228_v4 }
0x4452   : > { %11057 = vmatpush3.msra.mxu1 %v9151_v39 }
0x4453   : > { %11058 = vmatprep.subr.mxu1 %v13228_v4 }
0x4454   : > { %11059 = vmatpush3.msra.mxu1 %v9150_v41 }
0x4455   : > { %11063 = vmatprep.subr.mxu1 %v13228_v4 }
0x4505   : > { %v9041_v20 = vpop.f32.mrf.mxu1 }
0x4506   : > { %v9042_v22 = vadd.f32 %v10296_v19, %v9041_v20 }
0x4507   : > { %v11008_v23 = vpop.f32.mrf.mxu1 }
0x4508   : > { %v9045_v24 = vmax.f32 %v9042_v22, 0.0 }
0x450a   : > { %11042 = vmatmul.mubr.f32.vlgmr.msra.gmra.mxu0 %v9045_v24 }
0x450b   : > { %11078 = vmatprep.mubr.msk.f32.mxu0 %vm13229_vm4, %v13228_v4  ;;  %11075 = vmatpush3.msra.mxu0 %v9165_v11 }
0x450c   : > { %11076 = vmatprep.subr.mxu0 %v13228_v4 }
0x450d   : > { %11077 = vmatpush3.msra.mxu0 %v9164_v32 }
0x45ca   : > { %v9118_v49 = vpop.f32.mrf.mxu0 }
0x45cb   : > { %v9119_v26 = vadd.f32 %v10298_v25, %v9118_v49 }
0x45cc   : > { %v11043_v27 = vpop.f32.mrf.mxu0 }
0x45cd   : > { %v9122_v28 = vadd.f32 %v9119_v26, %v8965_v17 }
0x45cf   : > { %v9123_v40 = vsel %vm7773_vm9, %v9122_v28, 0.0 }
0x45d0   : > { %9124 = vadd.xlane.f32.xlu0 %v9123_v40 }
0x4659   : > { %v9125_v29 = vpop.xlane.xlu0 %9124 }
0x465a   : > { %v9126_v30 = vmul.f32 0.015625, %v9125_v29 }
0x465c   : > { %v9127_v31 = vsub.f32 %v9122_v28, %v9126_v30 }
0x465e   : > { %v9128_v33 = vmul.f32 %v9127_v31, %v9127_v31 }
0x4660   : > { %v9129_v21 = vsel %vm7773_vm9, %v9128_v33, 0.0 }
0x4661   : > { %9130 = vadd.xlane.f32.xlu0 %v9129_v21 }
0x46ea   : > { %v9131_v43 = vpop.xlane.xlu0 %9130 }
0x46eb   : > { %v9132_v44 = vmul.f32 0.015625, %v9131_v43 }
0x46ed   : > { %v9133_v45 = vadd.f32 1e-05, %v9132_v44 }
0x46ef   : > { %11690 = vrsqrt.f32 %v9133_v45 }
0x46fc   : > { %v11691_v42 = vpop.eup %11690 }
0x46fd   : > { %v9135_v47 = vmul.f32 %v11691_v42, %v9127_v31 }
0x46ff   : > { %v9142_v14 = vmul.f32 %v10299_v46, %v9135_v47 }
0x4701   : > { %v9149_v50 = vadd.f32 %v10300_v48, %v9142_v14 }
0x4703   : > { %v9167_v52 = vsel %vm7773_vm9, %v9149_v50, 0.0 }
0x4704   : > { %v9168_v53 = vrot.slane %v9167_v52, 4 }
0x4706   : > { %v9169_v54 = vadd.f32 %v9168_v53, %v9167_v52 }
0x4708   : > { %v9170_v55 = vrot.slane %v9169_v54, 2 }
0x470a   : > { %v9171_v56 = vadd.f32 %v9170_v55, %v9169_v54 }
0x470c   : > { %v9172_v59 = vrot.slane %v9171_v56, 1 }
0x470e   : > { %v9173_v60 = vadd.f32 %v9172_v59, %v9171_v56 }
0x4710   : > { %v9175_v61 = vmul.f32 0.5, %v9173_v60 }
0x4712   : > { %11061 = vmatmul.mubr.msk.f32.vlgmr.msra.gmra.mxu1 %vm4478_vm3, %v9175_v61 }
0x4713   : > { %11064 = vmatpush3.msra.mxu1 %v9162_v62  ;;  %11071 = vmatprep.mubr.msk.f32.mxu1 %vm13229_vm4, %v13228_v4 }
0x4714   : > { %11065 = vmatprep.subr.mxu1 %v13228_v4 }
0x4715   : > { %11066 = vmatpush3.msra.mxu1 %v9161_v63 }
0x4716   : > { %11067 = vmatprep.subr.mxu1 %v13228_v4 }
0x4717   : > { %11068 = vmatpush3.msra.mxu1 %v9160_v0 }
0x4718   : > { %11069 = vmatprep.subr.mxu1 %v13228_v4 }
0x4719   : > { %11070 = vmatpush3.msra.mxu1 %v9159_v2 }
0x47d2   : > { %v9245_v6 = vpop.f32.mrf.mxu1 }
0x47d3   : > { %v9246_v7 = vadd.f32 %v9245_v6, %v9158_v57 }
0x47d4   : > { %v11062_v8 = vpop.f32.mrf.mxu1 }
0x47d5   : > { %v9249_v9 = vmax.f32 %v9246_v7, 0.0 }
0x47d7   : > { %11072 = vmatmul.mubr.msk.f32.vlgmr.msra.gmra.mxu1 %vm3038_vm0, %v9249_v9 }
0x4897   : > { %v9319_v13 = vpop.f32.mrf.mxu1 }
0x4898   : > { %v9320_v51 = vadd.f32 %v9319_v13, %v9163_v12 }
0x4899   : > { %v11073_v10 = vpop.f32.mrf.mxu1 }
0x489a   : > { %v9323_v36 = vmax.f32 %v9320_v51, 0.0 }
0x489c   : > { %11079 = vmatmul.mubr.msk.f32.vlgmr.msra.gmra.mxu0 %vm3293_vm2, %v9323_v36 }
0x495c   : > { %v9393_v16 = vpop.f32.mrf.mxu0 }
0x495d   : > { %v9394_v17 = vadd.f32 %v9393_v16, %v9166_v15 }
0x495e   : > { %v11080_v4 = vpop.f32.mrf.mxu0 }
0x495f   : > { %9398 = vst.msk [vmem:[%s3028_s16] sm:$0x1] %vm9397_vm13, %v9394_v17 }
0x4960   : > { %12929 = shalt.err (!%p12926_p1)
}
0x4961   : > { %s12930_s0 = scalar_lea.hbm %s14833_s1, 16  ;;  %s12934_s2 = scalar_lea.hbm %s13651_s19, 32 }
0x4962   : > { %p12931_p2 = scmp.ne.s32.totalorder %s14833_s1, %s12930_s0  ;;  %p12935_p7 = scmp.lt.s32.totalorder %s14833_s1, %s13651_s19 }
0x4963   : > { %p12936_p8 = scmp.lt.s32.totalorder %s12934_s2, %s12930_s0 }
0x4964   : > { %p12932_p3 = pnand %p12931_p2, %p15093_p11 }
0x4965   : > { %p12937_p9 = por %p12936_p8, %p12935_p7 }
0x4966   : > { %p12933_p4 = pneg %p12932_p3 }
0x4968   : > { %p12938_p10 = pnand %p12937_p9, %p12933_p4 }
0x496a   : > { %12941 = shalt.err (!%p12938_p10)
}
0x496b   : > { %11285 = dma.vmem_to_hbm [thread:$0]  (%p15093_p11), %s9413_s18, 16, %s14833_s1, %s9400_s3  }
0x496c PF: > { %s15094_s6 = sld [smem:[#allocation179_spill]] }
0x496d   : > { %s15095_s5 = sld [smem:[#allocation177_spill]] }
0x496e   : > { %s15096_s4 = sld [smem:[#allocation182_spill]] }
0x4972   : > { %p11393_p12 = scmp.ge.s32.totalorder %s15094_s6, 2 }
0x4973   : > { %s9424_s16 = sand.u32 1, %s15095_s5  }
0x4974   : > { %p15097_p6 = scmp.ne.s32.totalorder %s15096_s4, 0  ;;  %s9425_s22 = scalar_lea.sflag [#allocation4], %s9424_s16 }
0x4976   : > { %p11288_p13 = pnand %p11393_p12, %p15097_p6 }
0x4978   : > { %p11289_p5 = pneg %p11288_p13 }
0x497a   : > { %13063 = dma.done.wait (%p11289_p5), %s9425_s22, 16  }
0x497b   : > { %13065 = vsyncadd (%p11289_p5), %s9425_s22, 4294967280  ;;  %s15098_s18 = sld [smem:[#allocation180_spill]]  ;;  %s15101_s0 = smov %s13072_s15 }
0x497c   : > { %s15099_s2 = sld [smem:[#allocation178_spill]] }
0x497d   : > { %s15100_s16 = sld [smem:[#allocation181_spill]] }
0x4981   : > { %p201_p0 = scmp.ge.s32.totalorder %s15098_s18, 4  }
0x4982   : > { %s15102_s15 = smov %s15099_s2 }
0x4983   :  { %203 = sbr.rel (!%p201_p0) target bundleno = 191 (0xbf), region = 670 }
0x4988   :  { %9429 = vsyncpa [#allocation3], 1 }
0x4989   :  { %9431 = vsyncpa [#allocation3 + $0x1], 1 }
0x498a   :  { %9432 = vsyncpa [#allocation6], 1 }
0x498b   :  { %9433 = vsyncpa [#allocation9], 1 }
0x498c   :  { %9434 = vsyncpa [#allocation12], 1 }
0x498d   :  { %9435 = vsyncpa [#allocation15], 1 }
0x498e   :  { %9436 = vsyncpa [#allocation18], 1 }
0x498f   :  { %9437 = vsyncpa [#allocation21], 1 }
0x4990   :  { %9438 = vsyncpa [#allocation24], 1 }
0x4991   :  { %9439 = vsyncpa [#allocation27], 1 }
0x4992   :  { %9440 = vsyncpa [#allocation30], 1 }
0x4993   :  { %9441 = vsyncpa [#allocation33], 1 }
0x4994   :  { %9442 = vsyncpa [#allocation36], 1 }
0x4995   :  { %9443 = vsyncpa [#allocation39], 1 }
0x4996   :  { %9444 = vsyncpa [#allocation42], 1 }
0x4997   :  { %9445 = vsyncpa [#allocation45], 1 }
0x4998   :  { %9446 = vsyncpa [#allocation48], 1 }
0x4999   :  { %9447 = vsyncpa [#allocation51], 1 }
0x499a   :  { %9448 = vsyncpa [#allocation54], 1 }
0x499b   :  { %9449 = vsyncpa [#allocation57], 1 }
0x499c   :  { %9450 = vsyncpa [#allocation60], 1 }
0x499d   :  { %9451 = vsyncpa [#allocation63], 1 }
0x499e   :  { %9452 = vsyncpa [#allocation66], 1 }
0x499f   :  { %9453 = vsyncpa [#allocation69], 1 }
0x49a0   :  { %9454 = vsyncpa [#allocation72], 1 }
0x49a1   :  { %9455 = vsyncpa [#allocation75], 1 }
0x49a2   :  { %9456 = vsyncpa [#allocation78], 1 }
0x49a3   :  { %9457 = vsyncpa [#allocation4], 1 }
0x49a4   :  { %9459 = vsyncpa [#allocation4 + $0x1], 1 }

</bundles_post_ra>
